<compile_context>
chip_gen: v7x
topology: tpu7x:2x2x1
jax: 0.10.0
libtpu: 0.0.40
codegen_flags: <defaults>
</compile_context>

<pallas_src>
import functools
import math

import jax
import jax.numpy as jnp
from jax.experimental import pallas as pl
from jax.experimental.pallas import tpu as pltpu


# ----------------------------------------------------------------------------
# Small helpers
# ----------------------------------------------------------------------------
def embedded_view_dim(multires):
    # include_input=True, (sin, cos) per frequency, 3 input channels
    return 3 + 3 * 2 * multires


def embed_view_dirs(x, multires):
    """NeRF get_embedder layout: [x, sin(2^0 x), cos(2^0 x), ..., sin, cos]."""
    outs = [x]
    for i in range(multires):
        freq = 2.0 ** i
        outs.append(jnp.sin(x * freq))
        outs.append(jnp.cos(x * freq))
    return jnp.concatenate(outs, axis=-1)


def _device_kind():
    try:
        return jax.devices()[0].device_kind.lower()
    except Exception:  # pragma: no cover
        return ""


def _min_grid_steps(kind):
    # Only dual-TensorCore parts (v7x / megacore v3/v4/v5p) benefit from
    # forcing >= 2 grid steps so ("parallel",) can shard across cores; on
    # single-TC chips (v5e/v6e) a forced split just adds a pipeline step and
    # padded-row work.
    dual = any(t in kind for t in ("v7", "7x", "v5p", "v4", "v3"))
    return 2 if dual else 1


def _default_tile_rows(kind):
    # v6e/v7x: 32 MiB scoped-VMEM default -> 2048-row tiles are comfortable
    # (~10 MiB double-buffered for this net, incl. 128-lane padding of narrow
    # blocks).  v5e: 16 MiB scoped default -> stay at 1024 for headroom, so no
    # vmem_limit_bytes override is needed.
    return 2048 if any(t in kind for t in ("v6", "v7", "7x")) else 1024


def _choose_tile_m(n_rows, desired, min_steps):
    n_rows = max(int(n_rows), 1)
    if min_steps <= 1 and n_rows <= desired:
        # Single full-array block: block dims == array dims is always legal,
        # no padded rows, no partial blocks.
        return n_rows
    for t in (2048, 1024, 512, 256, 128):
        if t <= desired and pl.cdiv(n_rows, t) >= min_steps:
            return t
    return min(n_rows, 128)


# ----------------------------------------------------------------------------
# Fused MLP kernel.
# refs = (pieces[0..P-1],                    # concat pieces, [tile_m, C_j]
#         W0_piece[0..P-1],                  # matching W0 row-blocks, bf16
#         freq_w[0..2L-1],                   # (sin_i, cos_i) W0 row-blocks, bf16
#         b0,                                # [1, H] f32
#         W1, b1, ..., W_{L-1}, b_{L-1},     # remaining layers (last is narrow)
#         out_ref)                           # [tile_m, d_out]
# ----------------------------------------------------------------------------
def _rendering_mlp_kernel(*refs, num_pieces, num_freq_w, view_idx, num_linear):
    pieces = refs[:num_pieces]
    w0 = refs[num_pieces:2 * num_pieces]
    pos = 2 * num_pieces
    freq_w = refs[pos:pos + num_freq_w]
    pos += num_freq_w
    b0_ref = refs[pos]
    pos += 1
    tail = refs[pos:-1]
    o_ref = refs[-1]

    def mxu(a, w_ref):
        # bf16 x bf16 MXU matmul with f32 accumulation (cast is in-VMEM, free).
        return jnp.dot(a.astype(jnp.bfloat16), w_ref[...],
                       preferred_element_type=jnp.float32)

    # ---- layer 0: fused "concat" = sum of per-piece sub-matmuls -------------
    h = mxu(pieces[0][...], w0[0])
    for j in range(1, num_pieces):
        h = h + mxu(pieces[j][...], w0[j])

    if num_freq_w:
        # In-kernel NeRF positional encoding of the raw view dirs.  Only the
        # base frequency touches the EUP; higher frequencies use the exact
        # double-angle identities on the VPU (sin 2x = 2sc, cos 2x = 1 - 2s^2),
        # and each frequency is fused into layer 0 as K=3 sub-matmuls.
        v = pieces[view_idx][...].astype(jnp.float32)
        s = jnp.sin(v)
        c = jnp.cos(v)
        h = h + mxu(s, freq_w[0]) + mxu(c, freq_w[1])
        for i in range(1, num_freq_w // 2):
            s, c = 2.0 * s * c, 1.0 - 2.0 * s * s
            h = h + mxu(s, freq_w[2 * i]) + mxu(c, freq_w[2 * i + 1])

    h = h + b0_ref[...]
    if num_linear > 1:
        h = jnp.maximum(h, 0.0)                      # ReLU (hidden layers only)

    # ---- remaining layers ----------------------------------------------------
    for l in range(1, num_linear):
        w_ref = tail[2 * (l - 1)]
        b_ref = tail[2 * (l - 1) + 1]
        h = mxu(h, w_ref) + b_ref[...]
        if l < num_linear - 1:
            h = jnp.maximum(h, 0.0)

    # Final tanh + narrow store: only the d_out real channels are touched
    # (masked vst to a (tile_m, d_out) block; writeback is d_out*4 B/row).
    o_ref[...] = jnp.tanh(h).astype(o_ref.dtype)


def fused_rendering_mlp(pieces, w0_pieces, freq_weights, b0,
                        tail_weights, tail_biases, *,
                        view_piece_idx, tile_m, out_dtype=jnp.float32):
    """pieces[j]: [N, C_j]; w0_pieces[j]: [C_j, H] bf16; freq_weights: 2L blocks
    of [3, H] bf16 in (sin_0, cos_0, sin_1, cos_1, ...) order; biases f32."""
    n = pieces[0].shape[0]
    num_linear = 1 + len(tail_weights)
    d_out = tail_weights[-1].shape[1] if tail_weights else b0.shape[1]
    grid = (pl.cdiv(n, tile_m),)

    def row_spec(c):
        return pl.BlockSpec((tile_m, c), lambda i: (i, 0))

    def resident_spec(a):
        # Constant index map -> fetched once, stays resident in VMEM.
        return pl.BlockSpec(a.shape, lambda i: (0, 0))

    flat_args, in_specs = [], []
    for x in pieces:
        flat_args.append(x)
        in_specs.append(row_spec(x.shape[1]))
    for w in w0_pieces:
        flat_args.append(w)
        in_specs.append(resident_spec(w))
    for w in freq_weights:
        flat_args.append(w)
        in_specs.append(resident_spec(w))
    flat_args.append(b0)
    in_specs.append(resident_spec(b0))
    for w, b in zip(tail_weights, tail_biases):
        flat_args.append(w)
        in_specs.append(resident_spec(w))
        flat_args.append(b)
        in_specs.append(resident_spec(b))

    kernel = functools.partial(
        _rendering_mlp_kernel,
        num_pieces=len(pieces),
        num_freq_w=len(freq_weights),
        view_idx=view_piece_idx,
        num_linear=num_linear)

    return pl.pallas_call(
        kernel,
        out_shape=jax.ShapeDtypeStruct((n, d_out), out_dtype),
        grid_spec=pltpu.PrefetchScalarGridSpec(
            num_scalar_prefetch=0,
            grid=grid,
            in_specs=in_specs,
            out_specs=pl.BlockSpec((tile_m, d_out), lambda i: (i, 0)),
        ),
        compiler_params=pltpu.CompilerParams(
            dimension_semantics=("parallel",),
        ),
    )(*flat_args)


# ----------------------------------------------------------------------------
# RenderingNetwork: parameter construction + forward pass
# ----------------------------------------------------------------------------
class RenderingNetworkPallas:
    def __init__(self, feature_vector_size, mode, d_in, d_out, dims,
                 weight_norm=True, multires_view=0, key=None,
                 desired_tile_m=None, out_dtype=jnp.float32):
        self.mode = mode
        self.multires_view = multires_view
        self.d_out = d_out
        self.out_dtype = out_dtype

        kind = _device_kind()
        self._min_steps = _min_grid_steps(kind)
        self.desired_tile_m = desired_tile_m or _default_tile_rows(kind)

        layer_dims = [d_in + feature_vector_size] + list(dims) + [d_out]
        if multires_view > 0:
            layer_dims[0] += embedded_view_dim(multires_view) - 3
        self.layer_dims = layer_dims
        num_linear = len(layer_dims) - 1

        # Channel widths of the concat pieces, in torch.cat order.
        E = embedded_view_dim(multires_view) if multires_view > 0 else 3
        if mode == 'idr':
            slot_kinds = ['plain', 'view', 'plain', 'plain']
            slot_widths = [3, E, 3, feature_vector_size]
        elif mode == 'no_view_dir':
            slot_kinds = ['plain', 'plain', 'plain']
            slot_widths = [3, 3, feature_vector_size]
        elif mode == 'no_normal':
            slot_kinds = ['plain', 'view', 'plain']
            slot_widths = [3, E, feature_vector_size]
        else:
            raise ValueError(f"unknown mode {mode}")
        if sum(slot_widths) != layer_dims[0]:
            raise ValueError("d_in / mode / multires_view inconsistent: concat "
                             f"width {sum(slot_widths)} != dims[0] {layer_dims[0]}")
        self.view_piece_idx = slot_kinds.index('view') if 'view' in slot_kinds else -1

        if key is None:
            key = jax.random.PRNGKey(0)

        # nn.Linear-style init + weight-norm reparameterization
        #   W = g * v / ||v||_row, g initialised to ||v||_row (PyTorch init).
        self._weights_f32, self._biases_f32 = [], []
        for l in range(num_linear):
            fan_in, fan_out = layer_dims[l], layer_dims[l + 1]
            key, kw, kb = jax.random.split(key, 3)
            bound = 1.0 / math.sqrt(fan_in)
            v = jax.random.uniform(kw, (fan_out, fan_in), jnp.float32, -bound, bound)
            b = jax.random.uniform(kb, (fan_out,), jnp.float32, -bound, bound)
            if weight_norm:
                v_norm = jnp.linalg.norm(v, axis=1, keepdims=True)
                g = v_norm                                   # PyTorch init: g = ||v||
                w_eff = g * (v / v_norm)
            else:
                w_eff = v
            self._weights_f32.append(jnp.asarray(w_eff.T, jnp.float32))   # [fan_in, fan_out]
            self._biases_f32.append(jnp.asarray(b[None, :], jnp.float32)) # [1, fan_out]

        bf16 = lambda a: a.astype(jnp.bfloat16)
        w0 = self._weights_f32[0]

        # Split W0 into row blocks matching the concat layout.
        #  - "plain" split: one block per concat piece (fallback / modes w/o view).
        #  - "fused" split: view slot broken into raw-view rows plus one
        #    (sin_i, cos_i) pair of [3, H] blocks per frequency, so the NeRF
        #    embedding can be computed inside the kernel.
        self.w0_pieces_fused, self.w0_pieces_plain, self.freq_weights = [], [], []
        r = 0
        for kind_, width in zip(slot_kinds, slot_widths):
            self.w0_pieces_plain.append(bf16(w0[r:r + width]))
            if kind_ == 'view' and multires_view > 0:
                self.w0_pieces_fused.append(bf16(w0[r:r + 3]))           # raw view rows
                rr = r + 3
                for _ in range(multires_view):
                    self.freq_weights.append(bf16(w0[rr:rr + 3]))        # sin(2^i v)
                    self.freq_weights.append(bf16(w0[rr + 3:rr + 6]))    # cos(2^i v)
                    rr += 6
            else:
                self.w0_pieces_fused.append(bf16(w0[r:r + width]))
            r += width
        assert r == layer_dims[0]

        self.b0 = self._biases_f32[0]                                    # f32
        self.tail_weights = [bf16(w) for w in self._weights_f32[1:]]     # bf16 (last is narrow, d_out cols)
        self.tail_biases = list(self._biases_f32[1:])                    # f32

        self._fusable = self.view_piece_idx >= 0 and multires_view > 0
        self._use_fused = self._fusable
        self._jit_fused = jax.jit(functools.partial(self._forward, fused=True))
        self._jit_plain = jax.jit(functools.partial(self._forward, fused=False))

    # ------------------------------------------------------------------
    def _pieces(self, points, normals, view_dirs, feature_vectors, fused):
        vd = view_dirs
        if (not fused) and self._fusable:
            # Fallback: wrapper-side embedding, still inside the same jit and in
            # f32 (the kernel's bf16 cast then matches the fused path bit-wise).
            vd = embed_view_dirs(vd.astype(jnp.float32), self.multires_view)
        if self.mode == 'idr':
            return [points, vd, normals, feature_vectors]
        if self.mode == 'no_view_dir':
            return [points, normals, feature_vectors]
        return [points, vd, feature_vectors]

    def _forward(self, points, normals, view_dirs, feature_vectors, *, fused):
        fused = fused and self._fusable
        pieces = self._pieces(points, normals, view_dirs, feature_vectors, fused)
        w0_pieces = self.w0_pieces_fused if fused else self.w0_pieces_plain
        freq_ws = self.freq_weights if fused else []
        tile_m = _choose_tile_m(pieces[0].shape[0], self.desired_tile_m, self._min_steps)
        return fused_rendering_mlp(
            pieces, w0_pieces, freq_ws, self.b0,
            self.tail_weights, self.tail_biases,
            view_piece_idx=self.view_piece_idx,
            tile_m=tile_m, out_dtype=self.out_dtype)

    def __call__(self, points, normals, view_dirs, feature_vectors):
        if self._use_fused:
            try:
                return self._jit_fused(points, normals, view_dirs, feature_vectors)
            except Exception:
                # TODO(synk): in-kernel sin/cos failed to lower on this
                # JAX/libtpu combination; fall back to the (still jit-fused)
                # wrapper-side view-dir embedding.
                self._use_fused = False
        return self._jit_plain(points, normals, view_dirs, feature_vectors)


# ----------------------------------------------------------------------------
# References
# ----------------------------------------------------------------------------
def reference_semantic(net, points, normals, view_dirs, feature_vectors):
    """Original PyTorch-module semantics in pure f32 JAX (mode-aware)."""
    vd = view_dirs
    if net.multires_view > 0:
        vd = embed_view_dirs(vd, net.multires_view)
    if net.mode == 'idr':
        x = jnp.concatenate([points, vd, normals, feature_vectors], -1)
    elif net.mode == 'no_view_dir':
        x = jnp.concatenate([points, normals, feature_vectors], -1)
    else:
        x = jnp.concatenate([points, vd, feature_vectors], -1)
    L = len(net._weights_f32)
    for l in range(L):
        x = x @ net._weights_f32[l] + net._biases_f32[l]
        if l < L - 1:
            x = jnp.maximum(x, 0.0)
    return jnp.tanh(x)


def reference_mirror(net, points, normals, view_dirs, feature_vectors):
    """Mirrors the kernel math (bf16 matmul inputs/weights, f32 accumulation,
    in-kernel embedding via double-angle recursion) in plain XLA."""
    pieces = net._pieces(points, normals, view_dirs, feature_vectors, fused=True)

    def mxu(a, w):
        return jnp.dot(a.astype(jnp.bfloat16), w, preferred_element_type=jnp.float32)

    h = mxu(pieces[0], net.w0_pieces_fused[0])
    for j in range(1, len(pieces)):
        h = h + mxu(pieces[j], net.w0_pieces_fused[j])
    if net.freq_weights:
        v = pieces[net.view_piece_idx].astype(jnp.float32)
        s, c = jnp.sin(v), jnp.cos(v)
        h = h + mxu(s, net.freq_weights[0]) + mxu(c, net.freq_weights[1])
        for i in range(1, len(net.freq_weights) // 2):
            s, c = 2.0 * s * c, 1.0 - 2.0 * s * s
            h = h + mxu(s, net.freq_weights[2 * i]) + mxu(c, net.freq_weights[2 * i + 1])
    h = h + net.b0
    L = 1 + len(net.tail_weights)
    if L > 1:
        h = jnp.maximum(h, 0.0)
    for l in range(1, L):
        h = mxu(h, net.tail_weights[l - 1]) + net.tail_biases[l - 1]
        if l < L - 1:
            h = jnp.maximum(h, 0.0)
    return jnp.tanh(h)


# ----------------------------------------------------------------------------
if __name__ == "__main__":
    key = jax.random.PRNGKey(0)
    kp, kn, kv, kf, kparams = jax.random.split(key, 5)

    N = 200                      # deliberately not a "nice" row count
    feature_vector_size = 32
    d_in = 9                     # points(3) + view_dirs(3) + normals(3)
    d_out = 3
    hidden = [64, 64]
    multires_view = 4

    points = jax.random.normal(kp, (N, 3), jnp.float32)
    normals = jax.random.normal(kn, (N, 3), jnp.float32)
    view_dirs = jax.random.normal(kv, (N, 3), jnp.float32)
    feature_vectors = jax.random.normal(kf, (N, feature_vector_size), jnp.float32)

    net = RenderingNetworkPallas(
        feature_vector_size=feature_vector_size,
        mode='idr',
        d_in=d_in,
        d_out=d_out,
        dims=hidden,
        weight_norm=True,
        multires_view=multires_view,
        key=kparams,
    )

    out = jax.block_until_ready(net(points, normals, view_dirs, feature_vectors))
    assert out.shape == (N, d_out), out.shape

    ref_exact = reference_mirror(net, points, normals, view_dirs, feature_vectors)
    ref_f32 = reference_semantic(net, points, normals, view_dirs, feature_vectors)
    err_exact = float(jnp.max(jnp.abs(out - ref_exact)))
    err_sem = float(jnp.max(jnp.abs(out - ref_f32)))
    assert err_exact < 1e-2, f"kernel vs bf16-mirror reference mismatch: {err_exact}"
    assert err_sem < 8e-2, f"kernel vs f32 semantic reference mismatch: {err_sem}"

    print("KERNEL_OK")
</pallas_src>

<mosaic_0001>
module attributes {stable_mosaic.version = 11 : i64} {
  func.func @_rendering_mlp_kernel(%arg0: i32, %arg1: memref<200x3xf32, #tpu.memory_space<vmem>>, %arg2: memref<200x3xf32, #tpu.memory_space<vmem>>, %arg3: memref<200x3xf32, #tpu.memory_space<vmem>>, %arg4: memref<200x32xf32, #tpu.memory_space<vmem>>, %arg5: memref<3x64xbf16, #tpu.memory_space<vmem>>, %arg6: memref<3x64xbf16, #tpu.memory_space<vmem>>, %arg7: memref<3x64xbf16, #tpu.memory_space<vmem>>, %arg8: memref<32x64xbf16, #tpu.memory_space<vmem>>, %arg9: memref<3x64xbf16, #tpu.memory_space<vmem>>, %arg10: memref<3x64xbf16, #tpu.memory_space<vmem>>, %arg11: memref<3x64xbf16, #tpu.memory_space<vmem>>, %arg12: memref<3x64xbf16, #tpu.memory_space<vmem>>, %arg13: memref<3x64xbf16, #tpu.memory_space<vmem>>, %arg14: memref<3x64xbf16, #tpu.memory_space<vmem>>, %arg15: memref<3x64xbf16, #tpu.memory_space<vmem>>, %arg16: memref<3x64xbf16, #tpu.memory_space<vmem>>, %arg17: memref<1x64xf32, #tpu.memory_space<vmem>>, %arg18: memref<64x64xbf16, #tpu.memory_space<vmem>>, %arg19: memref<1x64xf32, #tpu.memory_space<vmem>>, %arg20: memref<64x3xbf16, #tpu.memory_space<vmem>>, %arg21: memref<1x3xf32, #tpu.memory_space<vmem>>, %arg22: memref<200x3xf32, #tpu.memory_space<vmem>>) attributes {dimension_semantics = [#tpu.dimension_semantics<parallel>], iteration_bounds = array<i64: 1>, scalar_prefetch = 0 : i64, scratch_operands = 0 : i64, tpu.core_type = #tpu.core_type<tc>, window_params = [{transform_indices = @transform_0, window_bounds = array<i64: 200, 3>}, {transform_indices = @transform_1, window_bounds = array<i64: 200, 3>}, {transform_indices = @transform_2, window_bounds = array<i64: 200, 3>}, {transform_indices = @transform_3, window_bounds = array<i64: 200, 32>}, {pipeline_mode = #tpu.pipeline_mode<synchronous>, transform_indices = @transform_4, window_bounds = array<i64: 3, 64>}, {pipeline_mode = #tpu.pipeline_mode<synchronous>, transform_indices = @transform_5, window_bounds = array<i64: 3, 64>}, {pipeline_mode = #tpu.pipeline_mode<synchronous>, transform_indices = @transform_6, window_bounds = array<i64: 3, 64>}, {pipeline_mode = #tpu.pipeline_mode<synchronous>, transform_indices = @transform_7, window_bounds = array<i64: 32, 64>}, {pipeline_mode = #tpu.pipeline_mode<synchronous>, transform_indices = @transform_8, window_bounds = array<i64: 3, 64>}, {pipeline_mode = #tpu.pipeline_mode<synchronous>, transform_indices = @transform_9, window_bounds = array<i64: 3, 64>}, {pipeline_mode = #tpu.pipeline_mode<synchronous>, transform_indices = @transform_10, window_bounds = array<i64: 3, 64>}, {pipeline_mode = #tpu.pipeline_mode<synchronous>, transform_indices = @transform_11, window_bounds = array<i64: 3, 64>}, {pipeline_mode = #tpu.pipeline_mode<synchronous>, transform_indices = @transform_12, window_bounds = array<i64: 3, 64>}, {pipeline_mode = #tpu.pipeline_mode<synchronous>, transform_indices = @transform_13, window_bounds = array<i64: 3, 64>}, {pipeline_mode = #tpu.pipeline_mode<synchronous>, transform_indices = @transform_14, window_bounds = array<i64: 3, 64>}, {pipeline_mode = #tpu.pipeline_mode<synchronous>, transform_indices = @transform_15, window_bounds = array<i64: 3, 64>}, {pipeline_mode = #tpu.pipeline_mode<synchronous>, transform_indices = @transform_16, window_bounds = array<i64: 1, 64>}, {pipeline_mode = #tpu.pipeline_mode<synchronous>, transform_indices = @transform_17, window_bounds = array<i64: 64, 64>}, {pipeline_mode = #tpu.pipeline_mode<synchronous>, transform_indices = @transform_18, window_bounds = array<i64: 1, 64>}, {pipeline_mode = #tpu.pipeline_mode<synchronous>, transform_indices = @transform_19, window_bounds = array<i64: 64, 3>}, {pipeline_mode = #tpu.pipeline_mode<synchronous>, transform_indices = @transform_20, window_bounds = array<i64: 1, 3>}, {transform_indices = @transform_21, window_bounds = array<i64: 200, 3>}]} {
    %c0 = arith.constant 0 : index
    %c0_0 = arith.constant 0 : index
    %0 = vector.load %arg1[%c0, %c0_0] : memref<200x3xf32, #tpu.memory_space<vmem>>, vector<200x3xf32>
    %1 = arith.truncf %0 : vector<200x3xf32> to vector<200x3xbf16>
    %c0_1 = arith.constant 0 : index
    %c0_2 = arith.constant 0 : index
    %2 = vector.load %arg5[%c0_1, %c0_2] : memref<3x64xbf16, #tpu.memory_space<vmem>>, vector<3x64xbf16>
    %cst = arith.constant dense<0.000000e+00> : vector<200x64xf32>
    %3 = tpu.matmul %1, %2, %cst {dimension_numbers = #tpu.dot_dimension_numbers<[1], [0], [0], [1], [0, 0, 1, 1], [], []>} : vector<200x3xbf16>, vector<3x64xbf16>, vector<200x64xf32> -> vector<200x64xf32>
    %c0_3 = arith.constant 0 : index
    %c0_4 = arith.constant 0 : index
    %4 = vector.load %arg2[%c0_3, %c0_4] : memref<200x3xf32, #tpu.memory_space<vmem>>, vector<200x3xf32>
    %5 = arith.truncf %4 : vector<200x3xf32> to vector<200x3xbf16>
    %c0_5 = arith.constant 0 : index
    %c0_6 = arith.constant 0 : index
    %6 = vector.load %arg6[%c0_5, %c0_6] : memref<3x64xbf16, #tpu.memory_space<vmem>>, vector<3x64xbf16>
    %cst_7 = arith.constant dense<0.000000e+00> : vector<200x64xf32>
    %7 = tpu.matmul %5, %6, %cst_7 {dimension_numbers = #tpu.dot_dimension_numbers<[1], [0], [0], [1], [0, 0, 1, 1], [], []>} : vector<200x3xbf16>, vector<3x64xbf16>, vector<200x64xf32> -> vector<200x64xf32>
    %8 = arith.addf %3, %7 : vector<200x64xf32>
    %c0_8 = arith.constant 0 : index
    %c0_9 = arith.constant 0 : index
    %9 = vector.load %arg3[%c0_8, %c0_9] : memref<200x3xf32, #tpu.memory_space<vmem>>, vector<200x3xf32>
    %10 = arith.truncf %9 : vector<200x3xf32> to vector<200x3xbf16>
    %c0_10 = arith.constant 0 : index
    %c0_11 = arith.constant 0 : index
    %11 = vector.load %arg7[%c0_10, %c0_11] : memref<3x64xbf16, #tpu.memory_space<vmem>>, vector<3x64xbf16>
    %cst_12 = arith.constant dense<0.000000e+00> : vector<200x64xf32>
    %12 = tpu.matmul %10, %11, %cst_12 {dimension_numbers = #tpu.dot_dimension_numbers<[1], [0], [0], [1], [0, 0, 1, 1], [], []>} : vector<200x3xbf16>, vector<3x64xbf16>, vector<200x64xf32> -> vector<200x64xf32>
    %13 = arith.addf %8, %12 : vector<200x64xf32>
    %c0_13 = arith.constant 0 : index
    %c0_14 = arith.constant 0 : index
    %14 = vector.load %arg4[%c0_13, %c0_14] : memref<200x32xf32, #tpu.memory_space<vmem>>, vector<200x32xf32>
    %15 = arith.truncf %14 : vector<200x32xf32> to vector<200x32xbf16>
    %c0_15 = arith.constant 0 : index
    %c0_16 = arith.constant 0 : index
    %16 = vector.load %arg8[%c0_15, %c0_16] : memref<32x64xbf16, #tpu.memory_space<vmem>>, vector<32x64xbf16>
    %cst_17 = arith.constant dense<0.000000e+00> : vector<200x64xf32>
    %17 = tpu.matmul %15, %16, %cst_17 {dimension_numbers = #tpu.dot_dimension_numbers<[1], [0], [0], [1], [0, 0, 1, 1], [], []>} : vector<200x32xbf16>, vector<32x64xbf16>, vector<200x64xf32> -> vector<200x64xf32>
    %18 = arith.addf %13, %17 : vector<200x64xf32>
    %c0_18 = arith.constant 0 : index
    %c0_19 = arith.constant 0 : index
    %19 = vector.load %arg2[%c0_18, %c0_19] : memref<200x3xf32, #tpu.memory_space<vmem>>, vector<200x3xf32>
    %20 = math.sin %19 : vector<200x3xf32>
    %21 = math.cos %19 : vector<200x3xf32>
    %22 = arith.truncf %20 : vector<200x3xf32> to vector<200x3xbf16>
    %c0_20 = arith.constant 0 : index
    %c0_21 = arith.constant 0 : index
    %23 = vector.load %arg9[%c0_20, %c0_21] : memref<3x64xbf16, #tpu.memory_space<vmem>>, vector<3x64xbf16>
    %cst_22 = arith.constant dense<0.000000e+00> : vector<200x64xf32>
    %24 = tpu.matmul %22, %23, %cst_22 {dimension_numbers = #tpu.dot_dimension_numbers<[1], [0], [0], [1], [0, 0, 1, 1], [], []>} : vector<200x3xbf16>, vector<3x64xbf16>, vector<200x64xf32> -> vector<200x64xf32>
    %25 = arith.addf %18, %24 : vector<200x64xf32>
    %26 = arith.truncf %21 : vector<200x3xf32> to vector<200x3xbf16>
    %c0_23 = arith.constant 0 : index
    %c0_24 = arith.constant 0 : index
    %27 = vector.load %arg10[%c0_23, %c0_24] : memref<3x64xbf16, #tpu.memory_space<vmem>>, vector<3x64xbf16>
    %cst_25 = arith.constant dense<0.000000e+00> : vector<200x64xf32>
    %28 = tpu.matmul %26, %27, %cst_25 {dimension_numbers = #tpu.dot_dimension_numbers<[1], [0], [0], [1], [0, 0, 1, 1], [], []>} : vector<200x3xbf16>, vector<3x64xbf16>, vector<200x64xf32> -> vector<200x64xf32>
    %29 = arith.addf %25, %28 : vector<200x64xf32>
    %cst_26 = arith.constant 2.000000e+00 : f32
    %30 = vector.broadcast %cst_26 : f32 to vector<200x3xf32>
    %31 = arith.mulf %30, %20 : vector<200x3xf32>
    %32 = arith.mulf %31, %21 : vector<200x3xf32>
    %cst_27 = arith.constant 2.000000e+00 : f32
    %33 = vector.broadcast %cst_27 : f32 to vector<200x3xf32>
    %34 = arith.mulf %33, %20 : vector<200x3xf32>
    %35 = arith.mulf %34, %20 : vector<200x3xf32>
    %cst_28 = arith.constant 1.000000e+00 : f32
    %36 = vector.broadcast %cst_28 : f32 to vector<200x3xf32>
    %37 = arith.subf %36, %35 : vector<200x3xf32>
    %38 = arith.truncf %32 : vector<200x3xf32> to vector<200x3xbf16>
    %c0_29 = arith.constant 0 : index
    %c0_30 = arith.constant 0 : index
    %39 = vector.load %arg11[%c0_29, %c0_30] : memref<3x64xbf16, #tpu.memory_space<vmem>>, vector<3x64xbf16>
    %cst_31 = arith.constant dense<0.000000e+00> : vector<200x64xf32>
    %40 = tpu.matmul %38, %39, %cst_31 {dimension_numbers = #tpu.dot_dimension_numbers<[1], [0], [0], [1], [0, 0, 1, 1], [], []>} : vector<200x3xbf16>, vector<3x64xbf16>, vector<200x64xf32> -> vector<200x64xf32>
    %41 = arith.addf %29, %40 : vector<200x64xf32>
    %42 = arith.truncf %37 : vector<200x3xf32> to vector<200x3xbf16>
    %c0_32 = arith.constant 0 : index
    %c0_33 = arith.constant 0 : index
    %43 = vector.load %arg12[%c0_32, %c0_33] : memref<3x64xbf16, #tpu.memory_space<vmem>>, vector<3x64xbf16>
    %cst_34 = arith.constant dense<0.000000e+00> : vector<200x64xf32>
    %44 = tpu.matmul %42, %43, %cst_34 {dimension_numbers = #tpu.dot_dimension_numbers<[1], [0], [0], [1], [0, 0, 1, 1], [], []>} : vector<200x3xbf16>, vector<3x64xbf16>, vector<200x64xf32> -> vector<200x64xf32>
    %45 = arith.addf %41, %44 : vector<200x64xf32>
    %cst_35 = arith.constant 2.000000e+00 : f32
    %46 = vector.broadcast %cst_35 : f32 to vector<200x3xf32>
    %47 = arith.mulf %46, %32 : vector<200x3xf32>
    %48 = arith.mulf %47, %37 : vector<200x3xf32>
    %cst_36 = arith.constant 2.000000e+00 : f32
    %49 = vector.broadcast %cst_36 : f32 to vector<200x3xf32>
    %50 = arith.mulf %49, %32 : vector<200x3xf32>
    %51 = arith.mulf %50, %32 : vector<200x3xf32>
    %cst_37 = arith.constant 1.000000e+00 : f32
    %52 = vector.broadcast %cst_37 : f32 to vector<200x3xf32>
    %53 = arith.subf %52, %51 : vector<200x3xf32>
    %54 = arith.truncf %48 : vector<200x3xf32> to vector<200x3xbf16>
    %c0_38 = arith.constant 0 : index
    %c0_39 = arith.constant 0 : index
    %55 = vector.load %arg13[%c0_38, %c0_39] : memref<3x64xbf16, #tpu.memory_space<vmem>>, vector<3x64xbf16>
    %cst_40 = arith.constant dense<0.000000e+00> : vector<200x64xf32>
    %56 = tpu.matmul %54, %55, %cst_40 {dimension_numbers = #tpu.dot_dimension_numbers<[1], [0], [0], [1], [0, 0, 1, 1], [], []>} : vector<200x3xbf16>, vector<3x64xbf16>, vector<200x64xf32> -> vector<200x64xf32>
    %57 = arith.addf %45, %56 : vector<200x64xf32>
    %58 = arith.truncf %53 : vector<200x3xf32> to vector<200x3xbf16>
    %c0_41 = arith.constant 0 : index
    %c0_42 = arith.constant 0 : index
    %59 = vector.load %arg14[%c0_41, %c0_42] : memref<3x64xbf16, #tpu.memory_space<vmem>>, vector<3x64xbf16>
    %cst_43 = arith.constant dense<0.000000e+00> : vector<200x64xf32>
    %60 = tpu.matmul %58, %59, %cst_43 {dimension_numbers = #tpu.dot_dimension_numbers<[1], [0], [0], [1], [0, 0, 1, 1], [], []>} : vector<200x3xbf16>, vector<3x64xbf16>, vector<200x64xf32> -> vector<200x64xf32>
    %61 = arith.addf %57, %60 : vector<200x64xf32>
    %cst_44 = arith.constant 2.000000e+00 : f32
    %62 = vector.broadcast %cst_44 : f32 to vector<200x3xf32>
    %63 = arith.mulf %62, %48 : vector<200x3xf32>
    %64 = arith.mulf %63, %53 : vector<200x3xf32>
    %cst_45 = arith.constant 2.000000e+00 : f32
    %65 = vector.broadcast %cst_45 : f32 to vector<200x3xf32>
    %66 = arith.mulf %65, %48 : vector<200x3xf32>
    %67 = arith.mulf %66, %48 : vector<200x3xf32>
    %cst_46 = arith.constant 1.000000e+00 : f32
    %68 = vector.broadcast %cst_46 : f32 to vector<200x3xf32>
    %69 = arith.subf %68, %67 : vector<200x3xf32>
    %70 = arith.truncf %64 : vector<200x3xf32> to vector<200x3xbf16>
    %c0_47 = arith.constant 0 : index
    %c0_48 = arith.constant 0 : index
    %71 = vector.load %arg15[%c0_47, %c0_48] : memref<3x64xbf16, #tpu.memory_space<vmem>>, vector<3x64xbf16>
    %cst_49 = arith.constant dense<0.000000e+00> : vector<200x64xf32>
    %72 = tpu.matmul %70, %71, %cst_49 {dimension_numbers = #tpu.dot_dimension_numbers<[1], [0], [0], [1], [0, 0, 1, 1], [], []>} : vector<200x3xbf16>, vector<3x64xbf16>, vector<200x64xf32> -> vector<200x64xf32>
    %73 = arith.addf %61, %72 : vector<200x64xf32>
    %74 = arith.truncf %69 : vector<200x3xf32> to vector<200x3xbf16>
    %c0_50 = arith.constant 0 : index
    %c0_51 = arith.constant 0 : index
    %75 = vector.load %arg16[%c0_50, %c0_51] : memref<3x64xbf16, #tpu.memory_space<vmem>>, vector<3x64xbf16>
    %cst_52 = arith.constant dense<0.000000e+00> : vector<200x64xf32>
    %76 = tpu.matmul %74, %75, %cst_52 {dimension_numbers = #tpu.dot_dimension_numbers<[1], [0], [0], [1], [0, 0, 1, 1], [], []>} : vector<200x3xbf16>, vector<3x64xbf16>, vector<200x64xf32> -> vector<200x64xf32>
    %77 = arith.addf %73, %76 : vector<200x64xf32>
    %c0_53 = arith.constant 0 : index
    %c0_54 = arith.constant 0 : index
    %78 = vector.load %arg17[%c0_53, %c0_54] : memref<1x64xf32, #tpu.memory_space<vmem>>, vector<1x64xf32>
    %79 = vector.broadcast %78 : vector<1x64xf32> to vector<200x64xf32>
    %80 = arith.addf %77, %79 : vector<200x64xf32>
    %cst_55 = arith.constant 0.000000e+00 : f32
    %81 = vector.broadcast %cst_55 : f32 to vector<200x64xf32>
    %82 = arith.maximumf %80, %81 : vector<200x64xf32>
    %83 = arith.truncf %82 : vector<200x64xf32> to vector<200x64xbf16>
    %c0_56 = arith.constant 0 : index
    %c0_57 = arith.constant 0 : index
    %84 = vector.load %arg18[%c0_56, %c0_57] : memref<64x64xbf16, #tpu.memory_space<vmem>>, vector<64x64xbf16>
    %cst_58 = arith.constant dense<0.000000e+00> : vector<200x64xf32>
    %85 = tpu.matmul %83, %84, %cst_58 {dimension_numbers = #tpu.dot_dimension_numbers<[1], [0], [0], [1], [0, 0, 1, 1], [], []>} : vector<200x64xbf16>, vector<64x64xbf16>, vector<200x64xf32> -> vector<200x64xf32>
    %c0_59 = arith.constant 0 : index
    %c0_60 = arith.constant 0 : index
    %86 = vector.load %arg19[%c0_59, %c0_60] : memref<1x64xf32, #tpu.memory_space<vmem>>, vector<1x64xf32>
    %87 = vector.broadcast %86 : vector<1x64xf32> to vector<200x64xf32>
    %88 = arith.addf %85, %87 : vector<200x64xf32>
    %cst_61 = arith.constant 0.000000e+00 : f32
    %89 = vector.broadcast %cst_61 : f32 to vector<200x64xf32>
    %90 = arith.maximumf %88, %89 : vector<200x64xf32>
    %91 = arith.truncf %90 : vector<200x64xf32> to vector<200x64xbf16>
    %c0_62 = arith.constant 0 : index
    %c0_63 = arith.constant 0 : index
    %92 = vector.load %arg20[%c0_62, %c0_63] : memref<64x3xbf16, #tpu.memory_space<vmem>>, vector<64x3xbf16>
    %cst_64 = arith.constant dense<0.000000e+00> : vector<200x3xf32>
    %93 = tpu.matmul %91, %92, %cst_64 {dimension_numbers = #tpu.dot_dimension_numbers<[1], [0], [0], [1], [0, 0, 1, 1], [], []>} : vector<200x64xbf16>, vector<64x3xbf16>, vector<200x3xf32> -> vector<200x3xf32>
    %c0_65 = arith.constant 0 : index
    %c0_66 = arith.constant 0 : index
    %94 = vector.load %arg21[%c0_65, %c0_66] : memref<1x3xf32, #tpu.memory_space<vmem>>, vector<1x3xf32>
    %95 = vector.broadcast %94 : vector<1x3xf32> to vector<200x3xf32>
    %96 = arith.addf %93, %95 : vector<200x3xf32>
    %97 = math.tanh %96 : vector<200x3xf32>
    %c0_67 = arith.constant 0 : index
    %c0_68 = arith.constant 0 : index
    %98 = vector.load %arg22[%c0_67, %c0_68] : memref<200x3xf32, #tpu.memory_space<vmem>>, vector<200x3xf32>
    tpu.vector_store %arg22[%c0_67, %c0_68], %97 {strides = array<i32>} : memref<200x3xf32, #tpu.memory_space<vmem>>, vector<200x3xf32>,
    return
  }
  func.func @transform_0(%arg0: i32) -> (i32, i32) {
    %c0_i32 = arith.constant 0 : i32
    %c0_i32_0 = arith.constant 0 : i32
    return %arg0, %c0_i32 : i32, i32
  }
  func.func @transform_1(%arg0: i32) -> (i32, i32) {
    %c0_i32 = arith.constant 0 : i32
    %c0_i32_0 = arith.constant 0 : i32
    return %arg0, %c0_i32 : i32, i32
  }
  func.func @transform_2(%arg0: i32) -> (i32, i32) {
    %c0_i32 = arith.constant 0 : i32
    %c0_i32_0 = arith.constant 0 : i32
    return %arg0, %c0_i32 : i32, i32
  }
  func.func @transform_3(%arg0: i32) -> (i32, i32) {
    %c0_i32 = arith.constant 0 : i32
    %c0_i32_0 = arith.constant 0 : i32
    return %arg0, %c0_i32 : i32, i32
  }
  func.func @transform_4(%arg0: i32) -> (i32, i32) {
    %c0_i32 = arith.constant 0 : i32
    %c0_i32_0 = arith.constant 0 : i32
    %c0_i32_1 = arith.constant 0 : i32
    return %c0_i32, %c0_i32_0 : i32, i32
  }
  func.func @transform_5(%arg0: i32) -> (i32, i32) {
    %c0_i32 = arith.constant 0 : i32
    %c0_i32_0 = arith.constant 0 : i32
    %c0_i32_1 = arith.constant 0 : i32
    return %c0_i32, %c0_i32_0 : i32, i32
  }
  func.func @transform_6(%arg0: i32) -> (i32, i32) {
    %c0_i32 = arith.constant 0 : i32
    %c0_i32_0 = arith.constant 0 : i32
    %c0_i32_1 = arith.constant 0 : i32
    return %c0_i32, %c0_i32_0 : i32, i32
  }
  func.func @transform_7(%arg0: i32) -> (i32, i32) {
    %c0_i32 = arith.constant 0 : i32
    %c0_i32_0 = arith.constant 0 : i32
    %c0_i32_1 = arith.constant 0 : i32
    return %c0_i32, %c0_i32_0 : i32, i32
  }
  func.func @transform_8(%arg0: i32) -> (i32, i32) {
    %c0_i32 = arith.constant 0 : i32
    %c0_i32_0 = arith.constant 0 : i32
    %c0_i32_1 = arith.constant 0 : i32
    return %c0_i32, %c0_i32_0 : i32, i32
  }
  func.func @transform_9(%arg0: i32) -> (i32, i32) {
    %c0_i32 = arith.constant 0 : i32
    %c0_i32_0 = arith.constant 0 : i32
    %c0_i32_1 = arith.constant 0 : i32
    return %c0_i32, %c0_i32_0 : i32, i32
  }
  func.func @transform_10(%arg0: i32) -> (i32, i32) {
    %c0_i32 = arith.constant 0 : i32
    %c0_i32_0 = arith.constant 0 : i32
    %c0_i32_1 = arith.constant 0 : i32
    return %c0_i32, %c0_i32_0 : i32, i32
  }
  func.func @transform_11(%arg0: i32) -> (i32, i32) {
    %c0_i32 = arith.constant 0 : i32
    %c0_i32_0 = arith.constant 0 : i32
    %c0_i32_1 = arith.constant 0 : i32
    return %c0_i32, %c0_i32_0 : i32, i32
  }
  func.func @transform_12(%arg0: i32) -> (i32, i32) {
    %c0_i32 = arith.constant 0 : i32
    %c0_i32_0 = arith.constant 0 : i32
    %c0_i32_1 = arith.constant 0 : i32
    return %c0_i32, %c0_i32_0 : i32, i32
  }
  func.func @transform_13(%arg0: i32) -> (i32, i32) {
    %c0_i32 = arith.constant 0 : i32
    %c0_i32_0 = arith.constant 0 : i32
    %c0_i32_1 = arith.constant 0 : i32
    return %c0_i32, %c0_i32_0 : i32, i32
  }
  func.func @transform_14(%arg0: i32) -> (i32, i32) {
    %c0_i32 = arith.constant 0 : i32
    %c0_i32_0 = arith.constant 0 : i32
    %c0_i32_1 = arith.constant 0 : i32
    return %c0_i32, %c0_i32_0 : i32, i32
  }
  func.func @transform_15(%arg0: i32) -> (i32, i32) {
    %c0_i32 = arith.constant 0 : i32
    %c0_i32_0 = arith.constant 0 : i32
    %c0_i32_1 = arith.constant 0 : i32
    return %c0_i32, %c0_i32_0 : i32, i32
  }
  func.func @transform_16(%arg0: i32) -> (i32, i32) {
    %c0_i32 = arith.constant 0 : i32
    %c0_i32_0 = arith.constant 0 : i32
    %c0_i32_1 = arith.constant 0 : i32
    return %c0_i32, %c0_i32_0 : i32, i32
  }
  func.func @transform_17(%arg0: i32) -> (i32, i32) {
    %c0_i32 = arith.constant 0 : i32
    %c0_i32_0 = arith.constant 0 : i32
    %c0_i32_1 = arith.constant 0 : i32
    return %c0_i32, %c0_i32_0 : i32, i32
  }
  func.func @transform_18(%arg0: i32) -> (i32, i32) {
    %c0_i32 = arith.constant 0 : i32
    %c0_i32_0 = arith.constant 0 : i32
    %c0_i32_1 = arith.constant 0 : i32
    return %c0_i32, %c0_i32_0 : i32, i32
  }
  func.func @transform_19(%arg0: i32) -> (i32, i32) {
    %c0_i32 = arith.constant 0 : i32
    %c0_i32_0 = arith.constant 0 : i32
    %c0_i32_1 = arith.constant 0 : i32
    return %c0_i32, %c0_i32_0 : i32, i32
  }
  func.func @transform_20(%arg0: i32) -> (i32, i32) {
    %c0_i32 = arith.constant 0 : i32
    %c0_i32_0 = arith.constant 0 : i32
    %c0_i32_1 = arith.constant 0 : i32
    return %c0_i32, %c0_i32_0 : i32, i32
  }
  func.func @transform_21(%arg0: i32) -> (i32, i32) {
    %c0_i32 = arith.constant 0 : i32
    %c0_i32_0 = arith.constant 0 : i32
    return %arg0, %c0_i32 : i32, i32
  }
}

module attributes {stable_mosaic.version = 11 : i64} {
  func.func @_rendering_mlp_kernel(%arg0: i32, %arg1: memref<200x3xf32, #tpu.memory_space<vmem>>, %arg2: memref<200x27xf32, #tpu.memory_space<vmem>>, %arg3: memref<200x3xf32, #tpu.memory_space<vmem>>, %arg4: memref<200x32xf32, #tpu.memory_space<vmem>>, %arg5: memref<3x64xbf16, #tpu.memory_space<vmem>>, %arg6: memref<27x64xbf16, #tpu.memory_space<vmem>>, %arg7: memref<3x64xbf16, #tpu.memory_space<vmem>>, %arg8: memref<32x64xbf16, #tpu.memory_space<vmem>>, %arg9: memref<1x64xf32, #tpu.memory_space<vmem>>, %arg10: memref<64x64xbf16, #tpu.memory_space<vmem>>, %arg11: memref<1x64xf32, #tpu.memory_space<vmem>>, %arg12: memref<64x3xbf16, #tpu.memory_space<vmem>>, %arg13: memref<1x3xf32, #tpu.memory_space<vmem>>, %arg14: memref<200x3xf32, #tpu.memory_space<vmem>>) attributes {dimension_semantics = [#tpu.dimension_semantics<parallel>], iteration_bounds = array<i64: 1>, scalar_prefetch = 0 : i64, scratch_operands = 0 : i64, tpu.core_type = #tpu.core_type<tc>, window_params = [{transform_indices = @transform_0, window_bounds = array<i64: 200, 3>}, {transform_indices = @transform_1, window_bounds = array<i64: 200, 27>}, {transform_indices = @transform_2, window_bounds = array<i64: 200, 3>}, {transform_indices = @transform_3, window_bounds = array<i64: 200, 32>}, {pipeline_mode = #tpu.pipeline_mode<synchronous>, transform_indices = @transform_4, window_bounds = array<i64: 3, 64>}, {pipeline_mode = #tpu.pipeline_mode<synchronous>, transform_indices = @transform_5, window_bounds = array<i64: 27, 64>}, {pipeline_mode = #tpu.pipeline_mode<synchronous>, transform_indices = @transform_6, window_bounds = array<i64: 3, 64>}, {pipeline_mode = #tpu.pipeline_mode<synchronous>, transform_indices = @transform_7, window_bounds = array<i64: 32, 64>}, {pipeline_mode = #tpu.pipeline_mode<synchronous>, transform_indices = @transform_8, window_bounds = array<i64: 1, 64>}, {pipeline_mode = #tpu.pipeline_mode<synchronous>, transform_indices = @transform_9, window_bounds = array<i64: 64, 64>}, {pipeline_mode = #tpu.pipeline_mode<synchronous>, transform_indices = @transform_10, window_bounds = array<i64: 1, 64>}, {pipeline_mode = #tpu.pipeline_mode<synchronous>, transform_indices = @transform_11, window_bounds = array<i64: 64, 3>}, {pipeline_mode = #tpu.pipeline_mode<synchronous>, transform_indices = @transform_12, window_bounds = array<i64: 1, 3>}, {transform_indices = @transform_13, window_bounds = array<i64: 200, 3>}]} {
    %c0 = arith.constant 0 : index
    %c0_0 = arith.constant 0 : index
    %0 = vector.load %arg1[%c0, %c0_0] : memref<200x3xf32, #tpu.memory_space<vmem>>, vector<200x3xf32>
    %1 = arith.truncf %0 : vector<200x3xf32> to vector<200x3xbf16>
    %c0_1 = arith.constant 0 : index
    %c0_2 = arith.constant 0 : index
    %2 = vector.load %arg5[%c0_1, %c0_2] : memref<3x64xbf16, #tpu.memory_space<vmem>>, vector<3x64xbf16>
    %cst = arith.constant dense<0.000000e+00> : vector<200x64xf32>
    %3 = tpu.matmul %1, %2, %cst {dimension_numbers = #tpu.dot_dimension_numbers<[1], [0], [0], [1], [0, 0, 1, 1], [], []>} : vector<200x3xbf16>, vector<3x64xbf16>, vector<200x64xf32> -> vector<200x64xf32>
    %c0_3 = arith.constant 0 : index
    %c0_4 = arith.constant 0 : index
    %4 = vector.load %arg2[%c0_3, %c0_4] : memref<200x27xf32, #tpu.memory_space<vmem>>, vector<200x27xf32>
    %5 = arith.truncf %4 : vector<200x27xf32> to vector<200x27xbf16>
    %c0_5 = arith.constant 0 : index
    %c0_6 = arith.constant 0 : index
    %6 = vector.load %arg6[%c0_5, %c0_6] : memref<27x64xbf16, #tpu.memory_space<vmem>>, vector<27x64xbf16>
    %cst_7 = arith.constant dense<0.000000e+00> : vector<200x64xf32>
    %7 = tpu.matmul %5, %6, %cst_7 {dimension_numbers = #tpu.dot_dimension_numbers<[1], [0], [0], [1], [0, 0, 1, 1], [], []>} : vector<200x27xbf16>, vector<27x64xbf16>, vector<200x64xf32> -> vector<200x64xf32>
    %8 = arith.addf %3, %7 : vector<200x64xf32>
    %c0_8 = arith.constant 0 : index
    %c0_9 = arith.constant 0 : index
    %9 = vector.load %arg3[%c0_8, %c0_9] : memref<200x3xf32, #tpu.memory_space<vmem>>, vector<200x3xf32>
    %10 = arith.truncf %9 : vector<200x3xf32> to vector<200x3xbf16>
    %c0_10 = arith.constant 0 : index
    %c0_11 = arith.constant 0 : index
    %11 = vector.load %arg7[%c0_10, %c0_11] : memref<3x64xbf16, #tpu.memory_space<vmem>>, vector<3x64xbf16>
    %cst_12 = arith.constant dense<0.000000e+00> : vector<200x64xf32>
    %12 = tpu.matmul %10, %11, %cst_12 {dimension_numbers = #tpu.dot_dimension_numbers<[1], [0], [0], [1], [0, 0, 1, 1], [], []>} : vector<200x3xbf16>, vector<3x64xbf16>, vector<200x64xf32> -> vector<200x64xf32>
    %13 = arith.addf %8, %12 : vector<200x64xf32>
    %c0_13 = arith.constant 0 : index
    %c0_14 = arith.constant 0 : index
    %14 = vector.load %arg4[%c0_13, %c0_14] : memref<200x32xf32, #tpu.memory_space<vmem>>, vector<200x32xf32>
    %15 = arith.truncf %14 : vector<200x32xf32> to vector<200x32xbf16>
    %c0_15 = arith.constant 0 : index
    %c0_16 = arith.constant 0 : index
    %16 = vector.load %arg8[%c0_15, %c0_16] : memref<32x64xbf16, #tpu.memory_space<vmem>>, vector<32x64xbf16>
    %cst_17 = arith.constant dense<0.000000e+00> : vector<200x64xf32>
    %17 = tpu.matmul %15, %16, %cst_17 {dimension_numbers = #tpu.dot_dimension_numbers<[1], [0], [0], [1], [0, 0, 1, 1], [], []>} : vector<200x32xbf16>, vector<32x64xbf16>, vector<200x64xf32> -> vector<200x64xf32>
    %18 = arith.addf %13, %17 : vector<200x64xf32>
    %c0_18 = arith.constant 0 : index
    %c0_19 = arith.constant 0 : index
    %19 = vector.load %arg9[%c0_18, %c0_19] : memref<1x64xf32, #tpu.memory_space<vmem>>, vector<1x64xf32>
    %20 = vector.broadcast %19 : vector<1x64xf32> to vector<200x64xf32>
    %21 = arith.addf %18, %20 : vector<200x64xf32>
    %cst_20 = arith.constant 0.000000e+00 : f32
    %22 = vector.broadcast %cst_20 : f32 to vector<200x64xf32>
    %23 = arith.maximumf %21, %22 : vector<200x64xf32>
    %24 = arith.truncf %23 : vector<200x64xf32> to vector<200x64xbf16>
    %c0_21 = arith.constant 0 : index
    %c0_22 = arith.constant 0 : index
    %25 = vector.load %arg10[%c0_21, %c0_22] : memref<64x64xbf16, #tpu.memory_space<vmem>>, vector<64x64xbf16>
    %cst_23 = arith.constant dense<0.000000e+00> : vector<200x64xf32>
    %26 = tpu.matmul %24, %25, %cst_23 {dimension_numbers = #tpu.dot_dimension_numbers<[1], [0], [0], [1], [0, 0, 1, 1], [], []>} : vector<200x64xbf16>, vector<64x64xbf16>, vector<200x64xf32> -> vector<200x64xf32>
    %c0_24 = arith.constant 0 : index
    %c0_25 = arith.constant 0 : index
    %27 = vector.load %arg11[%c0_24, %c0_25] : memref<1x64xf32, #tpu.memory_space<vmem>>, vector<1x64xf32>
    %28 = vector.broadcast %27 : vector<1x64xf32> to vector<200x64xf32>
    %29 = arith.addf %26, %28 : vector<200x64xf32>
    %cst_26 = arith.constant 0.000000e+00 : f32
    %30 = vector.broadcast %cst_26 : f32 to vector<200x64xf32>
    %31 = arith.maximumf %29, %30 : vector<200x64xf32>
    %32 = arith.truncf %31 : vector<200x64xf32> to vector<200x64xbf16>
    %c0_27 = arith.constant 0 : index
    %c0_28 = arith.constant 0 : index
    %33 = vector.load %arg12[%c0_27, %c0_28] : memref<64x3xbf16, #tpu.memory_space<vmem>>, vector<64x3xbf16>
    %cst_29 = arith.constant dense<0.000000e+00> : vector<200x3xf32>
    %34 = tpu.matmul %32, %33, %cst_29 {dimension_numbers = #tpu.dot_dimension_numbers<[1], [0], [0], [1], [0, 0, 1, 1], [], []>} : vector<200x64xbf16>, vector<64x3xbf16>, vector<200x3xf32> -> vector<200x3xf32>
    %c0_30 = arith.constant 0 : index
    %c0_31 = arith.constant 0 : index
    %35 = vector.load %arg13[%c0_30, %c0_31] : memref<1x3xf32, #tpu.memory_space<vmem>>, vector<1x3xf32>
    %36 = vector.broadcast %35 : vector<1x3xf32> to vector<200x3xf32>
    %37 = arith.addf %34, %36 : vector<200x3xf32>
    %38 = math.tanh %37 : vector<200x3xf32>
    %c0_32 = arith.constant 0 : index
    %c0_33 = arith.constant 0 : index
    %39 = vector.load %arg14[%c0_32, %c0_33] : memref<200x3xf32, #tpu.memory_space<vmem>>, vector<200x3xf32>
    tpu.vector_store %arg14[%c0_32, %c0_33], %38 {strides = array<i32>} : memref<200x3xf32, #tpu.memory_space<vmem>>, vector<200x3xf32>,
    return
  }
  func.func @transform_0(%arg0: i32) -> (i32, i32) {
    %c0_i32 = arith.constant 0 : i32
    %c0_i32_0 = arith.constant 0 : i32
    return %arg0, %c0_i32 : i32, i32
  }
  func.func @transform_1(%arg0: i32) -> (i32, i32) {
    %c0_i32 = arith.constant 0 : i32
    %c0_i32_0 = arith.constant 0 : i32
    return %arg0, %c0_i32 : i32, i32
  }
  func.func @transform_2(%arg0: i32) -> (i32, i32) {
    %c0_i32 = arith.constant 0 : i32
    %c0_i32_0 = arith.constant 0 : i32
    return %arg0, %c0_i32 : i32, i32
  }
  func.func @transform_3(%arg0: i32) -> (i32, i32) {
    %c0_i32 = arith.constant 0 : i32
    %c0_i32_0 = arith.constant 0 : i32
    return %arg0, %c0_i32 : i32, i32
  }
  func.func @transform_4(%arg0: i32) -> (i32, i32) {
    %c0_i32 = arith.constant 0 : i32
    %c0_i32_0 = arith.constant 0 : i32
    %c0_i32_1 = arith.constant 0 : i32
    return %c0_i32, %c0_i32_0 : i32, i32
  }
  func.func @transform_5(%arg0: i32) -> (i32, i32) {
    %c0_i32 = arith.constant 0 : i32
    %c0_i32_0 = arith.constant 0 : i32
    %c0_i32_1 = arith.constant 0 : i32
    return %c0_i32, %c0_i32_0 : i32, i32
  }
  func.func @transform_6(%arg0: i32) -> (i32, i32) {
    %c0_i32 = arith.constant 0 : i32
    %c0_i32_0 = arith.constant 0 : i32
    %c0_i32_1 = arith.constant 0 : i32
    return %c0_i32, %c0_i32_0 : i32, i32
  }
  func.func @transform_7(%arg0: i32) -> (i32, i32) {
    %c0_i32 = arith.constant 0 : i32
    %c0_i32_0 = arith.constant 0 : i32
    %c0_i32_1 = arith.constant 0 : i32
    return %c0_i32, %c0_i32_0 : i32, i32
  }
  func.func @transform_8(%arg0: i32) -> (i32, i32) {
    %c0_i32 = arith.constant 0 : i32
    %c0_i32_0 = arith.constant 0 : i32
    %c0_i32_1 = arith.constant 0 : i32
    return %c0_i32, %c0_i32_0 : i32, i32
  }
  func.func @transform_9(%arg0: i32) -> (i32, i32) {
    %c0_i32 = arith.constant 0 : i32
    %c0_i32_0 = arith.constant 0 : i32
    %c0_i32_1 = arith.constant 0 : i32
    return %c0_i32, %c0_i32_0 : i32, i32
  }
  func.func @transform_10(%arg0: i32) -> (i32, i32) {
    %c0_i32 = arith.constant 0 : i32
    %c0_i32_0 = arith.constant 0 : i32
    %c0_i32_1 = arith.constant 0 : i32
    return %c0_i32, %c0_i32_0 : i32, i32
  }
  func.func @transform_11(%arg0: i32) -> (i32, i32) {
    %c0_i32 = arith.constant 0 : i32
    %c0_i32_0 = arith.constant 0 : i32
    %c0_i32_1 = arith.constant 0 : i32
    return %c0_i32, %c0_i32_0 : i32, i32
  }
  func.func @transform_12(%arg0: i32) -> (i32, i32) {
    %c0_i32 = arith.constant 0 : i32
    %c0_i32_0 = arith.constant 0 : i32
    %c0_i32_1 = arith.constant 0 : i32
    return %c0_i32, %c0_i32_0 : i32, i32
  }
  func.func @transform_13(%arg0: i32) -> (i32, i32) {
    %c0_i32 = arith.constant 0 : i32
    %c0_i32_0 = arith.constant 0 : i32
    return %arg0, %c0_i32 : i32, i32
  }
}

</mosaic_0001>

<bundles_post_ra>
// kernel: _forward.1
= control target key start
LH: loop header
LB: loop body
LE: loop exit
PB: predicated region body
PF: predicated region fallthrough
CT: control target
= control target key end

     0   :  { %vm187_vm0 = vcmask 1040384   ;;  %vm188_vm1 = vcmask 1041408   ;;  %v17398_v0 = vmov 0.0   ;;  %v10475_v2 = vmov 65535   ;;  %s17361_s5 = inlined_call_operand.vmem [shape: bf16[3,64], index: 5, kind: input, shape index: {}]   ;;  %s17362_s4 = inlined_call_operand.vmem [shape: bf16[3,64], index: 4, kind: input, shape index: {}]   ;;  %s17363_s1 = inlined_call_operand.vmem [shape: f32[200,3], index: 1, kind: input, shape index: {}]   ;;  %s17364_s0 = inlined_call_operand.vmem [shape: f32[200,3], index: 0, kind: input, shape index: {}]   ;;  %s17365_s6 = inlined_call_operand.vmem [shape: bf16[3,64], index: 6, kind: input, shape index: {}]   ;;  %s17366_s7 = inlined_call_operand.vmem [shape: bf16[32,64], index: 7, kind: input, shape index: {}]   ;;  %s17367_s2 = inlined_call_operand.vmem [shape: f32[200,3], index: 2, kind: input, shape index: {}]   ;;  %s17368_s3 = inlined_call_operand.vmem [shape: f32[200,32], index: 3, kind: input, shape index: {}]   ;;  %s17369_s8 = inlined_call_operand.vmem [shape: bf16[3,64], index: 8, kind: input, shape index: {}]   ;;  %s17370_s9 = inlined_call_operand.vmem [shape: bf16[3,64], index: 9, kind: input, shape index: {}]   ;;  %s17371_s10 = inlined_call_operand.vmem [shape: bf16[3,64], index: 10, kind: input, shape index: {}]   ;;  %s17372_s11 = inlined_call_operand.vmem [shape: bf16[3,64], index: 11, kind: input, shape index: {}]   ;;  %s17373_s12 = inlined_call_operand.vmem [shape: bf16[3,64], index: 12, kind: input, shape index: {}]   ;;  %s17374_s13 = inlined_call_operand.vmem [shape: bf16[3,64], index: 13, kind: input, shape index: {}]   ;;  %s17375_s14 = inlined_call_operand.vmem [shape: bf16[3,64], index: 14, kind: input, shape index: {}]   ;;  %s17376_s15 = inlined_call_operand.vmem [shape: bf16[3,64], index: 15, kind: input, shape index: {}]   ;;  %s17377_s17 = inlined_call_operand.vmem [shape: bf16[64,64], index: 17, kind: input, shape index: {}]   ;;  %s17378_s19 = inlined_call_operand.vmem [shape: bf16[64,3], index: 19, kind: input, shape index: {}]   ;;  %s17379_s16 = inlined_call_operand.vmem [shape: f32[1,64], index: 16, kind: input, shape index: {}]   ;;  %s17380_s18 = inlined_call_operand.vmem [shape: f32[1,64], index: 18, kind: input, shape index: {}]   ;;  %s17381_s20 = inlined_call_operand.vmem [shape: f32[1,3], index: 20, kind: input, shape index: {}]   ;;  %s17382_s21 = inlined_call_operand.vmem [shape: f32[200,3], index: 21, kind: output, shape index: {}]  }
   0x1   :  { %17708 = sst [smem:[#allocation116_spill]] %s17361_s5  ;;  %9405 = vmatprep.subr.bf16.mxu0 %v17398_v0  ;;  %9459 = vmatprep.subr.bf16.mxu1 %v17398_v0  ;;  %v189_v3 = vsel %vm187_vm0, 4294967295, %v10475_v2  ;;  %vm17505_vm2 = vmmov 0   ;;  %vm17533_vm3 = vcmask 23552   ;;  %v17396_v48 = vmov 683565275  }
   0x2   :  { %17709 = sst [smem:[#allocation117_spill]] %s17362_s4  ;;  %s17714_s26 = sld [smem:[#allocation116_spill]]  ;;  %v10601_v5 = vsel %vm188_vm1, %v189_v3, 0  ;;  %9407 = vmatprep.mubr.msk.bf16.mxu0 %vm17505_vm2, %v17398_v0  ;;  %9461 = vmatprep.mubr.msk.bf16.mxu1 %vm17505_vm2, %v17398_v0  ;;  %v17394_v50 = vmov 2475754826  }
   0x3   :  { %17710 = sst [smem:[#allocation118_spill]] %s17363_s1  ;;  %s17715_s28 = sld [smem:[#allocation117_spill]]  ;;  %17716 = vst [vmem:[#allocation2_spill] sm:$0xff] %v10601_v5  ;;  %v17392_v52 = vmov 2131351028  }
   0x4   :  { %17711 = sst [smem:[#allocation119_spill]] %s17364_s0  ;;  %v17390_v54 = vmov 2102212464   ;;  %v17388_v56 = vmov 920167782  }
   0x5   :  { %17712 = sst [smem:[#allocation120_spill]] %s17365_s6  ;;  %s17717_s6 = sld [smem:[#allocation118_spill]]  ;;  %v17386_v63 = vmov 1326507024  }
   0x6   :  { %17713 = sst [smem:[#allocation121_spill]] %s17366_s7  ;;  %s17718_s4 = sld [smem:[#allocation119_spill]] }
   0x7   :  { %s17719_s27 = sld [smem:[#allocation120_spill]]  ;;  %s17720_s29 = sld [smem:[#allocation121_spill]] }
   0x8   :  { %v146_v1 = vld [vmem:[%s17714_s26] sm:$0x3] }
   0x9   :  { %v107_v4 = vld [vmem:[%s17715_s28] sm:$0x3]  ;;  %v192_v8 = vand.u32 %v10601_v5, %v146_v1 }
   0xa   :  { %v370_v9 = vand.u32 %v10601_v5, %v107_v4 }
   0xb   :  { %v10610_v6 = vld [vmem:[%s17717_s6] sm:$0xff]  ;;  %v10615_v7 = vld [vmem:[%s17717_s6 + $0x8] sm:$0xff]  ;;  %9406 = vmatpush3.bf16.msra.mxu0 %v192_v8  ;;  %v10649_v25 = vld [vmem:[%s17717_s6 + $0x10] sm:$0xff] }
   0xc   :  { %v1005_v10 = vand.u32 2147483647, %v10610_v6  ;;  %v69_v11 = vld [vmem:[%s17718_s4] sm:$0xff]  ;;  %v70_v12 = vld [vmem:[%s17718_s4 + $0x8] sm:$0xff]  ;;  %v133_v13 = vpack.c.bf16 %v10615_v7, %v10610_v6  ;;  %v1008_v14 = vand.u32 2139095040, %v10610_v6  ;;  %9460 = vmatpush3.bf16.msra.mxu1 %v370_v9  ;;  %9513 = vmatprep.subr.bf16.mxu0 %v17398_v0  ;;  %v1112_v20 = vand.u32 2139095040, %v10615_v7 }
   0xd   :  { %v546_v15 = vld [vmem:[%s17719_s27] sm:$0x3]  ;;  %v94_v16 = vpack.c.bf16 %v70_v12, %v69_v11  ;;  %9567 = vmatprep.subr.bf16.mxu1 %v17398_v0  ;;  %v1109_v19 = vand.u32 2147483647, %v10615_v7  ;;  %17721 = vst [vmem:[#allocation3_spill] sm:$0xff] %v10649_v25  ;;  %v10656_v28 = vld [vmem:[%s17717_s6 + $0x18] sm:$0xff] }
   0xe   :  { %v1009_v17 = vshrl.u32 %v1008_v14, 23  ;;  %v1012_v18 = vand.u32 8388607, %v1005_v10  ;;  %v587_v21 = vand.u32 %v546_v15, %v10601_v5  ;;  %9408 = vmatmul.mubr.msk.bf16.vlgmr.msra.gmra.mrb[0].mxu0 %vm17533_vm3, %v133_v13  ;;  %v10284_v23 = vld [vmem:[%s17720_s29] sm:$0xff]   ;;  %v1113_v24 = vshrl.u32 %v1112_v20, 23  ;;  %v71_v29 = vld [vmem:[%s17718_s4 + $0x10] sm:$0xff] }
   0xf   :  { %9462 = vmatmul.mubr.msk.bf16.vlgmr.msra.gmra.mrb[0].mxu1 %vm17533_vm3, %v94_v16  ;;  %9411 = vmatprep.mubr.msk.bf16.mxu0 %vm17505_vm2, %v17398_v0  ;;  %v72_v30 = vld [vmem:[%s17718_s4 + $0x18] sm:$0xff]  ;;  %v10666_v32 = vand.u32 8388607, %v1109_v19  ;;  %v10671_v33 = vld [vmem:[%s17717_s6 + $0x20] sm:$0xff]  ;;  %v134_v34 = vpack.c.bf16 %v10656_v28, %v10649_v25  ;;  %v10680_v36 = vld [vmem:[%s17717_s6 + $0x28] sm:$0xff] }
  0x10   :  { %v8861_v22 = vadd.s32 4294967169, %v1009_v17  ;;  %9514 = vmatpush3.bf16.msra.mxu0 %v587_v21  ;;  %v1013_v26 = vor.u32 8388608, %v1012_v18  ;;  %9568 = vmatpush3.bf16.msra.mxu1 %v10284_v23  ;;  %v8865_v31 = vadd.s32 4294967169, %v1113_v24  ;;  %v95_v35 = vpack.c.bf16 %v72_v30, %v71_v29  ;;  %v10685_v37 = vld [vmem:[%s17718_s4 + $0x20] sm:$0xff]  ;;  %v10690_v38 = vld [vmem:[%s17718_s4 + $0x28] sm:$0xff] }
  0x11   :  { %9465 = vmatprep.mubr.msk.bf16.mxu1 %vm17505_vm2, %v17398_v0  ;;  %9569 = vmatprep.subr.bf16.mxu1 %v17398_v0  ;;  %v1117_v44 = vor.u32 8388608, %v10666_v32  ;;  %v135_v45 = vpack.c.bf16 %v10680_v36, %v10671_v33  ;;  %v96_v46 = vpack.c.bf16 %v10690_v38, %v10685_v37  ;;  %v10285_v2 = vld [vmem:[%s17720_s29 + $0x8] sm:$0xff]  }
  0x12   :  { %v1015_v27 = vadd.s32 1, %v8861_v22  ;;  %9623 = vmatprep.subr.bf16.mxu0 %v17398_v0  ;;  %v1119_v40 = vadd.s32 1, %v8865_v31  ;;  %v10692_v43 = vshll.u32 %v1013_v26, 8 }
  0x14   :  { %vm1016_vm4 = vcmp.gt.s32.totalorder %v1015_v27, 0  ;;  %vm1120_vm5 = vcmp.gt.s32.totalorder %v1119_v40, 0  ;;  %9570 = vmatpush3.bf16.msra.mxu1 %v10285_v2 }
  0x15   :  { %v1017_v39 = vsel %vm1016_vm4, %v1015_v27, 0  ;;  %v1121_v9 = vsel %vm1120_vm5, %v1119_v40, 0  ;;  %9677 = vmatprep.subr.bf16.mxu1 %v17398_v0 }
  0x16   :  { %v1018_v41 = vshrl.u32 %v1017_v39, 5  ;;  %v1019_v42 = vand.u32 31, %v1017_v39  ;;  %9412 = vmatmul.mubr.msk.bf16.gmra.mrb[4].mxu0 %vm17533_vm3, %v134_v34  ;;  %v10720_v13 = vshrl.u32 %v1121_v9, 5  ;;  %v1123_v14 = vand.u32 31, %v1121_v9 }
  0x17   :  { %9466 = vmatmul.mubr.msk.bf16.gmra.mrb[4].mxu1 %vm17533_vm3, %v95_v35  ;;  %9415 = vmatprep.mubr.msk.bf16.mxu0 %vm17505_vm2, %v17398_v0 }
  0x18   :  { %v1020_v47 = vsub.s32 32, %v1019_v42  ;;  %v1022_v49 = vshll.u32 %v17396_v48, %v1019_v42  ;;  %v1025_v51 = vshll.u32 %v17394_v50, %v1019_v42  ;;  %v1028_v53 = vshll.u32 %v17392_v52, %v1019_v42  ;;  %9469 = vmatprep.mubr.msk.bf16.mxu1 %vm17505_vm2, %v17398_v0 }
  0x19   :  { %v1031_v55 = vshll.u32 %v17390_v54, %v1019_v42  ;;  %v1034_v57 = vshll.u32 %v17388_v56, %v1019_v42  ;;  %vm1037_vm6 = vcmp.lt.s32.totalorder %v1018_v41, 1  ;;  %vm1038_vm7 = vcmp.lt.s32.totalorder %v1018_v41, 2 }
  0x1a   :  { %v1021_v58 = vshrl.u32 %v17396_v48, %v1020_v47  ;;  %v1023_v59 = vshrl.u32 %v17394_v50, %v1020_v47  ;;  %v1026_v60 = vshrl.u32 %v17392_v52, %v1020_v47  ;;  %v1029_v61 = vshrl.u32 %v17390_v54, %v1020_v47 }
  0x1b   :  { %v1032_v62 = vshrl.u32 %v17388_v56, %v1020_v47  ;;  %v1035_v1 = vshrl.u32 %v17386_v63, %v1020_v47  ;;  %vm1039_vm8 = vcmp.lt.s32.totalorder %v1018_v41, 3  ;;  %vm1040_vm9 = vcmp.lt.s32.totalorder %v1018_v41, 4 }
  0x1c   :  { %v1024_v3 = vor.u32 %v1023_v59, %v1022_v49  ;;  %v1027_v4 = vor.u32 %v1026_v60, %v1025_v51  ;;  %v1030_v8 = vor.u32 %v1029_v61, %v1028_v53  ;;  %v1124_v23 = vsub.s32 32, %v1123_v14 }
  0x1d   :  { %v1033_v11 = vor.u32 %v1032_v62, %v1031_v55  ;;  %v1036_v12 = vor.u32 %v1035_v1, %v1034_v57  ;;  %v1126_v29 = vshll.u32 %v17396_v48, %v1123_v14  ;;  %v1129_v42 = vshll.u32 %v17394_v50, %v1123_v14 }
  0x1e   :  { %v1041_v15 = vsel %vm1037_vm6, %v1021_v58, %v1024_v3  ;;  %v1042_v16 = vsel %vm1040_vm9, %v1030_v8, 2102212464  ;;  %v1045_v17 = vsel %vm1037_vm6, %v1024_v3, %v1027_v4  ;;  %v1049_v18 = vsel %vm1037_vm6, %v1027_v4, %v1030_v8  ;;  %9416 = vmatmul.mubr.msk.bf16.gmra.mrb[8].mxu0 %vm17533_vm3, %v135_v45 }
  0x1f   :  { %v1043_v20 = vsel %vm1039_vm8, %v1027_v4, %v1042_v16  ;;  %v1046_v21 = vsel %vm1040_vm9, %v1033_v11, 920167782  ;;  %v1050_v22 = vsel %vm1040_vm9, %v1036_v12, 1326507024  ;;  %v1125_v35 = vshrl.u32 %v17396_v48, %v1124_v23  ;;  %9470 = vmatmul.mubr.msk.bf16.gmra.mrb[8].mxu1 %vm17533_vm3, %v96_v46  ;;  %9419 = vmatprep.mubr.msk.bf16.mxu0 %vm17505_vm2, %v17398_v0  ;;  %v11245_v48 = vld [vmem:[%s17368_s3 + $0x28] sm:$0xff] }
  0x20   :  { %v1044_v24 = vsel %vm1038_vm7, %v1041_v15, %v1043_v20  ;;  %v1047_v26 = vsel %vm1039_vm8, %v1030_v8, %v1046_v21  ;;  %v1051_v27 = vsel %vm1039_vm8, %v1033_v11, %v1050_v22  ;;  %9473 = vmatprep.mubr.msk.bf16.mxu1 %vm17505_vm2, %v17398_v0  ;;  %v1127_v41 = vshrl.u32 %v17394_v50, %v1124_v23  ;;  %v11240_v50 = vld [vmem:[%s17368_s3 + $0x20] sm:$0xff] }
  0x21   :  { %v1048_v30 = vsel %vm1038_vm7, %v1045_v17, %v1047_v26  ;;  %v1052_v31 = vsel %vm1038_vm7, %v1049_v18, %v1051_v27  ;;  %v1060_v34 = vmul.u32 %v10692_v43, %v1044_v24  ;;  %v1130_v45 = vshrl.u32 %v17392_v52, %v1124_v23 }
  0x22   :  { %v10741_v37 = vmul.u32.u64.low %v10692_v43, %v1052_v31  ;;  %v10742_v38 = vmul.u32.u64.high %v10692_v43, %v1052_v31, %v10741_v37  ;;  %v10745_v39 = vmul.u32.u64.low %v10692_v43, %v1048_v30  ;;  %v10746_v40 = vmul.u32.u64.high %v10692_v43, %v1048_v30, %v10745_v39 }
  0x23   :  { %v1132_v46 = vshll.u32 %v17392_v52, %v1123_v14  ;;  %v1133_v47 = vshrl.u32 %v17390_v54, %v1124_v23  ;;  %v1135_v43 = vshll.u32 %v17390_v54, %v1123_v14  ;;  %v1136_v49 = vshrl.u32 %v17388_v56, %v1124_v23  ;;  %v76_v37 = vld [vmem:[%s17718_s4 + $0x38] sm:$0xff]  ;;  %v11230_v54 = vld [vmem:[%s17367_s2 + $0x20] sm:$0xff]  ;;  %v11235_v52 = vld [vmem:[%s17367_s2 + $0x28] sm:$0xff] }
  0x24   :  { %v1138_v51 = vshll.u32 %v17388_v56, %v1123_v14  ;;  %v1128_v53 = vor.u32 %v1127_v41, %v1126_v29  ;;  %v1131_v55 = vor.u32 %v1130_v45, %v1129_v42  ;;  %v1139_v57 = vshrl.u32 %v17386_v63, %v1124_v23  ;;  %v10804_v29 = vld [vmem:[%s17717_s6 + $0x38] sm:$0xff]  ;;  %v11210_v63 = vld [vmem:[%s17367_s2 + $0x10] sm:$0xff] }
  0x25   :  { %vm1141_vm10 = vcmp.lt.s32.totalorder %v10720_v13, 1  ;;  %vm1062_vm11 = vc.u32 %v10742_v38, %v10745_v39  ;;  %v1063_v58 = vadd.s32 1, %v10746_v40  ;;  %v1134_v59 = vor.u32 %v1133_v47, %v1132_v46  ;;  %v10824_v46 = vld [vmem:[%s17717_s6 + $0x40] sm:$0xff]  ;;  %v10829_v47 = vld [vmem:[%s17717_s6 + $0x48] sm:$0xff]  ;;  %v11215_v56 = vld [vmem:[%s17367_s2 + $0x18] sm:$0xff] }
  0x26   :  { %v1157_v60 = vshll.u32 %v1117_v44, 8  ;;  %v1137_v61 = vor.u32 %v1136_v49, %v1135_v43  ;;  %v1140_v62 = vor.u32 %v1139_v57, %v1138_v51  ;;  %vm1142_vm12 = vcmp.lt.s32.totalorder %v10720_v13, 2 }
  0x27   :  { %vm1143_vm13 = vcmp.lt.s32.totalorder %v10720_v13, 3  ;;  %v1064_v1 = vsel %vm1062_vm11, %v1063_v58, %v10746_v40  ;;  %vm1144_vm14 = vcmp.lt.s32.totalorder %v10720_v13, 4  ;;  %v1145_v2 = vsel %vm1141_vm10, %v1125_v35, %v1128_v53  ;;  %v10799_v13 = vld [vmem:[%s17717_s6 + $0x30] sm:$0xff]  ;;  %v77_v58 = vld [vmem:[%s17718_s4 + $0x40] sm:$0xff] }
  0x28   :  { %v1149_v3 = vsel %vm1141_vm10, %v1128_v53, %v1131_v55  ;;  %v1065_v4 = vadd.s32 %v1064_v1, %v1060_v34  ;;  %v1146_v8 = vsel %vm1144_vm14, %v1134_v59, 2102212464  ;;  %v1150_v32 = vsel %vm1144_vm14, %v1137_v61, 920167782  ;;  %v75_v35 = vld [vmem:[%s17718_s4 + $0x30] sm:$0xff] }
  0x29   :  { %v1153_v44 = vsel %vm1141_vm10, %v1131_v55, %v1134_v59  ;;  %v1147_v9 = vsel %vm1143_vm13, %v1131_v55, %v1146_v8  ;;  %v1151_v11 = vsel %vm1143_vm13, %v1134_v59, %v1150_v32  ;;  %v1154_v12 = vsel %vm1144_vm14, %v1140_v62, 1326507024  ;;  %v78_v59 = vld [vmem:[%s17718_s4 + $0x48] sm:$0xff]  ;;  %v79_v32 = vld [vmem:[%s17718_s4 + $0x50] sm:$0xff] }
  0x2a   :  { %v1066_v14 = vadd.s32 536870912, %v1065_v4  ;;  %v1152_v15 = vsel %vm1142_vm12, %v1149_v3, %v1151_v11  ;;  %v1155_v16 = vsel %vm1143_vm13, %v1137_v61, %v1154_v12  ;;  %v1148_v17 = vsel %vm1142_vm12, %v1145_v2, %v1147_v9  ;;  %v10860_v61 = vld [vmem:[%s17717_s6 + $0x58] sm:$0xff]  ;;  %v10882_v12 = vld [vmem:[%s17717_s6 + $0x60] sm:$0xff] }
  0x2b   :  { %v1156_v18 = vsel %vm1142_vm12, %v1153_v44, %v1155_v16  ;;  %v10784_v20 = vmul.u32.u64.low %v1157_v60, %v1152_v15  ;;  %v10785_v21 = vmul.u32.u64.high %v1157_v60, %v1152_v15, %v10784_v20  ;;  %v1164_v26 = vmul.u32 %v1157_v60, %v1148_v17 }
  0x2c   :  { %v10788_v22 = vmul.u32.u64.low %v1157_v60, %v1156_v18  ;;  %v10789_v23 = vmul.u32.u64.high %v1157_v60, %v1156_v18, %v10788_v22  ;;  %v10791_v24 = vshrl.u32 %v1066_v14, 30  ;;  %v136_v40 = vpack.c.bf16 %v10804_v29, %v10799_v13  ;;  %v10855_v60 = vld [vmem:[%s17717_s6 + $0x50] sm:$0xff]  ;;  %v10887_v14 = vld [vmem:[%s17717_s6 + $0x68] sm:$0xff] }
  0x2d   :  { %v1167_v27 = vadd.s32 1, %v10785_v21  ;;  %v97_v42 = vpack.c.bf16 %v76_v37, %v75_v35  ;;  %v137_v49 = vpack.c.bf16 %v10829_v47, %v10824_v46  ;;  %v1216_v1 = vand.u32 2139095040, %v10649_v25  ;;  %v82_v37 = vld [vmem:[%s17718_s4 + $0x68] sm:$0xff] }
  0x2e   :  { %vm1166_vm15 = vc.u32 %v10789_v23, %v10784_v20  ;;  %v1068_v31 = vshll.u32 %v10791_v24, 30  ;;  %9420 = vmatmul.mubr.msk.bf16.gmra.mrb[12].mxu0 %vm17533_vm3, %v136_v40  ;;  %v1320_v2 = vand.u32 2139095040, %v10656_v28  ;;  %v138_v8 = vpack.c.bf16 %v10860_v61, %v10855_v60  ;;  %v80_v28 = vld [vmem:[%s17718_s4 + $0x58] sm:$0xff] }
  0x2f   :  { %v1168_v30 = vsel %vm1166_vm15, %v1167_v27, %v10785_v21  ;;  %9423 = vmatprep.mubr.msk.bf16.mxu0 %vm17505_vm2, %v17398_v0  ;;  %9474 = vmatmul.mubr.msk.bf16.gmra.mrb[12].mxu1 %vm17533_vm3, %v97_v42  ;;  %v1217_v9 = vshrl.u32 %v1216_v1, 23  ;;  %v1424_v16 = vand.u32 2139095040, %v10671_v33  ;;  %v99_v17 = vpack.c.bf16 %v80_v28, %v79_v32  ;;  %v81_v33 = vld [vmem:[%s17718_s4 + $0x60] sm:$0xff]  ;;  %v10914_v40 = vld [vmem:[%s17717_s6 + $0x78] sm:$0xff]  ;;  %v10952_v28 = vld [vmem:[%s17717_s6 + $0x88] sm:$0xff] }
  0x30   :  { %v1169_v34 = vadd.s32 %v1168_v30, %v1164_v26  ;;  %v10817_v45 = vsub.s32 %v1065_v4, %v1068_v31  ;;  %9477 = vmatprep.mubr.msk.bf16.mxu1 %vm17505_vm2, %v17398_v0  ;;  %v98_v4 = vpack.c.bf16 %v78_v59, %v77_v58  ;;  %v1321_v11 = vshrl.u32 %v1320_v2, 23 }
  0x31   :  { %v139_v18 = vpack.c.bf16 %v10887_v14, %v10882_v12  ;;  %v8869_v21 = vadd.s32 4294967169, %v1217_v9  ;;  %v1528_v27 = vand.u32 2139095040, %v10680_v36  ;;  %v1425_v31 = vshrl.u32 %v1424_v16, 23  ;;  %v10909_v36 = vld [vmem:[%s17717_s6 + $0x70] sm:$0xff] }
  0x32   :  { %v1170_v41 = vadd.s32 536870912, %v1169_v34  ;;  %v1071_v51 = vsub.s32 0, %v10817_v45  ;;  %v8873_v22 = vadd.s32 4294967169, %v1321_v11  ;;  %v1632_v58 = vand.u32 2139095040, %v10799_v13  ;;  %v10947_v11 = vld [vmem:[%s17717_s6 + $0x80] sm:$0xff] }
  0x33   :  { %v1529_v42 = vshrl.u32 %v1528_v27, 23  ;;  %v1736_v59 = vand.u32 2139095040, %v10804_v29  ;;  %vm1007_vm6 = vcmp.lt.s32.totalorder %v10610_v6, 0  ;;  %vm10926_vm7 = vcmp.le.f32.partialorder %v1005_v10, 0.7853982  ;;  %v84_v10 = vld [vmem:[%s17718_s4 + $0x78] sm:$0xff] }
  0x34   :  { %v10831_v43 = vshrl.u32 %v1170_v41, 30  ;;  %v8862_v55 = vmin.u32 %v1071_v51, %v10817_v45  ;;  %v1327_v35 = vadd.s32 1, %v8873_v22  ;;  %v8877_v51 = vadd.s32 4294967169, %v1425_v31 }
  0x35   :  { %v8881_v2 = vadd.s32 4294967169, %v1529_v42  ;;  %v1737_v9 = vshrl.u32 %v1736_v59, 23  ;;  %vm1111_vm10 = vcmp.lt.s32.totalorder %v10615_v7, 0  ;;  %v86_v59 = vld [vmem:[%s17718_s4 + $0x88] sm:$0xff]  ;;  %vm11017_vm11 = vcmp.le.f32.partialorder %v1109_v19, 0.7853982 }
  0x36   :  { %v1172_v53 = vshll.u32 %v10831_v43, 30  ;;  %9424 = vmatmul.mubr.msk.bf16.gmra.mrb[16].mxu0 %vm17533_vm3, %v137_v49  ;;  %v1073_v62 = vclz %v8862_v55  ;;  %v140_v55 = vpack.c.bf16 %v10914_v40, %v10909_v36  ;;  %vm1328_vm4 = vcmp.gt.s32.totalorder %v1327_v35, 0 }
  0x37   :  { %9427 = vmatprep.mubr.msk.bf16.mxu0 %vm17505_vm2, %v17398_v0  ;;  %9478 = vmatmul.mubr.msk.bf16.gmra.mrb[16].mxu1 %vm17533_vm3, %v98_v4  ;;  %v1091_v4 = vsub.s32 4, %v10791_v24  ;;  %v1329_v32 = vsel %vm1328_vm4, %v1327_v35, 0  ;;  %v1431_v29 = vadd.s32 1, %v8877_v51  ;;  %v8889_v35 = vadd.s32 4294967169, %v1737_v9 }
  0x38   :  { %v10844_v57 = vsub.s32 %v1169_v34, %v1172_v53  ;;  %v8863_v44 = vadd.s32 4294967294, %v1073_v62  ;;  %9481 = vmatprep.mubr.msk.bf16.mxu1 %vm17505_vm2, %v17398_v0  ;;  %v1223_v34 = vadd.s32 1, %v8869_v21  ;;  %v100_v53 = vpack.c.bf16 %v82_v37, %v81_v33 }
  0x39   :  { %v1061_v62 = vadd.s32 %v10745_v39, %v10742_v38  ;;  %v83_v38 = vld [vmem:[%s17718_s4 + $0x70] sm:$0xff]  ;;  %v1092_v22 = vsel %vm1007_vm6, %v1091_v4, %v10791_v24  ;;  %v10961_v27 = vand.u32 31, %v1329_v32  ;;  %vm1432_vm8 = vcmp.gt.s32.totalorder %v1431_v29, 0 }
  0x3a   :  { %v1175_v3 = vsub.s32 0, %v10844_v57  ;;  %vm8864_vm0 = vcmp.lt.s32.totalorder %v8863_v44, 0  ;;  %vm1224_vm1 = vcmp.gt.s32.totalorder %v1223_v34, 0  ;;  %v101_v33 = vpack.c.bf16 %v84_v10, %v83_v38  ;;  %v11003_v4 = vld [vmem:[%s17717_s6 + $0x90] sm:$0xff] }
  0x3b   :  { %v1076_v30 = vsel %vm8864_vm0, 0, %v8863_v44  ;;  %v1225_v13 = vsel %vm1224_vm1, %v1223_v34, 0  ;;  %v1633_v44 = vshrl.u32 %v1632_v58, 23  ;;  %v10983_v58 = vsub.s32 32, %v10961_v27 }
  0x3c   :  { %v8866_v15 = vmin.u32 %v1175_v3, %v10844_v57  ;;  %v1081_v49 = vsub.s32 4294967266, %v1076_v30  ;;  %v1077_v1 = vsub.s32 32, %v1076_v30  ;;  %v2256_v19 = vand.u32 2139095040, %v10882_v12 }
  0x3d   :  { %v8885_v34 = vadd.s32 4294967169, %v1633_v44 }
  0x3e   :  { %9428 = vmatmul.mubr.msk.bf16.gmra.mrb[20].mxu0 %vm17533_vm3, %v138_v8  ;;  %v1177_v26 = vclz %v8866_v15  ;;  %v1082_v3 = vadd.s32 127, %v1081_v49  ;;  %v1078_v15 = vshll.u32 %v10817_v45, %v1076_v30  ;;  %v1079_v16 = vshrl.u32 %v1061_v62, %v1077_v1 }
  0x3f   :  { %9431 = vmatprep.mubr.msk.bf16.mxu0 %vm17505_vm2, %v17398_v0  ;;  %9482 = vmatmul.mubr.msk.bf16.gmra.mrb[20].mxu1 %vm17533_vm3, %v99_v17  ;;  %v1535_v17 = vadd.s32 1, %v8881_v2  ;;  %v141_v45 = vpack.c.bf16 %v10952_v28, %v10947_v11  ;;  %v1165_v30 = vadd.s32 %v10784_v20, %v10789_v23  ;;  %v10973_v49 = vsel %vm10926_vm7, 0, %v1092_v22 }
  0x40   :  { %9485 = vmatprep.mubr.msk.bf16.mxu1 %vm17505_vm2, %v17398_v0  ;;  %v8867_v41 = vadd.s32 4294967294, %v1177_v26  ;;  %v1083_v21 = vshll.u32 %v1082_v3, 23  ;;  %v10959_v26 = vand.u32 31, %v1225_v13  ;;  %v1080_v37 = vor.u32 %v1079_v16, %v1078_v15 }
  0x41   :  { %vm1536_vm9 = vcmp.gt.s32.totalorder %v1535_v17, 0  ;;  %v1639_v2 = vadd.s32 1, %v8885_v34  ;;  %v1743_v3 = vadd.s32 1, %v8889_v35  ;;  %v2048_v16 = vand.u32 2139095040, %v10855_v60 }
  0x42   :  { %vm8868_vm5 = vcmp.lt.s32.totalorder %v8867_v41, 0  ;;  %v1084_v42 = vor.u32 4788187, %v1083_v21  ;;  %v10978_v23 = vsub.s32 32, %v10959_v26  ;;  %v1537_v1 = vsel %vm1536_vm9, %v1535_v17, 0  ;;  %v11165_v17 = vld [vmem:[%s17718_s4 + $0xc0] sm:$0xff] }
  0x43   :  { %v10935_v39 = vsel %vm8868_vm5, 0, %v8867_v41  ;;  %v1944_v41 = vand.u32 2139095040, %v10829_v47  ;;  %v85_v47 = vld [vmem:[%s17718_s4 + $0x80] sm:$0xff]  ;;  %v11021_v21 = vshrl.u32 %v1537_v1, 5  ;;  %vm1640_vm12 = vcmp.gt.s32.totalorder %v1639_v2, 0 }
  0x44   :  { %v1185_v31 = vsub.s32 4294967266, %v10935_v39  ;;  %v1181_v51 = vsub.s32 32, %v10935_v39  ;;  %v1085_v9 = vand.u32 2147483647, %v1084_v42  ;;  %v1182_v10 = vshll.u32 %v10844_v57, %v10935_v39 }
  0x45   :  { %v1945_v44 = vshrl.u32 %v1944_v41, 23  ;;  %17726 = vst [vmem:[#allocation4_spill] sm:$0xff] %v11021_v21  ;;  %v102_v22 = vpack.c.bf16 %v86_v59, %v85_v47  ;;  %vm1744_vm13 = vcmp.gt.s32.totalorder %v1743_v3, 0  ;;  %v2152_v57 = vand.u32 2139095040, %v10860_v61  ;;  %v87_v61 = vld [vmem:[%s17718_s4 + $0x90] sm:$0xff]  ;;  %v11438_v21 = vld [vmem:[%s17367_s2 + $0x98] sm:$0xff] }
  0x46   :  { %9432 = vmatmul.mubr.msk.bf16.gmra.mrb[24].mxu0 %vm17533_vm3, %v139_v18  ;;  %v1840_v18 = vand.u32 2139095040, %v10824_v46  ;;  %v10968_v46 = vshrl.u32 %v1225_v13, 5  ;;  %v1186_v20 = vadd.s32 127, %v1185_v31  ;;  %v11008_v13 = vld [vmem:[%s17717_s6 + $0x98] sm:$0xff]  ;;  %v1183_v15 = vshrl.u32 %v1165_v30, %v1181_v51  ;;  %17776 = vst [vmem:[#allocation53_spill] sm:$0xff] %v11438_v21 }
  0x47   :  { %9435 = vmatprep.mubr.msk.bf16.mxu0 %vm17505_vm2, %v17398_v0  ;;  %9486 = vmatmul.mubr.msk.bf16.gmra.mrb[24].mxu1 %vm17533_vm3, %v100_v53  ;;  %v1433_v53 = vsel %vm1432_vm8, %v1431_v29, 0  ;;  %v142_v31 = vpack.c.bf16 %v11008_v13, %v11003_v4  ;;  %v8897_v39 = vadd.s32 4294967169, %v1945_v44  ;;  %v2049_v35 = vshrl.u32 %v2048_v16, 23 }
  0x48   :  { %9489 = vmatprep.mubr.msk.bf16.mxu1 %vm17505_vm2, %v17398_v0  ;;  %v1841_v24 = vshrl.u32 %v1840_v18, 23  ;;  %v10993_v62 = vshrl.u32 %v1433_v53, 5  ;;  %v11010_v29 = vand.u32 31, %v1433_v53  ;;  %v1187_v18 = vshll.u32 %v1186_v20, 23  ;;  %v128_v20 = vld [vmem:[%s17717_s6 + $0xa0] sm:$0xff] }
  0x49   :  { %v1184_v34 = vor.u32 %v1183_v15, %v1182_v10  ;;  %v11033_v42 = vand.u32 31, %v1537_v1  ;;  %v2568_v51 = vand.u32 2139095040, %v10914_v40  ;;  %v2153_v53 = vshrl.u32 %v2152_v57, 23  ;;  %v88_v40 = vld [vmem:[%s17718_s4 + $0x98] sm:$0xff] }
  0x4a   :  { %v8893_v38 = vadd.s32 4294967169, %v1841_v24  ;;  %v1188_v24 = vor.u32 4788187, %v1187_v18  ;;  %v11031_v41 = vsub.s32 32, %v11010_v29  ;;  %v1951_v47 = vadd.s32 1, %v8897_v39 }
  0x4b   :  { %17727 = vst [vmem:[#allocation5_spill] sm:$0xff] %v11033_v42  ;;  %v2257_v59 = vshrl.u32 %v2256_v19, 23  ;;  %v103_v10 = vpack.c.bf16 %v88_v40, %v87_v61  ;;  %v11064_v18 = vsub.s32 32, %v11033_v42  ;;  %v130_v40 = vld [vmem:[%s17717_s6 + $0xb0] sm:$0xff]  ;;  %vm804_vm9 = vcmask 261120   ;;  %v11456_v42 = vld [vmem:[%s17368_s3 + $0x98] sm:$0xff] }
  0x4c   :  { %v1847_v60 = vadd.s32 1, %v8893_v38  ;;  %v1189_v44 = vand.u32 2147483647, %v1188_v24  ;;  %vm1952_vm15 = vcmp.gt.s32.totalorder %v1951_v47, 0  ;;  %17778 = vst [vmem:[#allocation55_spill] sm:$0xff] %v11456_v42 }
  0x4d   :  { %17728 = vst [vmem:[#allocation6_spill] sm:$0xff] %v11064_v18  ;;  %v8909_v39 = vadd.s32 4294967169, %v2257_v59  ;;  %v17782_v18 = vmov 683565275  }
  0x4e   :  { %9436 = vmatmul.mubr.msk.bf16.gmra.mrb[28].mxu0 %vm17533_vm3, %v140_v55  ;;  %v10980_v55 = vshrl.u32 %v1329_v32, 5  ;;  %v1087_v32 = vcvt.s32.f32 %v1080_v37  ;;  %v2464_v37 = vand.u32 2139095040, %v10909_v36  ;;  %v1745_v36 = vsel %vm1744_vm13, %v1743_v3, 0 }
  0x4f   :  { %9439 = vmatprep.mubr.msk.bf16.mxu0 %vm17505_vm2, %v17398_v0  ;;  %9490 = vmatmul.mubr.msk.bf16.gmra.mrb[28].mxu1 %vm17533_vm3, %v101_v33  ;;  %v1195_v33 = vsub.s32 4, %v10831_v43  ;;  %vm1848_vm14 = vcmp.gt.s32.totalorder %v1847_v60, 0  ;;  %v1191_v3 = vcvt.s32.f32 %v1184_v34  ;;  %v2263_v59 = vadd.s32 1, %v8909_v39 }
  0x50   :  { %9493 = vmatprep.mubr.msk.bf16.mxu1 %vm17505_vm2, %v17398_v0  ;;  %v1088_v30 = vmul.f32 %v1087_v32, %v1085_v9  ;;  %v8901_v32 = vadd.s32 4294967169, %v2049_v35  ;;  %v2465_v38 = vshrl.u32 %v2464_v37, 23  ;;  %v2569_v9 = vshrl.u32 %v2568_v51, 23 }
  0x51   :  { %v1196_v12 = vsel %vm1111_vm10, %v1195_v33, %v10831_v43  ;;  %v129_v43 = vld [vmem:[%s17717_s6 + $0xa8] sm:$0xff]  ;;  %v11068_v33 = vand.u32 31, %v1745_v36  ;;  %v1849_v57 = vsel %vm1848_vm14, %v1847_v60, 0  ;;  %v2672_v35 = vand.u32 2139095040, %v10947_v11  ;;  %v89_v60 = vld [vmem:[%s17718_s4 + $0xa0] sm:$0xff] }
  0x52   :  { %v143_v15 = vpack.c.bf16 %v129_v43, %v128_v20  ;;  %v11061_v16 = vsel %vm11017_vm11, 0, %v1196_v12  ;;  %v8917_v34 = vadd.s32 4294967169, %v2465_v38  ;;  %v1192_v24 = vmul.f32 %v1191_v3, %v1189_v44  ;;  %v90_v12 = vld [vmem:[%s17718_s4 + $0xa8] sm:$0xff]  ;;  %v131_v20 = vld [vmem:[%s17717_s6 + $0xb8] sm:$0xff] }
  0x53   :  { %17730 = vst [vmem:[#allocation8_spill] sm:$0xff] %v11068_v33  ;;  %v8921_v61 = vadd.s32 4294967169, %v2569_v9  ;;  %v1953_v43 = vsel %vm1952_vm15, %v1951_v47, 0  ;;  %v104_v9 = vpack.c.bf16 %v90_v12, %v89_v60  ;;  %v2776_v47 = vand.u32 2139095040, %v10952_v28  ;;  %v91_v28 = vld [vmem:[%s17718_s4 + $0xb0] sm:$0xff]  ;;  %v132_v60 = vld [vmem:[%s17717_s6 + $0xc0] sm:$0xff] }
  0x54   :  { %v2471_v3 = vadd.s32 1, %v8917_v34  ;;  %v1193_v38 = vxor.u32 2147483648, %v1192_v24  ;;  %v11114_v39 = vand.u32 31, %v1953_v43  ;;  %vm2264_vm4 = vcmp.gt.s32.totalorder %v2263_v59, 0 }
  0x55   :  { %v2575_v44 = vadd.s32 1, %v8921_v61  ;;  %v2777_v61 = vshrl.u32 %v2776_v47, 23  ;;  %vm1248_vm13 = vcmp.lt.s32.totalorder %v10968_v46, 4  ;;  %vm1349_vm15 = vcmp.lt.s32.totalorder %v10980_v55, 1 }
  0x56   :  { %9440 = vmatmul.mubr.msk.bf16.gmra.mrb[32].mxu0 %vm17533_vm3, %v141_v45  ;;  %v2360_v45 = vand.u32 2139095040, %v10887_v14  ;;  %v1641_v14 = vsel %vm1640_vm12, %v1639_v2, 0  ;;  %v1089_v2 = vxor.u32 2147483648, %v1088_v30  ;;  %17738 = vst [vmem:[#allocation16_spill] sm:$0xff] %v11114_v39  ;;  %v11138_v12 = vsub.s32 32, %v11114_v39 }
  0x57   :  { %9443 = vmatprep.mubr.msk.bf16.mxu0 %vm17505_vm2, %v17398_v0  ;;  %9494 = vmatmul.mubr.msk.bf16.gmra.mrb[32].mxu1 %vm17533_vm3, %v102_v22  ;;  %v11066_v22 = vand.u32 31, %v1641_v14  ;;  %v11074_v51 = vshrl.u32 %v1641_v14, 5  ;;  %v11089_v14 = vand.u32 31, %v1849_v57  ;;  %v8929_v47 = vadd.s32 4294967169, %v2777_v61  ;;  %v11194_v61 = vld [vmem:[%s17369_s8] sm:$0x3] }
  0x58   :  { %9497 = vmatprep.mubr.msk.bf16.mxu1 %vm17505_vm2, %v17398_v0  ;;  %v2361_v1 = vshrl.u32 %v2360_v45, 23  ;;  %v2055_v45 = vadd.s32 1, %v8901_v32  ;;  %v1090_v37 = vsel %vm1007_vm6, %v1089_v2, %v1088_v30  ;;  %v11087_v30 = vshrl.u32 %v1745_v36, 5  ;;  %17741 = vst [vmem:[#allocation19_spill] sm:$0xff] %v11138_v12 }
  0x59   :  { %17729 = vst [vmem:[#allocation7_spill] sm:$0xff] %v11066_v22  ;;  %17731 = vst [vmem:[#allocation9_spill] sm:$0xff] %v11074_v51  ;;  %v11085_v11 = vsub.s32 32, %v11066_v22  ;;  %v11102_v36 = vsub.s32 32, %v11068_v33  ;;  %v1093_v2 = vsel %vm10926_vm7, %v10610_v6, %v1090_v37  ;;  %v2673_v32 = vshrl.u32 %v2672_v35, 23  ;;  %v11410_v33 = vld [vmem:[%s17367_s2 + $0x88] sm:$0xff] }
  0x5a   :  { %v8913_v19 = vadd.s32 4294967169, %v2361_v1  ;;  %17733 = vst [vmem:[#allocation11_spill] sm:$0xff] %v11087_v30  ;;  %17734 = vst [vmem:[#allocation12_spill] sm:$0xff] %v11089_v14  ;;  %vm2056_vm0 = vcmp.gt.s32.totalorder %v2055_v45, 0  ;;  %10294 = vcosq.f32 %v1093_v2  ;;  %v11116_v6 = vshrl.u32 %v1953_v43, 5  ;;  %v11387_v30 = vld [vmem:[%s17368_s3 + $0x70] sm:$0xff] }
  0x5b   :  { %17732 = vst [vmem:[#allocation10_spill] sm:$0xff] %v11085_v11  ;;  %17735 = vst [vmem:[#allocation13_spill] sm:$0xff] %v11102_v36  ;;  %vm2472_vm6 = vcmp.gt.s32.totalorder %v2471_v3, 0  ;;  %v8925_v8 = vadd.s32 4294967169, %v2673_v32  ;;  %10296 = vsinq.f32 %v1093_v2  ;;  %vm2576_vm7 = vcmp.gt.s32.totalorder %v2575_v44, 0  ;;  %v11392_v36 = vld [vmem:[%s17368_s3 + $0x78] sm:$0xff] }
  0x5c   :  { %v2367_v1 = vadd.s32 1, %v8913_v19  ;;  %v2057_v19 = vsel %vm2056_vm0, %v2055_v45, 0  ;;  %17739 = vst [vmem:[#allocation17_spill] sm:$0xff] %v11116_v6  ;;  %v2265_v35 = vsel %vm2264_vm4, %v2263_v59, 0  ;;  %v11315_v6 = vld [vmem:[%s17367_s2 + $0x50] sm:$0xff]  ;;  %17769 = vst [vmem:[#allocation46_spill] sm:$0xff] %v11387_v30  ;;  %v1230_v30 = vshll.u32 %v17782_v18, %v10959_v26 }
  0x5d   :  { %v11125_v45 = vand.u32 31, %v2057_v19  ;;  %v11150_v2 = vadd.s32 1, %v8925_v8  ;;  %v11152_v32 = vand.u32 31, %v2265_v35  ;;  %17770 = vst [vmem:[#allocation47_spill] sm:$0xff] %v11392_v36  ;;  %17772 = vst [vmem:[#allocation49_spill] sm:$0xff] %v11410_v33  ;;  %v11415_v51 = vld [vmem:[%s17368_s3 + $0x80] sm:$0xff] }
  0x5e   :  { %9444 = vmatmul.mubr.msk.bf16.gmra.mrb[36].mxu0 %vm17533_vm3, %v142_v31  ;;  %v8905_v31 = vadd.s32 4294967169, %v2153_v53  ;;  %vm2368_vm5 = vcmp.gt.s32.totalorder %v2367_v1, 0  ;;  %17773 = vst [vmem:[#allocation50_spill] sm:$0xff] %v11415_v51  ;;  %v11433_v22 = vld [vmem:[%s17367_s2 + $0x90] sm:$0xff]  ;;  %v11466_v11 = vld [vmem:[%s17367_s2 + $0xa8] sm:$0xff]  ;;  %v1098_v33 = vadd.s32 3, %v10973_v49 }
  0x5f   :  { %9447 = vmatprep.mubr.msk.bf16.mxu0 %vm17505_vm2, %v17398_v0  ;;  %9498 = vmatmul.mubr.msk.bf16.gmra.mrb[36].mxu1 %vm17533_vm3, %v103_v10  ;;  %v144_v10 = vpack.c.bf16 %v131_v20, %v130_v40  ;;  %17740 = vst [vmem:[#allocation18_spill] sm:$0xff] %v11125_v45  ;;  %v2369_v37 = vsel %vm2368_vm5, %v2367_v1, 0  ;;  %v2473_v40 = vsel %vm2472_vm6, %v2471_v3, 0  ;;  %v2880_v20 = vand.u32 2139095040, %v11003_v4  ;;  %17744 = vst [vmem:[#allocation22_spill] sm:$0xff] %v11152_v32 }
  0x60   :  { %v2159_v53 = vadd.s32 1, %v8905_v31  ;;  %9501 = vmatprep.mubr.msk.bf16.mxu1 %vm17505_vm2, %v17398_v0  ;;  %v11111_v31 = vsub.s32 32, %v11089_v14  ;;  %v2577_v1 = vsel %vm2576_vm7, %v2575_v44, 0  ;;  %v11157_v3 = vsub.s32 32, %v11125_v45  ;;  %v11364_v14 = vld [vmem:[%s17368_s3 + $0x68] sm:$0xff]  ;;  %17775 = vst [vmem:[#allocation52_spill] sm:$0xff] %v11433_v22 }
  0x61   :  { %v11159_v4 = vand.u32 31, %v2473_v40  ;;  %v2881_v8 = vshrl.u32 %v2880_v20, 23  ;;  %v11204_v20 = vshrl.u32 %v2265_v35, 5  ;;  %vm2680_vm8 = vcmp.gt.s32.totalorder %v11150_v2, 0  ;;  %v11225_v35 = vld [vmem:[%s17368_s3 + $0x18] sm:$0xff]  ;;  %17767 = vst [vmem:[#allocation44_spill] sm:$0xff] %v11364_v14 }
  0x62   :  { %17737 = vst [vmem:[#allocation15_spill] sm:$0xff] %v11111_v31  ;;  %vm2160_vm1 = vcmp.gt.s32.totalorder %v2159_v53, 0  ;;  %17746 = vst [vmem:[#allocation24_spill] sm:$0xff] %v11157_v3  ;;  %v17760_v45 = vmov 0.0   ;;  %v106_v31 = vpack.c.bf16 %v11165_v17, %v11165_v17  ;;  %v11443_v17 = vld [vmem:[%s17368_s3 + $0x90] sm:$0xff]  ;;  %vm1247_vm12 = vcmp.lt.s32.totalorder %v10968_v46, 3 }
  0x63   :  { %v2161_v34 = vsel %vm2160_vm1, %v2159_v53, 0  ;;  %v11140_v53 = vshrl.u32 %v2057_v19, 5  ;;  %17747 = vst [vmem:[#allocation25_spill] sm:$0xff] %v11159_v4  ;;  %v11169_v19 = vand.u32 31, %v2577_v1  ;;  %17751 = vst [vmem:[#allocation29_spill] sm:$0xff] %v11204_v20  ;;  %v11250_v20 = vshrl.u32 %v2369_v37, 5 }
  0x64   :  { %v11147_v59 = vand.u32 31, %v2161_v34  ;;  %v11167_v44 = vshrl.u32 %v2161_v34, 5  ;;  %v11189_v34 = vld [vmem:[%s17368_s3 + $0x8] sm:$0xff]  ;;  %17777 = vst [vmem:[#allocation54_spill] sm:$0xff] %v11443_v17  ;;  %17780 = vst [vmem:[#allocation57_spill] sm:$0xff] %v11466_v11  ;;  %vm1350_vm0 = vcmp.lt.s32.totalorder %v10980_v55, 2 }
  0x65   :  { %17742 = vst [vmem:[#allocation20_spill] sm:$0xff] %v11140_v53  ;;  %17749 = vst [vmem:[#allocation27_spill] sm:$0xff] %v11169_v19  ;;  %v11306_v53 = vadd.s32 1, %v8929_v47  ;;  %v11330_v47 = vld [vmem:[%s17368_s3 + $0x58] sm:$0xff]  ;;  %v11350_v39 = vsub.s32 32, %v11169_v19  ;;  %v11369_v19 = vld [vmem:[%s17367_s2 + $0x70] sm:$0xff] }
  0x66   :  { %9448 = vmatmul.mubr.msk.bf16.gmra.mrb[40].mxu0 %vm17533_vm3, %v143_v15  ;;  %v11108_v15 = vshrl.u32 %v1849_v57, 5  ;;  %v1194_v57 = vsel %vm1111_vm10, %v1193_v38, %v1192_v24  ;;  %v92_v24 = vld [vmem:[%s17718_s4 + $0xb8] sm:$0xff]  ;;  %17743 = vst [vmem:[#allocation21_spill] sm:$0xff] %v11147_v59  ;;  %v11154_v38 = vand.u32 31, %v2369_v37  ;;  %17748 = vst [vmem:[#allocation26_spill] sm:$0xff] %v11167_v44  ;;  %v11272_v37 = vld [vmem:[%s17368_s3 + $0x30] sm:$0xff] }
  0x67   :  { %9451 = vmatprep.mubr.msk.bf16.mxu0 %vm17505_vm2, %v17398_v0  ;;  %9502 = vmatmul.mubr.msk.bf16.gmra.mrb[40].mxu1 %vm17533_vm3, %v104_v9  ;;  %v1197_v43 = vsel %vm11017_vm11, %v10615_v7, %v1194_v57  ;;  %v105_v9 = vpack.c.bf16 %v92_v24, %v91_v28  ;;  %v2984_v7 = vand.u32 2139095040, %v11008_v13  ;;  %v11174_v57 = vld [vmem:[%s17367_s2] sm:$0xff]  ;;  %v11179_v13 = vld [vmem:[%s17367_s2 + $0x8] sm:$0xff]  ;;  %17753 = vst [vmem:[#allocation31_spill] sm:$0xff] %v11250_v20  ;;  %17759 = vst [vmem:[#allocation37_spill] sm:$0xff] %v11306_v53 }
  0x68   :  { %17736 = vst [vmem:[#allocation14_spill] sm:$0xff] %v11108_v15  ;;  %9505 = vmatprep.mubr.msk.bf16.mxu1 %vm17505_vm2, %v17398_v0  ;;  %17745 = vst [vmem:[#allocation23_spill] sm:$0xff] %v11154_v38  ;;  %10298 = vcosq.f32 %v1197_v43  ;;  %v11184_v28 = vld [vmem:[%s17368_s3] sm:$0xff]  ;;  %v11253_v44 = vsub.s32 32, %v11154_v38  ;;  %v11297_v20 = vld [vmem:[%s17368_s3 + $0x48] sm:$0xff]  ;;  %v11302_v38 = vsub.s32 32, %v11159_v4 }
  0x69   :  { %v11199_v24 = vld [vmem:[%s17370_s9] sm:$0x3]  ;;  %10300 = vsinq.f32 %v1197_v43  ;;  %v11220_v43 = vld [vmem:[%s17368_s3 + $0x10] sm:$0xff]  ;;  %v2985_v3 = vshrl.u32 %v2984_v7, 23  ;;  %17764 = vst [vmem:[#allocation41_spill] sm:$0xff] %v11350_v39  ;;  %v11355_v53 = vsel %vm2680_vm8, %v11150_v2, 0  ;;  %v6234_v39 = vand.u32 %v11194_v61, %v10601_v5 }
  0x6a   :  { %17754 = vst [vmem:[#allocation32_spill] sm:$0xff] %v11253_v44  ;;  %v11299_v44 = vpop.eup %10294  ;;  %17757 = vst [vmem:[#allocation35_spill] sm:$0xff] %v11302_v38  ;;  %v11320_v38 = vld [vmem:[%s17367_s2 + $0x58] sm:$0xff]  ;;  %v11335_v7 = vld [vmem:[%s17367_s2 + $0x60] sm:$0xff]  ;;  %v11357_v15 = vadd.s32 4294967169, %v2881_v8  ;;  %v533_v8 = vpack.c.bf16 %v11179_v13, %v11174_v57  ;;  %vm1245_vm10 = vcmp.lt.s32.totalorder %v10968_v46, 1 }
  0x6b   :  { %17761 = vst [vmem:[#allocation38_spill] sm:$0xff] %v11335_v7  ;;  %v11345_v4 = vld [vmem:[%s17368_s3 + $0x60] sm:$0xff]  ;;  %v11347_v12 = vpop.eup %10296  ;;  %17765 = vst [vmem:[#allocation42_spill] sm:$0xff] %v11355_v53  ;;  %v11374_v2 = vld [vmem:[%s17367_s2 + $0x78] sm:$0xff]  ;;  %v11477_v7 = vadd.s32 4294967169, %v2985_v3  ;;  %vm1246_vm11 = vcmp.lt.s32.totalorder %v10968_v46, 2 }
  0x6c   :  { %17763 = vst [vmem:[#allocation40_spill] sm:$0xff] %v11345_v4  ;;  %17766 = vst [vmem:[#allocation43_spill] sm:$0xff] %v11357_v15  ;;  %v11397_v57 = vld [vmem:[%s17367_s2 + $0x80] sm:$0xff]  ;;  %v11420_v61 = vld [vmem:[%s17368_s3 + $0x88] sm:$0xff]  ;;  %v17451_v4 = vand.u32 2147483647, %v10649_v25  ;;  %v1229_v15 = vshrl.u32 %v17782_v18, %v10978_v23 }
  0x6d   :  { %17768 = vst [vmem:[#allocation45_spill] sm:$0xff] %v11369_v19  ;;  %17771 = vst [vmem:[#allocation48_spill] sm:$0xff] %v11397_v57  ;;  %v17785_v11 = vmov 2102212464   ;;  %v17786_v51 = vmov 920167782  }
  0x6e   :  { %9452 = vmatmul.mubr.msk.bf16.gmra.mrb[44].mxu0 %vm17533_vm3, %v144_v10  ;;  %v145_v10 = vpack.c.bf16 %v132_v60, %v132_v60  ;;  %v11202_v60 = vsub.s32 32, %v11147_v59  ;;  %v11262_v59 = vld [vmem:[%s17367_s2 + $0x30] sm:$0xff]  ;;  %17774 = vst [vmem:[#allocation51_spill] sm:$0xff] %v11420_v61  ;;  %17781 = vst [vmem:[#allocation58_spill] sm:$0xff] %v11477_v7  ;;  %v17784_v7 = vmov 2131351028   ;;  %v1237_v17 = vshrl.u32 %v17785_v11, %v10978_v23 }
  0x6f   :  { %9455 = vmatprep.mubr.msk.bf16.mxu0 %vm17505_vm2, %v17398_v0  ;;  %v11248_v0 = vsub.s32 32, %v11152_v32  ;;  %9506 = vmatmul.mubr.msk.bf16.gmra.mrb[44].mxu1 %vm17533_vm3, %v105_v9  ;;  %v11282_v9 = vld [vmem:[%s17367_s2 + $0x40] sm:$0xff]  ;;  %v11304_v32 = vshrl.u32 %v2577_v1, 5  ;;  %v11325_v1 = vld [vmem:[%s17368_s3 + $0x50] sm:$0xff]  ;;  %v1234_v3 = vshrl.u32 %v17784_v7, %v10978_v23  ;;  %v1239_v42 = vshll.u32 %v17785_v11, %v10959_v26 }
  0x70   :  { %17750 = vst [vmem:[#allocation28_spill] sm:$0xff] %v11202_v60  ;;  %v11255_v60 = vshrl.u32 %v2473_v40, 5  ;;  %v11277_v40 = vld [vmem:[%s17368_s3 + $0x38] sm:$0xff]  ;;  %9509 = vmatprep.mubr.msk.bf16.mxu1 %vm17505_vm2, %v17760_v45  ;;  %v1240_v61 = vshrl.u32 %v17786_v51, %v10978_v23  ;;  %v1242_v57 = vshll.u32 %v17786_v51, %v10959_v26  ;;  %v17787_v36 = vmov 1326507024  }
  0x71   :  { %17752 = vst [vmem:[#allocation30_spill] sm:$0xff] %v11248_v0  ;;  %v11267_v0 = vld [vmem:[%s17367_s2 + $0x38] sm:$0xff]  ;;  %17758 = vst [vmem:[#allocation36_spill] sm:$0xff] %v11304_v32  ;;  %v11340_v32 = vld [vmem:[%s17367_s2 + $0x68] sm:$0xff]  ;;  %v1243_v25 = vshrl.u32 %v17787_v36, %v10978_v23  ;;  %vm1351_vm1 = vcmp.lt.s32.totalorder %v10980_v55, 3  ;;  %vm1352_vm4 = vcmp.lt.s32.totalorder %v10980_v55, 4 }
  0x72   :  { %17755 = vst [vmem:[#allocation33_spill] sm:$0xff] %v11255_v60  ;;  %v11292_v60 = vld [vmem:[%s17368_s3 + $0x40] sm:$0xff]  ;;  %17762 = vst [vmem:[#allocation39_spill] sm:$0xff] %v11340_v32  ;;  %v11475_v14 = vpop.eup %10298  ;;  %v17783_v32 = vmov 2475754826   ;;  %v1241_v19 = vor.u32 %v1240_v61, %v1239_v42  ;;  %v17789_v42 = vpack.c.bf16 %v11215_v56, %v11210_v63  ;;  %v17790_v56 = vand.u32 %v11199_v24, %v10601_v5 }
  0x73   :  { %17756 = vst [vmem:[#allocation34_spill] sm:$0xff] %v11292_v60  ;;  %v11461_v60 = vld [vmem:[%s17367_s2 + $0xa0] sm:$0xff]  ;;  %v11487_v13 = vpop.eup %10300  ;;  %v11565_v61 = vand.u32 3, %v1098_v33  ;;  %v1202_v24 = vadd.s32 3, %v11061_v16  ;;  %v1335_v46 = vshrl.u32 %v17783_v32, %v10983_v58 }
  0x74   :  { %17779 = vst [vmem:[#allocation56_spill] sm:$0xff] %v11461_v60  ;;  %v1236_v60 = vshll.u32 %v17784_v7, %v10959_v26 }
  0x75   :  { %vm1101_vm5 = vcmp.eq.s32.totalorder %v11565_v61, 0  ;;  %vm1104_vm6 = vcmp.eq.s32.totalorder %v11565_v61, 2  ;;  %vm1100_vm7 = vcmp.lt.s32.totalorder %v11565_v61, 2  ;;  %v1438_v61 = vshll.u32 %v17782_v18, %v11010_v29 }
  0x76   :  { %9456 = vmatmul.mubr.msk.bf16.gmra.mrb[48].mxu0 %vm17533_vm3, %v145_v10  ;;  %v11287_v10 = vld [vmem:[%s17367_s2 + $0x48] sm:$0xff] }
  0x77   :  { %9515 = vmatprep.mubr.msk.bf16.mxu0 %vm17505_vm2, %v17760_v45  ;;  %9510 = vmatmul.mubr.msk.bf16.gmra.mrb[48].mxu1 %vm17533_vm3, %v106_v31  ;;  %v1233_v31 = vshll.u32 %v17783_v32, %v10959_v26 }
  0x78   :  { %9571 = vmatprep.mubr.msk.bf16.mxu1 %vm17505_vm2, %v17760_v45 }
  0x79   :  { %v1235_v21 = vor.u32 %v1234_v3, %v1233_v31  ;;  %v1244_v31 = vor.u32 %v1243_v25, %v1242_v57 }
  0x7b   :  { %v1258_v57 = vsel %vm1248_vm13, %v1244_v31, 1326507024 }
  0x7e   :  { %9516 = vmatmul.mubr.msk.bf16.vlgmr.msra.gmra.mrb[52].mxu0 %vm17533_vm3, %v533_v8  ;;  %v1220_v8 = vand.u32 8388607, %v17451_v4 }
  0x7f   :  { %9624 = vmatpush3.bf16.msra.mxu0 %v6234_v39  ;;  %9519 = vmatprep.mubr.msk.bf16.mxu0 %vm17505_vm2, %v17760_v45  ;;  %v1231_v39 = vshrl.u32 %v17783_v32, %v10978_v23  ;;  %v17788_v23 = vpack.c.bf16 %v11189_v34, %v11184_v28 }
  0x80   :  { %9731 = vmatprep.subr.bf16.mxu0 %v17760_v45  ;;  %v1221_v4 = vor.u32 8388608, %v1220_v8  ;;  %v1238_v8 = vor.u32 %v1237_v17, %v1236_v60 }
  0x81   :  { %v1232_v22 = vor.u32 %v1231_v39, %v1230_v30  ;;  %9572 = vmatmul.mubr.msk.bf16.vlgmr.msra.gmra.mrb[52].mxu1 %vm804_vm9, %v17788_v23  ;;  %v1259_v39 = vsel %vm1247_vm12, %v1241_v19, %v1258_v57 }
  0x82   :  { %v1250_v26 = vsel %vm1248_vm13, %v1238_v8, 2102212464  ;;  %v1261_v17 = vshll.u32 %v1221_v4, 8  ;;  %v11548_v4 = vld [vmem:[%s17717_s6 + $0x18] sm:$0xff]  ;;  %9678 = vmatpush3.bf16.msra.mxu1 %v17790_v56  ;;  %9575 = vmatprep.mubr.msk.bf16.mxu1 %vm17505_vm2, %v17760_v45  ;;  %v1343_v56 = vshll.u32 %v17785_v11, %v10961_v27 }
  0x83   :  { %v1249_v30 = vsel %vm1245_vm10, %v1229_v15, %v1232_v22  ;;  %v1253_v60 = vsel %vm1245_vm10, %v1232_v22, %v1235_v21  ;;  %v1251_v25 = vsel %vm1247_vm12, %v1235_v21, %v1250_v26  ;;  %v1254_v15 = vsel %vm1248_vm13, %v1241_v19, 920167782  ;;  %9785 = vmatprep.subr.bf16.mxu1 %v17760_v45 }
  0x84   :  { %v1257_v22 = vsel %vm1245_vm10, %v1235_v21, %v1238_v8  ;;  %v17465_v28 = vand.u32 2147483647, %v11548_v4  ;;  %v1252_v34 = vsel %vm1246_vm11, %v1249_v30, %v1251_v25  ;;  %v1255_v21 = vsel %vm1247_vm12, %v1238_v8, %v1254_v15 }
  0x85   :  { %v1256_v3 = vsel %vm1246_vm11, %v1253_v60, %v1255_v21  ;;  %v1260_v8 = vsel %vm1246_vm11, %v1257_v22, %v1259_v39  ;;  %v1268_v26 = vmul.u32 %v1261_v17, %v1252_v34  ;;  %v1334_v60 = vshll.u32 %v17782_v18, %v10961_v27 }
  0x86   :  { %9520 = vmatmul.mubr.msk.bf16.gmra.mrb[56].mxu0 %vm17533_vm3, %v17789_v42  ;;  %v11575_v30 = vmul.u32.u64.low %v1261_v17, %v1256_v3  ;;  %v11576_v31 = vmul.u32.u64.high %v1261_v17, %v1256_v3, %v11575_v30  ;;  %v11579_v33 = vmul.u32.u64.low %v1261_v17, %v1260_v8  ;;  %v11580_v23 = vmul.u32.u64.high %v1261_v17, %v1260_v8, %v11579_v33 }
  0x87   :  { %9523 = vmatprep.mubr.msk.bf16.mxu0 %vm17505_vm2, %v17760_v45  ;;  %v1324_v42 = vand.u32 8388607, %v17465_v28  ;;  %v1333_v19 = vshrl.u32 %v17782_v18, %v10983_v58  ;;  %v1337_v25 = vshll.u32 %v17783_v32, %v10961_v27  ;;  %v1338_v15 = vshrl.u32 %v17784_v7, %v10983_v58 }
  0x88   :  { %v1340_v17 = vshll.u32 %v17784_v7, %v10961_v27  ;;  %v1341_v22 = vshrl.u32 %v17785_v11, %v10983_v58  ;;  %v1344_v34 = vshrl.u32 %v17786_v51, %v10983_v58  ;;  %v1271_v21 = vadd.s32 1, %v11576_v31 }
  0x89   :  { %v1336_v57 = vor.u32 %v1335_v46, %v1334_v60  ;;  %v1339_v3 = vor.u32 %v1338_v15, %v1337_v25  ;;  %v1346_v39 = vshll.u32 %v17786_v51, %v10961_v27  ;;  %v17791_v8 = vpack.c.bf16 %v11225_v35, %v11220_v43 }
  0x8a   :  { %v17792_v33 = vpack.c.bf16 %v11235_v52, %v11230_v54  ;;  %vm1270_vm14 = vc.u32 %v11580_v23, %v11575_v30  ;;  %v1325_v28 = vor.u32 8388608, %v1324_v42  ;;  %v1342_v63 = vor.u32 %v1341_v22, %v1340_v17  ;;  %v11644_v17 = vld [vmem:[%s17368_s3 + $0xa8] sm:$0xff]  ;;  %v11649_v22 = vld [vmem:[%s17367_s2 + $0xb0] sm:$0xff] }
  0x8b   :  { %9576 = vmatmul.mubr.msk.bf16.gmra.mrb[56].mxu1 %vm804_vm9, %v17791_v8  ;;  %v1272_v27 = vsel %vm1270_vm14, %v1271_v21, %v11576_v31  ;;  %v1345_v43 = vor.u32 %v1344_v34, %v1343_v56  ;;  %v1347_v52 = vshrl.u32 %v17787_v36, %v10983_v58  ;;  %v1353_v35 = vsel %vm1349_vm15, %v1333_v19, %v1336_v57  ;;  %v11633_v58 = vld [vmem:[%s17368_s3 + $0xa0] sm:$0xff] }
  0x8c   :  { %9579 = vmatprep.mubr.msk.bf16.mxu1 %vm17505_vm2, %v17760_v45  ;;  %v1273_v54 = vadd.s32 %v1272_v27, %v1268_v26  ;;  %v1354_v60 = vsel %vm1352_vm4, %v1342_v63, 2102212464  ;;  %v1357_v46 = vsel %vm1349_vm15, %v1336_v57, %v1339_v3  ;;  %v1361_v19 = vsel %vm1349_vm15, %v1339_v3, %v1342_v63 }
  0x8d   :  { %v1348_v42 = vor.u32 %v1347_v52, %v1346_v39  ;;  %v1358_v31 = vsel %vm1352_vm4, %v1345_v43, 920167782  ;;  %v1355_v26 = vsel %vm1351_vm1, %v1339_v3, %v1354_v60  ;;  %v17467_v56 = vxor.u32 2147483648, %v11299_v44  ;;  %v11662_v3 = vld [vmem:[%s17368_s3 + $0xb0] sm:$0xff]  ;;  %v11667_v39 = vld [vmem:[%s17368_s3 + $0xb8] sm:$0xff] }
  0x8e   :  { %9524 = vmatmul.mubr.msk.bf16.gmra.mrb[60].mxu0 %vm17533_vm3, %v17792_v33  ;;  %v1274_v25 = vadd.s32 536870912, %v1273_v54  ;;  %v1359_v15 = vsel %vm1351_vm1, %v1342_v63, %v1358_v31  ;;  %v1365_v57 = vshll.u32 %v1325_v28, 8  ;;  %v11657_v63 = vld [vmem:[%s17367_s2 + $0xb8] sm:$0xff]  ;;  %17793 = vst [vmem:[#allocation59_spill] sm:$0xff] %v11662_v3  ;;  %v11670_v8 = vand.u32 3, %v1202_v24 }
  0x8f   :  { %9527 = vmatprep.mubr.msk.bf16.mxu0 %vm17505_vm2, %v17760_v45  ;;  %v1360_v34 = vsel %vm1350_vm0, %v1357_v46, %v1359_v15  ;;  %v1362_v21 = vsel %vm1352_vm4, %v1348_v42, 1326507024  ;;  %v1356_v27 = vsel %vm1350_vm0, %v1353_v35, %v1355_v26  ;;  %v17794_v46 = vpack.c.bf16 %v11245_v48, %v11240_v50 }
  0x90   :  { %v11672_v28 = vshrl.u32 %v1274_v25, 30  ;;  %v1363_v33 = vsel %vm1351_vm1, %v1345_v43, %v1362_v21  ;;  %v11680_v42 = vmul.u32.u64.low %v1365_v57, %v1360_v34  ;;  %v11681_v60 = vmul.u32.u64.high %v1365_v57, %v1360_v34, %v11680_v42  ;;  %v11718_v25 = vld [vmem:[%s17368_s3 + $0xc0] sm:$0xff] }
  0x91   :  { %v1364_v52 = vsel %vm1350_vm0, %v1361_v19, %v1363_v33  ;;  %v17795_v24 = vpack.c.bf16 %v11267_v0, %v11262_v59  ;;  %v11698_v31 = vshrl.u32 %v11355_v53, 5  ;;  %v11713_v59 = vld [vmem:[%s17367_s2 + $0xc0] sm:$0xff]  ;;  %17798 = vst [vmem:[#allocation62_spill] sm:$0xff] %v11718_v25  ;;  %v17466_v26 = vxor.u32 2147483648, %v11487_v13 }
  0x92   :  { %v1276_v43 = vshll.u32 %v11672_v28, 30  ;;  %v11694_v55 = vmul.u32.u64.low %v1365_v57, %v1364_v52  ;;  %v11695_v35 = vmul.u32.u64.high %v1365_v57, %v1364_v52, %v11694_v55  ;;  %17797 = vst [vmem:[#allocation61_spill] sm:$0xff] %v11713_v59  ;;  %v1372_v19 = vmul.u32 %v1365_v57, %v1356_v27 }
  0x93   :  { %9580 = vmatmul.mubr.msk.bf16.gmra.mrb[60].mxu1 %vm804_vm9, %v17794_v46  ;;  %17796 = vst [vmem:[#allocation60_spill] sm:$0xff] %v11698_v31  ;;  %v17799_v34 = vxor.u32 2147483648, %v11347_v12  ;;  %v1106_v33 = vsel %vm1104_vm6, %v17467_v56, %v11347_v12  ;;  %vm1205_vm8 = vcmp.eq.s32.totalorder %v11670_v8, 0  ;;  %v1375_v52 = vadd.s32 1, %v11681_v60 }
  0x94   :  { %9583 = vmatprep.mubr.msk.bf16.mxu1 %vm17505_vm2, %v17760_v45  ;;  %v11722_v15 = vsub.s32 %v1273_v54, %v1276_v43  ;;  %vm1374_vm10 = vc.u32 %v11695_v35, %v11680_v42  ;;  %v17470_v46 = vxor.u32 2147483648, %v11475_v14  ;;  %v11748_v43 = vand.u32 3, %v11061_v16 }
  0x95   :  { %v1103_v21 = vsel %vm1101_vm5, %v11299_v44, %v17799_v34  ;;  %v1376_v55 = vsel %vm1374_vm10, %v1375_v52, %v11681_v60  ;;  %v11758_v57 = vsel %vm1205_vm8, %v11475_v14, %v17466_v26  ;;  %vm1208_vm11 = vcmp.eq.s32.totalorder %v11670_v8, 2 }
  0x96   :  { %9528 = vmatmul.mubr.msk.bf16.gmra.mrb[64].mxu0 %vm17533_vm3, %v17795_v24  ;;  %v1279_v27 = vsub.s32 0, %v11722_v15  ;;  %v11745_v24 = vand.u32 3, %v10973_v49  ;;  %v11753_v34 = vsel %vm1100_vm7, %v1103_v21, %v1106_v33  ;;  %v1377_v50 = vadd.s32 %v1376_v55, %v1372_v19  ;;  %v11765_v49 = vld [vmem:[%s17717_s6 + $0x20] sm:$0xff] }
  0x97   :  { %9531 = vmatprep.mubr.msk.bf16.mxu0 %vm17505_vm2, %v17760_v45  ;;  %v1421_v16 = vand.u32 2147483647, %v11765_v49  ;;  %v1439_v60 = vshrl.u32 %v17783_v32, %v11031_v41  ;;  %v17800_v21 = vpack.c.bf16 %v11277_v40, %v11272_v37  ;;  %v17801_v19 = vpack.c.bf16 %v11287_v10, %v11282_v9  ;;  %v11783_v33 = vld [vmem:[%s17717_s6] sm:$0xff] }
  0x98   :  { %v8870_v54 = vmin.u32 %v1279_v27, %v11722_v15  ;;  %vm1097_vm12 = vweird.f32 %v11783_v33  ;;  %v1441_v27 = vshll.u32 %v17783_v32, %v11010_v29  ;;  %v1442_v37 = vshrl.u32 %v17784_v7, %v11031_v41 }
  0x99   :  { %v1444_v40 = vshll.u32 %v17784_v7, %v11010_v29  ;;  %vm1204_vm13 = vcmp.lt.s32.totalorder %v11670_v8, 2  ;;  %v1378_v9 = vadd.s32 536870912, %v1377_v50  ;;  %v1445_v10 = vshrl.u32 %v17785_v11, %v11031_v41 }
  0x9a   :  { %v1281_v52 = vclz %v8870_v54  ;;  %v1447_v54 = vshll.u32 %v17785_v11, %v11010_v29  ;;  %v1448_v55 = vshrl.u32 %v17786_v51, %v11031_v41  ;;  %vm3700_vm14 = vcmp.eq.s32.totalorder %v11745_v24, 0 }
  0x9b   :  { %9584 = vmatmul.mubr.msk.bf16.gmra.mrb[64].mxu1 %vm804_vm9, %v17800_v21  ;;  %v1210_v21 = vsel %vm1208_vm11, %v17470_v46, %v11487_v13  ;;  %vm3703_vm15 = vcmp.eq.s32.totalorder %v11745_v24, 2  ;;  %v1269_v48 = vadd.s32 %v11575_v30, %v11580_v23  ;;  %v11812_v0 = vshrl.u32 %v1378_v9, 30 }
  0x9c   :  { %9587 = vmatprep.mubr.msk.bf16.mxu1 %vm17505_vm2, %v17760_v45  ;;  %v1428_v26 = vand.u32 8388607, %v1421_v16  ;;  %v1440_v56 = vor.u32 %v1439_v60, %v1438_v61  ;;  %v1443_v31 = vor.u32 %v1442_v37, %v1441_v27  ;;  %v1450_v53 = vshll.u32 %v17786_v51, %v11010_v29  ;;  %v17802_v29 = vld [vmem:[#allocation34_spill] sm:$0xff] }
  0x9d   :  { %v1451_v46 = vshrl.u32 %v17787_v36, %v11031_v41  ;;  %v1446_v59 = vor.u32 %v1445_v10, %v1444_v40  ;;  %v1449_v3 = vor.u32 %v1448_v55, %v1447_v54  ;;  %vm1456_vm1 = vcmp.lt.s32.totalorder %v10993_v62, 4 }
  0x9e   :  { %9532 = vmatmul.mubr.msk.bf16.gmra.mrb[68].mxu0 %vm17533_vm3, %v17801_v19  ;;  %v8871_v19 = vadd.s32 4294967294, %v1281_v52  ;;  %v1380_v52 = vshll.u32 %v11812_v0, 30  ;;  %v1437_v60 = vshrl.u32 %v17782_v18, %v11031_v41  ;;  %vm1453_vm4 = vcmp.lt.s32.totalorder %v10993_v62, 1 }
  0x9f   :  { %9535 = vmatprep.mubr.msk.bf16.mxu0 %vm17505_vm2, %v17760_v45  ;;  %vm1455_vm5 = vcmp.lt.s32.totalorder %v10993_v62, 3  ;;  %v17803_v27 = vpack.c.bf16 %v11297_v20, %v17802_v29  ;;  %v1429_v37 = vor.u32 8388608, %v1428_v26  ;;  %vm1454_vm7 = vcmp.lt.s32.totalorder %v10993_v62, 2 }
  0xa0   :  { %vm8872_vm0 = vcmp.lt.s32.totalorder %v8871_v19, 0  ;;  %v11823_v61 = vsub.s32 %v1377_v50, %v1380_v52  ;;  %v11840_v50 = vld [vmem:[%s17717_s6 + $0x8] sm:$0xff]  ;;  %v1458_v20 = vsel %vm1456_vm1, %v1446_v59, 2102212464  ;;  %v1462_v40 = vsel %vm1456_vm1, %v1449_v3, 920167782 }
  0xa1   :  { %v1284_v25 = vsel %vm8872_vm0, 0, %v8871_v19  ;;  %vm1201_vm6 = vweird.f32 %v11840_v50  ;;  %v1461_v26 = vsel %vm1453_vm4, %v1440_v56, %v1443_v31  ;;  %v1463_v54 = vsel %vm1455_vm5, %v1446_v59, %v1462_v40  ;;  %v17838_v50 = vld [vmem:[#allocation51_spill] sm:$0xff] }
  0xa2   :  { %v1285_v30 = vsub.s32 32, %v1284_v25  ;;  %v1286_v23 = vshll.u32 %v11722_v15, %v1284_v25  ;;  %v1289_v9 = vsub.s32 4294967266, %v1284_v25  ;;  %v17804_v15 = vpack.c.bf16 %v11320_v38, %v11315_v6 }
  0xa3   :  { %9588 = vmatmul.mubr.msk.bf16.gmra.mrb[68].mxu1 %vm804_vm9, %v17803_v27  ;;  %v1383_v6 = vsub.s32 0, %v11823_v61  ;;  %v1452_v38 = vor.u32 %v1451_v46, %v1450_v53  ;;  %v11860_v55 = vsel %vm1097_vm12, nan, %v11753_v34  ;;  %vm3699_vm8 = vcmp.lt.s32.totalorder %v11745_v24, 2 }
  0xa4   :  { %v1287_v41 = vshrl.u32 %v1269_v48, %v1285_v30  ;;  %v1290_v25 = vadd.s32 127, %v1289_v9  ;;  %9591 = vmatprep.mubr.msk.bf16.mxu1 %vm17505_vm2, %v17760_v45  ;;  %17805 = vst [vmem:[#allocation34_spill] sm:$0xff] %v11860_v55  ;;  %v17806_v53 = vxor.u32 2147483648, %v11347_v12  ;;  %v1211_v52 = vsel %vm1204_vm13, %v11758_v57, %v1210_v21 }
  0xa5   :  { %v8874_v19 = vmin.u32 %v1383_v6, %v11823_v61  ;;  %v17807_v30 = vxor.u32 2147483648, %v11299_v44  ;;  %v1457_v9 = vsel %vm1453_vm4, %v1437_v60, %v1440_v56  ;;  %v1459_v27 = vsel %vm1455_vm5, %v1443_v31, %v1458_v20 }
  0xa6   :  { %9536 = vmatmul.mubr.msk.bf16.gmra.mrb[72].mxu0 %vm17533_vm3, %v17804_v15  ;;  %v1288_v48 = vor.u32 %v1287_v41, %v1286_v23  ;;  %v1291_v10 = vshll.u32 %v1290_v25, 23  ;;  %v3702_v46 = vsel %vm3700_vm14, %v11299_v44, %v17806_v53  ;;  %v1464_v15 = vsel %vm1454_vm7, %v1461_v26, %v1463_v54 }
  0xa7   :  { %9539 = vmatprep.mubr.msk.bf16.mxu0 %vm17505_vm2, %v17760_v45  ;;  %v3705_v34 = vsel %vm3703_vm15, %v17807_v30, %v11347_v12  ;;  %v1385_v29 = vclz %v8874_v19  ;;  %v1465_v8 = vsel %vm1453_vm4, %v1443_v31, %v1446_v59  ;;  %v1466_v44 = vsel %vm1456_vm1, %v1452_v38, 1326507024  ;;  %v17809_v31 = vld [vmem:[#allocation39_spill] sm:$0xff]  ;;  %v17810_v59 = vld [vmem:[#allocation38_spill] sm:$0xff] }
  0xa8   :  { %v1292_v23 = vor.u32 4788187, %v1291_v10  ;;  %v1295_v21 = vcvt.s32.f32 %v1288_v48  ;;  %v1469_v12 = vshll.u32 %v1429_v37, 8  ;;  %vm3802_vm10 = vcmp.lt.s32.totalorder %v11748_v43, 2  ;;  %v11925_v10 = vld [vmem:[%s17371_s10] sm:$0x3] }
  0xa9   :  { %vm3803_vm11 = vcmp.eq.s32.totalorder %v11748_v43, 0  ;;  %v8875_v56 = vadd.s32 4294967294, %v1385_v29  ;;  %v1467_v60 = vsel %vm1455_vm5, %v1449_v3, %v1466_v44  ;;  %v17808_v41 = vpack.c.bf16 %v11330_v47, %v11325_v1  ;;  %v17816_v44 = vld [vmem:[#allocation40_spill] sm:$0xff] }
  0xaa   :  { %v1293_v57 = vand.u32 2147483647, %v1292_v23  ;;  %v17811_v25 = vpack.c.bf16 %v17809_v31, %v17810_v59  ;;  %v1373_v37 = vadd.s32 %v11680_v42, %v11695_v35  ;;  %v1468_v6 = vsel %vm1454_vm7, %v1465_v8, %v1467_v60  ;;  %v17821_v31 = vld [vmem:[#allocation3_spill] sm:$0xff] }
  0xab   :  { %9592 = vmatmul.mubr.msk.bf16.gmra.mrb[72].mxu1 %vm804_vm9, %v17808_v41  ;;  %v11903_v38 = vmul.u32.u64.low %v1469_v12, %v1464_v15  ;;  %v11904_v20 = vmul.u32.u64.high %v1469_v12, %v1464_v15, %v11903_v38  ;;  %vm8876_vm13 = vcmp.lt.s32.totalorder %v8875_v56, 0  ;;  %v1460_v1 = vsel %vm1454_vm7, %v1457_v9, %v1459_v27 }
  0xac   :  { %9595 = vmatprep.mubr.msk.bf16.mxu1 %vm17505_vm2, %v17760_v45  ;;  %v11913_v47 = vmul.u32.u64.low %v1469_v12, %v1468_v6  ;;  %v11914_v3 = vmul.u32.u64.high %v1469_v12, %v1468_v6, %v11913_v47  ;;  %vm3806_vm14 = vcmp.eq.s32.totalorder %v11748_v43, 2  ;;  %v1296_v42 = vmul.f32 %v1295_v21, %v1293_v57  ;;  %v17815_v21 = vld [vmem:[#allocation44_spill] sm:$0xff]  ;;  %v11986_v6 = vld [vmem:[%s17717_s6 + $0x28] sm:$0xff] }
  0xad   :  { %v1299_v35 = vsub.s32 4, %v11672_v28  ;;  %v1388_v40 = vsel %vm8876_vm13, 0, %v8875_v56  ;;  %v11920_v48 = vsel %vm1201_vm6, nan, %v1211_v52  ;;  %v3706_v53 = vsel %vm3699_vm8, %v3702_v46, %v3705_v34  ;;  %v17818_v56 = vld [vmem:[#allocation45_spill] sm:$0xff] }
  0xae   :  { %9540 = vmatmul.mubr.msk.bf16.gmra.mrb[76].mxu0 %vm17533_vm3, %v17811_v25  ;;  %17812 = vst [vmem:[#allocation39_spill] sm:$0xff] %v11920_v48  ;;  %v1389_v62 = vsub.s32 32, %v1388_v40  ;;  %v1390_v26 = vshll.u32 %v11823_v61, %v1388_v40  ;;  %v1393_v54 = vsub.s32 4294967266, %v1388_v40  ;;  %v17813_v19 = vxor.u32 2147483648, %v11487_v13  ;;  %v11942_v61 = vld [vmem:[%s17717_s6 + $0x10] sm:$0xff] }
  0xaf   :  { %9543 = vmatprep.mubr.msk.bf16.mxu0 %vm17505_vm2, %v17760_v45  ;;  %v1476_v52 = vmul.u32 %v1469_v12, %v1460_v1  ;;  %v1479_v23 = vadd.s32 1, %v11904_v20  ;;  %v17814_v9 = vxor.u32 2147483648, %v11475_v14  ;;  %vm1215_vm15 = vcmp.lt.s32.totalorder %v11942_v61, 0 }
  0xb0   :  { %v3805_v30 = vsel %vm3803_vm11, %v11475_v14, %v17813_v19  ;;  %v1391_v24 = vshrl.u32 %v1373_v37, %v1389_v62  ;;  %v1394_v46 = vadd.s32 127, %v1393_v54  ;;  %v6768_v34 = vand.u32 %v11925_v10, %v10601_v5  ;;  %v17826_v62 = vld [vmem:[#allocation6_spill] sm:$0xff] }
  0xb1   :  { %v3808_v29 = vsel %vm3806_vm14, %v17814_v9, %v11487_v13  ;;  %v1297_v27 = vxor.u32 2147483648, %v1296_v42  ;;  %v1300_v15 = vsel %vm1215_vm15, %v1299_v35, %v11672_v28  ;;  %vm1478_vm0 = vc.u32 %v11914_v3, %v11903_v38  ;;  %v17825_v35 = vld [vmem:[#allocation5_spill] sm:$0xff] }
  0xb2   :  { %v6180_v14 = vpack.c.bf16 %v11920_v48, %v11860_v55  ;;  %v1392_v13 = vor.u32 %v1391_v24, %v1390_v26  ;;  %v1395_v8 = vshll.u32 %v1394_v46, 23  ;;  %v1480_v57 = vsel %vm1478_vm0, %v1479_v23, %v11904_v20 }
  0xb3   :  { %v17817_v12 = vpack.c.bf16 %v17815_v21, %v17816_v44  ;;  %v17819_v60 = vpack.c.bf16 %v11374_v2, %v17818_v56  ;;  %v11965_v28 = vsel %vm1097_vm12, nan, %v3706_v53  ;;  %v11969_v41 = vsel %vm3802_vm10, %v3805_v30, %v3808_v29 }
  0xb4   :  { %17820 = vst [vmem:[#allocation38_spill] sm:$0xff] %v11965_v28  ;;  %v17822_v59 = vand.u32 2147483647, %v17821_v31  ;;  %v1481_v37 = vadd.s32 %v1480_v57, %v1476_v52  ;;  %v1396_v33 = vor.u32 4788187, %v1395_v8  ;;  %v1399_v43 = vcvt.s32.f32 %v1392_v13  ;;  %v17831_v31 = vld [vmem:[#allocation47_spill] sm:$0xff] }
  0xb5   :  { %9596 = vmatmul.mubr.msk.bf16.gmra.mrb[76].mxu1 %vm804_vm9, %v17817_v12  ;;  %v1525_v20 = vand.u32 2147483647, %v11986_v6  ;;  %v1298_v1 = vsel %vm1215_vm15, %v1297_v27, %v1296_v42  ;;  %vm1319_vm12 = vcmp.lt.s32.totalorder %v11548_v4, 0  ;;  %v1551_v40 = vshll.u32 %v17785_v11, %v17825_v35 }
  0xb6   :  { %9544 = vmatmul.mubr.msk.bf16.gmra.mrb[80].mxu0 %vm17533_vm3, %v17819_v60  ;;  %vm11973_vm1 = vcmp.le.f32.partialorder %v17822_v59, 0.7853982  ;;  %9599 = vmatprep.mubr.msk.bf16.mxu1 %vm17505_vm2, %v17760_v45  ;;  %v1482_v47 = vadd.s32 536870912, %v1481_v37  ;;  %v1552_v26 = vshrl.u32 %v17786_v51, %v17826_v62  ;;  %v1397_v54 = vand.u32 2147483647, %v1396_v33  ;;  %v17830_v60 = vld [vmem:[#allocation4_spill] sm:$0xff] }
  0xb7   :  { %9547 = vmatprep.mubr.msk.bf16.mxu0 %vm17505_vm2, %v17760_v45  ;;  %v1302_v2 = vsel %vm11973_vm1, 0, %v1300_v15  ;;  %v1545_v53 = vshll.u32 %v17783_v32, %v17825_v35  ;;  %v1554_v19 = vshll.u32 %v17786_v51, %v17825_v35  ;;  %v1555_v30 = vshrl.u32 %v17787_v36, %v17826_v62  ;;  %v17832_v59 = vld [vmem:[#allocation46_spill] sm:$0xff]  ;;  %v17834_v33 = vld [vmem:[#allocation49_spill] sm:$0xff] }
  0xb8   :  { %v12002_v42 = vshrl.u32 %v1482_v47, 30  ;;  %v1546_v52 = vshrl.u32 %v17784_v7, %v17826_v62  ;;  %v1548_v23 = vshll.u32 %v17784_v7, %v17825_v35  ;;  %v1549_v9 = vshrl.u32 %v17785_v11, %v17826_v62 }
  0xb9   :  { %v1301_v29 = vsel %vm11973_vm1, %v11942_v61, %v1298_v1  ;;  %v1400_v24 = vmul.f32 %v1399_v43, %v1397_v54  ;;  %v1542_v46 = vshll.u32 %v17782_v18, %v17825_v35  ;;  %v1543_v27 = vshrl.u32 %v17783_v32, %v17826_v62  ;;  %v17835_v43 = vld [vmem:[#allocation48_spill] sm:$0xff] }
  0xba   :  { %v17827_v15 = vand.u32 2147483647, %v11548_v4  ;;  %v1484_v8 = vshll.u32 %v12002_v42, 30  ;;  %v1553_v57 = vor.u32 %v1552_v26, %v1551_v40  ;;  %v1556_v21 = vor.u32 %v1555_v30, %v1554_v19 }
  0xbb   :  { %v1306_v44 = vadd.s32 3, %v1302_v2  ;;  %v1403_v12 = vsub.s32 4, %v11812_v0  ;;  %v1532_v56 = vand.u32 8388607, %v1525_v20  ;;  %vm1560_vm5 = vcmp.lt.s32.totalorder %v17830_v60, 4 }
  0xbc   :  { %vm12019_vm4 = vcmp.le.f32.partialorder %v17827_v15, 0.7853982  ;;  %v17833_v25 = vpack.c.bf16 %v17831_v31, %v17832_v59  ;;  %v17836_v1 = vpack.c.bf16 %v17834_v33, %v17835_v43  ;;  %10302 = vcosq.f32 %v1301_v29  ;;  %v17842_v33 = vld [vmem:[#allocation52_spill] sm:$0xff] }
  0xbd   :  { %v12036_v47 = vsub.s32 %v1481_v37, %v1484_v8  ;;  %v1547_v35 = vor.u32 %v1546_v52, %v1545_v53  ;;  %v1550_v40 = vor.u32 %v1549_v9, %v1548_v23  ;;  %10304 = vsinq.f32 %v1301_v29 }
  0xbe   :  { %9600 = vmatmul.mubr.msk.bf16.gmra.mrb[80].mxu1 %vm804_vm9, %v17833_v25  ;;  %9548 = vmatmul.mubr.msk.bf16.gmra.mrb[84].mxu0 %vm17533_vm3, %v17836_v1  ;;  %v1401_v26 = vxor.u32 2147483648, %v1400_v24  ;;  %v1544_v54 = vor.u32 %v1543_v27, %v1542_v46  ;;  %vm1557_vm7 = vcmp.lt.s32.totalorder %v17830_v60, 1  ;;  %vm1559_vm8 = vcmp.lt.s32.totalorder %v17830_v60, 3  ;;  %v17841_v25 = vld [vmem:[#allocation53_spill] sm:$0xff] }
  0xbf   :  { %9603 = vmatprep.mubr.msk.bf16.mxu1 %vm17505_vm2, %v17760_v45  ;;  %9551 = vmatprep.mubr.msk.bf16.mxu0 %vm17505_vm2, %v17760_v45  ;;  %v1487_v19 = vsub.s32 0, %v12036_v47  ;;  %v1566_v37 = vsel %vm1560_vm5, %v1553_v57, 920167782  ;;  %v1570_v53 = vsel %vm1560_vm5, %v1556_v21, 1326507024  ;;  %v1404_v30 = vsel %vm1319_vm12, %v1403_v12, %v11812_v0 }
  0xc0   :  { %v12052_v52 = vand.u32 3, %v1302_v2  ;;  %v1533_v23 = vor.u32 8388608, %v1532_v56  ;;  %v1541_v9 = vshrl.u32 %v17782_v18, %v17826_v62  ;;  %vm1558_vm10 = vcmp.lt.s32.totalorder %v17830_v60, 2 }
  0xc1   :  { %v8878_v29 = vmin.u32 %v1487_v19, %v12036_v47  ;;  %v1562_v46 = vsel %vm1560_vm5, %v1550_v40, 2102212464  ;;  %v1569_v27 = vsel %vm1557_vm7, %v1547_v35, %v1550_v40  ;;  %v1402_v15 = vsel %vm1319_vm12, %v1401_v26, %v1400_v24 }
  0xc2   :  { %v1565_v0 = vsel %vm1557_vm7, %v1544_v54, %v1547_v35  ;;  %v1567_v2 = vsel %vm1559_vm8, %v1550_v40, %v1566_v37  ;;  %v1571_v62 = vsel %vm1559_vm8, %v1553_v57, %v1570_v53  ;;  %v12073_v8 = vsel %vm1201_vm6, nan, %v11969_v41  ;;  %v17839_v41 = vld [vmem:[#allocation50_spill] sm:$0xff] }
  0xc3   :  { %17837 = vst [vmem:[#allocation44_spill] sm:$0xff] %v12073_v8  ;;  %v1406_v21 = vsel %vm12019_vm4, 0, %v1404_v30  ;;  %vm1423_vm11 = vcmp.lt.s32.totalorder %v11765_v49, 0  ;;  %v1489_v24 = vclz %v8878_v29  ;;  %v12078_v12 = vand.u32 3, %v1306_v44 }
  0xc4   :  { %v1561_v56 = vsel %vm1557_vm7, %v1541_v9, %v1544_v54  ;;  %v1563_v31 = vsel %vm1559_vm8, %v1547_v35, %v1562_v46  ;;  %v1572_v57 = vsel %vm1558_vm10, %v1569_v27, %v1571_v62  ;;  %v17840_v59 = vpack.c.bf16 %v17838_v50, %v17839_v41  ;;  %v17849_v41 = vld [vmem:[#allocation57_spill] sm:$0xff] }
  0xc5   :  { %v17843_v43 = vpack.c.bf16 %v17841_v25, %v17842_v33  ;;  %v1405_v44 = vsel %vm12019_vm4, %v11548_v4, %v1402_v15  ;;  %vm12099_vm6 = vcmp.le.f32.partialorder %v1421_v16, 0.7853982  ;;  %v8879_v35 = vadd.s32 4294967294, %v1489_v24 }
  0xc6   :  { %9604 = vmatmul.mubr.msk.bf16.gmra.mrb[84].mxu1 %vm804_vm9, %v17840_v59  ;;  %v1568_v40 = vsel %vm1558_vm10, %v1565_v0, %v1567_v2  ;;  %v1573_v26 = vshll.u32 %v1533_v23, 8  ;;  %v1410_v54 = vadd.s32 3, %v1406_v21  ;;  %vm3906_vm13 = vcmp.eq.s32.totalorder %v12052_v52, 0  ;;  %v10303_v19 = vpop.eup %10302  ;;  %v17850_v59 = vld [vmem:[#allocation56_spill] sm:$0xff] }
  0xc7   :  { %9552 = vmatmul.mubr.msk.bf16.gmra.mrb[88].mxu0 %vm17533_vm3, %v17843_v43  ;;  %9607 = vmatprep.mubr.msk.bf16.mxu1 %vm17505_vm2, %v17760_v45  ;;  %v1477_v16 = vadd.s32 %v11903_v38, %v11914_v3  ;;  %v1507_v13 = vsub.s32 4, %v12002_v42  ;;  %vm8880_vm14 = vcmp.lt.s32.totalorder %v8879_v35, 0  ;;  %v1564_v37 = vsel %vm1558_vm10, %v1561_v56, %v1563_v31  ;;  %v10305_v23 = vpop.eup %10304  ;;  %v17846_v31 = vld [vmem:[#allocation55_spill] sm:$0xff] }
  0xc8   :  { %9555 = vmatprep.mubr.msk.bf16.mxu0 %vm17505_vm2, %v17760_v45  ;;  %v12115_v53 = vmul.u32.u64.low %v1573_v26, %v1572_v57  ;;  %v12116_v30 = vmul.u32.u64.high %v1573_v26, %v1572_v57, %v12115_v53  ;;  %10306 = vcosq.f32 %v1405_v44  ;;  %v1492_v9 = vsel %vm8880_vm14, 0, %v8879_v35  ;;  %v17847_v57 = vld [vmem:[#allocation54_spill] sm:$0xff] }
  0xc9   :  { %v12118_v29 = vmul.u32.u64.low %v1573_v26, %v1568_v40  ;;  %v12119_v46 = vmul.u32.u64.high %v1573_v26, %v1568_v40, %v12118_v29  ;;  %10308 = vsinq.f32 %v1405_v44  ;;  %v1493_v27 = vsub.s32 32, %v1492_v9 }
  0xca   :  { %v1494_v38 = vshll.u32 %v12036_v47, %v1492_v9  ;;  %v1497_v3 = vsub.s32 4294967266, %v1492_v9  ;;  %vm1309_vm15 = vcmp.eq.s32.totalorder %v12078_v12, 0  ;;  %vm1312_vm0 = vcmp.eq.s32.totalorder %v12078_v12, 2  ;;  %v12170_v9 = vld [vmem:[%s17717_s6 + $0x30] sm:$0xff] }
  0xcb   :  { %v1313_v60 = vxor.u32 2147483648, %v10303_v19  ;;  %vm3909_vm1 = vcmp.eq.s32.totalorder %v12052_v52, 2  ;;  %v1310_v15 = vxor.u32 2147483648, %v10305_v23  ;;  %v1495_v0 = vshrl.u32 %v1477_v16, %v1493_v27 }
  0xcc   :  { %v1498_v2 = vadd.s32 127, %v1497_v3  ;;  %v1508_v62 = vsel %vm1423_vm11, %v1507_v13, %v12002_v42  ;;  %v12129_v24 = vand.u32 3, %v1406_v21  ;;  %v1580_v56 = vmul.u32 %v1573_v26, %v1564_v37 }
  0xcd   :  { %vm1582_vm12 = vc.u32 %v12116_v30, %v12118_v29  ;;  %v1583_v47 = vadd.s32 1, %v12119_v46  ;;  %v17848_v50 = vpack.c.bf16 %v17846_v31, %v17847_v57  ;;  %v17851_v25 = vpack.c.bf16 %v17849_v41, %v17850_v59 }
  0xce   :  { %v12142_v33 = vand.u32 3, %v1410_v54  ;;  %vm3905_vm4 = vcmp.lt.s32.totalorder %v12052_v52, 2  ;;  %v1496_v42 = vor.u32 %v1495_v0, %v1494_v38  ;;  %v1499_v21 = vshll.u32 %v1498_v2, 23  ;;  %v17853_v2 = vld [vmem:[#allocation10_spill] sm:$0xff] }
  0xcf   :  { %9608 = vmatmul.mubr.msk.bf16.gmra.mrb[88].mxu1 %vm804_vm9, %v17848_v50  ;;  %9556 = vmatmul.mubr.msk.bf16.gmra.mrb[92].mxu0 %vm17533_vm3, %v17851_v25  ;;  %vm1308_vm5 = vcmp.lt.s32.totalorder %v12078_v12, 2  ;;  %v1314_v43 = vsel %vm1312_vm0, %v1313_v60, %v10305_v23  ;;  %v12154_v44 = vsel %vm12099_vm6, 0, %v1508_v62  ;;  %v1584_v35 = vsel %vm1582_vm12, %v1583_v47, %v12119_v46 }
  0xd0   :  { %9611 = vmatprep.mubr.msk.bf16.mxu1 %vm17505_vm2, %v17760_v45  ;;  %9559 = vmatprep.mubr.msk.bf16.mxu0 %vm17505_vm2, %v17760_v45  ;;  %v1311_v40 = vsel %vm1309_vm15, %v10303_v19, %v1310_v15  ;;  %v3908_v26 = vsel %vm3906_vm13, %v10303_v19, %v1310_v15  ;;  %v3911_v54 = vsel %vm3909_vm1, %v1313_v60, %v10305_v23  ;;  %v1500_v16 = vor.u32 4788187, %v1499_v21  ;;  %v17852_v15 = vld [vmem:[#allocation7_spill] sm:$0xff] }
  0xd1   :  { %vm17476_vm7 = vweird.f32 %v11942_v61  ;;  %vm4012_vm8 = vcmp.eq.s32.totalorder %v12129_v24, 2  ;;  %v1503_v13 = vcvt.s32.f32 %v1496_v42  ;;  %v1585_v37 = vadd.s32 %v1584_v35, %v1580_v56 }
  0xd2   :  { %vm1413_vm10 = vcmp.eq.s32.totalorder %v12142_v33, 0  ;;  %vm1416_vm14 = vcmp.eq.s32.totalorder %v12142_v33, 2  ;;  %v1501_v53 = vand.u32 2147483647, %v1500_v16  ;;  %v1629_v19 = vand.u32 2147483647, %v12170_v9  ;;  %v12173_v23 = vpop.eup %10306 }
  0xd3   :  { %v1315_v46 = vsel %vm1308_vm5, %v1311_v40, %v1314_v43  ;;  %v12179_v27 = vsel %vm3905_vm4, %v3908_v26, %v3911_v54  ;;  %vm4009_vm13 = vcmp.eq.s32.totalorder %v12129_v24, 0  ;;  %v12183_v38 = vadd.s32 3, %v12154_v44  ;;  %v10309_v60 = vpop.eup %10308 }
  0xd4   :  { %v1586_v3 = vadd.s32 536870912, %v1585_v37  ;;  %vm1412_vm15 = vcmp.lt.s32.totalorder %v12142_v33, 2  ;;  %v1646_v0 = vshll.u32 %v17782_v18, %v17852_v15  ;;  %v1647_v12 = vshrl.u32 %v17783_v32, %v17853_v2 }
  0xd5   :  { %v1649_v52 = vshll.u32 %v17783_v32, %v17852_v15  ;;  %v1650_v62 = vshrl.u32 %v17784_v7, %v17853_v2  ;;  %v1504_v56 = vmul.f32 %v1503_v13, %v1501_v53  ;;  %v1655_v31 = vshll.u32 %v17785_v11, %v17852_v15  ;;  %v17857_v53 = vld [vmem:[#allocation9_spill] sm:$0xff] }
  0xd6   :  { %v12194_v47 = vshrl.u32 %v1586_v3, 30  ;;  %v1656_v57 = vshrl.u32 %v17786_v51, %v17853_v2  ;;  %v17854_v50 = vpack.c.bf16 %v11644_v17, %v11633_v58  ;;  %v17855_v41 = vpack.c.bf16 %v11657_v63, %v11649_v22 }
  0xd7   :  { %v12210_v59 = vsel %vm17476_vm7, nan, %v1315_v46  ;;  %v1636_v25 = vand.u32 8388607, %v1629_v19  ;;  %v1652_v42 = vshll.u32 %v17784_v7, %v17852_v15  ;;  %v1653_v58 = vshrl.u32 %v17785_v11, %v17853_v2 }
  0xd8   :  { %9612 = vmatmul.mubr.msk.bf16.gmra.mrb[92].mxu1 %vm804_vm9, %v17854_v50  ;;  %9560 = vmatmul.mubr.msk.bf16.gmra.mrb[96].mxu0 %vm17533_vm3, %v17855_v41  ;;  %17856 = vst [vmem:[#allocation40_spill] sm:$0xff] %v12210_v59  ;;  %v1414_v17 = vxor.u32 2147483648, %v10309_v60  ;;  %v1417_v22 = vxor.u32 2147483648, %v12173_v23  ;;  %vm4008_vm0 = vcmp.lt.s32.totalorder %v12129_v24, 2  ;;  %v1588_v63 = vshll.u32 %v12194_v47, 30 }
  0xd9   :  { %9615 = vmatprep.mubr.msk.bf16.mxu1 %vm17505_vm2, %v17760_v45  ;;  %9563 = vmatprep.mubr.msk.bf16.mxu0 %vm17505_vm2, %v17760_v45  ;;  %v1645_v21 = vshrl.u32 %v17782_v18, %v17853_v2  ;;  %v1648_v43 = vor.u32 %v1647_v12, %v1646_v0  ;;  %v1657_v35 = vor.u32 %v1656_v57, %v1655_v31  ;;  %v1505_v54 = vxor.u32 2147483648, %v1504_v56 }
  0xda   :  { %v1658_v40 = vshll.u32 %v17786_v51, %v17852_v15  ;;  %v1659_v26 = vshrl.u32 %v17787_v36, %v17853_v2  ;;  %v12231_v16 = vsub.s32 %v1585_v37, %v1588_v63  ;;  %v1651_v13 = vor.u32 %v1650_v62, %v1649_v52 }
  0xdb   :  { %vm1664_vm1 = vcmp.lt.s32.totalorder %v17857_v53, 4  ;;  %v12236_v46 = vadd.s32 %v12118_v29, %v12116_v30  ;;  %v1637_v3 = vor.u32 8388608, %v1636_v25  ;;  %v1654_v50 = vor.u32 %v1653_v58, %v1652_v42 }
  0xdc   :  { %vm1661_vm12 = vcmp.lt.s32.totalorder %v17857_v53, 1  ;;  %vm1409_vm4 = vweird.f32 %v11548_v4  ;;  %v1418_v15 = vsel %vm1416_vm14, %v1417_v22, %v10309_v60  ;;  %v4014_v37 = vsel %vm4012_vm8, %v1417_v22, %v10309_v60  ;;  %v17859_v22 = vld [vmem:[#allocation59_spill] sm:$0xff] }
  0xdd   :  { %vm1527_vm5 = vcmp.lt.s32.totalorder %v11986_v6, 0  ;;  %v1591_v2 = vsub.s32 0, %v12231_v16  ;;  %vm1663_vm7 = vcmp.lt.s32.totalorder %v17857_v53, 3  ;;  %v1415_v62 = vsel %vm1413_vm10, %v12173_v23, %v1414_v17 }
  0xde   :  { %v1660_v31 = vor.u32 %v1659_v26, %v1658_v40  ;;  %v1670_v57 = vsel %vm1664_vm1, %v1657_v35, 920167782  ;;  %v1506_v25 = vsel %vm1423_vm11, %v1505_v54, %v1504_v56  ;;  %vm1662_vm8 = vcmp.lt.s32.totalorder %v17857_v53, 2  ;;  %v17861_v40 = vld [vmem:[#allocation61_spill] sm:$0xff] }
  0xdf   :  { %v8882_v42 = vmin.u32 %v1591_v2, %v12231_v16  ;;  %v1669_v58 = vsel %vm1661_vm12, %v1648_v43, %v1651_v13  ;;  %v17860_v63 = vpack.c.bf16 %v11667_v39, %v17859_v22  ;;  %v17862_v26 = vpack.c.bf16 %v17861_v40, %v17861_v40 }
  0xe0   :  { %v1666_v2 = vsel %vm1664_vm1, %v1654_v50, 2102212464  ;;  %v1671_v39 = vsel %vm1663_vm7, %v1654_v50, %v1670_v57  ;;  %vm12285_vm11 = vcmp.le.f32.partialorder %v1525_v20, 0.7853982  ;;  %v1673_v57 = vsel %vm1661_vm12, %v1651_v13, %v1654_v50 }
  0xe1   :  { %v228_v0 = vpop.f32.mrb[0].mxu0  ;;  %9616 = vmatmul.mubr.msk.bf16.gmra.mrb[96].mxu1 %vm804_vm9, %v17860_v63  ;;  %9564 = vmatmul.mubr.msk.bf16.gmra.mrb[100].mxu0 %vm17533_vm3, %v17862_v26  ;;  %v1672_v33 = vsel %vm1662_vm8, %v1669_v58, %v1671_v39  ;;  %v12299_v20 = vshll.u32 %v1637_v3, 8  ;;  %v12330_v26 = vld [vmem:[%s17372_s11] sm:$0x3]  ;;  %v12375_v4 = vand.u32 3, %v12183_v38  ;;  %v12389_v38 = vld [vmem:[%s17717_s6 + $0x38] sm:$0xff] }
  0xe2   :  { %v406_v12 = vpop.f32.mrb[0].mxu1  ;;  %v9409_v29 = vpop.f32.mrb[1].mxu0  ;;  %9619 = vmatprep.mubr.msk.bf16.mxu1 %vm17505_vm2, %v17760_v45  ;;  %9625 = vmatprep.mubr.msk.bf16.mxu0 %vm17505_vm2, %v17760_v45 }
  0xe3   :  { %v12247_v30 = vadd.f32 %v406_v12, %v228_v0  ;;  %v9463_v52 = vpop.f32.mrb[1].mxu1  ;;  %v231_v41 = vpop.f32.mrb[2].mxu0  ;;  %v4011_v12 = vsel %vm4009_vm13, %v12173_v23, %v1414_v17  ;;  %v1419_v29 = vsel %vm1412_vm15, %v1415_v62, %v1418_v15  ;;  %v1593_v23 = vclz %v8882_v42 }
  0xe4   :  { %v409_v60 = vpop.f32.mrb[2].mxu1  ;;  %v9410_v56 = vpop.f32.mrb[3].mxu0  ;;  %v1611_v17 = vsub.s32 4, %v12194_v47  ;;  %v1674_v15 = vsel %vm1664_vm1, %v1660_v31, 1326507024  ;;  %v1667_v42 = vsel %vm1663_vm7, %v1651_v13, %v1666_v2  ;;  %v4015_v1 = vsel %vm4008_vm0, %v4011_v12, %v4014_v37 }
  0xe5   :  { %17858 = vst [vmem:[#allocation45_spill] sm:$0xff] %v12247_v30  ;;  %v12268_v0 = vadd.f32 %v409_v60, %v231_v41  ;;  %v9464_v54 = vpop.f32.mrb[3].mxu1  ;;  %v1509_v41 = vsel %vm12099_vm6, %v11765_v49, %v1506_v25  ;;  %v8883_v62 = vadd.s32 4294967294, %v1593_v23  ;;  %v1665_v60 = vsel %vm1661_vm12, %v1645_v21, %v1648_v43  ;;  %v17867_v23 = vld [vmem:[#allocation62_spill] sm:$0xff] }
  0xe6   :  { %v1675_v50 = vsel %vm1663_vm7, %v1657_v35, %v1674_v15  ;;  %v12312_v31 = vmul.u32.u64.low %v12299_v20, %v1672_v33  ;;  %v12313_v3 = vmul.u32.u64.high %v12299_v20, %v1672_v33, %v12312_v31  ;;  %10310 = vcosq.f32 %v1509_v41 }
  0xe7   :  { %17863 = vst [vmem:[#allocation3_spill] sm:$0xff] %v12268_v0  ;;  %v1676_v25 = vsel %vm1662_vm8, %v1673_v57, %v1675_v50  ;;  %vm8884_vm6 = vcmp.lt.s32.totalorder %v8883_v62, 0  ;;  %v1612_v63 = vsel %vm1527_vm5, %v1611_v17, %v12194_v47  ;;  %v1668_v40 = vsel %vm1662_vm8, %v1665_v60, %v1667_v42 }
  0xe8   :  { %v12317_v21 = vmul.u32.u64.low %v12299_v20, %v1676_v25  ;;  %v12318_v43 = vmul.u32.u64.high %v12299_v20, %v1676_v25, %v12317_v21  ;;  %v1596_v37 = vsel %vm8884_vm6, 0, %v8883_v62  ;;  %10312 = vsinq.f32 %v1509_v41 }
  0xe9   :  { %v236_v58 = vpop.f32.mrb[4].mxu0  ;;  %v1597_v12 = vsub.s32 32, %v1596_v37  ;;  %v1598_v2 = vshll.u32 %v12231_v16, %v1596_v37  ;;  %v1601_v39 = vsub.s32 4294967266, %v1596_v37  ;;  %v17868_v57 = vpack.c.bf16 %v17867_v23, %v17867_v23  ;;  %9626 = vmatmul.mubr.msk.bf16.vlgmr.msra.gmra.mrb[104].mxu0 %vm17533_vm3, %v6180_v14 }
  0xea   :  { %v414_v22 = vpop.f32.mrb[4].mxu1  ;;  %v9413_v24 = vpop.f32.mrb[5].mxu0  ;;  %v12343_v47 = vsel %vm1409_vm4, nan, %v1419_v29  ;;  %vm17870_vm7 = vweird.f32 %v11942_v61  ;;  %v1687_v33 = vadd.s32 1, %v12313_v3  ;;  %9732 = vmatpush3.bf16.msra.mxu0 %v6768_v34  ;;  %v12360_v14 = vsel %vm1409_vm4, nan, %v4015_v1  ;;  %9629 = vmatprep.mubr.msk.bf16.mxu0 %vm17505_vm2, %v17760_v45 }
  0xeb   :  { %v12320_v35 = vadd.f32 %v414_v22, %v236_v58  ;;  %v9467_v13 = vpop.f32.mrb[5].mxu1  ;;  %v239_v56 = vpop.f32.mrb[6].mxu0  ;;  %9620 = vmatmul.mubr.msk.bf16.gmra.mrb[100].mxu1 %vm804_vm9, %v17868_v57  ;;  %17869 = vst [vmem:[#allocation6_spill] sm:$0xff] %v12343_v47  ;;  %v12348_v53 = vsel %vm17870_vm7, nan, %v12179_v27  ;;  %17873 = vst [vmem:[#allocation46_spill] sm:$0xff] %v12360_v14  ;;  %v1599_v61 = vshrl.u32 %v12236_v46, %v1597_v12  ;;  %v1602_v27 = vadd.s32 127, %v1601_v39 }
  0xec   :  { %v417_v54 = vpop.f32.mrb[6].mxu1  ;;  %17871 = vst [vmem:[#allocation4_spill] sm:$0xff] %v12348_v53  ;;  %v9414_v17 = vpop.f32.mrb[7].mxu0  ;;  %9679 = vmatprep.mubr.msk.bf16.mxu1 %vm17505_vm2, %v17760_v45  ;;  %v1684_v29 = vmul.u32 %v12299_v20, %v1668_v40  ;;  %v6397_v15 = vpack.c.bf16 %v12073_v8, %v11965_v28  ;;  %v6985_v62 = vand.u32 %v12330_v26, %v10601_v5  ;;  %v1614_v10 = vsel %vm12285_vm11, 0, %v1612_v63  ;;  %v17874_v63 = vld [vmem:[#allocation8_spill] sm:$0xff]  ;;  %v17875_v40 = vld [vmem:[#allocation13_spill] sm:$0xff] }
  0xed   :  { %17866 = vst [vmem:[#allocation5_spill] sm:$0xff] %v12320_v35  ;;  %v12350_v16 = vadd.f32 %v417_v54, %v239_v56  ;;  %v9468_v41 = vpop.f32.mrb[7].mxu1  ;;  %vm1686_vm9 = vc.u32 %v12318_v43, %v12312_v31  ;;  %v1600_v34 = vor.u32 %v1599_v61, %v1598_v2  ;;  %v1603_v46 = vshll.u32 %v1602_v27, 23  ;;  %9839 = vmatprep.subr.bf16.mxu0 %v17760_v45  ;;  %v17900_v8 = vld [vmem:[#allocation17_spill] sm:$0xff] }
  0xee   :  { %v12378_v20 = vand.u32 3, %v12154_v44  ;;  %v6181_v60 = vpack.c.bf16 %v12343_v47, %v12210_v59  ;;  %v6398_v42 = vpack.c.bf16 %v12360_v14, %v12348_v53  ;;  %v1688_v50 = vsel %vm1686_vm9, %v1687_v33, %v12313_v3 }
  0xef   :  { %17872 = vst [vmem:[#allocation47_spill] sm:$0xff] %v12350_v16  ;;  %v17477_v1 = vand.u32 2147483647, %v12389_v38  ;;  %v1604_v25 = vor.u32 4788187, %v1603_v46  ;;  %v1607_v44 = vcvt.s32.f32 %v1600_v34  ;;  %v12392_v58 = vadd.s32 3, %v1614_v10 }
  0xf0   :  { %v1689_v21 = vadd.s32 %v1688_v50, %v1684_v29  ;;  %v12394_v24 = vand.u32 3, %v1614_v10  ;;  %v1750_v3 = vshll.u32 %v17782_v18, %v17874_v63  ;;  %v1751_v26 = vshrl.u32 %v17783_v32, %v17875_v40  ;;  %v12402_v54 = vpop.eup %10310 }
  0xf1   :  { %v244_v22 = vpop.f32.mrb[8].mxu0  ;;  %v1753_v56 = vshll.u32 %v17783_v32, %v17874_v63  ;;  %v1605_v12 = vand.u32 2147483647, %v1604_v25  ;;  %v1754_v17 = vshrl.u32 %v17784_v7, %v17875_v40  ;;  %9630 = vmatmul.mubr.msk.bf16.gmra.mrb[108].mxu0 %vm17533_vm3, %v6181_v60  ;;  %vm1517_vm10 = vcmp.eq.s32.totalorder %v12375_v4, 0 }
  0xf2   :  { %v422_v13 = vpop.f32.mrb[8].mxu1  ;;  %v9417_v37 = vpop.f32.mrb[9].mxu0  ;;  %v1690_v57 = vadd.s32 536870912, %v1689_v21  ;;  %vm1520_vm14 = vcmp.eq.s32.totalorder %v12375_v4, 2  ;;  %vm4115_vm13 = vcmp.eq.s32.totalorder %v12378_v20, 2  ;;  %v1749_v27 = vshrl.u32 %v17782_v18, %v17875_v40  ;;  %9633 = vmatprep.mubr.msk.bf16.mxu0 %vm17505_vm2, %v17760_v45 }
  0xf3   :  { %v12404_v2 = vadd.f32 %v422_v13, %v244_v22  ;;  %v9471_v39 = vpop.f32.mrb[9].mxu1  ;;  %v247_v23 = vpop.f32.mrb[10].mxu0  ;;  %9680 = vmatmul.mubr.msk.bf16.vlgmr.msra.gmra.mrb[104].mxu1 %vm17533_vm3, %v6397_v15  ;;  %v1740_v61 = vand.u32 8388607, %v17477_v1  ;;  %v1756_v29 = vshll.u32 %v17784_v7, %v17874_v63  ;;  %v1757_v15 = vshrl.u32 %v17785_v11, %v17875_v40 }
  0xf4   :  { %v425_v41 = vpop.f32.mrb[10].mxu1  ;;  %v9418_v33 = vpop.f32.mrb[11].mxu0  ;;  %9786 = vmatpush3.bf16.msra.mxu1 %v6985_v62  ;;  %9683 = vmatprep.mubr.msk.bf16.mxu1 %vm17505_vm2, %v17760_v45  ;;  %v1608_v34 = vmul.f32 %v1607_v44, %v1605_v12  ;;  %vm4112_vm15 = vcmp.eq.s32.totalorder %v12378_v20, 0  ;;  %v12426_v50 = vshrl.u32 %v1690_v57, 30  ;;  %v1759_v25 = vshll.u32 %v17785_v11, %v17874_v63 }
  0xf5   :  { %17876 = vst [vmem:[#allocation49_spill] sm:$0xff] %v12404_v2  ;;  %v10313_v10 = vpop.eup %10312  ;;  %v12424_v46 = vadd.f32 %v425_v41, %v247_v23  ;;  %v9472_v60 = vpop.f32.mrb[11].mxu1  ;;  %v1521_v22 = vxor.u32 2147483648, %v12402_v54  ;;  %v1760_v62 = vshrl.u32 %v17786_v51, %v17875_v40  ;;  %v1762_v44 = vshll.u32 %v17786_v51, %v17874_v63  ;;  %9893 = vmatprep.subr.bf16.mxu1 %v17760_v45 }
  0xf6   :  { %v1763_v13 = vshrl.u32 %v17787_v36, %v17875_v40  ;;  %v1609_v37 = vxor.u32 2147483648, %v1608_v34  ;;  %v1692_v12 = vshll.u32 %v12426_v50, 30  ;;  %v1752_v39 = vor.u32 %v1751_v26, %v1750_v3  ;;  %v17878_v60 = vld [vmem:[#allocation11_spill] sm:$0xff] }
  0xf7   :  { %17877 = vst [vmem:[#allocation48_spill] sm:$0xff] %v12424_v46  ;;  %v1755_v23 = vor.u32 %v1754_v17, %v1753_v56  ;;  %vm1516_vm0 = vcmp.lt.s32.totalorder %v12375_v4, 2  ;;  %v1518_v57 = vxor.u32 2147483648, %v10313_v10  ;;  %vm4111_vm1 = vcmp.lt.s32.totalorder %v12378_v20, 2 }
  0xf8   :  { %v1758_v41 = vor.u32 %v1757_v15, %v1756_v29  ;;  %v1761_v33 = vor.u32 %v1760_v62, %v1759_v25  ;;  %vm1765_vm12 = vcmp.lt.s32.totalorder %v17878_v60, 1  ;;  %v1610_v63 = vsel %vm1527_vm5, %v1609_v37, %v1608_v34 }
  0xf9   :  { %v12446_v40 = vsub.s32 %v1689_v21, %v1692_v12  ;;  %v1764_v1 = vor.u32 %v1763_v13, %v1762_v44  ;;  %vm1768_vm4 = vcmp.lt.s32.totalorder %v17878_v60, 4  ;;  %v1613_v3 = vsel %vm12285_vm11, %v11986_v6, %v1610_v63 }
  0xfa   :  { %v1741_v26 = vor.u32 8388608, %v1740_v61  ;;  %vm1766_vm8 = vcmp.lt.s32.totalorder %v17878_v60, 2  ;;  %vm1767_vm6 = vcmp.lt.s32.totalorder %v17878_v60, 3  ;;  %vm1513_vm7 = vweird.f32 %v11765_v49 }
  0xfb   :  { %10314 = vcosq.f32 %v1613_v3  ;;  %v1695_v56 = vsub.s32 0, %v12446_v40  ;;  %v1770_v21 = vsel %vm1768_vm4, %v1758_v41, 2102212464  ;;  %v1773_v17 = vsel %vm1765_vm12, %v1752_v39, %v1755_v23  ;;  %9684 = vmatmul.mubr.msk.bf16.gmra.mrb[108].mxu1 %vm17533_vm3, %v6398_v42 }
  0xfc   :  { %10316 = vsinq.f32 %v1613_v3  ;;  %v12465_v52 = vand.u32 3, %v12392_v58  ;;  %v1769_v61 = vsel %vm1765_vm12, %v1749_v27, %v1752_v39  ;;  %v1774_v29 = vsel %vm1768_vm4, %v1761_v33, 920167782  ;;  %9687 = vmatprep.mubr.msk.bf16.mxu1 %vm17505_vm2, %v17760_v45 }
  0xfd   :  { %v8886_v15 = vmin.u32 %v1695_v56, %v12446_v40  ;;  %v1775_v34 = vsel %vm1767_vm6, %v1758_v41, %v1774_v29  ;;  %v1777_v42 = vsel %vm1765_vm12, %v1755_v23, %v1758_v41  ;;  %v1778_v58 = vsel %vm1768_vm4, %v1764_v1, 1326507024 }
  0xfe   :  { %v1771_v27 = vsel %vm1767_vm6, %v1755_v23, %v1770_v21  ;;  %v1776_v25 = vsel %vm1766_vm8, %v1773_v17, %v1775_v34  ;;  %v1779_v62 = vsel %vm1767_vm6, %v1761_v33, %v1778_v58  ;;  %v1781_v44 = vshll.u32 %v1741_v26, 8 }
  0xff   :  { %v1519_v13 = vsel %vm1517_vm10, %v12402_v54, %v1518_v57  ;;  %v1522_v37 = vsel %vm1520_vm14, %v1521_v22, %v10313_v10  ;;  %v4117_v1 = vsel %vm4115_vm13, %v1521_v22, %v10313_v10  ;;  %v1697_v12 = vclz %v8886_v15 }
 0x100   :  { %vm1617_vm5 = vweird.f32 %v11986_v6  ;;  %v4114_v39 = vsel %vm4112_vm15, %v12402_v54, %v1518_v57  ;;  %v1780_v23 = vsel %vm1766_vm8, %v1777_v42, %v1779_v62  ;;  %v1772_v3 = vsel %vm1766_vm8, %v1769_v61, %v1771_v27 }
 0x101   :  { %v12499_v41 = vmul.u32.u64.low %v1781_v44, %v1776_v25  ;;  %v12500_v33 = vmul.u32.u64.high %v1781_v44, %v1776_v25, %v12499_v41  ;;  %v8887_v63 = vadd.s32 4294967294, %v1697_v12  ;;  %vm1620_vm11 = vcmp.lt.s32.totalorder %v12465_v52, 2 }
 0x102   :  { %v12505_v26 = vmul.u32.u64.low %v1781_v44, %v1780_v23  ;;  %v12506_v10 = vmul.u32.u64.high %v1781_v44, %v1780_v23, %v12505_v26  ;;  %vm4214_vm9 = vcmp.lt.s32.totalorder %v12394_v24, 2  ;;  %vm4215_vm10 = vcmp.eq.s32.totalorder %v12394_v24, 0  ;;  %v430_v23 = vpop.f32.mrb[12].mxu1 }
 0x103   :  { %vm4218_vm14 = vcmp.eq.s32.totalorder %v12394_v24, 2  ;;  %v1523_v54 = vsel %vm1516_vm0, %v1519_v13, %v1522_v37  ;;  %v4118_v22 = vsel %vm4111_vm1, %v4114_v39, %v4117_v1  ;;  %v1685_v57 = vadd.s32 %v12312_v31, %v12318_v43 }
 0x104   :  { %vm8888_vm13 = vcmp.lt.s32.totalorder %v8887_v63, 0  ;;  %vm1621_vm15 = vcmp.eq.s32.totalorder %v12465_v52, 0  ;;  %v1788_v56 = vmul.u32 %v1781_v44, %v1772_v3  ;;  %v1791_v21 = vadd.s32 1, %v12500_v33 }
 0x105   :  { %v1700_v60 = vsel %vm8888_vm13, 0, %v8887_v63  ;;  %v10315_v17 = vpop.eup %10314  ;;  %vm1624_vm12 = vcmp.eq.s32.totalorder %v12465_v52, 2  ;;  %v12524_v20 = vsel %vm1513_vm7, nan, %v1523_v54  ;;  %v12528_v43 = vsel %vm1513_vm7, nan, %v4118_v22  ;;  %v9475_v22 = vpop.f32.mrb[13].mxu1 }
 0x106   :  { %v1701_v61 = vsub.s32 32, %v1700_v60  ;;  %v1702_v4 = vshll.u32 %v12446_v40, %v1700_v60  ;;  %v1705_v29 = vsub.s32 4294967266, %v1700_v60  ;;  %v10317_v15 = vpop.eup %10316  ;;  %17879 = vst [vmem:[#allocation51_spill] sm:$0xff] %v12524_v20  ;;  %v1625_v31 = vxor.u32 2147483648, %v10315_v17  ;;  %17880 = vst [vmem:[#allocation50_spill] sm:$0xff] %v12528_v43  ;;  %v252_v40 = vpop.f32.mrb[12].mxu0 }
 0x107   :  { %vm1790_vm0 = vc.u32 %v12506_v10, %v12499_v41  ;;  %v1622_v34 = vxor.u32 2147483648, %v10317_v15  ;;  %v1715_v44 = vsub.s32 4, %v12426_v50  ;;  %v9421_v37 = vpop.f32.mrb[13].mxu0  ;;  %v12544_v54 = vadd.f32 %v430_v23, %v252_v40  ;;  %v433_v52 = vpop.f32.mrb[14].mxu1 }
 0x108   :  { %v1703_v42 = vshrl.u32 %v1685_v57, %v1701_v61  ;;  %v1706_v58 = vadd.s32 127, %v1705_v29  ;;  %v1792_v27 = vsel %vm1790_vm0, %v1791_v21, %v12500_v33  ;;  %v1626_v25 = vsel %vm1624_vm12, %v1625_v31, %v10317_v15  ;;  %v255_v63 = vpop.f32.mrb[14].mxu0  ;;  %v9476_v29 = vpop.f32.mrb[15].mxu1 }
 0x109   :  { %v4220_v62 = vsel %vm4218_vm14, %v1625_v31, %v10317_v15  ;;  %v1793_v13 = vadd.s32 %v1792_v27, %v1788_v56  ;;  %v1623_v49 = vsel %vm1621_vm15, %v10315_v17, %v1622_v34  ;;  %v4217_v1 = vsel %vm4215_vm10, %v10315_v17, %v1622_v34  ;;  %17881 = vst [vmem:[#allocation53_spill] sm:$0xff] %v12544_v54  ;;  %v9422_v57 = vpop.f32.mrb[15].mxu0  ;;  %v12567_v34 = vld [vmem:[%s17717_s6 + $0x40] sm:$0xff]  ;;  %v17885_v27 = vld [vmem:[#allocation12_spill] sm:$0xff] }
 0x10a   :  { %v1704_v12 = vor.u32 %v1703_v42, %v1702_v4  ;;  %v1707_v39 = vshll.u32 %v1706_v58, 23  ;;  %v1627_v33 = vsel %vm1620_vm11, %v1623_v49, %v1626_v25  ;;  %v4221_v3 = vsel %vm4214_vm9, %v4217_v1, %v4220_v62  ;;  %v17886_v25 = vld [vmem:[#allocation15_spill] sm:$0xff] }
 0x10b   :  { %v1794_v26 = vadd.s32 536870912, %v1793_v13  ;;  %v12548_v60 = vsel %vm1617_vm5, nan, %v1627_v33  ;;  %v12552_v56 = vsel %vm1617_vm5, nan, %v4221_v3  ;;  %vm1631_vm1 = vcmp.lt.s32.totalorder %v12170_v9, 0 }
 0x10c   :  { %17882 = vst [vmem:[#allocation52_spill] sm:$0xff] %v12548_v60  ;;  %17883 = vst [vmem:[#allocation55_spill] sm:$0xff] %v12552_v56  ;;  %v1708_v21 = vor.u32 4788187, %v1707_v39  ;;  %v1711_v17 = vcvt.s32.f32 %v1704_v12  ;;  %v6182_v24 = vpack.c.bf16 %v12548_v60, %v12524_v20  ;;  %v6399_v61 = vpack.c.bf16 %v12552_v56, %v12528_v43  ;;  %v12592_v12 = vpop.f32.mrb[16].mxu0 }
 0x10d   :  { %v1795_v4 = vshrl.u32 %v1794_v26, 30  ;;  %v1716_v6 = vsel %vm1631_vm1, %v1715_v44, %v12426_v50  ;;  %v12562_v31 = vadd.f32 %v433_v52, %v255_v63  ;;  %v17478_v42 = vand.u32 2147483647, %v12567_v34  ;;  %v9425_v33 = vpop.f32.mrb[17].mxu0 }
 0x10e   :  { %v1709_v15 = vand.u32 2147483647, %v1708_v21  ;;  %9634 = vmatmul.mubr.msk.bf16.gmra.mrb[112].mxu0 %vm17533_vm3, %v6182_v24  ;;  %9688 = vmatmul.mubr.msk.bf16.gmra.mrb[112].mxu1 %vm17533_vm3, %v6399_v61  ;;  %v1854_v40 = vshll.u32 %v17782_v18, %v17885_v27  ;;  %v1855_v50 = vshrl.u32 %v17783_v32, %v17886_v25  ;;  %v1857_v62 = vshll.u32 %v17783_v32, %v17885_v27  ;;  %v12607_v22 = vpop.f32.mrb[18].mxu0 }
 0x10f   :  { %17884 = vst [vmem:[#allocation54_spill] sm:$0xff] %v12562_v31  ;;  %v1796_v58 = vshll.u32 %v1795_v4, 30  ;;  %9637 = vmatprep.mubr.msk.bf16.mxu0 %vm17505_vm2, %v17760_v45  ;;  %9691 = vmatprep.mubr.msk.bf16.mxu1 %vm17505_vm2, %v17760_v45  ;;  %vm12584_vm4 = vcmp.le.f32.partialorder %v1629_v19, 0.7853982  ;;  %v1858_v49 = vshrl.u32 %v17784_v7, %v17886_v25  ;;  %v1860_v1 = vshll.u32 %v17784_v7, %v17885_v27  ;;  %v9426_v24 = vpop.f32.mrb[19].mxu0  ;;  %v17898_v31 = vld [vmem:[#allocation19_spill] sm:$0xff] }
 0x110   :  { %v1712_v37 = vmul.f32 %v1711_v17, %v1709_v15  ;;  %v1861_v23 = vshrl.u32 %v17785_v11, %v17886_v25  ;;  %v1863_v19 = vshll.u32 %v17785_v11, %v17885_v27  ;;  %v1864_v63 = vshrl.u32 %v17786_v51, %v17886_v25 }
 0x111   :  { %v12594_v39 = vsub.s32 %v1793_v13, %v1796_v58  ;;  %vm1735_vm8 = vcmp.lt.s32.totalorder %v12389_v38, 0  ;;  %v1844_v26 = vand.u32 8388607, %v17478_v42  ;;  %v1866_v13 = vshll.u32 %v17786_v51, %v17885_v27  ;;  %v17889_v58 = vld [vmem:[#allocation14_spill] sm:$0xff] }
 0x112   :  { %v1713_v3 = vxor.u32 2147483648, %v1712_v37  ;;  %v12611_v57 = vsel %vm12584_vm4, 0, %v1716_v6  ;;  %v1819_v17 = vsub.s32 4, %v1795_v4  ;;  %v1856_v52 = vor.u32 %v1855_v50, %v1854_v40 }
 0x113   :  { %v1799_v21 = vsub.s32 0, %v12594_v39  ;;  %v1859_v29 = vor.u32 %v1858_v49, %v1857_v62  ;;  %v1867_v15 = vshrl.u32 %v17787_v36, %v17886_v25  ;;  %vm1869_vm6 = vcmp.lt.s32.totalorder %v17889_v58, 1 }
 0x114   :  { %v1714_v61 = vsel %vm1631_vm1, %v1713_v3, %v1712_v37  ;;  %v1862_v33 = vor.u32 %v1861_v23, %v1860_v1  ;;  %v1865_v42 = vor.u32 %v1864_v63, %v1863_v19  ;;  %v1722_v40 = vadd.s32 3, %v12611_v57  ;;  %v12635_v1 = vpop.f32.mrb[16].mxu1 }
 0x115   :  { %v1717_v27 = vsel %vm12584_vm4, %v12170_v9, %v1714_v61  ;;  %v8890_v6 = vmin.u32 %v1799_v21, %v12594_v39  ;;  %v1845_v50 = vor.u32 8388608, %v1844_v26  ;;  %v1853_v37 = vshrl.u32 %v17782_v18, %v17886_v25 }
 0x116   :  { %v1868_v62 = vor.u32 %v1867_v15, %v1866_v13  ;;  %v1789_v49 = vadd.s32 %v12499_v41, %v12506_v10  ;;  %v1820_v24 = vsel %vm1735_vm8, %v1819_v17, %v1795_v4  ;;  %vm1871_vm7 = vcmp.lt.s32.totalorder %v17889_v58, 3  ;;  %v9479_v10 = vpop.f32.mrb[17].mxu1 }
 0x117   :  { %v1801_v3 = vclz %v8890_v6  ;;  %10318 = vcosq.f32 %v1717_v27  ;;  %vm1870_vm5 = vcmp.lt.s32.totalorder %v17889_v58, 2  ;;  %vm1872_vm11 = vcmp.lt.s32.totalorder %v17889_v58, 4  ;;  %v12643_v21 = vpop.f32.mrb[18].mxu1 }
 0x118   :  { %v1877_v44 = vsel %vm1869_vm6, %v1856_v52, %v1859_v29  ;;  %v1874_v23 = vsel %vm1872_vm11, %v1862_v33, 2102212464  ;;  %v1878_v19 = vsel %vm1872_vm11, %v1865_v42, 920167782  ;;  %v1881_v41 = vsel %vm1869_vm6, %v1859_v29, %v1862_v33  ;;  %v9480_v6 = vpop.f32.mrb[19].mxu1 }
 0x119   :  { %v8891_v25 = vadd.s32 4294967294, %v1801_v3  ;;  %v1873_v4 = vsel %vm1869_vm6, %v1853_v37, %v1856_v52  ;;  %v1879_v63 = vsel %vm1871_vm7, %v1862_v33, %v1878_v19  ;;  %v1882_v26 = vsel %vm1872_vm11, %v1868_v62, 1326507024 }
 0x11a   :  { %v1885_v13 = vshll.u32 %v1845_v50, 8  ;;  %v1875_v17 = vsel %vm1871_vm7, %v1859_v29, %v1874_v23  ;;  %v1880_v61 = vsel %vm1870_vm5, %v1877_v44, %v1879_v63  ;;  %v1883_v15 = vsel %vm1871_vm7, %v1865_v42, %v1882_v26  ;;  %v17890_v23 = vld [vmem:[#allocation37_spill] sm:$0xff]  ;;  %v17895_v26 = vld [vmem:[#allocation43_spill] sm:$0xff] }
 0x11b   :  { %vm8892_vm9 = vcmp.lt.s32.totalorder %v8891_v25, 0  ;;  %v1884_v52 = vsel %vm1870_vm5, %v1881_v41, %v1883_v15  ;;  %10320 = vsinq.f32 %v1717_v27  ;;  %vm2784_vm10 = vcmp.gt.s32.totalorder %v17890_v23, 0 }
 0x11c   :  { %v1804_v3 = vsel %vm8892_vm9, 0, %v8891_v25  ;;  %v12653_v33 = vmul.u32.u64.low %v1885_v13, %v1880_v61  ;;  %v12654_v37 = vmul.u32.u64.high %v1885_v13, %v1880_v61, %v12653_v33  ;;  %v1876_v44 = vsel %vm1870_vm5, %v1873_v4, %v1875_v17  ;;  %v17891_v25 = vld [vmem:[#allocation42_spill] sm:$0xff] }
 0x11d   :  { %v1805_v50 = vsub.s32 32, %v1804_v3  ;;  %v1806_v62 = vshll.u32 %v12594_v39, %v1804_v3  ;;  %v1809_v29 = vsub.s32 4294967266, %v1804_v3  ;;  %v12665_v10 = vand.u32 31, %v17891_v25  ;;  %v17897_v25 = vld [vmem:[#allocation16_spill] sm:$0xff] }
 0x11e   :  { %v12661_v42 = vmul.u32.u64.low %v1885_v13, %v1884_v52  ;;  %v12662_v19 = vmul.u32.u64.high %v1885_v13, %v1884_v52, %v12661_v42  ;;  %v17892_v41 = vand.u32 2147483647, %v12389_v38  ;;  %v12674_v61 = vadd.s32 1, %v17895_v26 }
 0x11f   :  { %v1807_v27 = vshrl.u32 %v1789_v49, %v1805_v50  ;;  %v1810_v39 = vadd.s32 127, %v1809_v29  ;;  %v12676_v15 = vand.u32 3, %v1722_v40  ;;  %v1895_v4 = vadd.s32 1, %v12654_v37  ;;  %v17896_v49 = vld [vmem:[#allocation58_spill] sm:$0xff] }
 0x120   :  { %vm12669_vm14 = vcmp.le.f32.partialorder %v17892_v41, 0.7853982  ;;  %v12682_v17 = vsel %vm2784_vm10, %v17890_v23, 0  ;;  %v1892_v52 = vmul.u32 %v1885_v13, %v1876_v44  ;;  %v12687_v50 = vadd.s32 1, %v17896_v49  ;;  %v12692_v40 = vld [vmem:[%s17717_s6 + $0xa0] sm:$0xff]  ;;  %v12703_v44 = vld [vmem:[%s17717_s6 + $0x48] sm:$0xff] }
 0x121   :  { %v1822_v58 = vsel %vm12669_vm14, 0, %v1820_v24  ;;  %v1808_v6 = vor.u32 %v1807_v27, %v1806_v62  ;;  %v1811_v3 = vshll.u32 %v1810_v39, 23  ;;  %v12684_v42 = vpop.eup %10318  ;;  %v12696_v29 = vand.u32 3, %v12611_v57  ;;  %v12712_v57 = vld [vmem:[%s17717_s6 + $0xa8] sm:$0xff]  ;;  %v12720_v49 = vpop.f32.mrb[20].mxu0 }
 0x122   :  { %vm1894_vm13 = vc.u32 %v12662_v19, %v12653_v33  ;;  %v1826_v23 = vadd.s32 3, %v1822_v58  ;;  %v12707_v41 = vsub.s32 32, %v12665_v10  ;;  %vm1725_vm15 = vcmp.eq.s32.totalorder %v12676_v15, 0  ;;  %v12722_v24 = vpop.f32.mrb[20].mxu1 }
 0x123   :  { %v1812_v62 = vor.u32 4788187, %v1811_v3  ;;  %v1815_v13 = vcvt.s32.f32 %v1808_v6  ;;  %v1896_v39 = vsel %vm1894_vm13, %v1895_v4, %v12654_v37  ;;  %vm1728_vm12 = vcmp.eq.s32.totalorder %v12676_v15, 2  ;;  %v9429_v4 = vpop.f32.mrb[21].mxu0 }
 0x124   :  { %v12718_v6 = vand.u32 3, %v1822_v58  ;;  %v1897_v3 = vadd.s32 %v1896_v39, %v1892_v52  ;;  %v1958_v5 = vshll.u32 %v17782_v18, %v17897_v25  ;;  %v1959_v27 = vshrl.u32 %v17783_v32, %v17898_v31  ;;  %v9483_v58 = vpop.f32.mrb[21].mxu1  ;;  %v12738_v35 = vpop.f32.mrb[22].mxu0 }
 0x125   :  { %v1813_v26 = vand.u32 2147483647, %v1812_v62  ;;  %v1961_v54 = vshll.u32 %v17783_v32, %v17897_v25  ;;  %v1962_v37 = vshrl.u32 %v17784_v7, %v17898_v31  ;;  %v10321_v62 = vpop.eup %10320  ;;  %v12732_v39 = vand.u32 3, %v1826_v23  ;;  %v12740_v0 = vpop.f32.mrb[22].mxu1 }
 0x126   :  { %vm4318_vm0 = vcmp.eq.s32.totalorder %v12696_v29, 0  ;;  %vm4321_vm1 = vcmp.eq.s32.totalorder %v12696_v29, 2  ;;  %v1898_v46 = vadd.s32 536870912, %v1897_v3  ;;  %v17899_v2 = vand.u32 2147483647, %v12703_v44  ;;  %v9430_v58 = vpop.f32.mrb[23].mxu0 }
 0x127   :  { %v1816_v52 = vmul.f32 %v1815_v13, %v1813_v26  ;;  %vm1724_vm4 = vcmp.lt.s32.totalorder %v12676_v15, 2  ;;  %v1964_v4 = vshll.u32 %v17784_v7, %v17897_v25  ;;  %v1965_v13 = vshrl.u32 %v17785_v11, %v17898_v31 }
 0x128   :  { %v1948_v16 = vand.u32 8388607, %v17899_v2  ;;  %v1967_v23 = vshll.u32 %v17785_v11, %v17897_v25  ;;  %v1968_v26 = vshrl.u32 %v17786_v51, %v17898_v31  ;;  %v9484_v2 = vpop.f32.mrb[23].mxu1  ;;  %v1729_v30 = vxor.u32 2147483648, %v12684_v42 }
 0x129   :  { %v1817_v56 = vxor.u32 2147483648, %v1816_v52  ;;  %v12752_v43 = vshrl.u32 %v1898_v46, 30  ;;  %v1970_v60 = vshll.u32 %v17786_v51, %v17897_v25  ;;  %v1726_v20 = vxor.u32 2147483648, %v10321_v62 }
 0x12a   :  { %vm4317_vm6 = vcmp.lt.s32.totalorder %v12696_v29, 2  ;;  %v1960_v14 = vor.u32 %v1959_v27, %v1958_v5  ;;  %v1963_v47 = vor.u32 %v1962_v37, %v1961_v54  ;;  %v1971_v53 = vshrl.u32 %v17787_v36, %v17898_v31 }
 0x12b   :  { %v1818_v58 = vsel %vm1735_vm8, %v1817_v56, %v1816_v52  ;;  %v1900_v2 = vshll.u32 %v12752_v43, 30  ;;  %v1969_v59 = vor.u32 %v1968_v26, %v1967_v23  ;;  %vm1973_vm7 = vcmp.lt.s32.totalorder %v17900_v8, 1 }
 0x12c   :  { %vm1721_vm5 = vweird.f32 %v12170_v9  ;;  %v1821_v46 = vsel %vm12669_vm14, %v12389_v38, %v1818_v58  ;;  %v1966_v25 = vor.u32 %v1965_v13, %v1964_v4  ;;  %v1972_v5 = vor.u32 %v1971_v53, %v1970_v60 }
 0x12d   :  { %vm1976_vm11 = vcmp.lt.s32.totalorder %v17900_v8, 4  ;;  %10322 = vcosq.f32 %v1821_v46  ;;  %v12768_v54 = vsub.s32 %v1897_v3, %v1900_v2  ;;  %v1957_v56 = vshrl.u32 %v17782_v18, %v17898_v31 }
 0x12e   :  { %vm1975_vm8 = vcmp.lt.s32.totalorder %v17900_v8, 3  ;;  %10324 = vsinq.f32 %v1821_v46  ;;  %v1949_v27 = vor.u32 8388608, %v1948_v16  ;;  %vm1974_vm9 = vcmp.lt.s32.totalorder %v17900_v8, 2 }
 0x12f   :  { %v1981_v63 = vsel %vm1973_vm7, %v1960_v14, %v1963_v47  ;;  %v1727_v53 = vsel %vm1725_vm15, %v12684_v42, %v1726_v20  ;;  %v1730_v60 = vsel %vm1728_vm12, %v1729_v30, %v10321_v62  ;;  %v1903_v3 = vsub.s32 0, %v12768_v54 }
 0x130   :  { %v1982_v31 = vsel %vm1976_vm11, %v1969_v59, 920167782  ;;  %v1978_v16 = vsel %vm1976_vm11, %v1966_v25, 2102212464  ;;  %v1985_v52 = vsel %vm1973_vm7, %v1963_v47, %v1966_v25  ;;  %v1986_v4 = vsel %vm1976_vm11, %v1972_v5, 1326507024 }
 0x131   :  { %v1983_v37 = vsel %vm1975_vm8, %v1966_v25, %v1982_v31  ;;  %vm4420_vm10 = vcmp.lt.s32.totalorder %v12718_v6, 2  ;;  %vm4421_vm14 = vcmp.eq.s32.totalorder %v12718_v6, 0  ;;  %v8894_v13 = vmin.u32 %v1903_v3, %v12768_v54 }
 0x132   :  { %v1984_v23 = vsel %vm1974_vm9, %v1981_v63, %v1983_v37  ;;  %v1987_v26 = vsel %vm1975_vm8, %v1969_v59, %v1986_v4  ;;  %vm1825_vm13 = vweird.f32 %v12389_v38  ;;  %v4320_v58 = vsel %vm4318_vm0, %v12684_v42, %v1726_v20 }
 0x133   :  { %v4323_v2 = vsel %vm4321_vm1, %v1729_v30, %v10321_v62  ;;  %v1988_v46 = vsel %vm1974_vm9, %v1985_v52, %v1987_v26  ;;  %v1989_v25 = vshll.u32 %v1949_v27, 8  ;;  %v1731_v5 = vsel %vm1724_vm4, %v1727_v53, %v1730_v60 }
 0x134   :  { %v1905_v63 = vclz %v8894_v13  ;;  %v1977_v59 = vsel %vm1973_vm7, %v1957_v56, %v1960_v14  ;;  %v1979_v3 = vsel %vm1975_vm8, %v1963_v47, %v1978_v16  ;;  %vm1828_vm15 = vcmp.lt.s32.totalorder %v12732_v39, 2 }
 0x135   :  { %v12813_v31 = vmul.u32.u64.low %v1989_v25, %v1988_v46  ;;  %v12814_v37 = vmul.u32.u64.high %v1989_v25, %v1988_v46, %v12813_v31  ;;  %v12816_v20 = vmul.u32.u64.low %v1989_v25, %v1984_v23  ;;  %v12817_v42 = vmul.u32.u64.high %v1989_v25, %v1984_v23, %v12816_v20 }
 0x136   :  { %v4324_v30 = vsel %vm4317_vm6, %v4320_v58, %v4323_v2  ;;  %vm4424_vm12 = vcmp.eq.s32.totalorder %v12718_v6, 2  ;;  %v8895_v15 = vadd.s32 4294967294, %v1905_v63  ;;  %vm1829_vm0 = vcmp.eq.s32.totalorder %v12732_v39, 0 }
 0x137   :  { %vm1832_vm1 = vcmp.eq.s32.totalorder %v12732_v39, 2  ;;  %v12828_v47 = vadd.f32 %v12635_v1, %v12592_v12  ;;  %v12832_v14 = vadd.f32 %v12643_v21, %v12607_v22  ;;  %v10323_v62 = vpop.eup %10322  ;;  %v12836_v29 = vsel %vm1721_vm5, nan, %v1731_v5 }
 0x138   :  { %17903 = vst [vmem:[#allocation7_spill] sm:$0xff] %v12836_v29  ;;  %v1893_v56 = vadd.s32 %v12653_v33, %v12662_v19  ;;  %vm8896_vm4 = vcmp.lt.s32.totalorder %v8895_v15, 0  ;;  %v1980_v27 = vsel %vm1974_vm9, %v1977_v59, %v1979_v3  ;;  %v10325_v53 = vpop.eup %10324  ;;  %v1833_v60 = vxor.u32 2147483648, %v10323_v62 }
 0x139   :  { %17901 = vst [vmem:[#allocation57_spill] sm:$0xff] %v12828_v47  ;;  %17902 = vst [vmem:[#allocation56_spill] sm:$0xff] %v12832_v14  ;;  %v12844_v12 = vsel %vm1721_vm5, nan, %v4324_v30  ;;  %v1908_v22 = vsel %vm8896_vm4, 0, %v8895_v15  ;;  %vm1998_vm6 = vc.u32 %v12814_v37, %v12816_v20  ;;  %v1830_v1 = vxor.u32 2147483648, %v10325_v53 }
 0x13a   :  { %17904 = vst [vmem:[#allocation10_spill] sm:$0xff] %v12844_v12  ;;  %v1909_v21 = vsub.s32 32, %v1908_v22  ;;  %v1910_v16 = vshll.u32 %v12768_v54, %v1908_v22  ;;  %v1913_v52 = vsub.s32 4294967266, %v1908_v22  ;;  %v1834_v33 = vsel %vm1832_vm1, %v1833_v60, %v10325_v53 }
 0x13b   :  { %v4426_v8 = vsel %vm4424_vm12, %v1833_v60, %v10325_v53  ;;  %v1996_v19 = vmul.u32 %v1989_v25, %v1980_v27  ;;  %v1999_v9 = vadd.s32 1, %v12817_v42  ;;  %v1831_v4 = vsel %vm1829_vm0, %v10323_v62, %v1830_v1  ;;  %v17908_v27 = vld [vmem:[#allocation18_spill] sm:$0xff]  ;;  %v17909_v53 = vld [vmem:[#allocation24_spill] sm:$0xff] }
 0x13c   :  { %v4423_v13 = vsel %vm4421_vm14, %v10323_v62, %v1830_v1  ;;  %v1911_v23 = vshrl.u32 %v1893_v56, %v1909_v21  ;;  %v1914_v26 = vadd.s32 127, %v1913_v52  ;;  %vm2888_vm7 = vcmp.gt.s32.totalorder %v12674_v61, 0  ;;  %v12894_v56 = vld [vmem:[%s17717_s6 + $0x50] sm:$0xff] }
 0x13d   :  { %v1835_v54 = vsel %vm1828_vm15, %v1831_v4, %v1834_v33  ;;  %v4427_v58 = vsel %vm4420_vm10, %v4423_v13, %v4426_v8  ;;  %v2000_v2 = vsel %vm1998_vm6, %v1999_v9, %v12817_v42  ;;  %v12876_v39 = vshrl.u32 %v12682_v17, 5 }
 0x13e   :  { %v12869_v46 = vsel %vm1825_vm13, nan, %v1835_v54  ;;  %v12873_v25 = vsel %vm1825_vm13, nan, %v4427_v58  ;;  %v1912_v5 = vor.u32 %v1911_v23, %v1910_v16  ;;  %v1915_v63 = vshll.u32 %v1914_v26, 23 }
 0x13f   :  { %17905 = vst [vmem:[#allocation9_spill] sm:$0xff] %v12869_v46  ;;  %17906 = vst [vmem:[#allocation59_spill] sm:$0xff] %v12873_v25  ;;  %v6183_v6 = vpack.c.bf16 %v12869_v46, %v12836_v29  ;;  %v6400_v59 = vpack.c.bf16 %v12873_v25, %v12844_v12  ;;  %v2001_v3 = vadd.s32 %v2000_v2, %v1996_v19  ;;  %v12883_v31 = vand.u32 31, %v12682_v17 }
 0x140   :  { %v2889_v42 = vsel %vm2888_vm7, %v12674_v61, 0  ;;  %vm2992_vm5 = vcmp.gt.s32.totalorder %v12687_v50, 0  ;;  %v1916_v38 = vor.u32 4788187, %v1915_v63  ;;  %v17907_v30 = vand.u32 2139095040, %v12692_v40 }
 0x141   :  { %9638 = vmatmul.mubr.msk.bf16.gmra.mrb[116].mxu0 %vm17533_vm3, %v6183_v6  ;;  %9692 = vmatmul.mubr.msk.bf16.gmra.mrb[116].mxu1 %vm17533_vm3, %v6400_v59  ;;  %v2002_v62 = vadd.s32 536870912, %v2001_v3  ;;  %v17494_v17 = vand.u32 2147483647, %v12894_v56  ;;  %v2062_v61 = vshll.u32 %v17782_v18, %v17908_v27  ;;  %v1919_v40 = vcvt.s32.f32 %v1912_v5 }
 0x142   :  { %v3089_v15 = vshrl.u32 %v17907_v30, 23  ;;  %9641 = vmatprep.mubr.msk.bf16.mxu0 %vm17505_vm2, %v17760_v45  ;;  %9695 = vmatprep.mubr.msk.bf16.mxu1 %vm17505_vm2, %v17760_v45  ;;  %v2063_v60 = vshrl.u32 %v17783_v32, %v17909_v53  ;;  %v2065_v22 = vshll.u32 %v17783_v32, %v17908_v27  ;;  %v2066_v1 = vshrl.u32 %v17784_v7, %v17909_v53  ;;  %v17912_v30 = vld [vmem:[#allocation20_spill] sm:$0xff] }
 0x143   :  { %v1917_v21 = vand.u32 2147483647, %v1916_v38  ;;  %v12909_v16 = vshrl.u32 %v2002_v62, 30  ;;  %v2071_v52 = vshll.u32 %v17785_v11, %v17908_v27  ;;  %v2072_v33 = vshrl.u32 %v17786_v51, %v17909_v53 }
 0x144   :  { %v12916_v8 = vsub.s32 32, %v12883_v31  ;;  %v17910_v19 = vand.u32 2139095040, %v12712_v57  ;;  %v2068_v4 = vshll.u32 %v17784_v7, %v17908_v27  ;;  %v2069_v13 = vshrl.u32 %v17785_v11, %v17909_v53 }
 0x145   :  { %v12926_v23 = vshrl.u32 %v2889_v42, 5  ;;  %v1923_v26 = vsub.s32 4, %v12752_v43  ;;  %v2004_v54 = vshll.u32 %v12909_v16, 30  ;;  %v2052_v58 = vand.u32 8388607, %v17494_v17  ;;  %v13061_v17 = vpop.f32.mrb[24].mxu1 }
 0x146   :  { %v12920_v9 = vshrl.u32 %v17910_v19, 23  ;;  %v2064_v2 = vor.u32 %v2063_v60, %v2062_v61  ;;  %v2073_v5 = vor.u32 %v2072_v33, %v2071_v52  ;;  %v2074_v57 = vshll.u32 %v17786_v51, %v17908_v27 }
 0x147   :  { %17911 = vst [vmem:[#allocation61_spill] sm:$0xff] %v12926_v23  ;;  %v2075_v63 = vshrl.u32 %v17787_v36, %v17909_v53  ;;  %v1920_v6 = vmul.f32 %v1919_v40, %v1917_v21  ;;  %v12936_v59 = vsub.s32 %v2001_v3, %v2004_v54  ;;  %v2067_v38 = vor.u32 %v2066_v1, %v2065_v22 }
 0x148   :  { %vm2080_vm11 = vcmp.lt.s32.totalorder %v17912_v30, 4  ;;  %v12939_v62 = vand.u32 31, %v2889_v42  ;;  %vm1839_vm8 = vcmp.lt.s32.totalorder %v12567_v34, 0  ;;  %v2070_v19 = vor.u32 %v2069_v13, %v2068_v4 }
 0x149   :  { %vm2077_vm9 = vcmp.lt.s32.totalorder %v17912_v30, 1  ;;  %v2993_v27 = vsel %vm2992_vm5, %v12687_v50, 0  ;;  %v1924_v61 = vsel %vm1839_vm8, %v1923_v26, %v12752_v43  ;;  %v2007_v3 = vsub.s32 0, %v12936_v59 }
 0x14a   :  { %17913 = vst [vmem:[#allocation62_spill] sm:$0xff] %v12939_v62  ;;  %vm2079_vm10 = vcmp.lt.s32.totalorder %v17912_v30, 3  ;;  %v2053_v40 = vor.u32 8388608, %v2052_v58  ;;  %v2061_v42 = vshrl.u32 %v17782_v18, %v17909_v53  ;;  %v2076_v60 = vor.u32 %v2075_v63, %v2074_v57 }
 0x14b   :  { %v2086_v22 = vsel %vm2080_vm11, %v2073_v5, 920167782  ;;  %v1921_v1 = vxor.u32 2147483648, %v1920_v6  ;;  %v8898_v21 = vmin.u32 %v2007_v3, %v12936_v59  ;;  %vm2078_vm14 = vcmp.lt.s32.totalorder %v17912_v30, 2 }
 0x14c   :  { %v2085_v43 = vsel %vm2077_vm9, %v2064_v2, %v2067_v38  ;;  %v12959_v50 = vshrl.u32 %v2993_v27, 5  ;;  %v12961_v52 = vand.u32 31, %v2993_v27  ;;  %v12963_v33 = vadd.s32 4294967169, %v3089_v15 }
 0x14d   :  { %v2087_v53 = vsel %vm2079_vm10, %v2070_v19, %v2086_v22  ;;  %v17916_v4 = vand.u32 2147483647, %v12567_v34  ;;  %v2009_v26 = vclz %v8898_v21  ;;  %v2082_v54 = vsel %vm2080_vm11, %v2070_v19, 2102212464 }
 0x14e   :  { %17914 = vst [vmem:[#allocation8_spill] sm:$0xff] %v12959_v50  ;;  %17915 = vst [vmem:[#allocation13_spill] sm:$0xff] %v12961_v52  ;;  %v2089_v58 = vsel %vm2077_vm9, %v2067_v38, %v2070_v19  ;;  %v2088_v57 = vsel %vm2078_vm14, %v2085_v43, %v2087_v53  ;;  %v2090_v63 = vsel %vm2080_vm11, %v2076_v60, 1326507024  ;;  %v2093_v27 = vshll.u32 %v2053_v40, 8 }
 0x14f   :  { %vm12969_vm13 = vcmp.le.f32.partialorder %v17916_v4, 0.7853982  ;;  %v1922_v3 = vsel %vm1839_vm8, %v1921_v1, %v1920_v6  ;;  %v8899_v22 = vadd.s32 4294967294, %v2009_v26  ;;  %v2081_v21 = vsel %vm2077_vm9, %v2061_v42, %v2064_v2 }
 0x150   :  { %v1926_v15 = vsel %vm12969_vm13, 0, %v1924_v61  ;;  %v2091_v19 = vsel %vm2079_vm10, %v2073_v5, %v2090_v63  ;;  %v2083_v61 = vsel %vm2079_vm10, %v2067_v38, %v2082_v54  ;;  %v1997_v6 = vadd.s32 %v12816_v20, %v12814_v37 }
 0x151   :  { %v2092_v43 = vsel %vm2078_vm14, %v2089_v58, %v2091_v19  ;;  %v12993_v53 = vmul.u32.u64.low %v2093_v27, %v2088_v57  ;;  %v12994_v4 = vmul.u32.u64.high %v2093_v27, %v2088_v57, %v12993_v53  ;;  %vm8900_vm15 = vcmp.lt.s32.totalorder %v8899_v22, 0 }
 0x152   :  { %v12999_v40 = vmul.u32.u64.low %v2093_v27, %v2092_v43  ;;  %v13000_v60 = vmul.u32.u64.high %v2093_v27, %v2092_v43, %v12999_v40  ;;  %v1925_v2 = vsel %vm12969_vm13, %v12567_v34, %v1922_v3  ;;  %v1930_v5 = vadd.s32 3, %v1926_v15 }
 0x153   :  { %v2012_v38 = vsel %vm8900_vm15, 0, %v8899_v22  ;;  %v2027_v42 = vsub.s32 4, %v12909_v16  ;;  %v2084_v58 = vsel %vm2078_vm14, %v2081_v21, %v2083_v61  ;;  %v13010_v37 = vsub.s32 32, %v12939_v62  ;;  %v13033_v61 = vld [vmem:[%s17717_s6 + $0x58] sm:$0xff] }
 0x154   :  { %v2013_v1 = vsub.s32 32, %v2012_v38  ;;  %v2014_v26 = vshll.u32 %v12936_v59, %v2012_v38  ;;  %v2017_v54 = vsub.s32 4294967266, %v2012_v38  ;;  %v13013_v20 = vadd.s32 4294967169, %v12920_v9  ;;  %v17923_v40 = vld [vmem:[#allocation21_spill] sm:$0xff] }
 0x155   :  { %17919 = vst [vmem:[#allocation11_spill] sm:$0xff] %v13010_v37  ;;  %vm1943_vm12 = vcmp.lt.s32.totalorder %v12703_v44, 0  ;;  %v2103_v13 = vadd.s32 1, %v12994_v4  ;;  %10326 = vcosq.f32 %v1925_v2  ;;  %v17920_v57 = vand.u32 2147483647, %v12703_v44 }
 0x156   :  { %v2015_v59 = vshrl.u32 %v1997_v6, %v2013_v1  ;;  %v2018_v30 = vadd.s32 127, %v2017_v54  ;;  %10328 = vsinq.f32 %v1925_v2  ;;  %v13023_v3 = vand.u32 3, %v1930_v5  ;;  %v17924_v2 = vld [vmem:[#allocation28_spill] sm:$0xff] }
 0x157   :  { %vm13019_vm0 = vcmp.le.f32.partialorder %v17920_v57, 0.7853982  ;;  %v2100_v22 = vmul.u32 %v2093_v27, %v2084_v58  ;;  %vm2102_vm1 = vc.u32 %v13000_v60, %v12993_v53  ;;  %v2028_v19 = vsel %vm1943_vm12, %v2027_v42, %v12909_v16 }
 0x158   :  { %v2016_v9 = vor.u32 %v2015_v59, %v2014_v26  ;;  %v2019_v21 = vshll.u32 %v2018_v30, 23  ;;  %v17495_v43 = vand.u32 2147483647, %v13033_v61  ;;  %v2104_v6 = vsel %vm2102_vm1, %v2103_v13, %v12994_v4 }
 0x159   :  { %v2166_v27 = vshll.u32 %v17782_v18, %v17923_v40  ;;  %v2167_v5 = vshrl.u32 %v17783_v32, %v17924_v2  ;;  %v2169_v38 = vshll.u32 %v17783_v32, %v17923_v40  ;;  %v2170_v42 = vshrl.u32 %v17784_v7, %v17924_v2 }
 0x15a   :  { %v2020_v1 = vor.u32 4788187, %v2019_v21  ;;  %v2023_v16 = vcvt.s32.f32 %v2016_v9  ;;  %v2172_v26 = vshll.u32 %v17784_v7, %v17923_v40  ;;  %v2030_v4 = vsel %vm13019_vm0, 0, %v2028_v19  ;;  %v13059_v21 = vpop.f32.mrb[24].mxu0 }
 0x15b   :  { %v13049_v54 = vand.u32 3, %v1926_v15  ;;  %v2105_v58 = vadd.s32 %v2104_v6, %v2100_v22  ;;  %v2173_v13 = vshrl.u32 %v17785_v11, %v17924_v2  ;;  %v2156_v59 = vand.u32 8388607, %v17495_v43  ;;  %v9487_v43 = vpop.f32.mrb[25].mxu1 }
 0x15c   :  { %v2021_v57 = vand.u32 2147483647, %v2020_v1  ;;  %v2175_v30 = vshll.u32 %v17785_v11, %v17923_v40  ;;  %v2176_v9 = vshrl.u32 %v17786_v51, %v17924_v2  ;;  %v2168_v19 = vor.u32 %v2167_v5, %v2166_v27  ;;  %v9433_v1 = vpop.f32.mrb[25].mxu0  ;;  %v13069_v29 = vpop.f32.mrb[26].mxu1  ;;  %v17925_v43 = vld [vmem:[#allocation26_spill] sm:$0xff] }
 0x15d   :  { %v2106_v15 = vadd.s32 536870912, %v2105_v58  ;;  %v2178_v22 = vshll.u32 %v17786_v51, %v17923_v40  ;;  %v2179_v6 = vshrl.u32 %v17787_v36, %v17924_v2  ;;  %v2171_v47 = vor.u32 %v2170_v42, %v2169_v38  ;;  %v13067_v46 = vpop.f32.mrb[26].mxu0  ;;  %v9488_v38 = vpop.f32.mrb[27].mxu1 }
 0x15e   :  { %v2024_v14 = vmul.f32 %v2023_v16, %v2021_v57  ;;  %v2174_v25 = vor.u32 %v2173_v13, %v2172_v26  ;;  %v2177_v12 = vor.u32 %v2176_v9, %v2175_v30  ;;  %vm1933_vm4 = vcmp.eq.s32.totalorder %v13023_v3, 0  ;;  %v9434_v5 = vpop.f32.mrb[27].mxu0 }
 0x15f   :  { %vm1936_vm6 = vcmp.eq.s32.totalorder %v13023_v3, 2  ;;  %v2034_v27 = vadd.s32 3, %v2030_v4  ;;  %vm4524_vm7 = vcmp.eq.s32.totalorder %v13049_v54, 0  ;;  %vm4527_vm5 = vcmp.eq.s32.totalorder %v13049_v54, 2  ;;  %v10327_v16 = vpop.eup %10326 }
 0x160   :  { %v13075_v40 = vshrl.u32 %v2106_v15, 30  ;;  %vm2181_vm11 = vcmp.lt.s32.totalorder %v17925_v43, 1  ;;  %vm2183_vm8 = vcmp.lt.s32.totalorder %v17925_v43, 3  ;;  %v2025_v42 = vxor.u32 2147483648, %v2024_v14  ;;  %v10329_v57 = vpop.eup %10328 }
 0x161   :  { %v13079_v26 = vand.u32 3, %v2030_v4  ;;  %v2180_v13 = vor.u32 %v2179_v6, %v2178_v22  ;;  %vm2184_vm9 = vcmp.lt.s32.totalorder %v17925_v43, 4  ;;  %v2157_v9 = vor.u32 8388608, %v2156_v59 }
 0x162   :  { %v2108_v30 = vshll.u32 %v13075_v40, 30  ;;  %v2165_v15 = vshrl.u32 %v17782_v18, %v17924_v2  ;;  %v2190_v1 = vsel %vm2184_vm9, %v2177_v12, 920167782  ;;  %vm1932_vm10 = vcmp.lt.s32.totalorder %v13023_v3, 2 }
 0x163   :  { %v2026_v5 = vsel %vm1943_vm12, %v2025_v42, %v2024_v14  ;;  %vm4523_vm14 = vcmp.lt.s32.totalorder %v13049_v54, 2  ;;  %vm2182_vm13 = vcmp.lt.s32.totalorder %v17925_v43, 2  ;;  %v2189_v4 = vsel %vm2181_vm11, %v2168_v19, %v2171_v47 }
 0x164   :  { %v2191_v59 = vsel %vm2183_vm8, %v2174_v25, %v2190_v1  ;;  %v2029_v2 = vsel %vm13019_vm0, %v12703_v44, %v2026_v5  ;;  %v13099_v22 = vsub.s32 %v2105_v58, %v2108_v30  ;;  %v2186_v6 = vsel %vm2184_vm9, %v2174_v25, 2102212464 }
 0x165   :  { %v2193_v14 = vsel %vm2181_vm11, %v2171_v47, %v2174_v25  ;;  %v1934_v38 = vxor.u32 2147483648, %v10329_v57  ;;  %v1937_v42 = vxor.u32 2147483648, %v10327_v16  ;;  %10330 = vcosq.f32 %v2029_v2 }
 0x166   :  { %v2194_v50 = vsel %vm2184_vm9, %v2180_v13, 1326507024  ;;  %vm1929_vm15 = vweird.f32 %v12567_v34  ;;  %10332 = vsinq.f32 %v2029_v2  ;;  %v2111_v63 = vsub.s32 0, %v13099_v22 }
 0x167   :  { %v2192_v58 = vsel %vm2182_vm13, %v2189_v4, %v2191_v59  ;;  %v2195_v30 = vsel %vm2183_vm8, %v2177_v12, %v2194_v50  ;;  %v2185_v25 = vsel %vm2181_vm11, %v2165_v15, %v2168_v19  ;;  %v2187_v1 = vsel %vm2183_vm8, %v2171_v47, %v2186_v6 }
 0x168   :  { %v2196_v13 = vsel %vm2182_vm13, %v2193_v14, %v2195_v30  ;;  %v2197_v5 = vshll.u32 %v2157_v9, 8  ;;  %v2035_v23 = vand.u32 3, %v2034_v27  ;;  %v8902_v2 = vmin.u32 %v2111_v63, %v13099_v22 }
 0x169   :  { %v13122_v28 = vadd.f32 %v12722_v24, %v12720_v49  ;;  %v13126_v12 = vadd.f32 %v12740_v0, %v12738_v35  ;;  %vm2033_vm12 = vweird.f32 %v12703_v44  ;;  %vm4626_vm0 = vcmp.lt.s32.totalorder %v13079_v26, 2 }
 0x16a   :  { %v13128_v50 = vmul.u32.u64.low %v2197_v5, %v2196_v13  ;;  %v13129_v19 = vmul.u32.u64.high %v2197_v5, %v2196_v13, %v13128_v50  ;;  %v13131_v15 = vmul.u32.u64.low %v2197_v5, %v2192_v58  ;;  %v13132_v47 = vmul.u32.u64.high %v2197_v5, %v2192_v58, %v13131_v15 }
 0x16b   :  { %17926 = vst [vmem:[#allocation12_spill] sm:$0xff] %v13122_v28  ;;  %17927 = vst [vmem:[#allocation15_spill] sm:$0xff] %v13126_v12  ;;  %vm2047_vm1 = vcmp.lt.s32.totalorder %v12894_v56, 0  ;;  %v2113_v27 = vclz %v8902_v2  ;;  %v2188_v24 = vsel %vm2182_vm13, %v2185_v25, %v2187_v1  ;;  %v1935_v0 = vsel %vm1933_vm4, %v10327_v16, %v1934_v38 }
 0x16c   :  { %v1938_v35 = vsel %vm1936_vm6, %v1937_v42, %v10329_v57  ;;  %v4526_v49 = vsel %vm4524_vm7, %v10327_v16, %v1934_v38  ;;  %v4529_v9 = vsel %vm4527_vm5, %v1937_v42, %v10329_v57  ;;  %vm2036_vm11 = vcmp.lt.s32.totalorder %v2035_v23, 2 }
 0x16d   :  { %vm4627_vm8 = vcmp.eq.s32.totalorder %v13079_v26, 0  ;;  %vm4630_vm9 = vcmp.eq.s32.totalorder %v13079_v26, 2  ;;  %v8903_v4 = vadd.s32 4294967294, %v2113_v27  ;;  %vm2037_vm2 = vcmp.eq.s32.totalorder %v2035_v23, 0 }
 0x16e   :  { %v2204_v43 = vmul.u32 %v2197_v5, %v2188_v24  ;;  %vm2206_vm4 = vc.u32 %v13129_v19, %v13131_v15  ;;  %v2207_v59 = vadd.s32 1, %v13132_v47  ;;  %v1939_v6 = vsel %vm1932_vm10, %v1935_v0, %v1938_v35 }
 0x16f   :  { %v4530_v16 = vsel %vm4523_vm14, %v4526_v49, %v4529_v9  ;;  %v2101_v57 = vadd.s32 %v12993_v53, %v13000_v60  ;;  %vm8904_vm6 = vcmp.lt.s32.totalorder %v8903_v4, 0  ;;  %v10331_v14 = vpop.eup %10330  ;;  %vm2040_vm7 = vcmp.eq.s32.totalorder %v2035_v23, 2 }
 0x170   :  { %v2116_v38 = vsel %vm8904_vm6, 0, %v8903_v4  ;;  %v2131_v42 = vsub.s32 4, %v13075_v40  ;;  %v2208_v63 = vsel %vm2206_vm4, %v2207_v59, %v13132_v47  ;;  %v10333_v58 = vpop.eup %10332  ;;  %v2041_v30 = vxor.u32 2147483648, %v10331_v14 }
 0x171   :  { %v2117_v25 = vsub.s32 32, %v2116_v38  ;;  %v2118_v3 = vshll.u32 %v13099_v22, %v2116_v38  ;;  %v2121_v1 = vsub.s32 4294967266, %v2116_v38  ;;  %v13164_v54 = vsel %vm1929_vm15, nan, %v1939_v6  ;;  %v13209_v38 = vld [vmem:[%s17717_s6 + $0x60] sm:$0xff] }
 0x172   :  { %17928 = vst [vmem:[#allocation14_spill] sm:$0xff] %v13164_v54  ;;  %v2038_v13 = vxor.u32 2147483648, %v10333_v58  ;;  %v13168_v53 = vsel %vm1929_vm15, nan, %v4530_v16  ;;  %v2209_v60 = vadd.s32 %v2208_v63, %v2204_v43  ;;  %v2042_v5 = vsel %vm2040_vm7, %v2041_v30, %v10333_v58  ;;  %v17935_v63 = vld [vmem:[#allocation22_spill] sm:$0xff] }
 0x173   :  { %17929 = vst [vmem:[#allocation37_spill] sm:$0xff] %v13168_v53  ;;  %v4632_v2 = vsel %vm4630_vm9, %v2041_v30, %v10333_v58  ;;  %v2119_v50 = vshrl.u32 %v2101_v57, %v2117_v25  ;;  %v2122_v47 = vadd.s32 127, %v2121_v1  ;;  %v2132_v24 = vsel %vm2047_vm1, %v2131_v42, %v13075_v40  ;;  %v17936_v25 = vld [vmem:[#allocation30_spill] sm:$0xff] }
 0x174   :  { %v2039_v27 = vsel %vm2037_vm2, %v10331_v14, %v2038_v13  ;;  %v4629_v22 = vsel %vm4627_vm8, %v10331_v14, %v2038_v13  ;;  %v2210_v0 = vadd.s32 536870912, %v2209_v60  ;;  %v17932_v59 = vand.u32 2147483647, %v12894_v56 }
 0x175   :  { %v2043_v34 = vsel %vm2036_vm11, %v2039_v27, %v2042_v5  ;;  %v4633_v35 = vsel %vm4626_vm0, %v4629_v22, %v4632_v2  ;;  %v2120_v49 = vor.u32 %v2119_v50, %v2118_v3  ;;  %v2123_v9 = vshll.u32 %v2122_v47, 23  ;;  %v13225_v5 = vld [vmem:[%s17717_s6 + $0xb0] sm:$0xff] }
 0x176   :  { %v13183_v4 = vsel %vm2033_vm12, nan, %v2043_v34  ;;  %v13187_v43 = vsel %vm2033_vm12, nan, %v4633_v35  ;;  %vm13191_vm2 = vcmp.le.f32.partialorder %v17932_v59, 0.7853982  ;;  %v13195_v23 = vshrl.u32 %v2210_v0, 30 }
 0x177   :  { %17930 = vst [vmem:[#allocation42_spill] sm:$0xff] %v13183_v4  ;;  %17931 = vst [vmem:[#allocation43_spill] sm:$0xff] %v13187_v43  ;;  %v6184_v26 = vpack.c.bf16 %v13183_v4, %v13164_v54  ;;  %v6401_v6 = vpack.c.bf16 %v13187_v43, %v13168_v53  ;;  %v2124_v16 = vor.u32 4788187, %v2123_v9  ;;  %v13203_v44 = vsel %vm13191_vm2, 0, %v2132_v24 }
 0x178   :  { %v2127_v57 = vcvt.s32.f32 %v2120_v49  ;;  %v2212_v14 = vshll.u32 %v13195_v23, 30  ;;  %v17507_v42 = vand.u32 2147483647, %v13209_v38  ;;  %v2270_v58 = vshll.u32 %v17782_v18, %v17935_v63 }
 0x179   :  { %9642 = vmatmul.mubr.msk.bf16.gmra.mrb[120].mxu0 %vm17533_vm3, %v6184_v26  ;;  %9696 = vmatmul.mubr.msk.bf16.gmra.mrb[120].mxu1 %vm17533_vm3, %v6401_v6  ;;  %v2125_v30 = vand.u32 2147483647, %v2124_v16  ;;  %v2271_v3 = vshrl.u32 %v17783_v32, %v17936_v25  ;;  %v2273_v1 = vshll.u32 %v17783_v32, %v17935_v63  ;;  %v2274_v13 = vshrl.u32 %v17784_v7, %v17936_v25 }
 0x17a   :  { %vm17937_vm5 = vmmov 0   ;;  %v13232_v50 = vsub.s32 %v2209_v60, %v2212_v14  ;;  %v2279_v47 = vshll.u32 %v17785_v11, %v17935_v63  ;;  %v2280_v27 = vshrl.u32 %v17786_v51, %v17936_v25 }
 0x17b   :  { %9645 = vmatprep.mubr.msk.bf16.mxu0 %vm17937_vm5, %v17760_v45  ;;  %9699 = vmatprep.mubr.msk.bf16.mxu1 %vm17937_vm5, %v17760_v45  ;;  %v2128_v22 = vmul.f32 %v2127_v57, %v2125_v30  ;;  %v2276_v24 = vshll.u32 %v17784_v7, %v17935_v63  ;;  %v2277_v0 = vshrl.u32 %v17785_v11, %v17936_v25  ;;  %v2138_v35 = vadd.s32 3, %v13203_v44  ;;  %v17938_v30 = vld [vmem:[#allocation29_spill] sm:$0xff] }
 0x17c   :  { %v2282_v34 = vshll.u32 %v17786_v51, %v17935_v63  ;;  %vm2151_vm10 = vcmp.lt.s32.totalorder %v13033_v61, 0  ;;  %v2215_v60 = vsub.s32 0, %v13232_v50  ;;  %v2260_v49 = vand.u32 8388607, %v17507_v42 }
 0x17d   :  { %v2283_v9 = vshrl.u32 %v17787_v36, %v17936_v25  ;;  %v2129_v59 = vxor.u32 2147483648, %v2128_v22  ;;  %v2269_v26 = vshrl.u32 %v17782_v18, %v17936_v25  ;;  %v2272_v6 = vor.u32 %v2271_v3, %v2270_v58 }
 0x17e   :  { %v2275_v16 = vor.u32 %v2274_v13, %v2273_v1  ;;  %v2205_v57 = vadd.s32 %v13131_v15, %v13129_v19  ;;  %v8906_v14 = vmin.u32 %v2215_v60, %v13232_v50  ;;  %v2281_v63 = vor.u32 %v2280_v27, %v2279_v47 }
 0x17f   :  { %vm2285_vm14 = vcmp.lt.s32.totalorder %v17938_v30, 1  ;;  %v2130_v42 = vsel %vm2047_vm1, %v2129_v59, %v2128_v22  ;;  %v2278_v2 = vor.u32 %v2277_v0, %v2276_v24  ;;  %v2284_v12 = vor.u32 %v2283_v9, %v2282_v34 }
 0x180   :  { %vm2288_vm13 = vcmp.lt.s32.totalorder %v17938_v30, 4  ;;  %v2133_v58 = vsel %vm13191_vm2, %v12894_v56, %v2130_v42  ;;  %v2217_v25 = vclz %v8906_v14  ;;  %v2261_v3 = vor.u32 8388608, %v2260_v49 }
 0x181   :  { %vm2287_vm15 = vcmp.lt.s32.totalorder %v17938_v30, 3  ;;  %v2235_v19 = vsub.s32 4, %v13195_v23  ;;  %vm2286_vm12 = vcmp.lt.s32.totalorder %v17938_v30, 2  ;;  %v2290_v15 = vsel %vm2288_vm13, %v2278_v2, 2102212464 }
 0x182   :  { %v2293_v1 = vsel %vm2285_vm14, %v2272_v6, %v2275_v16  ;;  %10334 = vcosq.f32 %v2133_v58  ;;  %v8907_v13 = vadd.s32 4294967294, %v2217_v25  ;;  %v2289_v40 = vsel %vm2285_vm14, %v2269_v26, %v2272_v6 }
 0x183   :  { %v2294_v42 = vsel %vm2288_vm13, %v2281_v63, 920167782  ;;  %v2291_v47 = vsel %vm2287_vm15, %v2275_v16, %v2290_v15  ;;  %v2297_v22 = vsel %vm2285_vm14, %v2275_v16, %v2278_v2  ;;  %v2298_v24 = vsel %vm2288_vm13, %v2284_v12, 1326507024  ;;  %v10460_v15 = vld [vmem:[%s17717_s6 + $0xb8] sm:$0xff] }
 0x184   :  { %v2295_v27 = vsel %vm2287_vm15, %v2278_v2, %v2294_v42  ;;  %vm8908_vm0 = vcmp.lt.s32.totalorder %v8907_v13, 0  ;;  %v2299_v34 = vsel %vm2287_vm15, %v2281_v63, %v2298_v24  ;;  %v2301_v60 = vshll.u32 %v2261_v3, 8  ;;  %v13324_v24 = vld [vmem:[%s17717_s6 + $0xc0] sm:$0xff] }
 0x185   :  { %v2296_v0 = vsel %vm2286_vm12, %v2293_v1, %v2295_v27  ;;  %10336 = vsinq.f32 %v2133_v58  ;;  %v2220_v49 = vsel %vm8908_vm0, 0, %v8907_v13  ;;  %v2236_v9 = vsel %vm2151_vm10, %v2235_v19, %v13195_v23 }
 0x186   :  { %v2300_v59 = vsel %vm2286_vm12, %v2297_v22, %v2299_v34  ;;  %v2221_v26 = vsub.s32 32, %v2220_v49  ;;  %v2222_v2 = vshll.u32 %v13232_v50, %v2220_v49  ;;  %v2225_v6 = vsub.s32 4294967266, %v2220_v49 }
 0x187   :  { %v2292_v12 = vsel %vm2286_vm12, %v2289_v40, %v2291_v47  ;;  %v13288_v16 = vmul.u32.u64.low %v2301_v60, %v2300_v59  ;;  %v13289_v14 = vmul.u32.u64.high %v2301_v60, %v2300_v59, %v13288_v16  ;;  %v13296_v25 = vsub.s32 32, %v12961_v52 }
 0x188   :  { %v13291_v63 = vmul.u32.u64.low %v2301_v60, %v2296_v0  ;;  %v13292_v58 = vmul.u32.u64.high %v2301_v60, %v2296_v0, %v13291_v63  ;;  %v17940_v23 = vand.u32 2147483647, %v13033_v61  ;;  %v2223_v50 = vshrl.u32 %v2205_v57, %v2221_v26  ;;  %v13342_v26 = vld [vmem:[%s17717_s6 + $0x68] sm:$0xff]  ;;  %v13348_v16 = vpop.f32.mrb[28].mxu0 }
 0x189   :  { %17939 = vst [vmem:[#allocation58_spill] sm:$0xff] %v13296_v25  ;;  %v2226_v19 = vadd.s32 127, %v2225_v6  ;;  %v13305_v30 = vadd.s32 1, %v12963_v33  ;;  %v3400_v1 = vand.u32 2139095040, %v10460_v15  ;;  %v13310_v13 = vand.u32 3, %v2138_v35  ;;  %v17945_v15 = vld [vmem:[#allocation32_spill] sm:$0xff] }
 0x18a   :  { %vm13300_vm1 = vcmp.le.f32.partialorder %v17940_v23, 0.7853982  ;;  %v13315_v42 = vadd.s32 1, %v13013_v20  ;;  %v2224_v47 = vor.u32 %v2223_v50, %v2222_v2  ;;  %v2308_v57 = vmul.u32 %v2301_v60, %v2292_v12  ;;  %v13350_v23 = vpop.f32.mrb[28].mxu1 }
 0x18b   :  { %v2238_v40 = vsel %vm13300_vm1, 0, %v2236_v9  ;;  %v2227_v27 = vshll.u32 %v2226_v19, 23  ;;  %v17943_v22 = vand.u32 2139095040, %v13225_v5  ;;  %vm2310_vm11 = vc.u32 %v13289_v14, %v13291_v63 }
 0x18c   :  { %v2311_v20 = vadd.s32 1, %v13292_v58  ;;  %v13330_v0 = vpop.eup %10334  ;;  %v2231_v60 = vcvt.s32.f32 %v2224_v47  ;;  %v2242_v49 = vadd.s32 3, %v2238_v40  ;;  %v13333_v5 = vand.u32 3, %v13203_v44 }
 0x18d   :  { %v13319_v33 = vshrl.u32 %v17943_v22, 23  ;;  %v2228_v34 = vor.u32 4788187, %v2227_v27  ;;  %v13335_v9 = vshrl.u32 %v3400_v1, 23  ;;  %vm2141_vm8 = vcmp.eq.s32.totalorder %v13310_v13, 0  ;;  %v9437_v27 = vpop.f32.mrb[29].mxu0 }
 0x18e   :  { %v2312_v59 = vsel %vm2310_vm11, %v2311_v20, %v13292_v58  ;;  %vm2144_vm9 = vcmp.eq.s32.totalorder %v13310_v13, 2  ;;  %v13346_v12 = vand.u32 3, %v2238_v40  ;;  %v17944_v58 = vld [vmem:[#allocation23_spill] sm:$0xff]  ;;  %v2375_v1 = vshrl.u32 %v17783_v32, %v17945_v15  ;;  %v13368_v35 = vpop.f32.mrb[30].mxu0 }
 0x18f   :  { %v2229_v6 = vand.u32 2147483647, %v2228_v34  ;;  %v2313_v44 = vadd.s32 %v2312_v59, %v2308_v57  ;;  %v13352_v50 = vpop.eup %10336  ;;  %v2374_v19 = vshll.u32 %v17782_v18, %v17944_v58  ;;  %v2377_v47 = vshll.u32 %v17783_v32, %v17944_v58  ;;  %v9491_v57 = vpop.f32.mrb[29].mxu1 }
 0x190   :  { %v2378_v40 = vshrl.u32 %v17784_v7, %v17945_v15  ;;  %v13362_v20 = vand.u32 3, %v2242_v49  ;;  %vm4730_vm4 = vcmp.eq.s32.totalorder %v13333_v5, 0  ;;  %vm4733_vm6 = vcmp.eq.s32.totalorder %v13333_v5, 2  ;;  %v13370_v2 = vpop.f32.mrb[30].mxu1  ;;  %v9438_v28 = vpop.f32.mrb[31].mxu0 }
 0x191   :  { %v2232_v22 = vmul.f32 %v2231_v60, %v2229_v6  ;;  %v2314_v34 = vadd.s32 536870912, %v2313_v44  ;;  %v2383_v59 = vshll.u32 %v17785_v11, %v17944_v58  ;;  %vm2140_vm7 = vcmp.lt.s32.totalorder %v13310_v13, 2  ;;  %v9492_v43 = vpop.f32.mrb[31].mxu1 }
 0x192   :  { %v17946_v27 = vand.u32 2147483647, %v13342_v26  ;;  %v2380_v60 = vshll.u32 %v17784_v7, %v17944_v58  ;;  %v2381_v49 = vshrl.u32 %v17785_v11, %v17945_v15  ;;  %v2384_v6 = vshrl.u32 %v17786_v51, %v17945_v15 }
 0x193   :  { %v2145_v4 = vxor.u32 2147483648, %v13330_v0  ;;  %v2233_v53 = vxor.u32 2147483648, %v2232_v22  ;;  %v13382_v54 = vshrl.u32 %v2314_v34, 30  ;;  %v2386_v25 = vshll.u32 %v17786_v51, %v17944_v58  ;;  %v17947_v34 = vld [vmem:[#allocation31_spill] sm:$0xff] }
 0x194   :  { %v2364_v57 = vand.u32 8388607, %v17946_v27  ;;  %v2142_v27 = vxor.u32 2147483648, %v13352_v50  ;;  %vm4729_vm2 = vcmp.lt.s32.totalorder %v13333_v5, 2  ;;  %v2376_v52 = vor.u32 %v2375_v1, %v2374_v19 }
 0x195   :  { %v2379_v37 = vor.u32 %v2378_v40, %v2377_v47  ;;  %v2387_v62 = vshrl.u32 %v17787_v36, %v17945_v15  ;;  %v2234_v28 = vsel %vm2151_vm10, %v2233_v53, %v2232_v22  ;;  %v2316_v43 = vshll.u32 %v13382_v54, 30 }
 0x196   :  { %v2385_v48 = vor.u32 %v2384_v6, %v2383_v59  ;;  %vm2389_vm14 = vcmp.lt.s32.totalorder %v17947_v34, 1  ;;  %vm2137_vm13 = vweird.f32 %v12894_v56  ;;  %v2237_v58 = vsel %vm13300_vm1, %v13033_v61, %v2234_v28 }
 0x197   :  { %v2382_v55 = vor.u32 %v2381_v49, %v2380_v60  ;;  %v2388_v19 = vor.u32 %v2387_v62, %v2386_v25  ;;  %vm2392_vm15 = vcmp.lt.s32.totalorder %v17947_v34, 4  ;;  %10338 = vcosq.f32 %v2237_v58 }
 0x198   :  { %v13399_v1 = vsub.s32 %v2313_v44, %v2316_v43  ;;  %v2373_v53 = vshrl.u32 %v17782_v18, %v17945_v15  ;;  %vm2391_vm10 = vcmp.lt.s32.totalorder %v17947_v34, 3  ;;  %10340 = vsinq.f32 %v2237_v58 }
 0x199   :  { %v2365_v47 = vor.u32 8388608, %v2364_v57  ;;  %vm2390_vm12 = vcmp.lt.s32.totalorder %v17947_v34, 2  ;;  %v2397_v3 = vsel %vm2389_vm14, %v2376_v52, %v2379_v37  ;;  %v2143_v62 = vsel %vm2141_vm8, %v13330_v0, %v2142_v27 }
 0x19a   :  { %v2146_v25 = vsel %vm2144_vm9, %v2145_v4, %v13352_v50  ;;  %v2319_v44 = vsub.s32 0, %v13399_v1  ;;  %v2398_v15 = vsel %vm2392_vm15, %v2385_v48, 920167782  ;;  %v2394_v40 = vsel %vm2392_vm15, %v2382_v55, 2102212464 }
 0x19b   :  { %v2399_v22 = vsel %vm2391_vm10, %v2382_v55, %v2398_v15  ;;  %v2401_v59 = vsel %vm2389_vm14, %v2379_v37, %v2382_v55  ;;  %v2402_v57 = vsel %vm2392_vm15, %v2388_v19, 1326507024  ;;  %vm3096_vm0 = vcmp.gt.s32.totalorder %v13305_v30, 0 }
 0x19c   :  { %vm4832_vm1 = vcmp.lt.s32.totalorder %v13346_v12, 2  ;;  %vm4833_vm11 = vcmp.eq.s32.totalorder %v13346_v12, 0  ;;  %v8910_v60 = vmin.u32 %v2319_v44, %v13399_v1  ;;  %v2400_v49 = vsel %vm2390_vm12, %v2397_v3, %v2399_v22 }
 0x19d   :  { %v2403_v6 = vsel %vm2391_vm10, %v2385_v48, %v2402_v57  ;;  %vm2241_vm8 = vweird.f32 %v13033_v61  ;;  %v4732_v55 = vsel %vm4730_vm4, %v13330_v0, %v2142_v27  ;;  %v4735_v28 = vsel %vm4733_vm6, %v2145_v4, %v13352_v50 }
 0x19e   :  { %v2404_v43 = vsel %vm2390_vm12, %v2401_v59, %v2403_v6  ;;  %v2405_v58 = vshll.u32 %v2365_v47, 8  ;;  %vm3200_vm9 = vcmp.gt.s32.totalorder %v13315_v42, 0  ;;  %v2147_v19 = vsel %vm2140_vm7, %v2143_v62, %v2146_v25 }
 0x19f   :  { %v2321_v48 = vclz %v8910_v60  ;;  %v2393_v3 = vsel %vm2389_vm14, %v2373_v53, %v2376_v52  ;;  %v2395_v0 = vsel %vm2391_vm10, %v2379_v37, %v2394_v40  ;;  %vm2244_vm4 = vcmp.lt.s32.totalorder %v13362_v20, 2 }
 0x1a0   :  { %v13448_v27 = vmul.u32.u64.low %v2405_v58, %v2404_v43  ;;  %v13449_v44 = vmul.u32.u64.high %v2405_v58, %v2404_v43, %v13448_v27  ;;  %v13451_v4 = vmul.u32.u64.low %v2405_v58, %v2400_v49  ;;  %v13452_v50 = vmul.u32.u64.high %v2405_v58, %v2400_v49, %v13451_v4 }
 0x1a1   :  { %v4736_v13 = vsel %vm4729_vm2, %v4732_v55, %v4735_v28  ;;  %vm4836_vm6 = vcmp.eq.s32.totalorder %v13346_v12, 2  ;;  %v8911_v47 = vadd.s32 4294967294, %v2321_v48  ;;  %vm2245_vm7 = vcmp.eq.s32.totalorder %v13362_v20, 0  ;;  %v10339_v53 = vpop.eup %10338 }
 0x1a2   :  { %vm2248_vm14 = vcmp.eq.s32.totalorder %v13362_v20, 2  ;;  %v13463_v52 = vadd.f32 %v13061_v17, %v13059_v21  ;;  %v13467_v37 = vadd.f32 %v13069_v29, %v13067_v46  ;;  %v13471_v5 = vsel %vm2137_vm13, nan, %v2147_v19  ;;  %v10341_v15 = vpop.eup %10340 }
 0x1a3   :  { %17950 = vst [vmem:[#allocation17_spill] sm:$0xff] %v13471_v5  ;;  %v2309_v62 = vadd.s32 %v13291_v63, %v13289_v14  ;;  %vm8912_vm2 = vcmp.lt.s32.totalorder %v8911_v47, 0  ;;  %v2396_v25 = vsel %vm2390_vm12, %v2393_v3, %v2395_v0  ;;  %v2249_v40 = vxor.u32 2147483648, %v10339_v53 }
 0x1a4   :  { %17948 = vst [vmem:[#allocation16_spill] sm:$0xff] %v13463_v52  ;;  %17949 = vst [vmem:[#allocation19_spill] sm:$0xff] %v13467_v37  ;;  %v13479_v17 = vsel %vm2137_vm13, nan, %v4736_v13  ;;  %v2324_v29 = vsel %vm8912_vm2, 0, %v8911_v47  ;;  %vm2414_vm15 = vc.u32 %v13449_v44, %v13451_v4  ;;  %v2246_v46 = vxor.u32 2147483648, %v10341_v15 }
 0x1a5   :  { %17951 = vst [vmem:[#allocation18_spill] sm:$0xff] %v13479_v17  ;;  %v2325_v21 = vsub.s32 32, %v2324_v29  ;;  %v2326_v22 = vshll.u32 %v13399_v1, %v2324_v29  ;;  %v2329_v59 = vsub.s32 4294967266, %v2324_v29  ;;  %v2250_v14 = vsel %vm2248_vm14, %v2249_v40, %v10341_v15 }
 0x1a6   :  { %v4838_v63 = vsel %vm4836_vm6, %v2249_v40, %v10341_v15  ;;  %v2412_v34 = vmul.u32 %v2405_v58, %v2396_v25  ;;  %v2415_v56 = vadd.s32 1, %v13452_v50  ;;  %v2247_v57 = vsel %vm2245_vm7, %v10339_v53, %v2246_v46  ;;  %v17955_v15 = vld [vmem:[#allocation25_spill] sm:$0xff]  ;;  %v17956_v40 = vld [vmem:[#allocation35_spill] sm:$0xff] }
 0x1a7   :  { %v4835_v60 = vsel %vm4833_vm11, %v10339_v53, %v2246_v46  ;;  %v2327_v49 = vshrl.u32 %v2309_v62, %v2325_v21  ;;  %v2330_v6 = vadd.s32 127, %v2329_v59  ;;  %v3097_v1 = vsel %vm3096_vm0, %v13305_v30, 0  ;;  %v13531_v62 = vld [vmem:[%s17717_s6 + $0x70] sm:$0xff] }
 0x1a8   :  { %v2251_v55 = vsel %vm2244_vm4, %v2247_v57, %v2250_v14  ;;  %v4839_v28 = vsel %vm4832_vm1, %v4835_v60, %v4838_v63  ;;  %v2416_v43 = vsel %vm2414_vm15, %v2415_v56, %v13452_v50  ;;  %v3201_v12 = vsel %vm3200_vm9, %v13315_v42, 0 }
 0x1a9   :  { %v13506_v58 = vsel %vm2241_vm8, nan, %v2251_v55  ;;  %v13510_v19 = vsel %vm2241_vm8, nan, %v4839_v28  ;;  %v2328_v30 = vor.u32 %v2327_v49, %v2326_v22  ;;  %v2331_v48 = vshll.u32 %v2330_v6, 23 }
 0x1aa   :  { %17952 = vst [vmem:[#allocation24_spill] sm:$0xff] %v13506_v58  ;;  %17953 = vst [vmem:[#allocation20_spill] sm:$0xff] %v13510_v19  ;;  %v6185_v20 = vpack.c.bf16 %v13506_v58, %v13471_v5  ;;  %v6402_v3 = vpack.c.bf16 %v13510_v19, %v13479_v17  ;;  %v2417_v0 = vadd.s32 %v2416_v43, %v2412_v34  ;;  %v13519_v27 = vshrl.u32 %v3097_v1, 5 }
 0x1ab   :  { %v8949_v50 = vadd.s32 4294967169, %v13319_v33  ;;  %v17954_v61 = vand.u32 2139095040, %v13324_v24  ;;  %v2332_v47 = vor.u32 4788187, %v2331_v48  ;;  %v13524_v53 = vand.u32 31, %v3097_v1 }
 0x1ac   :  { %9646 = vmatmul.mubr.msk.bf16.gmra.mrb[124].mxu0 %vm17533_vm3, %v6185_v20  ;;  %9700 = vmatmul.mubr.msk.bf16.gmra.mrb[124].mxu1 %vm17533_vm3, %v6402_v3  ;;  %v2418_v42 = vadd.s32 536870912, %v2417_v0  ;;  %v17525_v25 = vand.u32 2147483647, %v13531_v62  ;;  %v2478_v33 = vshll.u32 %v17782_v18, %v17955_v15  ;;  %v2335_v24 = vcvt.s32.f32 %v2328_v30 }
 0x1ad   :  { %v3505_v13 = vshrl.u32 %v17954_v61, 23  ;;  %9649 = vmatprep.mubr.msk.bf16.mxu0 %vm17937_vm5, %v17760_v45  ;;  %9703 = vmatprep.mubr.msk.bf16.mxu1 %vm17937_vm5, %v17760_v45  ;;  %v2479_v29 = vshrl.u32 %v17783_v32, %v17956_v40  ;;  %v2481_v46 = vshll.u32 %v17783_v32, %v17955_v15  ;;  %v2482_v21 = vshrl.u32 %v17784_v7, %v17956_v40 }
 0x1ae   :  { %v2333_v22 = vand.u32 2147483647, %v2332_v47  ;;  %v13546_v59 = vshrl.u32 %v2418_v42, 30  ;;  %v2487_v14 = vshll.u32 %v17785_v11, %v17955_v15  ;;  %v2488_v63 = vshrl.u32 %v17786_v51, %v17956_v40 }
 0x1af   :  { %v13552_v34 = vshrl.u32 %v3201_v12, 5  ;;  %v13554_v56 = vand.u32 31, %v3201_v12  ;;  %v2484_v57 = vshll.u32 %v17784_v7, %v17955_v15  ;;  %v2485_v60 = vshrl.u32 %v17785_v11, %v17956_v40 }
 0x1b0   :  { %v3303_v49 = vadd.s32 1, %v8949_v50  ;;  %v2339_v6 = vsub.s32 4, %v13382_v54  ;;  %v2420_v1 = vshll.u32 %v13546_v59, 30  ;;  %v2468_v55 = vand.u32 8388607, %v17525_v25  ;;  %v17958_v50 = vld [vmem:[#allocation33_spill] sm:$0xff] }
 0x1b1   :  { %17957 = vst [vmem:[#allocation21_spill] sm:$0xff] %v13552_v34  ;;  %v2480_v28 = vor.u32 %v2479_v29, %v2478_v33  ;;  %v2489_v43 = vor.u32 %v2488_v63, %v2487_v14  ;;  %v2490_v30 = vshll.u32 %v17786_v51, %v17955_v15  ;;  %v2491_v48 = vshrl.u32 %v17787_v36, %v17956_v40 }
 0x1b2   :  { %v2336_v12 = vmul.f32 %v2335_v24, %v2333_v22  ;;  %v13568_v20 = vsub.s32 %v2417_v0, %v2420_v1  ;;  %v2483_v3 = vor.u32 %v2482_v21, %v2481_v46  ;;  %vm2496_vm13 = vcmp.lt.s32.totalorder %v17958_v50, 4 }
 0x1b3   :  { %v8953_v61 = vadd.s32 4294967169, %v13335_v9  ;;  %vm2255_vm10 = vcmp.lt.s32.totalorder %v13209_v38, 0  ;;  %v2486_v47 = vor.u32 %v2485_v60, %v2484_v57  ;;  %vm2493_vm12 = vcmp.lt.s32.totalorder %v17958_v50, 1 }
 0x1b4   :  { %v8957_v42 = vadd.s32 4294967169, %v3505_v13  ;;  %v2340_v15 = vsel %vm2255_vm10, %v2339_v6, %v13382_v54  ;;  %v2423_v33 = vsub.s32 0, %v13568_v20  ;;  %vm2495_vm0 = vcmp.lt.s32.totalorder %v17958_v50, 3 }
 0x1b5   :  { %v2469_v0 = vor.u32 8388608, %v2468_v55  ;;  %v2477_v24 = vshrl.u32 %v17782_v18, %v17956_v40  ;;  %v2492_v29 = vor.u32 %v2491_v48, %v2490_v30  ;;  %v2502_v9 = vsel %vm2496_vm13, %v2489_v43, 920167782 }
 0x1b6   :  { %v2337_v46 = vxor.u32 2147483648, %v2336_v12  ;;  %v8914_v21 = vmin.u32 %v2423_v33, %v13568_v20  ;;  %vm2494_vm1 = vcmp.lt.s32.totalorder %v17958_v50, 2  ;;  %v2501_v54 = vsel %vm2493_vm12, %v2480_v28, %v2483_v3 }
 0x1b7   :  { %v13588_v13 = vsub.s32 32, %v13524_v53  ;;  %vm3304_vm11 = vcmp.gt.s32.totalorder %v3303_v49, 0  ;;  %v13590_v22 = vadd.s32 1, %v8953_v61  ;;  %v2503_v40 = vsel %vm2495_vm0, %v2486_v47, %v2502_v9 }
 0x1b8   :  { %v17959_v14 = vand.u32 2147483647, %v13209_v38  ;;  %v2425_v57 = vclz %v8914_v21  ;;  %v2498_v60 = vsel %vm2496_vm13, %v2486_v47, 2102212464  ;;  %v2505_v6 = vsel %vm2493_vm12, %v2483_v3, %v2486_v47 }
 0x1b9   :  { %v2504_v55 = vsel %vm2494_vm1, %v2501_v54, %v2503_v40  ;;  %v2506_v30 = vsel %vm2496_vm13, %v2492_v29, 1326507024  ;;  %v2509_v48 = vshll.u32 %v2469_v0, 8  ;;  %v2338_v61 = vsel %vm2255_vm10, %v2337_v46, %v2336_v12 }
 0x1ba   :  { %vm13596_vm8 = vcmp.le.f32.partialorder %v17959_v14, 0.7853982  ;;  %v8915_v33 = vadd.s32 4294967294, %v2425_v57  ;;  %v2497_v9 = vsel %vm2493_vm12, %v2477_v24, %v2480_v28  ;;  %v2507_v47 = vsel %vm2495_vm0, %v2489_v43, %v2506_v30 }
 0x1bb   :  { %v2342_v1 = vsel %vm13596_vm8, 0, %v2340_v15  ;;  %v2499_v15 = vsel %vm2495_vm0, %v2483_v3, %v2498_v60  ;;  %v2508_v21 = vsel %vm2494_vm1, %v2505_v6, %v2507_v47  ;;  %v2413_v12 = vadd.s32 %v13451_v4, %v13449_v44 }
 0x1bc   :  { %v13620_v54 = vmul.u32.u64.low %v2509_v48, %v2504_v55  ;;  %v13621_v40 = vmul.u32.u64.high %v2509_v48, %v2504_v55, %v13620_v54  ;;  %vm8916_vm9 = vcmp.lt.s32.totalorder %v8915_v33, 0  ;;  %v2341_v28 = vsel %vm13596_vm8, %v13209_v38, %v2338_v61 }
 0x1bd   :  { %v13626_v0 = vmul.u32.u64.low %v2509_v48, %v2508_v21  ;;  %v13627_v29 = vmul.u32.u64.high %v2509_v48, %v2508_v21, %v13626_v0  ;;  %v2346_v43 = vadd.s32 3, %v2342_v1  ;;  %v2428_v3 = vsel %vm8916_vm9, 0, %v8915_v33  ;;  %v17965_v21 = vld [vmem:[#allocation27_spill] sm:$0xff] }
 0x1be   :  { %v2443_v24 = vsub.s32 4, %v13546_v59  ;;  %v2429_v46 = vsub.s32 32, %v2428_v3  ;;  %v2430_v14 = vshll.u32 %v13568_v20, %v2428_v3  ;;  %v2433_v57 = vsub.s32 4294967266, %v2428_v3 }
 0x1bf   :  { %v2500_v60 = vsel %vm2494_vm1, %v2497_v9, %v2499_v15  ;;  %v13637_v44 = vsel %vm3304_vm11, %v3303_v49, 0  ;;  %v13639_v4 = vadd.s32 1, %v8957_v42  ;;  %v17962_v6 = vand.u32 2147483647, %v13342_v26  ;;  %v13659_v9 = vld [vmem:[%s17717_s6 + $0x78] sm:$0xff] }
 0x1c0   :  { %v2519_v55 = vadd.s32 1, %v13621_v40  ;;  %10342 = vcosq.f32 %v2341_v28  ;;  %vm2359_vm6 = vcmp.lt.s32.totalorder %v13342_v26, 0  ;;  %v2431_v20 = vshrl.u32 %v2413_v12, %v2429_v46  ;;  %v17966_v12 = vld [vmem:[#allocation41_spill] sm:$0xff] }
 0x1c1   :  { %vm13643_vm4 = vcmp.le.f32.partialorder %v17962_v6, 0.7853982  ;;  %v2434_v30 = vadd.s32 127, %v2433_v57  ;;  %10344 = vsinq.f32 %v2341_v28  ;;  %v13649_v50 = vand.u32 3, %v2346_v43 }
 0x1c2   :  { %v2516_v49 = vmul.u32 %v2509_v48, %v2500_v60  ;;  %vm2518_vm7 = vc.u32 %v13627_v29, %v13620_v54  ;;  %v2432_v42 = vor.u32 %v2431_v20, %v2430_v14  ;;  %v2444_v33 = vsel %vm2359_vm6, %v2443_v24, %v13546_v59 }
 0x1c3   :  { %v2435_v61 = vshll.u32 %v2434_v30, 23  ;;  %v17524_v47 = vand.u32 2147483647, %v13659_v9  ;;  %v2520_v15 = vsel %vm2518_vm7, %v2519_v55, %v13621_v40  ;;  %v2582_v48 = vshll.u32 %v17782_v18, %v17965_v21  ;;  %v13685_v30 = vpop.f32.mrb[32].mxu0 }
 0x1c4   :  { %v2583_v0 = vshrl.u32 %v17783_v32, %v17966_v12  ;;  %v2585_v28 = vshll.u32 %v17783_v32, %v17965_v21  ;;  %v2439_v59 = vcvt.s32.f32 %v2432_v42  ;;  %v2586_v3 = vshrl.u32 %v17784_v7, %v17966_v12  ;;  %v13687_v42 = vpop.f32.mrb[32].mxu1 }
 0x1c5   :  { %v2436_v43 = vor.u32 4788187, %v2435_v61  ;;  %v2588_v24 = vshll.u32 %v17784_v7, %v17965_v21  ;;  %v2446_v40 = vsel %vm13643_vm4, 0, %v2444_v33  ;;  %v13675_v46 = vand.u32 3, %v2342_v1 }
 0x1c6   :  { %v2521_v14 = vadd.s32 %v2520_v15, %v2516_v49  ;;  %v2589_v57 = vshrl.u32 %v17785_v11, %v17966_v12  ;;  %v2572_v6 = vand.u32 8388607, %v17524_v47  ;;  %v2591_v55 = vshll.u32 %v17785_v11, %v17965_v21  ;;  %v9441_v15 = vpop.f32.mrb[33].mxu0 }
 0x1c7   :  { %v2437_v60 = vand.u32 2147483647, %v2436_v43  ;;  %v2592_v20 = vshrl.u32 %v17786_v51, %v17966_v12  ;;  %v2584_v61 = vor.u32 %v2583_v0, %v2582_v48  ;;  %v2594_v49 = vshll.u32 %v17786_v51, %v17965_v21  ;;  %v9495_v43 = vpop.f32.mrb[33].mxu1  ;;  %v13693_v19 = vpop.f32.mrb[34].mxu0  ;;  %v17967_v0 = vld [vmem:[#allocation36_spill] sm:$0xff] }
 0x1c8   :  { %v2522_v1 = vadd.s32 536870912, %v2521_v14  ;;  %v2595_v33 = vshrl.u32 %v17787_v36, %v17966_v12  ;;  %v2587_v25 = vor.u32 %v2586_v3, %v2585_v28  ;;  %v2590_v37 = vor.u32 %v2589_v57, %v2588_v24  ;;  %v13695_v17 = vpop.f32.mrb[34].mxu1  ;;  %v9442_v28 = vpop.f32.mrb[35].mxu0 }
 0x1c9   :  { %v2440_v47 = vmul.f32 %v2439_v59, %v2437_v60  ;;  %v2593_v52 = vor.u32 %v2592_v20, %v2591_v55  ;;  %vm2349_vm14 = vcmp.eq.s32.totalorder %v13649_v50, 0  ;;  %vm2352_vm2 = vcmp.eq.s32.totalorder %v13649_v50, 2  ;;  %v9496_v59 = vpop.f32.mrb[35].mxu1 }
 0x1ca   :  { %v2450_v48 = vadd.s32 3, %v2446_v40  ;;  %vm4936_vm15 = vcmp.eq.s32.totalorder %v13675_v46, 0  ;;  %vm4939_vm13 = vcmp.eq.s32.totalorder %v13675_v46, 2  ;;  %v13701_v21 = vshrl.u32 %v2522_v1, 30  ;;  %v10343_v3 = vpop.eup %10342 }
 0x1cb   :  { %vm2597_vm10 = vcmp.lt.s32.totalorder %v17967_v0, 1  ;;  %vm2599_vm12 = vcmp.lt.s32.totalorder %v17967_v0, 3  ;;  %v2441_v24 = vxor.u32 2147483648, %v2440_v47  ;;  %v13705_v57 = vand.u32 3, %v2446_v40  ;;  %v10345_v55 = vpop.eup %10344 }
 0x1cc   :  { %v2596_v60 = vor.u32 %v2595_v33, %v2594_v49  ;;  %vm2600_vm0 = vcmp.lt.s32.totalorder %v17967_v0, 4  ;;  %v2524_v20 = vshll.u32 %v13701_v21, 30  ;;  %v2573_v15 = vor.u32 8388608, %v2572_v6 }
 0x1cd   :  { %v2581_v1 = vshrl.u32 %v17782_v18, %v17966_v12  ;;  %v2606_v43 = vsel %vm2600_vm0, %v2593_v52, 920167782  ;;  %vm2348_vm1 = vcmp.lt.s32.totalorder %v13649_v50, 2  ;;  %v2442_v28 = vsel %vm2359_vm6, %v2441_v24, %v2440_v47 }
 0x1ce   :  { %vm4935_vm11 = vcmp.lt.s32.totalorder %v13675_v46, 2  ;;  %vm2598_vm8 = vcmp.lt.s32.totalorder %v17967_v0, 2  ;;  %v2605_v40 = vsel %vm2597_vm10, %v2584_v61, %v2587_v25  ;;  %v2607_v6 = vsel %vm2599_vm12, %v2590_v37, %v2606_v43 }
 0x1cf   :  { %v2445_v12 = vsel %vm13643_vm4, %v13342_v26, %v2442_v28  ;;  %v13725_v49 = vsub.s32 %v2521_v14, %v2524_v20  ;;  %v2602_v33 = vsel %vm2600_vm0, %v2590_v37, 2102212464  ;;  %v2609_v47 = vsel %vm2597_vm10, %v2587_v25, %v2590_v37 }
 0x1d0   :  { %v2350_v59 = vxor.u32 2147483648, %v10345_v55  ;;  %v2353_v24 = vxor.u32 2147483648, %v10343_v3  ;;  %10346 = vcosq.f32 %v2445_v12  ;;  %v2610_v58 = vsel %vm2600_vm0, %v2596_v60, 1326507024 }
 0x1d1   :  { %vm2345_vm9 = vweird.f32 %v13209_v38  ;;  %10348 = vsinq.f32 %v2445_v12  ;;  %v2527_v63 = vsub.s32 0, %v13725_v49  ;;  %v2608_v14 = vsel %vm2598_vm8, %v2605_v40, %v2607_v6 }
 0x1d2   :  { %v2611_v20 = vsel %vm2599_vm12, %v2593_v52, %v2610_v58  ;;  %v2601_v37 = vsel %vm2597_vm10, %v2581_v1, %v2584_v61  ;;  %v2603_v43 = vsel %vm2599_vm12, %v2587_v25, %v2602_v33  ;;  %v2613_v28 = vshll.u32 %v2573_v15, 8 }
 0x1d3   :  { %v2612_v60 = vsel %vm2598_vm8, %v2609_v47, %v2611_v20  ;;  %v2451_v5 = vand.u32 3, %v2450_v48  ;;  %v8918_v12 = vmin.u32 %v2527_v63, %v13725_v49  ;;  %v13748_v34 = vadd.f32 %v13350_v23, %v13348_v16 }
 0x1d4   :  { %v13752_v52 = vadd.f32 %v13370_v2, %v13368_v35  ;;  %v13754_v58 = vmul.u32.u64.low %v2613_v28, %v2612_v60  ;;  %v13755_v61 = vmul.u32.u64.high %v2613_v28, %v2612_v60, %v13754_v58  ;;  %vm2449_vm4 = vweird.f32 %v13342_v26 }
 0x1d5   :  { %17968 = vst [vmem:[#allocation28_spill] sm:$0xff] %v13748_v34  ;;  %v13757_v1 = vmul.u32.u64.low %v2613_v28, %v2608_v14  ;;  %v13758_v25 = vmul.u32.u64.high %v2613_v28, %v2608_v14, %v13757_v1  ;;  %vm5038_vm6 = vcmp.lt.s32.totalorder %v13705_v57, 2  ;;  %vm2463_vm7 = vcmp.lt.s32.totalorder %v13531_v62, 0 }
 0x1d6   :  { %17969 = vst [vmem:[#allocation26_spill] sm:$0xff] %v13752_v52  ;;  %v2529_v48 = vclz %v8918_v12  ;;  %v2604_v16 = vsel %vm2598_vm8, %v2601_v37, %v2603_v43  ;;  %v2351_v35 = vsel %vm2349_vm14, %v10343_v3, %v2350_v59  ;;  %v2354_v2 = vsel %vm2352_vm2, %v2353_v24, %v10345_v55 }
 0x1d7   :  { %v4938_v23 = vsel %vm4936_vm15, %v10343_v3, %v2350_v59  ;;  %v4941_v15 = vsel %vm4939_vm13, %v2353_v24, %v10345_v55  ;;  %vm2452_vm10 = vcmp.lt.s32.totalorder %v2451_v5, 2  ;;  %vm5039_vm12 = vcmp.eq.s32.totalorder %v13705_v57, 0 }
 0x1d8   :  { %vm5042_vm0 = vcmp.eq.s32.totalorder %v13705_v57, 2  ;;  %v8919_v40 = vadd.s32 4294967294, %v2529_v48  ;;  %vm2453_vm3 = vcmp.eq.s32.totalorder %v2451_v5, 0  ;;  %v2620_v0 = vmul.u32 %v2613_v28, %v2604_v16 }
 0x1d9   :  { %vm2622_vm14 = vc.u32 %v13755_v61, %v13757_v1  ;;  %v2623_v6 = vadd.s32 1, %v13758_v25  ;;  %v2355_v33 = vsel %vm2348_vm1, %v2351_v35, %v2354_v2  ;;  %v4942_v3 = vsel %vm4935_vm11, %v4938_v23, %v4941_v15 }
 0x1da   :  { %v2517_v55 = vadd.s32 %v13620_v54, %v13627_v29  ;;  %vm8920_vm2 = vcmp.lt.s32.totalorder %v8919_v40, 0  ;;  %v10347_v47 = vpop.eup %10346  ;;  %vm2456_vm15 = vcmp.eq.s32.totalorder %v2451_v5, 2  ;;  %v2547_v24 = vsub.s32 4, %v13701_v21 }
 0x1db   :  { %v2532_v59 = vsel %vm8920_vm2, 0, %v8919_v40  ;;  %v2624_v63 = vsel %vm2622_vm14, %v2623_v6, %v13758_v25  ;;  %v10349_v14 = vpop.eup %10348  ;;  %v2457_v20 = vxor.u32 2147483648, %v10347_v47  ;;  %v13790_v46 = vsel %vm2345_vm9, nan, %v2355_v33 }
 0x1dc   :  { %v2533_v37 = vsub.s32 32, %v2532_v59  ;;  %v2534_v50 = vshll.u32 %v13725_v49, %v2532_v59  ;;  %v2537_v43 = vsub.s32 4294967266, %v2532_v59  ;;  %17970 = vst [vmem:[#allocation22_spill] sm:$0xff] %v13790_v46  ;;  %v2454_v60 = vxor.u32 2147483648, %v10349_v14  ;;  %v13835_v59 = vld [vmem:[%s17717_s6 + $0x80] sm:$0xff] }
 0x1dd   :  { %v13794_v54 = vsel %vm2345_vm9, nan, %v4942_v3  ;;  %v2625_v29 = vadd.s32 %v2624_v63, %v2620_v0  ;;  %v2458_v28 = vsel %vm2456_vm15, %v2457_v20, %v10349_v14  ;;  %v5044_v12 = vsel %vm5042_vm0, %v2457_v20, %v10349_v14 }
 0x1de   :  { %17971 = vst [vmem:[#allocation30_spill] sm:$0xff] %v13794_v54  ;;  %v2535_v58 = vshrl.u32 %v2517_v55, %v2533_v37  ;;  %v2538_v25 = vadd.s32 127, %v2537_v43  ;;  %v2455_v48 = vsel %vm2453_vm3, %v10347_v47, %v2454_v60  ;;  %v5041_v49 = vsel %vm5039_vm12, %v10347_v47, %v2454_v60 }
 0x1df   :  { %v2548_v16 = vsel %vm2463_vm7, %v2547_v24, %v13701_v21  ;;  %v2626_v35 = vadd.s32 536870912, %v2625_v29  ;;  %v2459_v38 = vsel %vm2452_vm10, %v2455_v48, %v2458_v28  ;;  %v5045_v2 = vsel %vm5038_vm6, %v5041_v49, %v5044_v12 }
 0x1e0   :  { %v2536_v23 = vor.u32 %v2535_v58, %v2534_v50  ;;  %v2539_v15 = vshll.u32 %v2538_v25, 23  ;;  %v13809_v40 = vsel %vm2449_vm4, nan, %v2459_v38  ;;  %v13813_v0 = vsel %vm2449_vm4, nan, %v5045_v2 }
 0x1e1   :  { %17972 = vst [vmem:[#allocation29_spill] sm:$0xff] %v13809_v40  ;;  %17973 = vst [vmem:[#allocation23_spill] sm:$0xff] %v13813_v0  ;;  %v17974_v6 = vand.u32 2147483647, %v13531_v62  ;;  %v13821_v5 = vshrl.u32 %v2626_v35, 30  ;;  %v6186_v57 = vpack.c.bf16 %v13809_v40, %v13790_v46  ;;  %v6403_v33 = vpack.c.bf16 %v13813_v0, %v13794_v54 }
 0x1e2   :  { %v2540_v3 = vor.u32 4788187, %v2539_v15  ;;  %v2543_v55 = vcvt.s32.f32 %v2536_v23  ;;  %v17534_v24 = vand.u32 2147483647, %v13835_v59  ;;  %v2686_v63 = vshll.u32 %v17782_v18, %v12665_v10 }
 0x1e3   :  { %vm13817_vm3 = vcmp.le.f32.partialorder %v17974_v6, 0.7853982  ;;  %v2628_v47 = vshll.u32 %v13821_v5, 30  ;;  %vm17977_vm13 = vcmask 23552   ;;  %v2687_v20 = vshrl.u32 %v17783_v32, %v12707_v41 }
 0x1e4   :  { %v13829_v26 = vsel %vm13817_vm3, 0, %v2548_v16  ;;  %9650 = vmatmul.mubr.msk.bf16.gmra.mrb[128].mxu0 %vm17977_vm13, %v6186_v57  ;;  %vm17978_vm1 = vmmov %vm17977_vm13  ;;  %v2541_v14 = vand.u32 2147483647, %v2540_v3  ;;  %v2689_v37 = vshll.u32 %v17783_v32, %v12665_v10  ;;  %v2690_v50 = vshrl.u32 %v17784_v7, %v12707_v41  ;;  %v17980_v3 = vld [vmem:[#allocation60_spill] sm:$0xff] }
 0x1e5   :  { %9704 = vmatmul.mubr.msk.bf16.gmra.mrb[128].mxu1 %vm17978_vm1, %v6403_v33  ;;  %v13849_v43 = vand.u32 31, %v13637_v44  ;;  %9653 = vmatprep.mubr.msk.bf16.mxu0 %vm17937_vm5, %v17760_v45  ;;  %v13855_v60 = vsub.s32 %v2625_v29, %v2628_v47  ;;  %v2695_v28 = vshll.u32 %v17785_v11, %v12665_v10  ;;  %v2696_v12 = vshrl.u32 %v17786_v51, %v12707_v41 }
 0x1e6   :  { %9707 = vmatprep.mubr.msk.bf16.mxu1 %vm17937_vm5, %v17760_v45  ;;  %v2544_v58 = vmul.f32 %v2543_v55, %v2541_v14  ;;  %v2692_v25 = vshll.u32 %v17784_v7, %v12665_v10  ;;  %v2693_v48 = vshrl.u32 %v17785_v11, %v12707_v41  ;;  %v2698_v49 = vshll.u32 %v17786_v51, %v12665_v10 }
 0x1e7   :  { %17979 = vst [vmem:[#allocation32_spill] sm:$0xff] %v13849_v43  ;;  %v2554_v16 = vadd.s32 3, %v13829_v26  ;;  %vm2567_vm11 = vcmp.lt.s32.totalorder %v13659_v9, 0  ;;  %v2631_v29 = vsub.s32 0, %v13855_v60  ;;  %v2676_v35 = vand.u32 8388607, %v17534_v24 }
 0x1e8   :  { %v2699_v38 = vshrl.u32 %v17787_v36, %v12707_v41  ;;  %v2545_v2 = vxor.u32 2147483648, %v2544_v58  ;;  %v2685_v23 = vshrl.u32 %v17782_v18, %v12707_v41  ;;  %v2688_v15 = vor.u32 %v2687_v20, %v2686_v63 }
 0x1e9   :  { %v2691_v6 = vor.u32 %v2690_v50, %v2689_v37  ;;  %v2621_v10 = vadd.s32 %v13757_v1, %v13755_v61  ;;  %v8922_v57 = vmin.u32 %v2631_v29, %v13855_v60  ;;  %v2697_v33 = vor.u32 %v2696_v12, %v2695_v28 }
 0x1ea   :  { %vm2701_vm8 = vcmp.lt.s32.totalorder %v17980_v3, 1  ;;  %vm3408_vm9 = vcmp.gt.s32.totalorder %v13590_v22, 0  ;;  %v2546_v55 = vsel %vm2463_vm7, %v2545_v2, %v2544_v58  ;;  %v2694_v47 = vor.u32 %v2693_v48, %v2692_v25 }
 0x1eb   :  { %v2700_v14 = vor.u32 %v2699_v38, %v2698_v49  ;;  %vm2704_vm4 = vcmp.lt.s32.totalorder %v17980_v3, 4  ;;  %v2549_v41 = vsel %vm13817_vm3, %v13531_v62, %v2546_v55  ;;  %v2633_v63 = vclz %v8922_v57 }
 0x1ec   :  { %v2677_v61 = vor.u32 8388608, %v2676_v35  ;;  %vm2703_vm6 = vcmp.lt.s32.totalorder %v17980_v3, 3  ;;  %v2651_v1 = vsub.s32 4, %v13821_v5  ;;  %vm2702_vm10 = vcmp.lt.s32.totalorder %v17980_v3, 2 }
 0x1ed   :  { %v2706_v20 = vsel %vm2704_vm4, %v2694_v47, 2102212464  ;;  %v2709_v37 = vsel %vm2701_vm8, %v2688_v15, %v2691_v6  ;;  %10350 = vcosq.f32 %v2549_v41  ;;  %v8923_v50 = vadd.s32 4294967294, %v2633_v63 }
 0x1ee   :  { %v2705_v21 = vsel %vm2701_vm8, %v2685_v23, %v2688_v15  ;;  %v2710_v28 = vsel %vm2704_vm4, %v2697_v33, 920167782  ;;  %v2707_v12 = vsel %vm2703_vm6, %v2691_v6, %v2706_v20  ;;  %v2713_v25 = vsel %vm2701_vm8, %v2691_v6, %v2694_v47 }
 0x1ef   :  { %v2711_v58 = vsel %vm2703_vm6, %v2694_v47, %v2710_v28  ;;  %v2714_v48 = vsel %vm2704_vm4, %v2700_v14, 1326507024  ;;  %vm8924_vm7 = vcmp.lt.s32.totalorder %v8923_v50, 0  ;;  %v2717_v35 = vshll.u32 %v2677_v61, 8 }
 0x1f0   :  { %v2712_v49 = vsel %vm2702_vm10, %v2709_v37, %v2711_v58  ;;  %v2715_v29 = vsel %vm2703_vm6, %v2697_v33, %v2714_v48  ;;  %10352 = vsinq.f32 %v2549_v41  ;;  %v2636_v38 = vsel %vm8924_vm7, 0, %v8923_v50 }
 0x1f1   :  { %v2652_v2 = vsel %vm2567_vm11, %v2651_v1, %v13821_v5  ;;  %v2716_v23 = vsel %vm2702_vm10, %v2713_v25, %v2715_v29  ;;  %v2637_v15 = vsub.s32 32, %v2636_v38  ;;  %v2638_v6 = vshll.u32 %v13855_v60, %v2636_v38 }
 0x1f2   :  { %v2641_v57 = vsub.s32 4294967266, %v2636_v38  ;;  %v2708_v55 = vsel %vm2702_vm10, %v2705_v21, %v2707_v12  ;;  %v13912_v47 = vmul.u32.u64.low %v2717_v35, %v2716_v23  ;;  %v13913_v14 = vmul.u32.u64.high %v2717_v35, %v2716_v23, %v13912_v47 }
 0x1f3   :  { %v13915_v33 = vmul.u32.u64.low %v2717_v35, %v2712_v49  ;;  %v13916_v41 = vmul.u32.u64.high %v2717_v35, %v2712_v49, %v13915_v33  ;;  %vm3512_vm12 = vcmp.gt.s32.totalorder %v13639_v4, 0  ;;  %v17981_v5 = vand.u32 2147483647, %v13659_v9 }
 0x1f4   :  { %v2639_v60 = vshrl.u32 %v2621_v10, %v2637_v15  ;;  %v2642_v61 = vadd.s32 127, %v2641_v57  ;;  %v13927_v3 = vsub.s32 32, %v13554_v56  ;;  %v13930_v1 = vshrl.u32 %v13637_v44, 5  ;;  %v13969_v15 = vpop.f32.mrb[36].mxu0 }
 0x1f5   :  { %vm13922_vm0 = vcmp.le.f32.partialorder %v17981_v5, 0.7853982  ;;  %v13932_v20 = vand.u32 3, %v2554_v16  ;;  %v13939_v50 = vsel %vm3408_vm9, %v13590_v22, 0  ;;  %v2724_v10 = vmul.u32 %v2717_v35, %v2708_v55  ;;  %v13963_v35 = vld [vmem:[%s17717_s6 + $0x88] sm:$0xff] }
 0x1f6   :  { %17984 = vst [vmem:[#allocation31_spill] sm:$0xff] %v13930_v1  ;;  %v2654_v37 = vsel %vm13922_vm0, 0, %v2652_v2  ;;  %v2640_v21 = vor.u32 %v2639_v60, %v2638_v6  ;;  %v2643_v28 = vshll.u32 %v2642_v61, 23  ;;  %v13942_v12 = vsub.s32 32, %v13849_v43  ;;  %v13971_v6 = vpop.f32.mrb[36].mxu1  ;;  %v9445_v60 = vpop.f32.mrb[37].mxu0 }
 0x1f7   :  { %v13945_v58 = vsel %vm3512_vm12, %v13639_v4, 0  ;;  %vm2726_vm14 = vc.u32 %v13913_v14, %v13915_v33  ;;  %v2727_v44 = vadd.s32 1, %v13916_v41  ;;  %v13950_v16 = vpop.eup %10350  ;;  %v2658_v22 = vadd.s32 3, %v2654_v37  ;;  %v9499_v61 = vpop.f32.mrb[37].mxu1 }
 0x1f8   :  { %17985 = vst [vmem:[#allocation25_spill] sm:$0xff] %v13942_v12  ;;  %v2644_v25 = vor.u32 4788187, %v2643_v28  ;;  %v2647_v48 = vcvt.s32.f32 %v2640_v21  ;;  %v13953_v49 = vand.u32 3, %v13829_v26  ;;  %v13956_v29 = vand.u32 31, %v13939_v50 }
 0x1f9   :  { %vm2557_vm2 = vcmp.eq.s32.totalorder %v13932_v20, 0  ;;  %v2728_v4 = vsel %vm2726_vm14, %v2727_v44, %v13916_v41  ;;  %v17536_v38 = vand.u32 2147483647, %v13963_v35  ;;  %vm2560_vm15 = vcmp.eq.s32.totalorder %v13932_v20, 2  ;;  %v13989_v44 = vpop.f32.mrb[38].mxu0 }
 0x1fa   :  { %17986 = vst [vmem:[#allocation35_spill] sm:$0xff] %v13956_v29  ;;  %v2645_v2 = vand.u32 2147483647, %v2644_v25  ;;  %v13967_v23 = vand.u32 3, %v2654_v37  ;;  %v2729_v26 = vadd.s32 %v2728_v4, %v2724_v10  ;;  %v13973_v57 = vpop.eup %10352  ;;  %v2790_v55 = vshll.u32 %v17782_v18, %v12883_v31  ;;  %v13991_v25 = vpop.f32.mrb[38].mxu1 }
 0x1fb   :  { %v2791_v47 = vshrl.u32 %v17783_v32, %v12916_v8  ;;  %v2793_v41 = vshll.u32 %v17783_v32, %v12883_v31  ;;  %v2794_v5 = vshrl.u32 %v17784_v7, %v12916_v8  ;;  %v13983_v21 = vand.u32 3, %v2658_v22  ;;  %v9446_v60 = vpop.f32.mrb[39].mxu0  ;;  %v9500_v61 = vpop.f32.mrb[39].mxu1 }
 0x1fc   :  { %v2648_v37 = vmul.f32 %v2647_v48, %v2645_v2  ;;  %vm5142_vm3 = vcmp.eq.s32.totalorder %v13953_v49, 0  ;;  %vm5145_vm13 = vcmp.eq.s32.totalorder %v13953_v49, 2  ;;  %v2730_v28 = vadd.s32 536870912, %v2729_v26 }
 0x1fd   :  { %v2799_v10 = vshll.u32 %v17785_v11, %v12883_v31  ;;  %vm2556_vm1 = vcmp.lt.s32.totalorder %v13932_v20, 2  ;;  %v2780_v4 = vand.u32 8388607, %v17536_v38  ;;  %v2796_v48 = vshll.u32 %v17784_v7, %v12883_v31 }
 0x1fe   :  { %v2797_v22 = vshrl.u32 %v17785_v11, %v12916_v8  ;;  %v2800_v2 = vshrl.u32 %v17786_v51, %v12916_v8  ;;  %v2561_v24 = vxor.u32 2147483648, %v13950_v16  ;;  %v2649_v52 = vxor.u32 2147483648, %v2648_v37 }
 0x1ff   :  { %v14003_v34 = vshrl.u32 %v2730_v28, 30  ;;  %v2802_v1 = vshll.u32 %v17786_v51, %v12883_v31  ;;  %v2558_v38 = vxor.u32 2147483648, %v13973_v57  ;;  %vm5141_vm8 = vcmp.lt.s32.totalorder %v13953_v49, 2 }
 0x200   :  { %v2792_v0 = vor.u32 %v2791_v47, %v2790_v55  ;;  %v2795_v54 = vor.u32 %v2794_v5, %v2793_v41  ;;  %v2803_v12 = vshrl.u32 %v17787_v36, %v12916_v8  ;;  %v2650_v60 = vsel %vm2567_vm11, %v2649_v52, %v2648_v37 }
 0x201   :  { %v2732_v61 = vshll.u32 %v14003_v34, 30  ;;  %v2801_v43 = vor.u32 %v2800_v2, %v2799_v10  ;;  %vm2805_vm9 = vcmp.lt.s32.totalorder %v12876_v39, 1  ;;  %vm2553_vm4 = vweird.f32 %v13531_v62 }
 0x202   :  { %v2653_v31 = vsel %vm13922_vm0, %v13659_v9, %v2650_v60  ;;  %v2798_v28 = vor.u32 %v2797_v22, %v2796_v48  ;;  %v2804_v55 = vor.u32 %v2803_v12, %v2802_v1  ;;  %vm2808_vm6 = vcmp.lt.s32.totalorder %v12876_v39, 4 }
 0x203   :  { %10354 = vcosq.f32 %v2653_v31  ;;  %v14020_v47 = vsub.s32 %v2729_v26, %v2732_v61  ;;  %v2789_v52 = vshrl.u32 %v17782_v18, %v12916_v8  ;;  %vm2807_vm11 = vcmp.lt.s32.totalorder %v12876_v39, 3 }
 0x204   :  { %10356 = vsinq.f32 %v2653_v31  ;;  %v2781_v41 = vor.u32 8388608, %v2780_v4  ;;  %vm2806_vm10 = vcmp.lt.s32.totalorder %v12876_v39, 2  ;;  %v2813_v63 = vsel %vm2805_vm9, %v2792_v0, %v2795_v54 }
 0x205   :  { %v2559_v1 = vsel %vm2557_vm2, %v13950_v16, %v2558_v38  ;;  %v2562_v12 = vsel %vm2560_vm15, %v2561_v24, %v13973_v57  ;;  %v2735_v26 = vsub.s32 0, %v14020_v47  ;;  %v2814_v8 = vsel %vm2808_vm6, %v2801_v43, 920167782 }
 0x206   :  { %v2810_v5 = vsel %vm2808_vm6, %v2798_v28, 2102212464  ;;  %v2815_v37 = vsel %vm2807_vm11, %v2798_v28, %v2814_v8  ;;  %v2817_v10 = vsel %vm2805_vm9, %v2795_v54, %v2798_v28  ;;  %v2818_v4 = vsel %vm2808_vm6, %v2804_v55, 1326507024 }
 0x207   :  { %vm5244_vm7 = vcmp.lt.s32.totalorder %v13967_v23, 2  ;;  %vm5245_vm12 = vcmp.eq.s32.totalorder %v13967_v23, 0  ;;  %v8926_v48 = vmin.u32 %v2735_v26, %v14020_v47  ;;  %v2816_v22 = vsel %vm2806_vm10, %v2813_v63, %v2815_v37 }
 0x208   :  { %v2819_v2 = vsel %vm2807_vm11, %v2801_v43, %v2818_v4  ;;  %vm2657_vm0 = vweird.f32 %v13659_v9  ;;  %v5144_v60 = vsel %vm5142_vm3, %v13950_v16, %v2558_v38  ;;  %v5147_v61 = vsel %vm5145_vm13, %v2561_v24, %v13973_v57  ;;  %v17995_v9 = vld [vmem:[#allocation34_spill] sm:$0xff] }
 0x209   :  { %v2820_v31 = vsel %vm2806_vm10, %v2817_v10, %v2819_v2  ;;  %v2821_v28 = vshll.u32 %v2781_v41, 8  ;;  %v2563_v55 = vsel %vm2556_vm1, %v2559_v1, %v2562_v12  ;;  %v2737_v63 = vclz %v8926_v48 }
 0x20a   :  { %v2809_v43 = vsel %vm2805_vm9, %v2789_v52, %v2792_v0  ;;  %v2811_v26 = vsel %vm2807_vm11, %v2795_v54, %v2810_v5  ;;  %vm2660_vm14 = vcmp.lt.s32.totalorder %v13983_v21, 2  ;;  %v5148_v24 = vsel %vm5141_vm8, %v5144_v60, %v5147_v61 }
 0x20b   :  { %v14067_v8 = vmul.u32.u64.low %v2821_v28, %v2820_v31  ;;  %v14068_v16 = vmul.u32.u64.high %v2821_v28, %v2820_v31, %v14067_v8  ;;  %v14070_v38 = vmul.u32.u64.low %v2821_v28, %v2816_v22  ;;  %v14071_v37 = vmul.u32.u64.high %v2821_v28, %v2816_v22, %v14070_v38 }
 0x20c   :  { %vm5248_vm2 = vcmp.eq.s32.totalorder %v13967_v23, 2  ;;  %v8927_v20 = vadd.s32 4294967294, %v2737_v63  ;;  %vm2661_vm15 = vcmp.eq.s32.totalorder %v13983_v21, 0  ;;  %vm2664_vm3 = vcmp.eq.s32.totalorder %v13983_v21, 2 }
 0x20d   :  { %v14082_v54 = vadd.f32 %v13687_v42, %v13685_v30  ;;  %v14086_v0 = vadd.f32 %v13695_v17, %v13693_v19  ;;  %v10355_v57 = vpop.eup %10354  ;;  %v14090_v49 = vsel %vm2553_vm4, nan, %v2563_v55  ;;  %v2725_v52 = vadd.s32 %v13915_v33, %v13913_v14 }
 0x20e   :  { %17989 = vst [vmem:[#allocation41_spill] sm:$0xff] %v14090_v49  ;;  %vm8928_vm13 = vcmp.lt.s32.totalorder %v8927_v20, 0  ;;  %v2812_v41 = vsel %vm2806_vm10, %v2809_v43, %v2811_v26  ;;  %v10357_v1 = vpop.eup %10356  ;;  %v2665_v12 = vxor.u32 2147483648, %v10355_v57  ;;  %v14098_v30 = vsel %vm2553_vm4, nan, %v5148_v24 }
 0x20f   :  { %17987 = vst [vmem:[#allocation33_spill] sm:$0xff] %v14082_v54  ;;  %17988 = vst [vmem:[#allocation27_spill] sm:$0xff] %v14086_v0  ;;  %v2740_v17 = vsel %vm8928_vm13, 0, %v8927_v20  ;;  %vm2830_vm1 = vc.u32 %v14068_v16, %v14070_v38  ;;  %v2662_v19 = vxor.u32 2147483648, %v10357_v1  ;;  %v2828_v33 = vmul.u32 %v2821_v28, %v2812_v41 }
 0x210   :  { %v2741_v42 = vsub.s32 32, %v2740_v17  ;;  %v2742_v5 = vshll.u32 %v14020_v47, %v2740_v17  ;;  %v2745_v10 = vsub.s32 4294967266, %v2740_v17  ;;  %v2666_v14 = vsel %vm2664_vm3, %v2665_v12, %v10357_v1 }
 0x211   :  { %v5250_v39 = vsel %vm5248_vm2, %v2665_v12, %v10357_v1  ;;  %v2831_v62 = vadd.s32 1, %v14071_v37  ;;  %v2663_v4 = vsel %vm2661_vm15, %v10355_v57, %v2662_v19  ;;  %v5247_v48 = vsel %vm5245_vm12, %v10355_v57, %v2662_v19  ;;  %v17997_v57 = vld [vmem:[#allocation39_spill] sm:$0xff]  ;;  %v14155_v1 = vld [vmem:[%s17717_s6 + $0x90] sm:$0xff]  ;;  %v18001_v12 = vld [vmem:[#allocation62_spill] sm:$0xff] }
 0x212   :  { %v2743_v22 = vshrl.u32 %v2725_v52, %v2741_v42  ;;  %v2746_v2 = vadd.s32 127, %v2745_v10  ;;  %v14113_v47 = vshrl.u32 %v13939_v50, 5  ;;  %v2667_v60 = vsel %vm2660_vm14, %v2663_v4, %v2666_v14  ;;  %v18002_v42 = vld [vmem:[#allocation11_spill] sm:$0xff] }
 0x213   :  { %v5251_v61 = vsel %vm5244_vm7, %v5247_v48, %v5250_v39  ;;  %v2832_v31 = vsel %vm2830_vm1, %v2831_v62, %v14071_v37  ;;  %v14125_v28 = vsel %vm2657_vm0, nan, %v2667_v60  ;;  %v14132_v21 = vshrl.u32 %v13945_v58, 5  ;;  %v18003_v48 = vld [vmem:[#allocation38_spill] sm:$0xff] }
 0x214   :  { %17990 = vst [vmem:[#allocation36_spill] sm:$0xff] %v14113_v47  ;;  %17991 = vst [vmem:[#allocation60_spill] sm:$0xff] %v14125_v28  ;;  %v14129_v55 = vsel %vm2657_vm0, nan, %v5251_v61  ;;  %v2744_v50 = vor.u32 %v2743_v22, %v2742_v5  ;;  %v2747_v63 = vshll.u32 %v2746_v2, 23  ;;  %v6187_v23 = vpack.c.bf16 %v14125_v28, %v14090_v49  ;;  %v18005_v2 = vld [vmem:[#allocation44_spill] sm:$0xff] }
 0x215   :  { %17992 = vst [vmem:[#allocation63_spill] sm:$0xff] %v14132_v21  ;;  %v6404_v43 = vpack.c.bf16 %v14129_v55, %v14098_v30  ;;  %v2833_v26 = vadd.s32 %v2832_v31, %v2828_v33  ;;  %v14139_v8 = vsub.s32 32, %v13956_v29  ;;  %v14142_v37 = vand.u32 31, %v13945_v58 }
 0x216   :  { %v14145_v24 = vmul.f32 2.0, %v17995_v9  ;;  %v2748_v20 = vor.u32 4788187, %v2747_v63  ;;  %v14148_v52 = vmul.f32 2.0, %v17997_v57  ;;  %vm17999_vm8 = vcmask 23552   ;;  %v18009_v57 = vld [vmem:[#allocation61_spill] sm:$0xff] }
 0x217   :  { %17993 = vst [vmem:[#allocation64_spill] sm:$0xff] %v14139_v8  ;;  %17994 = vst [vmem:[#allocation65_spill] sm:$0xff] %v14142_v37  ;;  %9654 = vmatmul.mubr.msk.bf16.gmra.mrb[132].mxu0 %vm17999_vm8, %v6187_v23  ;;  %v2834_v41 = vadd.s32 536870912, %v2833_v26  ;;  %v17544_v58 = vand.u32 2147483647, %v14155_v1  ;;  %v2894_v17 = vshll.u32 %v17782_v18, %v18001_v12  ;;  %v2751_v19 = vcvt.s32.f32 %v2744_v50  ;;  %v18007_v50 = vld [vmem:[#allocation40_spill] sm:$0xff] }
 0x218   :  { %17996 = vst [vmem:[#allocation66_spill] sm:$0xff] %v14145_v24  ;;  %17998 = vst [vmem:[#allocation67_spill] sm:$0xff] %v14148_v52  ;;  %9657 = vmatprep.mubr.msk.bf16.mxu0 %vm17937_vm5, %v17760_v45  ;;  %v2895_v5 = vshrl.u32 %v17783_v32, %v18002_v42  ;;  %v2897_v10 = vshll.u32 %v17783_v32, %v18001_v12  ;;  %v2898_v14 = vshrl.u32 %v17784_v7, %v18002_v42 }
 0x219   :  { %vm18000_vm9 = vmmov %vm17999_vm8  ;;  %v2749_v39 = vand.u32 2147483647, %v2748_v20  ;;  %v14170_v33 = vshrl.u32 %v2834_v41, 30  ;;  %v2903_v62 = vshll.u32 %v17785_v11, %v18001_v12  ;;  %v2904_v4 = vshrl.u32 %v17786_v51, %v18002_v42 }
 0x21a   :  { %9708 = vmatmul.mubr.msk.bf16.gmra.mrb[132].mxu1 %vm18000_vm9, %v6404_v43  ;;  %v14178_v22 = vmul.f32 %v14145_v24, %v18003_v48  ;;  %v14182_v60 = vmul.f32 %v14148_v52, %v18005_v2  ;;  %v2900_v61 = vshll.u32 %v17784_v7, %v18001_v12  ;;  %v2901_v31 = vshrl.u32 %v17785_v11, %v18002_v42  ;;  %v18010_v24 = vld [vmem:[#allocation4_spill] sm:$0xff] }
 0x21b   :  { %9711 = vmatprep.mubr.msk.bf16.mxu1 %vm17937_vm5, %v17760_v45  ;;  %v14189_v63 = vmul.f32 2.0, %v18007_v50  ;;  %v2755_v23 = vsub.s32 4, %v14003_v34  ;;  %v2836_v43 = vshll.u32 %v14170_v33, 30  ;;  %v2884_v20 = vand.u32 8388607, %v17544_v58 }
 0x21c   :  { %18004 = vst [vmem:[#allocation62_spill] sm:$0xff] %v14178_v22  ;;  %18006 = vst [vmem:[#allocation11_spill] sm:$0xff] %v14182_v60  ;;  %v2896_v41 = vor.u32 %v2895_v5, %v2894_v17  ;;  %v2905_v48 = vor.u32 %v2904_v4, %v2903_v62  ;;  %v2906_v2 = vshll.u32 %v17786_v51, %v18001_v12  ;;  %vm2912_vm4 = vcmp.lt.s32.totalorder %v18009_v57, 4  ;;  %v18012_v5 = vld [vmem:[#allocation6_spill] sm:$0xff] }
 0x21d   :  { %18008 = vst [vmem:[#allocation38_spill] sm:$0xff] %v14189_v63  ;;  %v2907_v0 = vshrl.u32 %v17787_v36, %v18002_v42  ;;  %v2752_v54 = vmul.f32 %v2751_v19, %v2749_v39  ;;  %v14199_v52 = vsub.s32 %v2833_v26, %v2836_v43  ;;  %v2899_v50 = vor.u32 %v2898_v14, %v2897_v10 }
 0x21e   :  { %v14204_v9 = vmul.f32 %v14189_v63, %v18010_v24  ;;  %vm2671_vm6 = vcmp.lt.s32.totalorder %v13835_v59, 0  ;;  %v2902_v17 = vor.u32 %v2901_v31, %v2900_v61  ;;  %vm2909_vm11 = vcmp.lt.s32.totalorder %v18009_v57, 1  ;;  %v18014_v61 = vld [vmem:[#allocation46_spill] sm:$0xff] }
 0x21f   :  { %v14209_v12 = vmul.f32 2.0, %v18012_v5  ;;  %v2756_v26 = vsel %vm2671_vm6, %v2755_v23, %v14003_v34  ;;  %v2839_v19 = vsub.s32 0, %v14199_v52  ;;  %vm2911_vm10 = vcmp.lt.s32.totalorder %v18009_v57, 3  ;;  %v18016_v23 = vld [vmem:[#allocation51_spill] sm:$0xff] }
 0x220   :  { %18011 = vst [vmem:[#allocation44_spill] sm:$0xff] %v14204_v9  ;;  %v2885_v10 = vor.u32 8388608, %v2884_v20  ;;  %v2893_v24 = vshrl.u32 %v17782_v18, %v18002_v42  ;;  %v2908_v14 = vor.u32 %v2907_v0, %v2906_v2  ;;  %v2918_v39 = vsel %vm2912_vm4, %v2905_v48, 920167782  ;;  %v18018_v42 = vld [vmem:[#allocation52_spill] sm:$0xff] }
 0x221   :  { %18013 = vst [vmem:[#allocation61_spill] sm:$0xff] %v14209_v12  ;;  %v2753_v62 = vxor.u32 2147483648, %v2752_v54  ;;  %v8930_v4 = vmin.u32 %v2839_v19, %v14199_v52  ;;  %vm2910_vm7 = vcmp.lt.s32.totalorder %v18009_v57, 2  ;;  %v2917_v34 = vsel %vm2909_vm11, %v2896_v41, %v2899_v50 }
 0x222   :  { %v14226_v31 = vmul.f32 %v14209_v12, %v18014_v61  ;;  %v14229_v43 = vmul.f32 2.0, %v18016_v23  ;;  %v14232_v0 = vmul.f32 2.0, %v18018_v42  ;;  %v2919_v20 = vsel %vm2911_vm10, %v2902_v17, %v2918_v39 }
 0x223   :  { %v18020_v2 = vand.u32 2147483647, %v13835_v59  ;;  %v2841_v58 = vclz %v8930_v4  ;;  %v2914_v61 = vsel %vm2912_vm4, %v2902_v17, 2102212464  ;;  %v2921_v23 = vsel %vm2909_vm11, %v2899_v50, %v2902_v17 }
 0x224   :  { %18015 = vst [vmem:[#allocation4_spill] sm:$0xff] %v14226_v31  ;;  %18017 = vst [vmem:[#allocation46_spill] sm:$0xff] %v14229_v43  ;;  %v2920_v12 = vsel %vm2910_vm7, %v2917_v34, %v2919_v20  ;;  %v2922_v39 = vsel %vm2912_vm4, %v2908_v14, 1326507024  ;;  %v2754_v5 = vsel %vm2671_vm6, %v2753_v62, %v2752_v54  ;;  %v2913_v63 = vsel %vm2909_vm11, %v2893_v24, %v2896_v41 }
 0x225   :  { %18019 = vst [vmem:[#allocation68_spill] sm:$0xff] %v14232_v0  ;;  %vm14238_vm12 = vcmp.le.f32.partialorder %v18020_v2, 0.7853982  ;;  %v2925_v2 = vshll.u32 %v2885_v10, 8  ;;  %v8931_v4 = vadd.s32 4294967294, %v2841_v58  ;;  %v2923_v17 = vsel %vm2911_vm10, %v2905_v48, %v2922_v39 }
 0x226   :  { %v2758_v42 = vsel %vm14238_vm12, 0, %v2756_v26  ;;  %v2915_v26 = vsel %vm2911_vm10, %v2899_v50, %v2914_v61  ;;  %v2924_v34 = vsel %vm2910_vm7, %v2921_v23, %v2923_v17  ;;  %v2829_v54 = vadd.s32 %v14070_v38, %v14068_v16  ;;  %v18023_v16 = vld [vmem:[#allocation50_spill] sm:$0xff]  ;;  %v18025_v61 = vld [vmem:[#allocation55_spill] sm:$0xff] }
 0x227   :  { %v14262_v20 = vmul.u32.u64.low %v2925_v2, %v2920_v12  ;;  %v14263_v31 = vmul.u32.u64.high %v2925_v2, %v2920_v12, %v14262_v20  ;;  %vm8932_vm0 = vcmp.lt.s32.totalorder %v8931_v4, 0  ;;  %v2757_v41 = vsel %vm14238_vm12, %v13835_v59, %v2754_v5 }
 0x228   :  { %v14268_v58 = vmul.u32.u64.low %v2925_v2, %v2924_v34  ;;  %v14269_v10 = vmul.u32.u64.high %v2925_v2, %v2924_v34, %v14268_v58  ;;  %v2762_v48 = vadd.s32 3, %v2758_v42  ;;  %v2844_v50 = vsel %vm8932_vm0, 0, %v8931_v4 }
 0x229   :  { %v2859_v24 = vsub.s32 4, %v14170_v33  ;;  %v2845_v14 = vsub.s32 32, %v2844_v50  ;;  %v2846_v12 = vshll.u32 %v14199_v52, %v2844_v50  ;;  %v2849_v62 = vsub.s32 4294967266, %v2844_v50  ;;  %v14304_v50 = vld [vmem:[%s17717_s6 + $0x98] sm:$0xff] }
 0x22a   :  { %v2916_v23 = vsel %vm2910_vm7, %v2913_v63, %v2915_v26  ;;  %v14280_v38 = vmul.f32 %v14229_v43, %v18023_v16  ;;  %v14284_v39 = vmul.f32 %v14232_v0, %v18025_v61  ;;  %v18027_v5 = vand.u32 2147483647, %v13963_v35  ;;  %v14330_v0 = vpop.f32.mrb[40].mxu0  ;;  %v14332_v43 = vpop.f32.mrb[40].mxu1 }
 0x22b   :  { %v2935_v52 = vadd.s32 1, %v14263_v31  ;;  %10358 = vcosq.f32 %v2757_v41  ;;  %vm2775_vm2 = vcmp.lt.s32.totalorder %v13963_v35, 0  ;;  %v2847_v57 = vshrl.u32 %v2829_v54, %v2845_v14  ;;  %v18031_v14 = vld [vmem:[#allocation58_spill] sm:$0xff] }
 0x22c   :  { %18024 = vst [vmem:[#allocation50_spill] sm:$0xff] %v14280_v38  ;;  %18026 = vst [vmem:[#allocation55_spill] sm:$0xff] %v14284_v39  ;;  %vm14288_vm14 = vcmp.le.f32.partialorder %v18027_v5, 0.7853982  ;;  %v2850_v63 = vadd.s32 127, %v2849_v62  ;;  %10360 = vsinq.f32 %v2757_v41  ;;  %v14294_v4 = vand.u32 3, %v2762_v48 }
 0x22d   :  { %v2932_v17 = vmul.u32 %v2925_v2, %v2916_v23  ;;  %vm2934_vm15 = vc.u32 %v14269_v10, %v14262_v20  ;;  %v2848_v26 = vor.u32 %v2847_v57, %v2846_v12  ;;  %v2860_v58 = vsel %vm2775_vm2, %v2859_v24, %v14170_v33  ;;  %v18030_v48 = vld [vmem:[#allocation13_spill] sm:$0xff] }
 0x22e   :  { %v2851_v34 = vshll.u32 %v2850_v63, 23  ;;  %v17550_v54 = vand.u32 2147483647, %v14304_v50  ;;  %v2936_v41 = vsel %vm2934_vm15, %v2935_v52, %v14263_v31  ;;  %v2998_v2 = vshll.u32 %v17782_v18, %v18030_v48 }
 0x22f   :  { %v2999_v12 = vshrl.u32 %v17783_v32, %v18031_v14  ;;  %v3001_v62 = vshll.u32 %v17783_v32, %v18030_v48  ;;  %v2855_v33 = vcvt.s32.f32 %v2848_v26  ;;  %v3002_v24 = vshrl.u32 %v17784_v7, %v18031_v14 }
 0x230   :  { %v2852_v23 = vor.u32 4788187, %v2851_v34  ;;  %v3004_v16 = vshll.u32 %v17784_v7, %v18030_v48  ;;  %v2862_v31 = vsel %vm14288_vm14, 0, %v2860_v58  ;;  %v14320_v61 = vand.u32 3, %v2758_v42 }
 0x231   :  { %v2937_v5 = vadd.s32 %v2936_v41, %v2932_v17  ;;  %v3005_v52 = vshrl.u32 %v17785_v11, %v18031_v14  ;;  %v2988_v63 = vand.u32 8388607, %v17550_v54  ;;  %v3007_v26 = vshll.u32 %v17785_v11, %v18030_v48  ;;  %v9503_v54 = vpop.f32.mrb[41].mxu1 }
 0x232   :  { %v2853_v57 = vand.u32 2147483647, %v2852_v23  ;;  %v3008_v34 = vshrl.u32 %v17786_v51, %v18031_v14  ;;  %v3000_v58 = vor.u32 %v2999_v12, %v2998_v2  ;;  %v3010_v17 = vshll.u32 %v17786_v51, %v18030_v48  ;;  %v9449_v23 = vpop.f32.mrb[41].mxu0  ;;  %v14340_v21 = vpop.f32.mrb[42].mxu1  ;;  %v18032_v54 = vld [vmem:[#allocation8_spill] sm:$0xff] }
 0x233   :  { %v2938_v42 = vadd.s32 536870912, %v2937_v5  ;;  %v3011_v41 = vshrl.u32 %v17787_v36, %v18031_v14  ;;  %v3003_v38 = vor.u32 %v3002_v24, %v3001_v62  ;;  %v3006_v9 = vor.u32 %v3005_v52, %v3004_v16  ;;  %v14338_v22 = vpop.f32.mrb[42].mxu0  ;;  %v9504_v62 = vpop.f32.mrb[43].mxu1 }
 0x234   :  { %v2856_v39 = vmul.f32 %v2855_v33, %v2853_v57  ;;  %v3009_v60 = vor.u32 %v3008_v34, %v3007_v26  ;;  %vm2765_vm3 = vcmp.eq.s32.totalorder %v14294_v4, 0  ;;  %vm2768_vm13 = vcmp.eq.s32.totalorder %v14294_v4, 2  ;;  %v9450_v12 = vpop.f32.mrb[43].mxu0 }
 0x235   :  { %v2866_v2 = vadd.s32 3, %v2862_v31  ;;  %vm5348_vm1 = vcmp.eq.s32.totalorder %v14320_v61, 0  ;;  %vm5351_vm8 = vcmp.eq.s32.totalorder %v14320_v61, 2  ;;  %v14346_v48 = vshrl.u32 %v2938_v42, 30  ;;  %v10359_v33 = vpop.eup %10358 }
 0x236   :  { %vm3013_vm9 = vcmp.lt.s32.totalorder %v18032_v54, 1  ;;  %vm3015_vm4 = vcmp.lt.s32.totalorder %v18032_v54, 3  ;;  %v2857_v24 = vxor.u32 2147483648, %v2856_v39  ;;  %v14350_v16 = vand.u32 3, %v2862_v31  ;;  %v10361_v57 = vpop.eup %10360 }
 0x237   :  { %v3012_v52 = vor.u32 %v3011_v41, %v3010_v17  ;;  %vm3016_vm6 = vcmp.lt.s32.totalorder %v18032_v54, 4  ;;  %v2940_v26 = vshll.u32 %v14346_v48, 30  ;;  %v2989_v34 = vor.u32 8388608, %v2988_v63 }
 0x238   :  { %v2997_v42 = vshrl.u32 %v17782_v18, %v18031_v14  ;;  %v3022_v23 = vsel %vm3016_vm6, %v3009_v60, 920167782  ;;  %vm2764_vm11 = vcmp.lt.s32.totalorder %v14294_v4, 2  ;;  %v2858_v12 = vsel %vm2775_vm2, %v2857_v24, %v2856_v39 }
 0x239   :  { %vm5347_vm10 = vcmp.lt.s32.totalorder %v14320_v61, 2  ;;  %vm3014_vm7 = vcmp.lt.s32.totalorder %v18032_v54, 2  ;;  %v3021_v31 = vsel %vm3013_vm9, %v3000_v58, %v3003_v38  ;;  %v3023_v63 = vsel %vm3015_vm4, %v3006_v9, %v3022_v23 }
 0x23a   :  { %v2861_v14 = vsel %vm14288_vm14, %v13963_v35, %v2858_v12  ;;  %v14370_v17 = vsub.s32 %v2937_v5, %v2940_v26  ;;  %v3018_v41 = vsel %vm3016_vm6, %v3006_v9, 2102212464  ;;  %v3025_v39 = vsel %vm3013_vm9, %v3003_v38, %v3006_v9 }
 0x23b   :  { %v2766_v62 = vxor.u32 2147483648, %v10361_v57  ;;  %v2769_v24 = vxor.u32 2147483648, %v10359_v33  ;;  %10362 = vcosq.f32 %v2861_v14  ;;  %v3026_v47 = vsel %vm3016_vm6, %v3012_v52, 1326507024 }
 0x23c   :  { %vm2761_vm12 = vweird.f32 %v13835_v59  ;;  %10364 = vsinq.f32 %v2861_v14  ;;  %v2943_v19 = vsub.s32 0, %v14370_v17  ;;  %v3024_v5 = vsel %vm3014_vm7, %v3021_v31, %v3023_v63 }
 0x23d   :  { %v3027_v26 = vsel %vm3015_vm4, %v3009_v60, %v3026_v47  ;;  %v3017_v9 = vsel %vm3013_vm9, %v2997_v42, %v3000_v58  ;;  %v3019_v23 = vsel %vm3015_vm4, %v3003_v38, %v3018_v41  ;;  %v3029_v12 = vshll.u32 %v2989_v34, 8 }
 0x23e   :  { %v3028_v52 = vsel %vm3014_vm7, %v3025_v39, %v3027_v26  ;;  %v2867_v8 = vand.u32 3, %v2866_v2  ;;  %v8934_v14 = vmin.u32 %v2943_v19, %v14370_v17  ;;  %v14393_v29 = vadd.f32 %v13971_v6, %v13969_v15 }
 0x23f   :  { %v14397_v47 = vadd.f32 %v13991_v25, %v13989_v44  ;;  %v14399_v60 = vmul.u32.u64.low %v3029_v12, %v3028_v52  ;;  %v14400_v58 = vmul.u32.u64.high %v3029_v12, %v3028_v52, %v14399_v60  ;;  %vm2865_vm0 = vweird.f32 %v13963_v35 }
 0x240   :  { %18033 = vst [vmem:[#allocation13_spill] sm:$0xff] %v14393_v29  ;;  %v14402_v42 = vmul.u32.u64.low %v3029_v12, %v3024_v5  ;;  %v14403_v38 = vmul.u32.u64.high %v3029_v12, %v3024_v5, %v14402_v42  ;;  %vm5450_vm14 = vcmp.lt.s32.totalorder %v14350_v16, 2  ;;  %vm2879_vm2 = vcmp.lt.s32.totalorder %v14155_v1, 0 }
 0x241   :  { %18034 = vst [vmem:[#allocation58_spill] sm:$0xff] %v14397_v47  ;;  %v2945_v2 = vclz %v8934_v14  ;;  %v3020_v15 = vsel %vm3014_vm7, %v3017_v9, %v3019_v23  ;;  %v2767_v6 = vsel %vm2765_vm3, %v10359_v33, %v2766_v62  ;;  %v2770_v44 = vsel %vm2768_vm13, %v2769_v24, %v10361_v57 }
 0x242   :  { %v5350_v25 = vsel %vm5348_vm1, %v10359_v33, %v2766_v62  ;;  %v5353_v34 = vsel %vm5351_vm8, %v2769_v24, %v10361_v57  ;;  %vm2868_vm15 = vcmp.lt.s32.totalorder %v2867_v8, 2  ;;  %vm5451_vm9 = vcmp.eq.s32.totalorder %v14350_v16, 0 }
 0x243   :  { %vm5454_vm4 = vcmp.eq.s32.totalorder %v14350_v16, 2  ;;  %v8935_v31 = vadd.s32 4294967294, %v2945_v2  ;;  %vm2869_vm6 = vcmp.eq.s32.totalorder %v2867_v8, 0  ;;  %v3036_v54 = vmul.u32 %v3029_v12, %v3020_v15 }
 0x244   :  { %vm3038_vm3 = vc.u32 %v14400_v58, %v14402_v42  ;;  %v3039_v63 = vadd.s32 1, %v14403_v38  ;;  %v2771_v41 = vsel %vm2764_vm11, %v2767_v6, %v2770_v44  ;;  %v5354_v33 = vsel %vm5347_vm10, %v5350_v25, %v5353_v34 }
 0x245   :  { %v2933_v57 = vadd.s32 %v14262_v20, %v14269_v10  ;;  %vm8936_vm13 = vcmp.lt.s32.totalorder %v8935_v31, 0  ;;  %v10363_v39 = vpop.eup %10362  ;;  %vm2872_vm1 = vcmp.eq.s32.totalorder %v2867_v8, 2  ;;  %v2963_v24 = vsub.s32 4, %v14346_v48 }
 0x246   :  { %v2948_v62 = vsel %vm8936_vm13, 0, %v8935_v31  ;;  %v3040_v19 = vsel %vm3038_vm3, %v3039_v63, %v14403_v38  ;;  %v10365_v5 = vpop.eup %10364  ;;  %v2873_v26 = vxor.u32 2147483648, %v10363_v39  ;;  %v14435_v61 = vsel %vm2761_vm12, nan, %v2771_v41 }
 0x247   :  { %v2949_v9 = vsub.s32 32, %v2948_v62  ;;  %v2950_v4 = vshll.u32 %v14370_v17, %v2948_v62  ;;  %v2953_v23 = vsub.s32 4294967266, %v2948_v62  ;;  %18035 = vst [vmem:[#allocation8_spill] sm:$0xff] %v14435_v61  ;;  %v2870_v52 = vxor.u32 2147483648, %v10365_v5  ;;  %v14480_v62 = vld [vmem:[%s17717_s6 + $0xa0] sm:$0xff] }
 0x248   :  { %v14439_v20 = vsel %vm2761_vm12, nan, %v5354_v33  ;;  %v3041_v10 = vadd.s32 %v3040_v19, %v3036_v54  ;;  %v2874_v12 = vsel %vm2872_vm1, %v2873_v26, %v10365_v5  ;;  %v5456_v14 = vsel %vm5454_vm4, %v2873_v26, %v10365_v5 }
 0x249   :  { %v2951_v60 = vshrl.u32 %v2933_v57, %v2949_v9  ;;  %v2954_v38 = vadd.s32 127, %v2953_v23  ;;  %v2871_v2 = vsel %vm2869_vm6, %v10363_v39, %v2870_v52  ;;  %v5453_v17 = vsel %vm5451_vm9, %v10363_v39, %v2870_v52 }
 0x24a   :  { %v2964_v15 = vsel %vm2879_vm2, %v2963_v24, %v14346_v48  ;;  %v3042_v6 = vadd.s32 536870912, %v3041_v10  ;;  %v2875_v59 = vsel %vm2868_vm15, %v2871_v2, %v2874_v12  ;;  %v5457_v44 = vsel %vm5450_vm14, %v5453_v17, %v5456_v14 }
 0x24b   :  { %v2952_v25 = vor.u32 %v2951_v60, %v2950_v4  ;;  %v2955_v34 = vshll.u32 %v2954_v38, 23  ;;  %v14454_v31 = vsel %vm2865_vm0, nan, %v2875_v59  ;;  %v14458_v54 = vsel %vm2865_vm0, nan, %v5457_v44 }
 0x24c   :  { %18036 = vst [vmem:[#allocation69_spill] sm:$0xff] %v14454_v31  ;;  %18037 = vst [vmem:[#allocation70_spill] sm:$0xff] %v14458_v54  ;;  %v18038_v63 = vand.u32 2147483647, %v14155_v1  ;;  %v14466_v8 = vshrl.u32 %v3042_v6, 30  ;;  %v6188_v16 = vpack.c.bf16 %v14454_v31, %v14435_v61  ;;  %v6405_v41 = vpack.c.bf16 %v14458_v54, %v14439_v20 }
 0x24d   :  { %v2956_v33 = vor.u32 4788187, %v2955_v34  ;;  %v2959_v57 = vcvt.s32.f32 %v2952_v25  ;;  %v17561_v24 = vand.u32 2147483647, %v14480_v62  ;;  %v3102_v19 = vshll.u32 %v17782_v18, %v13524_v53 }
 0x24e   :  { %vm14462_vm8 = vcmp.le.f32.partialorder %v18038_v63, 0.7853982  ;;  %v3044_v39 = vshll.u32 %v14466_v8, 30  ;;  %vm18041_vm11 = vcmask 23552   ;;  %v3103_v26 = vshrl.u32 %v17783_v32, %v13588_v13 }
 0x24f   :  { %v14474_v35 = vsel %vm14462_vm8, 0, %v2964_v15  ;;  %9658 = vmatmul.mubr.msk.bf16.gmra.mrb[136].mxu0 %vm18041_vm11, %v6188_v16  ;;  %vm18042_vm10 = vmmov %vm18041_vm11  ;;  %v2957_v5 = vand.u32 2147483647, %v2956_v33  ;;  %v3105_v9 = vshll.u32 %v17783_v32, %v13524_v53  ;;  %v3106_v4 = vshrl.u32 %v17784_v7, %v13588_v13 }
 0x250   :  { %9712 = vmatmul.mubr.msk.bf16.gmra.mrb[136].mxu1 %vm18042_vm10, %v6405_v41  ;;  %v14494_v23 = vsub.s32 32, %v14142_v37  ;;  %9661 = vmatprep.mubr.msk.bf16.mxu0 %vm17937_vm5, %v17760_v45  ;;  %v14500_v52 = vsub.s32 %v3041_v10, %v3044_v39  ;;  %v3111_v12 = vshll.u32 %v17785_v11, %v13524_v53  ;;  %v3112_v14 = vshrl.u32 %v17786_v51, %v13588_v13 }
 0x251   :  { %9715 = vmatprep.mubr.msk.bf16.mxu1 %vm17937_vm5, %v17760_v45  ;;  %v2960_v60 = vmul.f32 %v2959_v57, %v2957_v5  ;;  %v3108_v38 = vshll.u32 %v17784_v7, %v13524_v53  ;;  %v3109_v2 = vshrl.u32 %v17785_v11, %v13588_v13  ;;  %v3114_v17 = vshll.u32 %v17786_v51, %v13524_v53 }
 0x252   :  { %18043 = vst [vmem:[#allocation71_spill] sm:$0xff] %v14494_v23  ;;  %v2970_v15 = vadd.s32 3, %v14474_v35  ;;  %vm2983_vm7 = vcmp.lt.s32.totalorder %v14304_v50, 0  ;;  %v3047_v10 = vsub.s32 0, %v14500_v52  ;;  %v3092_v6 = vand.u32 8388607, %v17561_v24 }
 0x253   :  { %v3115_v59 = vshrl.u32 %v17787_v36, %v13588_v13  ;;  %v2961_v44 = vxor.u32 2147483648, %v2960_v60  ;;  %v3101_v25 = vshrl.u32 %v17782_v18, %v13588_v13  ;;  %v3104_v34 = vor.u32 %v3103_v26, %v3102_v19 }
 0x254   :  { %v3107_v63 = vor.u32 %v3106_v4, %v3105_v9  ;;  %v3037_v53 = vadd.s32 %v14402_v42, %v14400_v58  ;;  %v8938_v16 = vmin.u32 %v3047_v10, %v14500_v52  ;;  %v3113_v41 = vor.u32 %v3112_v14, %v3111_v12 }
 0x255   :  { %vm3117_vm12 = vcmp.lt.s32.totalorder %v13519_v27, 1  ;;  %v2962_v33 = vsel %vm2879_vm2, %v2961_v44, %v2960_v60  ;;  %v3110_v57 = vor.u32 %v3109_v2, %v3108_v38  ;;  %v3116_v39 = vor.u32 %v3115_v59, %v3114_v17 }
 0x256   :  { %vm3120_vm0 = vcmp.lt.s32.totalorder %v13519_v27, 4  ;;  %v2965_v13 = vsel %vm14462_vm8, %v14155_v1, %v2962_v33  ;;  %v3049_v19 = vclz %v8938_v16  ;;  %v3093_v5 = vor.u32 8388608, %v3092_v6 }
 0x257   :  { %vm3119_vm14 = vcmp.lt.s32.totalorder %v13519_v27, 3  ;;  %v3067_v58 = vsub.s32 4, %v14466_v8  ;;  %vm3118_vm15 = vcmp.lt.s32.totalorder %v13519_v27, 2  ;;  %v3122_v42 = vsel %vm3120_vm0, %v3110_v57, 2102212464  ;;  %v18049_v27 = vld [vmem:[#allocation9_spill] sm:$0xff] }
 0x258   :  { %v3125_v26 = vsel %vm3117_vm12, %v3104_v34, %v3107_v63  ;;  %10366 = vcosq.f32 %v2965_v13  ;;  %v8939_v9 = vadd.s32 4294967294, %v3049_v19  ;;  %v3121_v48 = vsel %vm3117_vm12, %v3101_v25, %v3104_v34 }
 0x259   :  { %v3126_v4 = vsel %vm3120_vm0, %v3113_v41, 920167782  ;;  %v3123_v12 = vsel %vm3119_vm14, %v3107_v63, %v3122_v42  ;;  %v3129_v60 = vsel %vm3117_vm12, %v3107_v63, %v3110_v57  ;;  %v3130_v38 = vsel %vm3120_vm0, %v3116_v39, 1326507024 }
 0x25a   :  { %v3127_v14 = vsel %vm3119_vm14, %v3110_v57, %v3126_v4  ;;  %vm8940_vm2 = vcmp.lt.s32.totalorder %v8939_v9, 0  ;;  %v3131_v17 = vsel %vm3119_vm14, %v3113_v41, %v3130_v38  ;;  %v3133_v10 = vshll.u32 %v3093_v5, 8 }
 0x25b   :  { %v3128_v2 = vsel %vm3118_vm15, %v3125_v26, %v3127_v14  ;;  %10368 = vsinq.f32 %v2965_v13  ;;  %v3052_v6 = vsel %vm8940_vm2, 0, %v8939_v9  ;;  %v3068_v59 = vsel %vm2983_vm7, %v3067_v58, %v14466_v8  ;;  %v18044_v13 = vld [vmem:[#allocation7_spill] sm:$0xff]  ;;  %v18051_v26 = vld [vmem:[#allocation14_spill] sm:$0xff] }
 0x25c   :  { %v3132_v44 = vsel %vm3118_vm15, %v3129_v60, %v3131_v17  ;;  %v3053_v25 = vsub.s32 32, %v3052_v6  ;;  %v3054_v34 = vshll.u32 %v14500_v52, %v3052_v6  ;;  %v3057_v63 = vsub.s32 4294967266, %v3052_v6  ;;  %v18057_v6 = vld [vmem:[#allocation37_spill] sm:$0xff] }
 0x25d   :  { %v3124_v16 = vsel %vm3118_vm15, %v3121_v48, %v3123_v12  ;;  %v14556_v33 = vmul.u32.u64.low %v3133_v10, %v3132_v44  ;;  %v14557_v57 = vmul.u32.u64.high %v3133_v10, %v3132_v44, %v14556_v33  ;;  %v14564_v19 = vmul.f32 2.0, %v18044_v13  ;;  %v18053_v12 = vld [vmem:[#allocation10_spill] sm:$0xff] }
 0x25e   :  { %v14559_v41 = vmul.u32.u64.low %v3133_v10, %v3128_v2  ;;  %v14560_v39 = vmul.u32.u64.high %v3133_v10, %v3128_v2, %v14559_v41  ;;  %v18046_v8 = vand.u32 2147483647, %v14304_v50  ;;  %v3055_v52 = vshrl.u32 %v3037_v53, %v3053_v25  ;;  %v18055_v53 = vld [vmem:[#allocation59_spill] sm:$0xff] }
 0x25f   :  { %18045 = vst [vmem:[#allocation72_spill] sm:$0xff] %v14564_v19  ;;  %v3058_v58 = vadd.s32 127, %v3057_v63  ;;  %v14573_v42 = vmul.f32 2.0, %v18049_v27  ;;  %v14576_v9 = vmul.f32 2.0, %v18051_v26  ;;  %v14578_v48 = vand.u32 3, %v2970_v15 }
 0x260   :  { %vm14568_vm9 = vcmp.le.f32.partialorder %v18046_v8, 0.7853982  ;;  %v14584_v14 = vmul.f32 %v14564_v19, %v18053_v12  ;;  %v3056_v60 = vor.u32 %v3055_v52, %v3054_v34  ;;  %v3140_v2 = vmul.u32 %v3133_v10, %v3124_v16  ;;  %v18059_v16 = vld [vmem:[#allocation42_spill] sm:$0xff]  ;;  %v14610_v52 = vld [vmem:[%s17717_s6 + $0xa8] sm:$0xff] }
 0x261   :  { %18050 = vst [vmem:[#allocation73_spill] sm:$0xff] %v14573_v42  ;;  %18052 = vst [vmem:[#allocation74_spill] sm:$0xff] %v14576_v9  ;;  %v3070_v4 = vsel %vm14568_vm9, 0, %v3068_v59  ;;  %v3059_v38 = vshll.u32 %v3058_v58, 23  ;;  %v14588_v17 = vmul.f32 %v14573_v42, %v18055_v53  ;;  %v14592_v44 = vmul.f32 %v14576_v9, %v18057_v6  ;;  %v14618_v53 = vpop.f32.mrb[44].mxu1 }
 0x262   :  { %18054 = vst [vmem:[#allocation10_spill] sm:$0xff] %v14584_v14  ;;  %vm3142_vm4 = vc.u32 %v14557_v57, %v14559_v41  ;;  %v3143_v15 = vadd.s32 1, %v14560_v39  ;;  %v14597_v59 = vpop.eup %10366  ;;  %v3063_v63 = vcvt.s32.f32 %v3056_v60  ;;  %v3074_v34 = vadd.s32 3, %v3070_v4 }
 0x263   :  { %18056 = vst [vmem:[#allocation59_spill] sm:$0xff] %v14588_v17  ;;  %18058 = vst [vmem:[#allocation37_spill] sm:$0xff] %v14592_v44  ;;  %v3060_v25 = vor.u32 4788187, %v3059_v38  ;;  %v14600_v10 = vand.u32 3, %v14474_v35  ;;  %v14603_v33 = vmul.f32 2.0, %v18059_v16  ;;  %v3209_v24 = vshll.u32 %v17783_v32, %v13554_v56 }
 0x264   :  { %vm2973_vm6 = vcmp.eq.s32.totalorder %v14578_v48, 0  ;;  %v3144_v8 = vsel %vm3142_vm4, %v3143_v15, %v14560_v39  ;;  %vm2976_vm3 = vcmp.eq.s32.totalorder %v14578_v48, 2  ;;  %v14614_v60 = vand.u32 3, %v3070_v4  ;;  %v14616_v38 = vpop.f32.mrb[44].mxu0 }
 0x265   :  { %18060 = vst [vmem:[#allocation75_spill] sm:$0xff] %v14603_v33  ;;  %v3061_v12 = vand.u32 2147483647, %v3060_v25  ;;  %v3145_v35 = vadd.s32 %v3144_v8, %v3140_v2  ;;  %v14620_v6 = vpop.eup %10368  ;;  %v3206_v39 = vshll.u32 %v17782_v18, %v13554_v56  ;;  %v3207_v15 = vshrl.u32 %v17783_v32, %v13927_v3  ;;  %v9453_v25 = vpop.f32.mrb[45].mxu0 }
 0x266   :  { %v3210_v4 = vshrl.u32 %v17784_v7, %v13927_v3  ;;  %v9507_v2 = vpop.f32.mrb[45].mxu1  ;;  %v14630_v58 = vand.u32 3, %v3074_v34  ;;  %vm5554_vm13 = vcmp.eq.s32.totalorder %v14600_v10, 0  ;;  %vm5557_vm1 = vcmp.eq.s32.totalorder %v14600_v10, 2  ;;  %v14636_v16 = vpop.f32.mrb[46].mxu0 }
 0x267   :  { %v3064_v8 = vmul.f32 %v3063_v63, %v3061_v12  ;;  %v3146_v47 = vadd.s32 536870912, %v3145_v35  ;;  %v3215_v29 = vshll.u32 %v17785_v11, %v13554_v56  ;;  %v14638_v9 = vpop.f32.mrb[46].mxu1  ;;  %vm2972_vm8 = vcmp.lt.s32.totalorder %v14578_v48, 2  ;;  %v9454_v26 = vpop.f32.mrb[47].mxu0 }
 0x268   :  { %v18061_v25 = vand.u32 2147483647, %v14610_v52  ;;  %v3212_v63 = vshll.u32 %v17784_v7, %v13554_v56  ;;  %v3213_v34 = vshrl.u32 %v17785_v11, %v13927_v3  ;;  %v3216_v12 = vshrl.u32 %v17786_v51, %v13927_v3  ;;  %v9508_v44 = vpop.f32.mrb[47].mxu1 }
 0x269   :  { %v2977_v42 = vxor.u32 2147483648, %v14597_v59  ;;  %v3065_v27 = vxor.u32 2147483648, %v3064_v8  ;;  %v14650_v19 = vshrl.u32 %v3146_v47, 30  ;;  %v3218_v13 = vshll.u32 %v17786_v51, %v13554_v56  ;;  %v18062_v47 = vld [vmem:[#allocation21_spill] sm:$0xff] }
 0x26a   :  { %v3196_v2 = vand.u32 8388607, %v18061_v25  ;;  %v2974_v25 = vxor.u32 2147483648, %v14620_v6  ;;  %vm5553_vm11 = vcmp.lt.s32.totalorder %v14600_v10, 2  ;;  %v3208_v17 = vor.u32 %v3207_v15, %v3206_v39 }
 0x26b   :  { %v3211_v14 = vor.u32 %v3210_v4, %v3209_v24  ;;  %v3219_v23 = vshrl.u32 %v17787_v36, %v13927_v3  ;;  %v3066_v26 = vsel %vm2983_vm7, %v3065_v27, %v3064_v8  ;;  %v3148_v44 = vshll.u32 %v14650_v19, 30 }
 0x26c   :  { %v3217_v37 = vor.u32 %v3216_v12, %v3215_v29  ;;  %vm3221_vm10 = vcmp.lt.s32.totalorder %v18062_v47, 1  ;;  %vm2969_vm12 = vweird.f32 %v14155_v1  ;;  %v3069_v56 = vsel %vm14568_vm9, %v14304_v50, %v3066_v26 }
 0x26d   :  { %v3214_v54 = vor.u32 %v3213_v34, %v3212_v63  ;;  %v3220_v39 = vor.u32 %v3219_v23, %v3218_v13  ;;  %vm3224_vm0 = vcmp.lt.s32.totalorder %v18062_v47, 4  ;;  %10370 = vcosq.f32 %v3069_v56 }
 0x26e   :  { %v14667_v24 = vsub.s32 %v3145_v35, %v3148_v44  ;;  %v3205_v27 = vshrl.u32 %v17782_v18, %v13927_v3  ;;  %vm3223_vm7 = vcmp.lt.s32.totalorder %v18062_v47, 3  ;;  %10372 = vsinq.f32 %v3069_v56 }
 0x26f   :  { %v3197_v29 = vor.u32 8388608, %v3196_v2  ;;  %vm3222_vm14 = vcmp.lt.s32.totalorder %v18062_v47, 2  ;;  %v3229_v5 = vsel %vm3221_vm10, %v3208_v17, %v3211_v14  ;;  %v2975_v23 = vsel %vm2973_vm6, %v14597_v59, %v2974_v25 }
 0x270   :  { %v2978_v13 = vsel %vm2976_vm3, %v2977_v42, %v14620_v6  ;;  %v3151_v35 = vsub.s32 0, %v14667_v24  ;;  %v3230_v3 = vsel %vm3224_vm0, %v3217_v37, 920167782  ;;  %v3226_v15 = vsel %vm3224_vm0, %v3214_v54, 2102212464 }
 0x271   :  { %v3231_v4 = vsel %vm3223_vm7, %v3214_v54, %v3230_v3  ;;  %v3233_v8 = vsel %vm3221_vm10, %v3211_v14, %v3214_v54  ;;  %v3234_v2 = vsel %vm3224_vm0, %v3220_v39, 1326507024  ;;  %vm5656_vm15 = vcmp.lt.s32.totalorder %v14614_v60, 2 }
 0x272   :  { %vm5657_vm2 = vcmp.eq.s32.totalorder %v14614_v60, 0  ;;  %v8942_v63 = vmin.u32 %v3151_v35, %v14667_v24  ;;  %v3232_v34 = vsel %vm3222_vm14, %v3229_v5, %v3231_v4  ;;  %v3235_v12 = vsel %vm3223_vm7, %v3217_v37, %v3234_v2 }
 0x273   :  { %vm3073_vm9 = vweird.f32 %v14304_v50  ;;  %v5556_v54 = vsel %vm5554_vm13, %v14597_v59, %v2974_v25  ;;  %v5559_v26 = vsel %vm5557_vm1, %v2977_v42, %v14620_v6  ;;  %v3236_v44 = vsel %vm3222_vm14, %v3233_v8, %v3235_v12 }
 0x274   :  { %v3237_v56 = vshll.u32 %v3197_v29, 8  ;;  %v2979_v39 = vsel %vm2972_vm8, %v2975_v23, %v2978_v13  ;;  %v3153_v5 = vclz %v8942_v63  ;;  %v3225_v37 = vsel %vm3221_vm10, %v3205_v27, %v3208_v17 }
 0x275   :  { %v3227_v35 = vsel %vm3223_vm7, %v3211_v14, %v3226_v15  ;;  %vm3076_vm4 = vcmp.lt.s32.totalorder %v14630_v58, 2  ;;  %v5560_v42 = vsel %vm5553_vm11, %v5556_v54, %v5559_v26  ;;  %vm5660_vm6 = vcmp.eq.s32.totalorder %v14614_v60, 2  ;;  %v18065_v54 = vld [vmem:[#allocation17_spill] sm:$0xff] }
 0x276   :  { %v14714_v3 = vmul.u32.u64.low %v3237_v56, %v3236_v44  ;;  %v14715_v59 = vmul.u32.u64.high %v3237_v56, %v3236_v44, %v14714_v3  ;;  %v14717_v25 = vmul.u32.u64.low %v3237_v56, %v3232_v34  ;;  %v14718_v4 = vmul.u32.u64.high %v3237_v56, %v3232_v34, %v14717_v25 }
 0x277   :  { %v8943_v48 = vadd.s32 4294967294, %v3153_v5  ;;  %vm3077_vm3 = vcmp.eq.s32.totalorder %v14630_v58, 0  ;;  %vm3080_vm13 = vcmp.eq.s32.totalorder %v14630_v58, 2  ;;  %v14729_v14 = vadd.f32 %v14332_v43, %v14330_v0  ;;  %v10371_v6 = vpop.eup %10370  ;;  %v18068_v58 = vld [vmem:[#allocation43_spill] sm:$0xff] }
 0x278   :  { %v14733_v17 = vadd.f32 %v14340_v21, %v14338_v22  ;;  %v14737_v10 = vsel %vm2969_vm12, nan, %v2979_v39  ;;  %v3141_v27 = vadd.s32 %v14559_v41, %v14557_v57  ;;  %v3228_v29 = vsel %vm3222_vm14, %v3225_v37, %v3227_v35  ;;  %v10373_v23 = vpop.eup %10372 }
 0x279   :  { %18063 = vst [vmem:[#allocation21_spill] sm:$0xff] %v14729_v14  ;;  %vm8944_vm1 = vcmp.lt.s32.totalorder %v8943_v48, 0  ;;  %v3081_v13 = vxor.u32 2147483648, %v10371_v6  ;;  %v14745_v43 = vsel %vm2969_vm12, nan, %v5560_v42  ;;  %vm3246_vm8 = vc.u32 %v14715_v59, %v14717_v25  ;;  %v18084_v14 = vld [vmem:[#allocation23_spill] sm:$0xff] }
 0x27a   :  { %18064 = vst [vmem:[#allocation76_spill] sm:$0xff] %v14733_v17  ;;  %v3156_v21 = vsel %vm8944_vm1, 0, %v8943_v48  ;;  %v3078_v22 = vxor.u32 2147483648, %v10373_v23  ;;  %v3244_v47 = vmul.u32 %v3237_v56, %v3228_v29  ;;  %v3247_v1 = vadd.s32 1, %v14718_v4  ;;  %v18070_v48 = vld [vmem:[#allocation24_spill] sm:$0xff] }
 0x27b   :  { %v3157_v0 = vsub.s32 32, %v3156_v21  ;;  %v3158_v15 = vshll.u32 %v14667_v24, %v3156_v21  ;;  %v3161_v8 = vsub.s32 4294967266, %v3156_v21  ;;  %v3082_v57 = vsel %vm3080_vm13, %v3081_v13, %v10373_v23 }
 0x27c   :  { %v5662_v41 = vsel %vm5660_vm6, %v3081_v13, %v10373_v23  ;;  %v3079_v2 = vsel %vm3077_vm3, %v10371_v6, %v3078_v22  ;;  %v5659_v63 = vsel %vm5657_vm2, %v10371_v6, %v3078_v22  ;;  %v14760_v24 = vmul.f32 2.0, %v18065_v54  ;;  %v14804_v22 = vld [vmem:[%s17717_s6 + $0xb0] sm:$0xff] }
 0x27d   :  { %v3159_v34 = vshrl.u32 %v3141_v27, %v3157_v0  ;;  %v3162_v12 = vadd.s32 127, %v3161_v8  ;;  %v3083_v26 = vsel %vm3076_vm4, %v3079_v2, %v3082_v57  ;;  %v5663_v44 = vsel %vm5656_vm15, %v5659_v63, %v5662_v41  ;;  %v18072_v27 = vld [vmem:[#allocation18_spill] sm:$0xff]  ;;  %v18079_v41 = vld [vmem:[#allocation25_spill] sm:$0xff]  ;;  %v14819_v63 = vpop.f32.mrb[48].mxu0 }
 0x27e   :  { %18066 = vst [vmem:[#allocation77_spill] sm:$0xff] %v14760_v24  ;;  %v3248_v56 = vsel %vm3246_vm8, %v3247_v1, %v14718_v4  ;;  %v14772_v39 = vsel %vm3073_vm9, nan, %v3083_v26  ;;  %v14776_v5 = vsel %vm3073_vm9, nan, %v5663_v44  ;;  %v14780_v3 = vmul.f32 %v14603_v33, %v18068_v58  ;;  %v18080_v58 = vld [vmem:[#allocation20_spill] sm:$0xff] }
 0x27f   :  { %18067 = vst [vmem:[#allocation78_spill] sm:$0xff] %v14776_v5  ;;  %v3160_v37 = vor.u32 %v3159_v34, %v3158_v15  ;;  %v3163_v35 = vshll.u32 %v3162_v12, 23  ;;  %v6189_v60 = vpack.c.bf16 %v14772_v39, %v14737_v10  ;;  %v6406_v4 = vpack.c.bf16 %v14776_v5, %v14745_v43  ;;  %v18078_v15 = vld [vmem:[#allocation32_spill] sm:$0xff]  ;;  %v14821_v34 = vpop.f32.mrb[48].mxu1 }
 0x280   :  { %18069 = vst [vmem:[#allocation43_spill] sm:$0xff] %v14780_v3  ;;  %v3249_v42 = vadd.s32 %v3248_v56, %v3244_v47  ;;  %v14787_v6 = vmul.f32 2.0, %v18070_v48  ;;  %v14791_v50 = vmul.f32 %v14760_v24, %v18072_v27  ;;  %v14794_v29 = vmul.f32 2.0, %v13790_v46 }
 0x281   :  { %v3164_v23 = vor.u32 4788187, %v3163_v35  ;;  %v14797_v13 = vmul.f32 2.0, %v13809_v40  ;;  %vm18076_vm11 = vcmask 23552   ;;  %v3310_v8 = vshll.u32 %v17782_v18, %v18078_v15  ;;  %v9511_v35 = vpop.f32.mrb[49].mxu1 }
 0x282   :  { %18071 = vst [vmem:[#allocation79_spill] sm:$0xff] %v14787_v6  ;;  %18073 = vst [vmem:[#allocation18_spill] sm:$0xff] %v14791_v50  ;;  %9662 = vmatmul.mubr.msk.bf16.gmra.mrb[140].mxu0 %vm18076_vm11, %v6189_v60  ;;  %v3250_v21 = vadd.s32 536870912, %v3249_v42  ;;  %v3167_v57 = vcvt.s32.f32 %v3160_v37  ;;  %v3311_v47 = vshrl.u32 %v17783_v32, %v18079_v41  ;;  %v3313_v1 = vshll.u32 %v17783_v32, %v18078_v15  ;;  %v9457_v37 = vpop.f32.mrb[49].mxu0  ;;  %v505_v17 = vpop.f32.mrb[50].mxu1 }
 0x283   :  { %18074 = vst [vmem:[#allocation80_spill] sm:$0xff] %v14794_v29  ;;  %18075 = vst [vmem:[#allocation81_spill] sm:$0xff] %v14797_v13  ;;  %9665 = vmatprep.mubr.msk.bf16.mxu0 %vm17937_vm5, %v17760_v45  ;;  %v3314_v2 = vshrl.u32 %v17784_v7, %v18079_v41  ;;  %v3165_v12 = vand.u32 2147483647, %v3164_v23  ;;  %v3319_v44 = vshll.u32 %v17785_v11, %v18078_v15  ;;  %v327_v0 = vpop.f32.mrb[50].mxu0  ;;  %v3171_v35 = vsub.s32 4, %v14650_v19 }
 0x284   :  { %vm18077_vm10 = vmmov %vm18076_vm11  ;;  %v14823_v26 = vshrl.u32 %v3250_v21, 30  ;;  %v3320_v56 = vshrl.u32 %v17786_v51, %v18079_v41  ;;  %v14831_v60 = vmul.f32 %v14787_v6, %v18080_v58  ;;  %v3316_v23 = vshll.u32 %v17784_v7, %v18078_v15  ;;  %v9458_v40 = vpop.f32.mrb[51].mxu0 }
 0x285   :  { %9716 = vmatmul.mubr.msk.bf16.gmra.mrb[140].mxu1 %vm18077_vm10, %v6406_v4  ;;  %v18082_v4 = vld [vmem:[#allocation30_spill] sm:$0xff]  ;;  %v3317_v21 = vshrl.u32 %v17785_v11, %v18079_v41  ;;  %v14843_v37 = vmul.f32 %v14797_v13, %v18084_v14  ;;  %v18086_v5 = vand.u32 2147483647, %v14804_v22  ;;  %v3312_v46 = vor.u32 %v3311_v47, %v3310_v8 }
 0x286   :  { %9719 = vmatprep.mubr.msk.bf16.mxu1 %vm17937_vm5, %v17760_v45  ;;  %18081 = vst [vmem:[#allocation32_spill] sm:$0xff] %v14831_v60  ;;  %v14835_v27 = vmul.f32 %v14794_v29, %v18082_v4  ;;  %v3252_v58 = vshll.u32 %v14823_v26, 30  ;;  %v9512_v29 = vpop.f32.mrb[51].mxu1  ;;  %v3322_v6 = vshll.u32 %v17786_v51, %v18078_v15  ;;  %v3323_v17 = vshrl.u32 %v17787_v36, %v18079_v41 }
 0x287   :  { %18085 = vst [vmem:[#allocation20_spill] sm:$0xff] %v14843_v37  ;;  %v3300_v4 = vand.u32 8388607, %v18086_v5  ;;  %v3168_v0 = vmul.f32 %v3167_v57, %v3165_v12  ;;  %v3315_v13 = vor.u32 %v3314_v2, %v3313_v1  ;;  %v18087_v37 = vld [vmem:[#allocation31_spill] sm:$0xff]  ;;  %v14857_v48 = vmul.f32 2.0, %v14090_v49  ;;  %v14877_v12 = vpop.f32.mrb[52].mxu0 }
 0x288   :  { %18083 = vst [vmem:[#allocation25_spill] sm:$0xff] %v14835_v27  ;;  %v3321_v27 = vor.u32 %v3320_v56, %v3319_v44  ;;  %v14853_v14 = vsub.s32 %v3249_v42, %v3252_v58  ;;  %vm3328_vm12 = vcmp.lt.s32.totalorder %v18087_v37, 4  ;;  %vm3087_vm0 = vcmp.lt.s32.totalorder %v14480_v62, 0  ;;  %v14879_v44 = vpop.f32.mrb[52].mxu1 }
 0x289   :  { %18088 = vst [vmem:[#allocation30_spill] sm:$0xff] %v14857_v48  ;;  %v3318_v40 = vor.u32 %v3317_v21, %v3316_v23  ;;  %vm3325_vm7 = vcmp.lt.s32.totalorder %v18087_v37, 1  ;;  %v14862_v5 = vmul.f32 2.0, %v14125_v28  ;;  %v3172_v29 = vsel %vm3087_vm0, %v3171_v35, %v14650_v19  ;;  %v9517_v21 = vpop.f32.mrb[53].mxu0  ;;  %v9573_v35 = vpop.f32.mrb[53].mxu1 }
 0x28a   :  { %v3255_v42 = vsub.s32 0, %v14853_v14  ;;  %vm3327_vm14 = vcmp.lt.s32.totalorder %v18087_v37, 3  ;;  %v3301_v15 = vor.u32 8388608, %v3300_v4  ;;  %v3309_v8 = vshrl.u32 %v17782_v18, %v18079_v41 }
 0x28b   :  { %18089 = vst [vmem:[#allocation23_spill] sm:$0xff] %v14862_v5  ;;  %v3324_v57 = vor.u32 %v3323_v17, %v3322_v6  ;;  %v3334_v47 = vsel %vm3328_vm12, %v3321_v27, 920167782  ;;  %v3169_v1 = vxor.u32 2147483648, %v3168_v0  ;;  %vm3326_vm15 = vcmp.lt.s32.totalorder %v18087_v37, 2 }
 0x28c   :  { %v8946_v2 = vmin.u32 %v3255_v42, %v14853_v14  ;;  %v3333_v19 = vsel %vm3325_vm7, %v3312_v46, %v3315_v13  ;;  %v14883_v56 = vmul.f32 %v14857_v48, %v14098_v30  ;;  %v14887_v6 = vmul.f32 %v14862_v5, %v14129_v55  ;;  %v14904_v42 = vpop.f32.mrb[54].mxu0 }
 0x28d   :  { %v14890_v41 = vmul.f32 2.0, %v14435_v61  ;;  %v3335_v23 = vsel %vm3327_vm14, %v3318_v40, %v3334_v47  ;;  %v18093_v58 = vand.u32 2147483647, %v14480_v62  ;;  %v3330_v17 = vsel %vm3328_vm12, %v3318_v40, 2102212464  ;;  %v14906_v61 = vpop.f32.mrb[54].mxu1 }
 0x28e   :  { %18090 = vst [vmem:[#allocation31_spill] sm:$0xff] %v14883_v56  ;;  %18091 = vst [vmem:[#allocation82_spill] sm:$0xff] %v14887_v6  ;;  %v3257_v30 = vclz %v8946_v2  ;;  %v3337_v55 = vsel %vm3325_vm7, %v3315_v13, %v3318_v40  ;;  %v3336_v21 = vsel %vm3326_vm15, %v3333_v19, %v3335_v23  ;;  %v3338_v35 = vsel %vm3328_vm12, %v3324_v57, 1326507024  ;;  %v9574_v5 = vpop.f32.mrb[55].mxu1 }
 0x28f   :  { %18092 = vst [vmem:[#allocation83_spill] sm:$0xff] %v14890_v41  ;;  %vm14896_vm2 = vcmp.le.f32.partialorder %v18093_v58, 0.7853982  ;;  %v3341_v2 = vshll.u32 %v3301_v15, 8  ;;  %v9518_v58 = vpop.f32.mrb[55].mxu0  ;;  %v3170_v28 = vsel %vm3087_vm0, %v3169_v1, %v3168_v0  ;;  %v3329_v48 = vsel %vm3325_vm7, %v3309_v8, %v3312_v46  ;;  %v14939_v23 = vpop.f32.mrb[56].mxu1 }
 0x290   :  { %v3174_v47 = vsel %vm14896_vm2, 0, %v3172_v29  ;;  %v8947_v40 = vadd.s32 4294967294, %v3257_v30  ;;  %v3339_v49 = vsel %vm3327_vm14, %v3321_v27, %v3338_v35  ;;  %v3331_v29 = vsel %vm3327_vm14, %v3315_v13, %v3330_v17  ;;  %18096 = vst [vmem:[#allocation84_spill] sm:$0xff] %v14939_v23 }
 0x291   :  { %v3340_v19 = vsel %vm3326_vm15, %v3337_v55, %v3339_v49  ;;  %v14924_v57 = vmul.u32.u64.low %v3341_v2, %v3336_v21  ;;  %v14925_v15 = vmul.u32.u64.high %v3341_v2, %v3336_v21, %v14924_v57  ;;  %v3245_v0 = vadd.s32 %v14717_v25, %v14715_v59  ;;  %v14937_v49 = vpop.f32.mrb[56].mxu0  ;;  %v9577_v21 = vpop.f32.mrb[57].mxu1 }
 0x292   :  { %vm8948_vm9 = vcmp.lt.s32.totalorder %v8947_v40, 0  ;;  %v14930_v5 = vmul.u32.u64.low %v3341_v2, %v3340_v19  ;;  %v14931_v1 = vmul.u32.u64.high %v3341_v2, %v3340_v19, %v14930_v5  ;;  %v3173_v46 = vsel %vm14896_vm2, %v14480_v62, %v3170_v28  ;;  %v9521_v55 = vpop.f32.mrb[57].mxu0 }
 0x293   :  { %v3178_v27 = vadd.s32 3, %v3174_v47  ;;  %v3260_v13 = vsel %vm8948_vm9, 0, %v8947_v40  ;;  %v3275_v8 = vsub.s32 4, %v14823_v26  ;;  %v3332_v25 = vsel %vm3326_vm15, %v3329_v48, %v3331_v29  ;;  %v14958_v40 = vpop.f32.mrb[58].mxu0  ;;  %v14960_v48 = vpop.f32.mrb[58].mxu1 }
 0x294   :  { %v3261_v30 = vsub.s32 32, %v3260_v13  ;;  %v3262_v17 = vshll.u32 %v14853_v14, %v3260_v13  ;;  %v3265_v59 = vsub.s32 4294967266, %v3260_v13  ;;  %v14945_v4 = vmul.f32 2.0, %v14454_v31  ;;  %18101 = vst [vmem:[#allocation86_spill] sm:$0xff] %v14960_v48  ;;  %v9522_v19 = vpop.f32.mrb[59].mxu0 }
 0x295   :  { %v14949_v28 = vmul.f32 %v14890_v41, %v14439_v20  ;;  %v18098_v35 = vand.u32 2147483647, %v14610_v52  ;;  %v3351_v14 = vadd.s32 1, %v14925_v15  ;;  %10374 = vcosq.f32 %v3173_v46  ;;  %v9578_v20 = vpop.f32.mrb[59].mxu1 }
 0x296   :  { %vm3191_vm6 = vcmp.lt.s32.totalorder %v14610_v52, 0  ;;  %v3263_v37 = vshrl.u32 %v3245_v0, %v3261_v30  ;;  %v3266_v29 = vadd.s32 127, %v3265_v59  ;;  %10376 = vsinq.f32 %v3173_v46  ;;  %v14973_v0 = vld [vmem:[%s17717_s6 + $0xb8] sm:$0xff]  ;;  %v18103_v59 = vld [vmem:[#allocation64_spill] sm:$0xff]  ;;  %v14993_v30 = vpop.f32.mrb[60].mxu0  ;;  %v14995_v48 = vpop.f32.mrb[60].mxu1 }
 0x297   :  { %18097 = vst [vmem:[#allocation85_spill] sm:$0xff] %v14949_v28  ;;  %vm14953_vm4 = vcmp.le.f32.partialorder %v18098_v35, 0.7853982  ;;  %v14963_v5 = vand.u32 3, %v3178_v27  ;;  %v3348_v13 = vmul.u32 %v3341_v2, %v3332_v25  ;;  %vm3350_vm3 = vc.u32 %v14931_v1, %v14924_v57  ;;  %v18102_v27 = vld [vmem:[#allocation35_spill] sm:$0xff] }
 0x298   :  { %v3264_v55 = vor.u32 %v3263_v37, %v3262_v17  ;;  %v3267_v21 = vshll.u32 %v3266_v29, 23  ;;  %v3276_v35 = vsel %vm3191_vm6, %v3275_v8, %v14823_v26  ;;  %v3352_v46 = vsel %vm3350_vm3, %v3351_v14, %v14925_v15  ;;  %18104 = vst [vmem:[#allocation35_spill] sm:$0xff] %v14995_v48 }
 0x299   :  { %v3414_v2 = vshll.u32 %v17782_v18, %v18102_v27  ;;  %v3415_v17 = vshrl.u32 %v17783_v32, %v18103_v59  ;;  %v3417_v25 = vshll.u32 %v17783_v32, %v18102_v27  ;;  %v3418_v8 = vshrl.u32 %v17784_v7, %v18103_v59 }
 0x29a   :  { %v3268_v37 = vor.u32 4788187, %v3267_v21  ;;  %v3271_v26 = vcvt.s32.f32 %v3264_v55  ;;  %v3420_v29 = vshll.u32 %v17784_v7, %v18102_v27  ;;  %v3278_v15 = vsel %vm14953_vm4, 0, %v3276_v35  ;;  %v9525_v35 = vpop.f32.mrb[61].mxu0 }
 0x29b   :  { %v14989_v14 = vand.u32 3, %v3174_v47  ;;  %v3353_v19 = vadd.s32 %v3352_v46, %v3348_v13  ;;  %v3421_v20 = vshrl.u32 %v17785_v11, %v18103_v59  ;;  %v18105_v21 = vand.u32 2147483647, %v14973_v0  ;;  %v9581_v13 = vpop.f32.mrb[61].mxu1  ;;  %v15009_v48 = vpop.f32.mrb[62].mxu0 }
 0x29c   :  { %v3269_v55 = vand.u32 2147483647, %v3268_v37  ;;  %v3423_v31 = vshll.u32 %v17785_v11, %v18102_v27  ;;  %v3424_v47 = vshrl.u32 %v17786_v51, %v18103_v59  ;;  %v3416_v41 = vor.u32 %v3415_v17, %v3414_v2  ;;  %v9526_v35 = vpop.f32.mrb[63].mxu0  ;;  %v18107_v17 = vld [vmem:[#allocation36_spill] sm:$0xff] }
 0x29d   :  { %v14999_v23 = vand.u32 8388607, %v18105_v21  ;;  %v3354_v46 = vadd.s32 536870912, %v3353_v19  ;;  %v3426_v28 = vshll.u32 %v17786_v51, %v18102_v27  ;;  %v3427_v37 = vshrl.u32 %v17787_v36, %v18103_v59  ;;  %v15011_v21 = vpop.f32.mrb[62].mxu1  ;;  %v15048_v35 = vpop.f32.mrb[64].mxu0 }
 0x29e   :  { %18106 = vst [vmem:[#allocation64_spill] sm:$0xff] %v15011_v21  ;;  %vm3184_vm13 = vcmp.eq.s32.totalorder %v14963_v5, 2  ;;  %v3272_v6 = vmul.f32 %v3271_v26, %v3269_v55  ;;  %v3419_v56 = vor.u32 %v3418_v8, %v3417_v25  ;;  %v3422_v24 = vor.u32 %v3421_v20, %v3420_v29  ;;  %v9582_v13 = vpop.f32.mrb[63].mxu1  ;;  %v9529_v58 = vpop.f32.mrb[65].mxu0 }
 0x29f   :  { %v3425_v54 = vor.u32 %v3424_v47, %v3423_v31  ;;  %vm3181_vm1 = vcmp.eq.s32.totalorder %v14963_v5, 0  ;;  %v3282_v2 = vadd.s32 3, %v3278_v15  ;;  %vm5760_vm8 = vcmp.eq.s32.totalorder %v14989_v14, 0  ;;  %v10375_v21 = vpop.eup %10374  ;;  %v15050_v13 = vpop.f32.mrb[64].mxu1 }
 0x2a0   :  { %vm5763_vm11 = vcmp.eq.s32.totalorder %v14989_v14, 2  ;;  %v15017_v27 = vshrl.u32 %v3354_v46, 30  ;;  %vm3429_vm10 = vcmp.lt.s32.totalorder %v18107_v17, 1  ;;  %vm3431_vm12 = vcmp.lt.s32.totalorder %v18107_v17, 3  ;;  %v10377_v8 = vpop.eup %10376  ;;  %18108 = vst [vmem:[#allocation36_spill] sm:$0xff] %v15050_v13  ;;  %v15061_v13 = vpop.f32.mrb[66].mxu0 }
 0x2a1   :  { %v3273_v26 = vxor.u32 2147483648, %v3272_v6  ;;  %v15021_v25 = vand.u32 3, %v3278_v15  ;;  %v3428_v31 = vor.u32 %v3427_v37, %v3426_v28  ;;  %vm3432_vm0 = vcmp.lt.s32.totalorder %v18107_v17, 4  ;;  %v9530_v33 = vpop.f32.mrb[67].mxu0 }
 0x2a2   :  { %v3356_v29 = vshll.u32 %v15017_v27, 30  ;;  %v3405_v20 = vor.u32 8388608, %v14999_v23  ;;  %v3413_v55 = vshrl.u32 %v17782_v18, %v18103_v59  ;;  %v3438_v47 = vsel %vm3432_vm0, %v3425_v54, 920167782 }
 0x2a3   :  { %vm3180_vm7 = vcmp.lt.s32.totalorder %v14963_v5, 2  ;;  %v3274_v15 = vsel %vm3191_vm6, %v3273_v26, %v3272_v6  ;;  %vm5759_vm14 = vcmp.lt.s32.totalorder %v14989_v14, 2  ;;  %vm3430_vm15 = vcmp.lt.s32.totalorder %v18107_v17, 2 }
 0x2a4   :  { %v3437_v28 = vsel %vm3429_vm10, %v3416_v41, %v3419_v56  ;;  %v3439_v23 = vsel %vm3431_vm12, %v3422_v24, %v3438_v47  ;;  %v3277_v59 = vsel %vm14953_vm4, %v14610_v52, %v3274_v15  ;;  %v15042_v46 = vsub.s32 %v3353_v19, %v3356_v29  ;;  %v9585_v15 = vpop.f32.mrb[65].mxu1 }
 0x2a5   :  { %v3434_v37 = vsel %vm3432_vm0, %v3422_v24, 2102212464  ;;  %v3441_v6 = vsel %vm3429_vm10, %v3419_v56, %v3422_v24  ;;  %v3182_v26 = vxor.u32 2147483648, %v10377_v8  ;;  %v3185_v60 = vxor.u32 2147483648, %v10375_v21  ;;  %v15063_v50 = vpop.f32.mrb[66].mxu1 }
 0x2a6   :  { %10378 = vcosq.f32 %v3277_v59  ;;  %v3442_v47 = vsel %vm3432_vm0, %v3428_v31, 1326507024  ;;  %vm3177_vm2 = vweird.f32 %v14480_v62  ;;  %vm3295_vm9 = vcmp.lt.s32.totalorder %v14804_v22, 0  ;;  %18109 = vst [vmem:[#allocation87_spill] sm:$0xff] %v15063_v50  ;;  %v9586_v3 = vpop.f32.mrb[67].mxu1 }
 0x2a7   :  { %10380 = vsinq.f32 %v3277_v59  ;;  %v3359_v19 = vsub.s32 0, %v15042_v46  ;;  %v3440_v24 = vsel %vm3430_vm15, %v3437_v28, %v3439_v23  ;;  %v3443_v29 = vsel %vm3431_vm12, %v3425_v54, %v3442_v47  ;;  %v15110_v17 = vpop.f32.mrb[68].mxu1 }
 0x2a8   :  { %v3433_v31 = vsel %vm3429_vm10, %v3413_v55, %v3416_v41  ;;  %v3435_v59 = vsel %vm3431_vm12, %v3419_v56, %v3434_v37  ;;  %v3444_v58 = vsel %vm3430_vm15, %v3441_v6, %v3443_v29  ;;  %v3445_v15 = vshll.u32 %v3405_v20, 8  ;;  %18115 = vst [vmem:[#allocation90_spill] sm:$0xff] %v15110_v17 }
 0x2a9   :  { %v3283_v28 = vand.u32 3, %v3282_v2  ;;  %v8950_v23 = vmin.u32 %v3359_v19, %v15042_v46  ;;  %v15074_v54 = vadd.f32 %v14618_v53, %v14616_v38  ;;  %v15078_v47 = vadd.f32 %v14638_v9, %v14636_v16 }
 0x2aa   :  { %v15080_v41 = vmul.u32.u64.low %v3445_v15, %v3444_v58  ;;  %v15081_v55 = vmul.u32.u64.high %v3445_v15, %v3444_v58, %v15080_v41  ;;  %v15083_v56 = vmul.u32.u64.low %v3445_v15, %v3440_v24  ;;  %v15084_v37 = vmul.u32.u64.high %v3445_v15, %v3440_v24, %v15083_v56  ;;  %v15108_v24 = vpop.f32.mrb[68].mxu0 }
 0x2ab   :  { %18110 = vst [vmem:[#allocation88_spill] sm:$0xff] %v15074_v54  ;;  %18111 = vst [vmem:[#allocation89_spill] sm:$0xff] %v15078_v47  ;;  %v3186_v33 = vsel %vm3184_vm13, %v3185_v60, %v10377_v8  ;;  %vm3281_vm4 = vweird.f32 %v14610_v52  ;;  %vm5862_vm6 = vcmp.lt.s32.totalorder %v15021_v25, 2  ;;  %v18112_v38 = vand.u32 2147483647, %v14804_v22 }
 0x2ac   :  { %v3361_v9 = vclz %v8950_v23  ;;  %v3436_v16 = vsel %vm3430_vm15, %v3433_v31, %v3435_v59  ;;  %v3183_v3 = vsel %vm3181_vm1, %v10375_v21, %v3182_v26  ;;  %v5762_v2 = vsel %vm5760_vm8, %v10375_v21, %v3182_v26 }
 0x2ad   :  { %vm15093_vm3 = vcmp.le.f32.partialorder %v18112_v38, 0.7853982  ;;  %v5765_v20 = vsel %vm5763_vm11, %v3185_v60, %v10377_v8  ;;  %v3379_v6 = vsub.s32 4, %v15017_v27  ;;  %vm3284_vm13 = vcmp.lt.s32.totalorder %v3283_v28, 2  ;;  %v9533_v60 = vpop.f32.mrb[69].mxu0  ;;  %v9589_v8 = vpop.f32.mrb[69].mxu1 }
 0x2ae   :  { %vm5863_vm10 = vcmp.eq.s32.totalorder %v15021_v25, 0  ;;  %vm5866_vm12 = vcmp.eq.s32.totalorder %v15021_v25, 2  ;;  %v8951_v19 = vadd.s32 4294967294, %v3361_v9  ;;  %vm3285_vm0 = vcmp.eq.s32.totalorder %v3283_v28, 0  ;;  %v15121_v58 = vpop.f32.mrb[70].mxu0  ;;  %v15127_v5 = vpop.f32.mrb[70].mxu1 }
 0x2af   :  { %v3452_v29 = vmul.u32 %v3445_v15, %v3436_v16  ;;  %vm3454_vm1 = vc.u32 %v15081_v55, %v15083_v56  ;;  %v3455_v21 = vadd.s32 1, %v15084_v37  ;;  %v3187_v26 = vsel %vm3180_vm7, %v3183_v3, %v3186_v33  ;;  %18116 = vst [vmem:[#allocation91_spill] sm:$0xff] %v15127_v5  ;;  %v9534_v33 = vpop.f32.mrb[71].mxu0  ;;  %v9590_v3 = vpop.f32.mrb[71].mxu1 }
 0x2b0   :  { %v5766_v31 = vsel %vm5759_vm14, %v5762_v2, %v5765_v20  ;;  %v3349_v59 = vadd.s32 %v14924_v57, %v14931_v1  ;;  %vm8952_vm8 = vcmp.lt.s32.totalorder %v8951_v19, 0  ;;  %v10379_v15 = vpop.eup %10378  ;;  %vm3288_vm11 = vcmp.eq.s32.totalorder %v3283_v28, 2  ;;  %v15149_v33 = vpop.f32.mrb[72].mxu0 }
 0x2b1   :  { %v3364_v23 = vsel %vm8952_vm8, 0, %v8951_v19  ;;  %v3380_v41 = vsel %vm3295_vm9, %v3379_v6, %v15017_v27  ;;  %v3456_v38 = vsel %vm3454_vm1, %v3455_v21, %v15084_v37  ;;  %v10381_v14 = vpop.eup %10380  ;;  %v3289_v9 = vxor.u32 2147483648, %v10379_v15 }
 0x2b2   :  { %v3365_v16 = vsub.s32 32, %v3364_v23  ;;  %v3366_v57 = vshll.u32 %v15042_v46, %v3364_v23  ;;  %v3369_v1 = vsub.s32 4294967266, %v3364_v23  ;;  %v15132_v2 = vsel %vm3177_vm2, nan, %v3187_v26 }
 0x2b3   :  { %18117 = vst [vmem:[#allocation92_spill] sm:$0xff] %v15132_v2  ;;  %v3286_v20 = vxor.u32 2147483648, %v10381_v14  ;;  %v15136_v27 = vsel %vm3177_vm2, nan, %v5766_v31  ;;  %v3457_v37 = vadd.s32 %v3456_v38, %v3452_v29  ;;  %v3290_v6 = vsel %vm3288_vm11, %v3289_v9, %v10381_v14 }
 0x2b4   :  { %v5868_v19 = vsel %vm5866_vm12, %v3289_v9, %v10381_v14  ;;  %v3367_v21 = vshrl.u32 %v3349_v59, %v3365_v16  ;;  %v3370_v60 = vadd.s32 127, %v3369_v1  ;;  %v3382_v26 = vsel %vm15093_vm3, 0, %v3380_v41  ;;  %v15151_v59 = vpop.f32.mrb[72].mxu1  ;;  %v18119_v14 = vld [vmem:[#allocation70_spill] sm:$0xff]  ;;  %v9537_v41 = vpop.f32.mrb[73].mxu0 }
 0x2b5   :  { %v3287_v46 = vsel %vm3285_vm0, %v10379_v15, %v3286_v20  ;;  %v5865_v8 = vsel %vm5863_vm10, %v10379_v15, %v3286_v20  ;;  %v3458_v23 = vadd.s32 536870912, %v3457_v37  ;;  %18118 = vst [vmem:[#allocation93_spill] sm:$0xff] %v15151_v59  ;;  %v15155_v9 = vmul.f32 %v14945_v4, %v18119_v14  ;;  %v9593_v16 = vpop.f32.mrb[73].mxu1 }
 0x2b6   :  { %v3291_v62 = vsel %vm3284_vm13, %v3287_v46, %v3290_v6  ;;  %v5869_v29 = vsel %vm5862_vm6, %v5865_v8, %v5868_v19  ;;  %v3368_v31 = vor.u32 %v3367_v21, %v3366_v57  ;;  %v3371_v38 = vshll.u32 %v3370_v60, 23  ;;  %v15171_v6 = vpop.f32.mrb[74].mxu0  ;;  %v15173_v19 = vpop.f32.mrb[74].mxu1  ;;  %v15179_v60 = vld [vmem:[%s17717_s6 + $0xc0] sm:$0xff]  ;;  %v18123_v8 = vld [vmem:[#allocation65_spill] sm:$0xff] }
 0x2b7   :  { %18120 = vst [vmem:[#allocation70_spill] sm:$0xff] %v15155_v9  ;;  %v15159_v15 = vsel %vm3281_vm4, nan, %v3291_v62  ;;  %v15163_v28 = vsel %vm3281_vm4, nan, %v5869_v29  ;;  %v15165_v25 = vshrl.u32 %v3458_v23, 30  ;;  %v3386_v20 = vadd.s32 3, %v3382_v26  ;;  %18122 = vst [vmem:[#allocation95_spill] sm:$0xff] %v15173_v19 }
 0x2b8   :  { %18121 = vst [vmem:[#allocation94_spill] sm:$0xff] %v15159_v15  ;;  %v6190_v57 = vpack.c.bf16 %v15159_v15, %v15132_v2  ;;  %v6407_v1 = vpack.c.bf16 %v15163_v28, %v15136_v27  ;;  %v3372_v3 = vor.u32 4788187, %v3371_v38  ;;  %v3375_v21 = vcvt.s32.f32 %v3368_v31  ;;  %v9538_v62 = vpop.f32.mrb[75].mxu0  ;;  %v9594_v29 = vpop.f32.mrb[75].mxu1  ;;  %v18126_v31 = vld [vmem:[#allocation71_spill] sm:$0xff] }
 0x2b9   :  { %v3460_v52 = vshll.u32 %v15165_v25, 30  ;;  %v3518_v23 = vshll.u32 %v17782_v18, %v18123_v8  ;;  %vm18124_vm7 = vcmask 23552   ;;  %v3519_v14 = vshrl.u32 %v17783_v32, %v18126_v31  ;;  %v15221_v50 = vpop.f32.mrb[76].mxu1 }
 0x2ba   :  { %9666 = vmatmul.mubr.msk.bf16.gmra.mrb[144].mxu0 %vm18124_vm7, %v6190_v57  ;;  %vm18125_vm14 = vmmov %vm18124_vm7  ;;  %v3373_v38 = vand.u32 2147483647, %v3372_v3  ;;  %v3521_v41 = vshll.u32 %v17783_v32, %v18123_v8  ;;  %v3522_v16 = vshrl.u32 %v17784_v7, %v18126_v31  ;;  %v15198_v57 = vand.u32 3, %v3382_v26  ;;  %18128 = vst [vmem:[#allocation65_spill] sm:$0xff] %v15221_v50 }
 0x2bb   :  { %9720 = vmatmul.mubr.msk.bf16.gmra.mrb[144].mxu1 %vm18125_vm14, %v6407_v1  ;;  %9669 = vmatprep.mubr.msk.bf16.mxu0 %vm17937_vm5, %v17760_v45  ;;  %v15196_v62 = vsub.s32 %v3457_v37, %v3460_v52  ;;  %v3527_v1 = vshll.u32 %v17785_v11, %v18123_v8  ;;  %v3528_v3 = vshrl.u32 %v17786_v51, %v18126_v31  ;;  %v15210_v37 = vand.u32 3, %v3386_v20 }
 0x2bc   :  { %9723 = vmatprep.mubr.msk.bf16.mxu1 %vm17937_vm5, %v17760_v45  ;;  %v3376_v32 = vmul.f32 %v3375_v21, %v3373_v38  ;;  %v3524_v29 = vshll.u32 %v17784_v7, %v18123_v8  ;;  %v3525_v46 = vshrl.u32 %v17785_v11, %v18126_v31  ;;  %v3530_v19 = vshll.u32 %v17786_v51, %v18123_v8  ;;  %v15219_v11 = vpop.f32.mrb[76].mxu0 }
 0x2bd   :  { %v3463_v26 = vsub.s32 0, %v15196_v62  ;;  %v18127_v52 = vand.u32 2147483647, %v15179_v60  ;;  %v3531_v5 = vshrl.u32 %v17787_v36, %v18126_v31  ;;  %v3517_v7 = vshrl.u32 %v17782_v18, %v18126_v31  ;;  %v9541_v47 = vpop.f32.mrb[77].mxu0  ;;  %v9597_v36 = vpop.f32.mrb[77].mxu1 }
 0x2be   :  { %v3377_v21 = vxor.u32 2147483648, %v3376_v32  ;;  %v3520_v38 = vor.u32 %v3519_v14, %v3518_v23  ;;  %v3523_v17 = vor.u32 %v3522_v16, %v3521_v41  ;;  %v3453_v51 = vadd.s32 %v15083_v56, %v15081_v55  ;;  %v15230_v31 = vpop.f32.mrb[78].mxu0  ;;  %v15232_v14 = vpop.f32.mrb[78].mxu1 }
 0x2bf   :  { %v3508_v59 = vand.u32 8388607, %v18127_v52  ;;  %v8954_v20 = vmin.u32 %v3463_v26, %v15196_v62  ;;  %v3529_v8 = vor.u32 %v3528_v3, %v3527_v1  ;;  %v18129_v52 = vld [vmem:[#allocation63_spill] sm:$0xff]  ;;  %v3526_v18 = vor.u32 %v3525_v46, %v3524_v29  ;;  %18130 = vst [vmem:[#allocation71_spill] sm:$0xff] %v15232_v14  ;;  %v9542_v41 = vpop.f32.mrb[79].mxu0  ;;  %v9598_v16 = vpop.f32.mrb[79].mxu1 }
 0x2c0   :  { %vm3533_vm15 = vcmp.lt.s32.totalorder %v18129_v52, 1  ;;  %v3378_v54 = vsel %vm3295_vm9, %v3377_v21, %v3376_v32  ;;  %v3532_v23 = vor.u32 %v3531_v5, %v3530_v19  ;;  %vm3536_vm2 = vcmp.lt.s32.totalorder %v18129_v52, 4  ;;  %v18165_v26 = vld [vmem:[#allocation47_spill] sm:$0xff] }
 0x2c1   :  { %v3381_v55 = vsel %vm15093_vm3, %v14804_v22, %v3378_v54  ;;  %vm3399_vm4 = vcmp.lt.s32.totalorder %v14973_v0, 0  ;;  %v3465_v56 = vclz %v8954_v20  ;;  %v3509_v47 = vor.u32 8388608, %v3508_v59 }
 0x2c2   :  { %vm3535_vm6 = vcmp.lt.s32.totalorder %v18129_v52, 3  ;;  %10382 = vcosq.f32 %v3381_v55  ;;  %vm3534_vm9 = vcmp.lt.s32.totalorder %v18129_v52, 2  ;;  %v3538_v5 = vsel %vm3536_vm2, %v3526_v18, 2102212464  ;;  %v18139_v52 = vld [vmem:[#allocation34_spill] sm:$0xff] }
 0x2c3   :  { %v3541_v19 = vsel %vm3533_vm15, %v3520_v38, %v3523_v17  ;;  %10384 = vsinq.f32 %v3381_v55  ;;  %v8955_v53 = vadd.s32 4294967294, %v3465_v56  ;;  %v3537_v54 = vsel %vm3533_vm15, %v3517_v7, %v3520_v38  ;;  %v15281_v55 = vpop.f32.mrb[80].mxu1 }
 0x2c4   :  { %v3542_v59 = vsel %vm3536_vm2, %v3529_v8, 920167782  ;;  %vm3392_vm3 = vcmp.eq.s32.totalorder %v15210_v37, 2  ;;  %vm5969_vm13 = vcmp.eq.s32.totalorder %v15198_v57, 2  ;;  %v3539_v46 = vsel %vm3535_vm6, %v3523_v17, %v3538_v5  ;;  %18135 = vst [vmem:[#allocation96_spill] sm:$0xff] %v15281_v55  ;;  %v9601_v5 = vpop.f32.mrb[81].mxu1 }
 0x2c5   :  { %v3543_v1 = vsel %vm3535_vm6, %v3526_v18, %v3542_v59  ;;  %v3545_v3 = vsel %vm3533_vm15, %v3523_v17, %v3526_v18  ;;  %v3546_v32 = vsel %vm3536_vm2, %v3532_v23, 1326507024  ;;  %vm3389_vm10 = vcmp.eq.s32.totalorder %v15210_v37, 0  ;;  %v15279_v23 = vpop.f32.mrb[80].mxu0  ;;  %v18141_v5 = vld [vmem:[#allocation39_spill] sm:$0xff] }
 0x2c6   :  { %v18131_v29 = vand.u32 2147483647, %v14973_v0  ;;  %vm8956_vm0 = vcmp.lt.s32.totalorder %v8955_v53, 0  ;;  %vm5966_vm1 = vcmp.eq.s32.totalorder %v15198_v57, 0  ;;  %v3544_v21 = vsel %vm3534_vm9, %v3541_v19, %v3543_v1  ;;  %v9545_v16 = vpop.f32.mrb[81].mxu0  ;;  %v15296_v1 = vpop.f32.mrb[82].mxu1 }
 0x2c7   :  { %v3547_v17 = vsel %vm3535_vm6, %v3529_v8, %v3546_v32  ;;  %v3549_v7 = vshll.u32 %v3509_v47, 8  ;;  %vm3388_vm8 = vcmp.lt.s32.totalorder %v15210_v37, 2  ;;  %v3468_v38 = vsel %vm8956_vm0, 0, %v8955_v53  ;;  %v15294_v59 = vpop.f32.mrb[82].mxu0  ;;  %18136 = vst [vmem:[#allocation97_spill] sm:$0xff] %v15296_v1 }
 0x2c8   :  { %vm15261_vm12 = vcmp.le.f32.partialorder %v18131_v29, 0.7853982  ;;  %v3483_v20 = vsub.s32 4, %v15165_v25  ;;  %vm5965_vm11 = vcmp.lt.s32.totalorder %v15198_v57, 2  ;;  %v3548_v36 = vsel %vm3534_vm9, %v3545_v3, %v3547_v17  ;;  %v18138_v29 = vld [vmem:[#allocation11_spill] sm:$0xff] }
 0x2c9   :  { %v15277_v18 = vadd.f32 %v14821_v34, %v14819_v63  ;;  %vm3385_vm7 = vweird.f32 %v14804_v22  ;;  %v3469_v8 = vsub.s32 32, %v3468_v38  ;;  %v3470_v56 = vshll.u32 %v15196_v62, %v3468_v38  ;;  %v18137_v62 = vld [vmem:[#allocation62_spill] sm:$0xff] }
 0x2ca   :  { %v3473_v47 = vsub.s32 4294967266, %v3468_v38  ;;  %v3540_v41 = vsel %vm3534_vm9, %v3537_v54, %v3539_v46  ;;  %v15287_v19 = vmul.u32.u64.low %v3549_v7, %v3548_v36  ;;  %v15288_v53 = vmul.u32.u64.high %v3549_v7, %v3548_v36, %v15287_v19  ;;  %v18140_v54 = vld [vmem:[#allocation66_spill] sm:$0xff]  ;;  %v9546_v38 = vpop.f32.mrb[83].mxu0  ;;  %v9602_v36 = vpop.f32.mrb[83].mxu1 }
 0x2cb   :  { %18134 = vst [vmem:[#allocation63_spill] sm:$0xff] %v15277_v18  ;;  %v15290_v63 = vmul.u32.u64.low %v3549_v7, %v3544_v21  ;;  %v15291_v34 = vmul.u32.u64.high %v3549_v7, %v3544_v21, %v15290_v63  ;;  %v3471_v3 = vshrl.u32 %v3453_v51, %v3469_v8  ;;  %v15302_v46 = vmul.f32 %v18140_v54, %v18139_v52  ;;  %v18142_v19 = vld [vmem:[#allocation67_spill] sm:$0xff]  ;;  %v18144_v52 = vld [vmem:[#allocation45_spill] sm:$0xff]  ;;  %v15337_v1 = vpop.f32.mrb[84].mxu0 }
 0x2cc   :  { %v3474_v32 = vadd.s32 127, %v3473_v47  ;;  %v3484_v21 = vsel %vm3399_vm4, %v3483_v20, %v15165_v25  ;;  %v3556_v16 = vmul.u32 %v3549_v7, %v3540_v41  ;;  %v15309_v55 = vmul.f32 %v18142_v19, %v18141_v5  ;;  %v10383_v38 = vpop.eup %10382 }
 0x2cd   :  { %v15312_v51 = vmul.f32 2.0, %v18137_v62  ;;  %v3472_v8 = vor.u32 %v3471_v3, %v3470_v56  ;;  %v17595_v17 = vsub.f32 1.0, %v15302_v46  ;;  %v725_v54 = vadd.f32 %v14877_v12, %v18144_v52  ;;  %v10385_v41 = vpop.eup %10384  ;;  %v18191_v62 = vld [vmem:[#allocation72_spill] sm:$0xff] }
 0x2ce   :  { %v3475_v47 = vshll.u32 %v3474_v32, 23  ;;  %vm3558_vm14 = vc.u32 %v15288_v53, %v15290_v63  ;;  %v3559_v25 = vadd.s32 1, %v15291_v34  ;;  %v17597_v7 = vsub.f32 1.0, %v15309_v55 }
 0x2cf   :  { %18143 = vst [vmem:[#allocation34_spill] sm:$0xff] %v15312_v51  ;;  %v15322_v20 = vmul.f32 2.0, %v18138_v29  ;;  %v3393_v36 = vxor.u32 2147483648, %v10383_v38  ;;  %v3479_v3 = vcvt.s32.f32 %v3472_v8  ;;  %v15327_v32 = vmul.f32 %v15312_v51, %v17595_v17 }
 0x2d0   :  { %v3476_v56 = vor.u32 4788187, %v3475_v47  ;;  %v3390_v12 = vxor.u32 2147483648, %v10385_v41  ;;  %v3486_v5 = vsel %vm15261_vm12, 0, %v3484_v21  ;;  %v3560_v19 = vsel %vm3558_vm14, %v3559_v25, %v15291_v34  ;;  %v15339_v47 = vpop.f32.mrb[84].mxu1  ;;  %v9549_v21 = vpop.f32.mrb[85].mxu0 }
 0x2d1   :  { %18145 = vst [vmem:[#allocation66_spill] sm:$0xff] %v15322_v20  ;;  %18146 = vst [vmem:[#allocation39_spill] sm:$0xff] %v15327_v32  ;;  %v15335_v52 = vmul.f32 %v15322_v20, %v17597_v7  ;;  %v3394_v8 = vsel %vm3392_vm3, %v3393_v36, %v10385_v41  ;;  %v5971_v14 = vsel %vm5969_vm13, %v3393_v36, %v10385_v41  ;;  %v9605_v29 = vpop.f32.mrb[85].mxu1  ;;  %v15346_v34 = vmul.f32 2.0, %v14737_v10  ;;  %v15355_v20 = vpop.f32.mrb[86].mxu0 }
 0x2d2   :  { %18148 = vst [vmem:[#allocation45_spill] sm:$0xff] %v15339_v47  ;;  %v3477_v17 = vand.u32 2147483647, %v3476_v56  ;;  %v3561_v50 = vadd.s32 %v3560_v19, %v3556_v16  ;;  %v3391_v25 = vsel %vm3389_vm10, %v10383_v38, %v3390_v12  ;;  %v5968_v7 = vsel %vm5966_vm1, %v10383_v38, %v3390_v12  ;;  %v15357_v56 = vpop.f32.mrb[86].mxu1  ;;  %v9550_v19 = vpop.f32.mrb[87].mxu0 }
 0x2d3   :  { %18147 = vst [vmem:[#allocation67_spill] sm:$0xff] %v15335_v52  ;;  %v15353_v47 = vadd.f32 %v14879_v44, %v725_v54  ;;  %18150 = vst [vmem:[#allocation99_spill] sm:$0xff] %v15357_v56  ;;  %v3395_v16 = vsel %vm3388_vm8, %v3391_v25, %v3394_v8  ;;  %v5972_v41 = vsel %vm5965_vm11, %v5968_v7, %v5971_v14  ;;  %v9606_v21 = vpop.f32.mrb[87].mxu1  ;;  %v3490_v44 = vadd.s32 3, %v3486_v5  ;;  %v18151_v54 = vld [vmem:[#allocation3_spill] sm:$0xff]  ;;  %v18153_v56 = vld [vmem:[#allocation4_spill] sm:$0xff] }
 0x2d4   :  { %v3480_v29 = vmul.f32 %v3479_v3, %v3477_v17  ;;  %v3562_v36 = vadd.s32 536870912, %v3561_v50  ;;  %v15365_v38 = vsel %vm3385_vm7, nan, %v3395_v16  ;;  %v726_v12 = vadd.f32 %v14904_v42, %v18151_v54  ;;  %v18154_v14 = vld [vmem:[#allocation40_spill] sm:$0xff]  ;;  %v18155_v7 = vld [vmem:[#allocation38_spill] sm:$0xff]  ;;  %v18158_v19 = vld [vmem:[#allocation61_spill] sm:$0xff] }
 0x2d5   :  { %18149 = vst [vmem:[#allocation98_spill] sm:$0xff] %v15353_v47  ;;  %v18152_v47 = vld [vmem:[#allocation44_spill] sm:$0xff]  ;;  %v15372_v17 = vmul.f32 2.0, %v15365_v38  ;;  %v15378_v3 = vmul.f32 %v18155_v7, %v18154_v14  ;;  %v15382_v8 = vsel %vm3385_vm7, nan, %v5972_v41  ;;  %v15384_v25 = vand.u32 3, %v3486_v5  ;;  %v18157_v16 = vld [vmem:[#allocation6_spill] sm:$0xff] }
 0x2d6   :  { %v3481_v37 = vxor.u32 2147483648, %v3480_v29  ;;  %v15374_v57 = vshrl.u32 %v3562_v36, 30  ;;  %v15387_v42 = vadd.f32 %v14906_v61, %v726_v12  ;;  %v15391_v21 = vmul.f32 %v18158_v19, %v18157_v16  ;;  %v18162_v14 = vld [vmem:[#allocation5_spill] sm:$0xff]  ;;  %v15416_v7 = vpop.f32.mrb[88].mxu1 }
 0x2d7   :  { %v15397_v54 = vmul.f32 %v15372_v17, %v15382_v8  ;;  %v15401_v41 = vmul.f32 2.0, %v18152_v47  ;;  %v15408_v12 = vmul.f32 2.0, %v18153_v56  ;;  %18164 = vst [vmem:[#allocation5_spill] sm:$0xff] %v15416_v7  ;;  %v9609_v5 = vpop.f32.mrb[89].mxu1  ;;  %v18175_v56 = vld [vmem:[#allocation51_spill] sm:$0xff]  ;;  %vm6068_vm15 = vcmp.lt.s32.totalorder %v15384_v25, 2 }
 0x2d8   :  { %18156 = vst [vmem:[#allocation3_spill] sm:$0xff] %v15387_v42  ;;  %v3482_v36 = vsel %vm3399_vm4, %v3481_v37, %v3480_v29  ;;  %v3564_v22 = vshll.u32 %v15374_v57, 30  ;;  %v15412_v29 = vadd.f32 %v14937_v49, %v18162_v14  ;;  %v15414_v37 = vpop.f32.mrb[88].mxu0  ;;  %v15430_v49 = vmul.f32 %v15346_v34, %v14745_v43  ;;  %v15439_v19 = vpop.f32.mrb[90].mxu1 }
 0x2d9   :  { %18159 = vst [vmem:[#allocation40_spill] sm:$0xff] %v15397_v54  ;;  %18160 = vst [vmem:[#allocation38_spill] sm:$0xff] %v15401_v41  ;;  %v3485_v61 = vsel %vm15261_vm12, %v14973_v0, %v3482_v36  ;;  %v15423_v36 = vadd.f32 %v14958_v40, %v18165_v26  ;;  %v9553_v51 = vpop.f32.mrb[89].mxu0  ;;  %v15426_v54 = vmul.f32 2.0, %v14772_v39  ;;  %v18168_v14 = vsub.f32 1.0, %v15378_v3  ;;  %v9610_v7 = vpop.f32.mrb[91].mxu1 }
 0x2da   :  { %18161 = vst [vmem:[#allocation6_spill] sm:$0xff] %v15408_v12  ;;  %18163 = vst [vmem:[#allocation61_spill] sm:$0xff] %v15412_v29  ;;  %10386 = vcosq.f32 %v3485_v61  ;;  %v15418_v16 = vsub.s32 %v3561_v50, %v3564_v22  ;;  %v15437_v22 = vpop.f32.mrb[90].mxu0  ;;  %v15442_v40 = vmul.f32 2.0, %v15132_v2  ;;  %v15444_v51 = vand.u32 3, %v3490_v44  ;;  %v18174_v29 = vld [vmem:[#allocation55_spill] sm:$0xff] }
 0x2db   :  { %18166 = vst [vmem:[#allocation47_spill] sm:$0xff] %v15423_v36  ;;  %18167 = vst [vmem:[#allocation100_spill] sm:$0xff] %v15430_v49  ;;  %10388 = vsinq.f32 %v3485_v61  ;;  %v15435_v50 = vmul.f32 %v15401_v41, %v18168_v14  ;;  %v18171_v43 = vsub.f32 1.0, %v15391_v21  ;;  %v9554_v26 = vpop.f32.mrb[91].mxu0  ;;  %v15453_v14 = vmul.f32 2.0, %v15159_v15  ;;  %v18173_v36 = vld [vmem:[#allocation50_spill] sm:$0xff] }
 0x2dc   :  { %18170 = vst [vmem:[#allocation102_spill] sm:$0xff] %v15439_v19  ;;  %v3567_v5 = vsub.s32 0, %v15418_v16  ;;  %v18176_v41 = vld [vmem:[#allocation46_spill] sm:$0xff]  ;;  %v18177_v44 = vld [vmem:[#allocation52_spill] sm:$0xff]  ;;  %vm6069_vm2 = vcmp.eq.s32.totalorder %v15384_v25, 0  ;;  %vm6072_vm4 = vcmp.eq.s32.totalorder %v15384_v25, 2  ;;  %vm3489_vm6 = vweird.f32 %v14973_v0 }
 0x2dd   :  { %18169 = vst [vmem:[#allocation101_spill] sm:$0xff] %v15435_v50  ;;  %v15450_v61 = vmul.f32 %v15408_v12, %v18171_v43  ;;  %v15459_v47 = vmul.f32 %v18176_v41, %v18175_v56  ;;  %v18178_v50 = vld [vmem:[#allocation68_spill] sm:$0xff]  ;;  %v15473_v56 = vmul.f32 2.0, %v18173_v36  ;;  %v15476_v41 = vmul.f32 2.0, %v18174_v29  ;;  %v18183_v29 = vld [vmem:[#allocation49_spill] sm:$0xff]  ;;  %v15497_v12 = vpop.f32.mrb[92].mxu0 }
 0x2de   :  { %v15463_v42 = vmul.f32 %v18178_v50, %v18177_v44  ;;  %v8958_v7 = vmin.u32 %v3567_v5, %v15418_v16  ;;  %vm3492_vm9 = vcmp.lt.s32.totalorder %v15444_v51, 2  ;;  %vm3493_vm3 = vcmp.eq.s32.totalorder %v15444_v51, 0  ;;  %v18190_v15 = vld [vmem:[#allocation7_spill] sm:$0xff] }
 0x2df   :  { %18172 = vst [vmem:[#allocation103_spill] sm:$0xff] %v15450_v61  ;;  %v17609_v43 = vsub.f32 1.0, %v15459_v47  ;;  %18179 = vst [vmem:[#allocation51_spill] sm:$0xff] %v15473_v56  ;;  %vm3496_vm13 = vcmp.eq.s32.totalorder %v15444_v51, 2  ;;  %v3557_v5 = vadd.s32 %v15290_v63, %v15288_v53  ;;  %v15495_v36 = vadd.f32 %v14993_v30, %v18183_v29  ;;  %v18186_v53 = vld [vmem:[#allocation48_spill] sm:$0xff]  ;;  %v18192_v29 = vld [vmem:[#allocation9_spill] sm:$0xff] }
 0x2e0   :  { %v17614_v26 = vsub.f32 1.0, %v15463_v42  ;;  %18180 = vst [vmem:[#allocation46_spill] sm:$0xff] %v15476_v41  ;;  %v3569_v50 = vclz %v8958_v7  ;;  %v15499_v7 = vpop.f32.mrb[92].mxu1  ;;  %v15503_v63 = vadd.f32 %v15009_v48, %v18186_v53  ;;  %v18195_v48 = vld [vmem:[#allocation53_spill] sm:$0xff]  ;;  %vm3503_vm12 = vcmp.lt.s32.totalorder %v15179_v60, 0  ;;  %v18204_v30 = vld [vmem:[#allocation74_spill] sm:$0xff] }
 0x2e1   :  { %v15486_v44 = vmul.f32 %v15473_v56, %v17609_v43  ;;  %18184 = vst [vmem:[#allocation49_spill] sm:$0xff] %v15495_v36  ;;  %18185 = vst [vmem:[#allocation104_spill] sm:$0xff] %v15499_v7  ;;  %v18188_v43 = vld [vmem:[#allocation10_spill] sm:$0xff]  ;;  %v18189_v56 = vld [vmem:[#allocation59_spill] sm:$0xff]  ;;  %v15521_v53 = vadd.f32 %v15048_v35, %v18195_v48  ;;  %vm18214_vm1 = vcmask 23552   ;;  %vm3593_vm11 = vweird.f32 %v15179_v60 }
 0x2e2   :  { %v15491_v19 = vmul.f32 %v15476_v41, %v17614_v26  ;;  %v8959_v61 = vadd.s32 4294967294, %v3569_v50  ;;  %18187 = vst [vmem:[#allocation48_spill] sm:$0xff] %v15503_v63  ;;  %v15509_v26 = vmul.f32 %v18191_v62, %v18190_v15  ;;  %v9557_v41 = vpop.f32.mrb[93].mxu0  ;;  %v18193_v36 = vld [vmem:[#allocation73_spill] sm:$0xff]  ;;  %v15517_v50 = vmul.f32 2.0, %v18188_v43  ;;  %vm18215_vm8 = vmmov %vm18214_vm1 }
 0x2e3   :  { %18181 = vst [vmem:[#allocation52_spill] sm:$0xff] %v15486_v44  ;;  %v15514_v2 = vmul.f32 %v18193_v36, %v18192_v29  ;;  %18196 = vst [vmem:[#allocation72_spill] sm:$0xff] %v15521_v53  ;;  %v15523_v44 = vpop.f32.mrb[94].mxu0  ;;  %v15528_v62 = vmul.f32 2.0, %v18189_v56  ;;  %v18201_v41 = vld [vmem:[#allocation37_spill] sm:$0xff]  ;;  %v18202_v29 = vld [vmem:[#allocation43_spill] sm:$0xff] }
 0x2e4   :  { %18182 = vst [vmem:[#allocation68_spill] sm:$0xff] %v15491_v19  ;;  %v9613_v19 = vpop.f32.mrb[93].mxu1  ;;  %18194 = vst [vmem:[#allocation7_spill] sm:$0xff] %v15517_v50  ;;  %v10387_v15 = vpop.eup %10386  ;;  %vm8960_vm10 = vcmp.lt.s32.totalorder %v8959_v61, 0 }
 0x2e5   :  { %v15525_v7 = vpop.f32.mrb[94].mxu1  ;;  %18198 = vst [vmem:[#allocation73_spill] sm:$0xff] %v15528_v62  ;;  %v18199_v19 = vld [vmem:[#allocation54_spill] sm:$0xff]  ;;  %v9558_v43 = vpop.f32.mrb[95].mxu0  ;;  %v3497_v48 = vxor.u32 2147483648, %v10387_v15  ;;  %v3572_v53 = vsel %vm8960_vm10, 0, %v8959_v61  ;;  %vm18354_vm10 = vmmov %vm18214_vm1 }
 0x2e6   :  { %18197 = vst [vmem:[#allocation9_spill] sm:$0xff] %v15525_v7  ;;  %v15532_v36 = vadd.f32 %v15061_v13, %v18199_v19  ;;  %v9614_v63 = vpop.f32.mrb[95].mxu1  ;;  %v10389_v35 = vpop.eup %10388  ;;  %v17623_v7 = vsub.f32 1.0, %v15509_v26  ;;  %v3573_v32 = vsub.s32 32, %v3572_v53  ;;  %v3574_v18 = vshll.u32 %v15418_v16, %v3572_v53  ;;  %v18203_v61 = vld [vmem:[#allocation14_spill] sm:$0xff] }
 0x2e7   :  { %v3494_v56 = vxor.u32 2147483648, %v10389_v35  ;;  %v3577_v13 = vsub.s32 4294967266, %v3572_v53  ;;  %v3498_v19 = vsel %vm3496_vm13, %v3497_v48, %v10389_v35  ;;  %v6074_v43 = vsel %vm6072_vm4, %v3497_v48, %v10389_v35  ;;  %v15576_v51 = vpop.f32.mrb[96].mxu0  ;;  %vm18353_vm13 = vmmov %vm18214_vm1 }
 0x2e8   :  { %18200 = vst [vmem:[#allocation53_spill] sm:$0xff] %v15532_v36  ;;  %v15547_v63 = vmul.f32 %v15517_v50, %v17623_v7  ;;  %v15551_v36 = vmul.f32 %v18204_v30, %v18203_v61  ;;  %v3575_v53 = vshrl.u32 %v3557_v5, %v3573_v32  ;;  %v18205_v7 = vand.u32 2147483647, %v15179_v60  ;;  %v18210_v32 = vld [vmem:[#allocation75_spill] sm:$0xff]  ;;  %v18261_v50 = vld [vmem:[#allocation60_spill] sm:$0xff] }
 0x2e9   :  { %v3495_v52 = vsel %vm3493_vm3, %v10387_v15, %v3494_v56  ;;  %v6071_v16 = vsel %vm6069_vm2, %v10387_v15, %v3494_v56  ;;  %v3578_v49 = vadd.s32 127, %v3577_v13  ;;  %v18208_v30 = vsub.f32 1.0, %v15514_v2  ;;  %v18209_v56 = vld [vmem:[#allocation42_spill] sm:$0xff]  ;;  %vm18327_vm3 = vmmov %vm18214_vm1 }
 0x2ea   :  { %v3499_v35 = vsel %vm3492_vm9, %v3495_v52, %v3498_v19  ;;  %v6075_v48 = vsel %vm6068_vm15, %v6071_v16, %v6074_v43  ;;  %vm15563_vm0 = vcmp.le.f32.partialorder %v18205_v7, 0.7853982  ;;  %v15574_v5 = vmul.f32 %v18210_v32, %v18209_v56  ;;  %v15578_v52 = vpop.f32.mrb[96].mxu1  ;;  %v9561_v19 = vpop.f32.mrb[97].mxu0  ;;  %v18218_v32 = vld [vmem:[#allocation57_spill] sm:$0xff]  ;;  %vm18326_vm9 = vmmov %vm18214_vm1 }
 0x2eb   :  { %v15570_v61 = vmul.f32 %v15528_v62, %v18208_v30  ;;  %18211 = vst [vmem:[#allocation54_spill] sm:$0xff] %v15578_v52  ;;  %v15582_v25 = vsel %vm3489_vm6, nan, %v3499_v35  ;;  %v6076_v7 = vsel %vm3489_vm6, nan, %v6075_v48  ;;  %v3576_v15 = vor.u32 %v3575_v53, %v3574_v18  ;;  %v9617_v43 = vpop.f32.mrb[97].mxu1  ;;  %v15593_v52 = vpop.f32.mrb[98].mxu0  ;;  %v18250_v62 = vld [vmem:[#allocation16_spill] sm:$0xff] }
 0x2ec   :  { %v3579_v13 = vshll.u32 %v3578_v49, 23  ;;  %v6191_v16 = vpack.c.bf16 %v15582_v25, %v15365_v38  ;;  %v6408_v30 = vpack.c.bf16 %v6076_v7, %v15382_v8  ;;  %v15590_v56 = vmul.f32 2.0, %v15582_v25  ;;  %v15595_v35 = vpop.f32.mrb[98].mxu1  ;;  %v9562_v53 = vpop.f32.mrb[99].mxu0 }
 0x2ed   :  { %18212 = vst [vmem:[#allocation14_spill] sm:$0xff] %v15595_v35  ;;  %v3583_v48 = vcvt.s32.f32 %v3576_v15  ;;  %v15599_v49 = vmul.f32 2.0, %v18201_v41  ;;  %v9618_v19 = vpop.f32.mrb[99].mxu1  ;;  %v15607_v43 = vmul.f32 2.0, %v18202_v29  ;;  %v15611_v15 = vadd.f32 %v15108_v24, %v18218_v32  ;;  %v18226_v53 = vld [vmem:[#allocation32_spill] sm:$0xff]  ;;  %v18230_v35 = vld [vmem:[#allocation77_spill] sm:$0xff] }
 0x2ee   :  { %v3580_v0 = vor.u32 4788187, %v3579_v13  ;;  %9670 = vmatmul.mubr.msk.bf16.gmra.mrb[148].mxu0 %vm18214_vm1, %v6191_v16  ;;  %9724 = vmatmul.mubr.msk.bf16.gmra.mrb[148].mxu1 %vm18215_vm8, %v6408_v30  ;;  %v15604_v8 = vmul.f32 %v15590_v56, %v6076_v7  ;;  %v18220_v13 = vld [vmem:[#allocation56_spill] sm:$0xff]  ;;  %v18222_v7 = vsub.s32 4, %v15374_v57  ;;  %v18223_v24 = vsub.f32 1.0, %v15551_v36  ;;  %v18232_v29 = vld [vmem:[#allocation79_spill] sm:$0xff] }
 0x2ef   :  { %18213 = vst [vmem:[#allocation74_spill] sm:$0xff] %v15599_v49  ;;  %18217 = vst [vmem:[#allocation75_spill] sm:$0xff] %v15607_v43  ;;  %v15615_v18 = vadd.f32 %v15121_v58, %v18220_v13  ;;  %9673 = vmatprep.mubr.msk.bf16.mxu0 %vm17937_vm5, %v17760_v45  ;;  %9727 = vmatprep.mubr.msk.bf16.mxu1 %vm17937_vm5, %v17760_v45  ;;  %v18225_v58 = vld [vmem:[#allocation18_spill] sm:$0xff]  ;;  %v18227_v13 = vsub.f32 1.0, %v15574_v5  ;;  %v18235_v19 = vld [vmem:[#allocation12_spill] sm:$0xff] }
 0x2f0   :  { %18216 = vst [vmem:[#allocation42_spill] sm:$0xff] %v15604_v8  ;;  %18219 = vst [vmem:[#allocation57_spill] sm:$0xff] %v15611_v15  ;;  %v3581_v16 = vand.u32 2147483647, %v3580_v0  ;;  %v3588_v30 = vsel %vm3503_vm12, %v18222_v7, %v15374_v57  ;;  %v15629_v32 = vmul.f32 %v15599_v49, %v18223_v24  ;;  %v18229_v0 = vld [vmem:[#allocation17_spill] sm:$0xff]  ;;  %v18231_v15 = vld [vmem:[#allocation24_spill] sm:$0xff]  ;;  %v15654_v41 = vadd.f32 %v15149_v33, %v18235_v19 }
 0x2f1   :  { %18221 = vst [vmem:[#allocation56_spill] sm:$0xff] %v15615_v18  ;;  %v15636_v8 = vmul.f32 %v15607_v43, %v18227_v13  ;;  %v15640_v18 = vmul.f32 %v18230_v35, %v18229_v0  ;;  %v15644_v57 = vmul.f32 %v18232_v29, %v18231_v15  ;;  %v15647_v7 = vmul.f32 2.0, %v18225_v58  ;;  %v18237_v13 = vld [vmem:[#allocation15_spill] sm:$0xff]  ;;  %v18239_v15 = vld [vmem:[#allocation25_spill] sm:$0xff]  ;;  %v18240_v0 = vld [vmem:[#allocation20_spill] sm:$0xff] }
 0x2f2   :  { %18224 = vst [vmem:[#allocation105_spill] sm:$0xff] %v15629_v32  ;;  %v3584_v24 = vmul.f32 %v3583_v48, %v3581_v16  ;;  %v15650_v49 = vmul.f32 2.0, %v18226_v53  ;;  %18236 = vst [vmem:[#allocation24_spill] sm:$0xff] %v15654_v41  ;;  %v15658_v43 = vadd.f32 %v15171_v6, %v18237_v13  ;;  %v18242_v48 = vld [vmem:[#allocation80_spill] sm:$0xff]  ;;  %v15668_v53 = vpop.f32.mrb[100].mxu0  ;;  %v15670_v32 = vpop.f32.mrb[100].mxu1 }
 0x2f3   :  { %18228 = vst [vmem:[#allocation106_spill] sm:$0xff] %v15636_v8  ;;  %18233 = vst [vmem:[#allocation17_spill] sm:$0xff] %v15647_v7  ;;  %v18241_v8 = vld [vmem:[#allocation22_spill] sm:$0xff]  ;;  %v3590_v6 = vsel %vm15563_vm0, 0, %v3588_v30  ;;  %v18244_v19 = vld [vmem:[#allocation29_spill] sm:$0xff]  ;;  %v15679_v29 = vmul.f32 2.0, %v18239_v15 }
 0x2f4   :  { %18234 = vst [vmem:[#allocation77_spill] sm:$0xff] %v15650_v49  ;;  %18238 = vst [vmem:[#allocation79_spill] sm:$0xff] %v15658_v43  ;;  %v15666_v16 = vmul.f32 %v18242_v48, %v18241_v8  ;;  %v3585_v33 = vxor.u32 2147483648, %v3584_v24  ;;  %v18245_v13 = vld [vmem:[#allocation81_spill] sm:$0xff]  ;;  %v9565_v58 = vpop.f32.mrb[101].mxu0  ;;  %v9621_v43 = vpop.f32.mrb[101].mxu1 }
 0x2f5   :  { %18243 = vst [vmem:[#allocation12_spill] sm:$0xff] %v15670_v32  ;;  %v15676_v35 = vmul.f32 %v18245_v13, %v18244_v19  ;;  %18246 = vst [vmem:[#allocation15_spill] sm:$0xff] %v15679_v29  ;;  %v18247_v8 = vsub.f32 1.0, %v15640_v18  ;;  %v18248_v32 = vsub.f32 1.0, %v15644_v57  ;;  %v15693_v19 = vmul.f32 2.0, %v18240_v0  ;;  %v722_v13 = vpop.f32.mrb[102].mxu0 }
 0x2f6   :  { %v977_v15 = vpop.f32.mrb[102].mxu1  ;;  %v3586_v43 = vsel %vm3503_vm12, %v3585_v33, %v3584_v24  ;;  %v18255_v33 = vld [vmem:[#allocation31_spill] sm:$0xff]  ;;  %v18256_v58 = vld [vmem:[#allocation82_spill] sm:$0xff]  ;;  %vm18381_vm12 = vmmov %vm18214_vm1 }
 0x2f7   :  { %v15684_v48 = vmul.f32 %v15647_v7, %v18247_v8  ;;  %v15689_v41 = vmul.f32 %v15650_v49, %v18248_v32  ;;  %18249 = vst [vmem:[#allocation22_spill] sm:$0xff] %v15693_v19  ;;  %v15700_v8 = vadd.f32 %v15219_v11, %v18250_v62  ;;  %v18252_v7 = vld [vmem:[#allocation19_spill] sm:$0xff]  ;;  %v9566_v49 = vpop.f32.mrb[103].mxu0  ;;  %v9622_v30 = vpop.f32.mrb[103].mxu1  ;;  %v3589_v13 = vsel %vm15563_vm0, %v15179_v60, %v3586_v43  ;;  %v18257_v11 = vld [vmem:[#allocation41_spill] sm:$0xff]  ;;  %v18258_v62 = vld [vmem:[#allocation30_spill] sm:$0xff] }
 0x2f8   :  { %v15704_v32 = vadd.f32 %v15230_v31, %v18252_v7  ;;  %v18254_v15 = vsub.f32 1.0, %v15666_v16  ;;  %10390 = vcosq.f32 %v3589_v13  ;;  %v3594_v31 = vadd.s32 3, %v3590_v6  ;;  %v18262_v30 = vld [vmem:[#allocation23_spill] sm:$0xff]  ;;  %vm18382_vm0 = vmmov %vm18214_vm1 }
 0x2f9   :  { %18251 = vst [vmem:[#allocation80_spill] sm:$0xff] %v15700_v8  ;;  %v15718_v8 = vmul.f32 %v18258_v62, %v18257_v11  ;;  %v18260_v49 = vsub.f32 1.0, %v15676_v35  ;;  %v15727_v43 = vmul.f32 %v18262_v30, %v18261_v50  ;;  %10392 = vsinq.f32 %v3589_v13  ;;  %v18270_v50 = vld [vmem:[#allocation85_spill] sm:$0xff]  ;;  %v15772_v13 = vld [vmem:[%s17374_s13] sm:$0x3]  ;;  %vm18406_vm1 = vmmov %vm18382_vm0 }
 0x2fa   :  { %18253 = vst [vmem:[#allocation29_spill] sm:$0xff] %v15704_v32  ;;  %v15712_v24 = vmul.f32 %v15679_v29, %v18254_v15  ;;  %v15731_v0 = vmul.f32 2.0, %v18255_v33  ;;  %v15734_v11 = vmul.f32 2.0, %v18256_v58  ;;  %v18266_v32 = vld [vmem:[#allocation28_spill] sm:$0xff]  ;;  %v15747_v30 = vand.u32 3, %v3590_v6  ;;  %vm18407_vm8 = vmmov %vm18382_vm0 }
 0x2fb   :  { %18259 = vst [vmem:[#allocation81_spill] sm:$0xff] %v15718_v8  ;;  %v15723_v7 = vmul.f32 %v15693_v19, %v18260_v49  ;;  %18263 = vst [vmem:[#allocation16_spill] sm:$0xff] %v15727_v43  ;;  %v15739_v29 = vadd.f32 %v15279_v23, %v18266_v32  ;;  %v18268_v49 = vld [vmem:[#allocation26_spill] sm:$0xff]  ;;  %v18271_v62 = vsub.f32 1.0, %v15718_v8  ;;  %v18273_v23 = vld [vmem:[#allocation8_spill] sm:$0xff]  ;;  %v15767_v6 = vand.u32 3, %v3594_v31 }
 0x2fc   :  { %18264 = vst [vmem:[#allocation19_spill] sm:$0xff] %v15731_v0  ;;  %18265 = vst [vmem:[#allocation41_spill] sm:$0xff] %v15734_v11  ;;  %v15743_v19 = vadd.f32 %v15294_v59, %v18268_v49  ;;  %v15752_v15 = vld [vmem:[%s17373_s12] sm:$0x3]  ;;  %v18274_v32 = vld [vmem:[#allocation83_spill] sm:$0xff]  ;;  %v18278_v8 = vsub.f32 1.0, %v15727_v43 }
 0x2fd   :  { %18267 = vst [vmem:[#allocation30_spill] sm:$0xff] %v15739_v29  ;;  %v15757_v58 = vmul.f32 %v15731_v0, %v18271_v62  ;;  %v15761_v29 = vmul.f32 %v18274_v32, %v18273_v23  ;;  %v18276_v59 = vld [vmem:[#allocation69_spill] sm:$0xff]  ;;  %v15788_v31 = vpop.f32.mrb[104].mxu1  ;;  %v15793_v43 = vmul.f32 2.0, %v15155_v9  ;;  %v15809_v0 = vmul.f32 %v15453_v14, %v15163_v28 }
 0x2fe   :  { %18269 = vst [vmem:[#allocation60_spill] sm:$0xff] %v15743_v19  ;;  %v15765_v49 = vmul.f32 %v14945_v4, %v18276_v59  ;;  %v15777_v62 = vmul.f32 %v15734_v11, %v18278_v8  ;;  %v15780_v19 = vmul.f32 2.0, %v18270_v50  ;;  %v18280_v23 = vld [vmem:[#allocation33_spill] sm:$0xff]  ;;  %v15786_v4 = vpop.f32.mrb[104].mxu0  ;;  %18282 = vst [vmem:[#allocation69_spill] sm:$0xff] %v15788_v31  ;;  %v18284_v8 = vld [vmem:[#allocation27_spill] sm:$0xff] }
 0x2ff   :  { %18272 = vst [vmem:[#allocation23_spill] sm:$0xff] %v15757_v58  ;;  %18275 = vst [vmem:[#allocation28_spill] sm:$0xff] %v15761_v29  ;;  %v15784_v32 = vadd.f32 %v15337_v1, %v18280_v23  ;;  %v15797_v11 = vadd.f32 %v15355_v20, %v18284_v8  ;;  %v9627_v50 = vpop.f32.mrb[105].mxu0  ;;  %v9681_v33 = vpop.f32.mrb[105].mxu1  ;;  %v15805_v23 = vmul.f32 %v15442_v40, %v15136_v27  ;;  %v18293_v28 = vld [vmem:[#allocation13_spill] sm:$0xff]  ;;  %vm3596_vm7 = vcmp.lt.s32.totalorder %v15767_v6, 2 }
 0x300   :  { %18277 = vst [vmem:[#allocation26_spill] sm:$0xff] %v15765_v49  ;;  %18279 = vst [vmem:[#allocation8_spill] sm:$0xff] %v15777_v62  ;;  %v18286_v62 = vld [vmem:[#allocation78_spill] sm:$0xff]  ;;  %v15812_v59 = vpop.f32.mrb[106].mxu0  ;;  %v15814_v20 = vpop.f32.mrb[106].mxu1  ;;  %v18292_v27 = vsub.f32 1.0, %v15765_v49 }
 0x301   :  { %18281 = vst [vmem:[#allocation83_spill] sm:$0xff] %v15784_v32  ;;  %18283 = vst [vmem:[#allocation33_spill] sm:$0xff] %v15793_v43  ;;  %v15801_v1 = vmul.f32 %v15426_v54, %v18286_v62  ;;  %v18290_v50 = vld [vmem:[#allocation2_spill] sm:$0xff]  ;;  %v18291_v62 = vsub.f32 1.0, %v15761_v29  ;;  %v9628_v32 = vpop.f32.mrb[107].mxu0  ;;  %v9682_v9 = vpop.f32.mrb[107].mxu1 }
 0x302   :  { %18285 = vst [vmem:[#allocation27_spill] sm:$0xff] %v15797_v11  ;;  %18287 = vst [vmem:[#allocation78_spill] sm:$0xff] %v15805_v23  ;;  %v15826_v31 = vmul.f32 %v15793_v43, %v18292_v27  ;;  %v15830_v11 = vadd.f32 %v15414_v37, %v18293_v28  ;;  %v18295_v33 = vsub.f32 1.0, %v15309_v55  ;;  %v18296_v49 = vsub.f32 1.0, %v15378_v3  ;;  %v18298_v43 = vld [vmem:[#allocation58_spill] sm:$0xff]  ;;  %v10391_v9 = vpop.eup %10390 }
 0x303   :  { %18288 = vst [vmem:[#allocation107_spill] sm:$0xff] %v15809_v0  ;;  %18289 = vst [vmem:[#allocation108_spill] sm:$0xff] %v15814_v20  ;;  %v15821_v8 = vmul.f32 %v15780_v19, %v18291_v62  ;;  %v18294_v20 = vsub.f32 1.0, %v15302_v46  ;;  %v18297_v27 = vsub.f32 1.0, %v15391_v21  ;;  %v15848_v37 = vadd.f32 %v15437_v22, %v18298_v43  ;;  %v18301_v21 = vld [vmem:[#allocation21_spill] sm:$0xff]  ;;  %v10393_v43 = vpop.eup %10392 }
 0x304   :  { %vm6171_vm14 = vcmp.lt.s32.totalorder %v15747_v30, 2  ;;  %vm6172_vm15 = vcmp.eq.s32.totalorder %v15747_v30, 0  ;;  %vm6175_vm2 = vcmp.eq.s32.totalorder %v15747_v30, 2  ;;  %vm3597_vm4 = vcmp.eq.s32.totalorder %v15767_v6, 0 }
 0x305   :  { %v15836_v58 = vpack.c.bf16 %v18295_v33, %v18294_v20  ;;  %v15844_v29 = vpack.c.bf16 %v18297_v27, %v18296_v49  ;;  %vm3600_vm6 = vcmp.eq.s32.totalorder %v15767_v6, 2  ;;  %v18299_v55 = vsub.f32 1.0, %v15459_v47 }
 0x306   :  { %v18300_v46 = vsub.f32 1.0, %v15463_v42  ;;  %v15864_v22 = vadd.f32 %v15497_v12, %v18301_v21  ;;  %v3601_v49 = vxor.u32 2147483648, %v10391_v9  ;;  %v18303_v32 = vsub.f32 1.0, %v15509_v26  ;;  %v18307_v42 = vld [vmem:[#allocation76_spill] sm:$0xff]  ;;  %v15882_v12 = vpop.f32.mrb[108].mxu0 }
 0x307   :  { %v18304_v20 = vsub.f32 1.0, %v15514_v2  ;;  %v18305_v28 = vsub.f32 1.0, %v15551_v36  ;;  %v18306_v47 = vsub.f32 1.0, %v15574_v5  ;;  %v3598_v21 = vxor.u32 2147483648, %v10393_v43 }
 0x308   :  { %v15860_v3 = vpack.c.bf16 %v18300_v46, %v18299_v55  ;;  %18302 = vst [vmem:[#allocation13_spill] sm:$0xff] %v15864_v22  ;;  %v15880_v55 = vadd.f32 %v15523_v44, %v18307_v42  ;;  %v15884_v46 = vpop.f32.mrb[108].mxu1  ;;  %v18309_v26 = vsub.f32 1.0, %v15640_v18  ;;  %v18310_v2 = vsub.f32 1.0, %v15644_v57  ;;  %v9631_v44 = vpop.f32.mrb[109].mxu0 }
 0x309   :  { %v15870_v33 = vpack.c.bf16 %v18304_v20, %v18303_v32  ;;  %v15876_v27 = vpack.c.bf16 %v18306_v47, %v18305_v28  ;;  %v15894_v36 = vmul.f32 %v15372_v17, %v15365_v38  ;;  %v15898_v5 = vmul.f32 %v15590_v56, %v15582_v25  ;;  %v9685_v20 = vpop.f32.mrb[109].mxu1  ;;  %v15914_v17 = vpop.f32.mrb[110].mxu0 }
 0x30a   :  { %18308 = vst [vmem:[#allocation58_spill] sm:$0xff] %v15880_v55  ;;  %v15890_v32 = vpack.c.bf16 %v18310_v2, %v18309_v26  ;;  %v3602_v28 = vsel %vm3600_vm6, %v3601_v49, %v10393_v43  ;;  %v6177_v18 = vsel %vm6175_vm2, %v3601_v49, %v10393_v43  ;;  %v18313_v57 = vsub.f32 1.0, %v15666_v16  ;;  %v15916_v25 = vpop.f32.mrb[110].mxu1  ;;  %v9632_v49 = vpop.f32.mrb[111].mxu0  ;;  %v18318_v2 = vld [vmem:[#allocation100_spill] sm:$0xff]  ;;  %vm18475_vm2 = vmmov %vm18382_vm0 }
 0x30b   :  { %18311 = vst [vmem:[#allocation21_spill] sm:$0xff] %v15894_v36  ;;  %18312 = vst [vmem:[#allocation76_spill] sm:$0xff] %v15898_v5  ;;  %v18314_v47 = vsub.f32 1.0, %v15676_v35  ;;  %v15912_v38 = vmul.f32 %v15346_v34, %v14737_v10  ;;  %v3599_v56 = vsel %vm3597_vm4, %v10391_v9, %v3598_v21  ;;  %v6174_v43 = vsel %vm6172_vm15, %v10391_v9, %v3598_v21  ;;  %v9686_v26 = vpop.f32.mrb[111].mxu1  ;;  %v18319_v21 = vld [vmem:[#allocation88_spill] sm:$0xff]  ;;  %v18324_v49 = vld [vmem:[#allocation63_spill] sm:$0xff] }
 0x30c   :  { %v15924_v16 = vmul.f32 %v15426_v54, %v14772_v39  ;;  %v17656_v35 = vsub.f32 1.0, %v15894_v36  ;;  %v3603_v10 = vsel %vm3596_vm7, %v3599_v56, %v3602_v28  ;;  %v6178_v34 = vsel %vm6171_vm14, %v6174_v43, %v6177_v18  ;;  %v18322_v56 = vld [vmem:[#allocation89_spill] sm:$0xff]  ;;  %v15969_v62 = vpop.f32.mrb[112].mxu0  ;;  %vm18427_vm7 = vmmov %vm18382_vm0 }
 0x30d   :  { %v15908_v42 = vpack.c.bf16 %v18314_v47, %v18313_v57  ;;  %18316 = vst [vmem:[#allocation110_spill] sm:$0xff] %v15912_v38  ;;  %v15932_v44 = vmul.f32 2.0, %v18318_v2  ;;  %v17655_v20 = vsub.f32 1.0, %v15898_v5  ;;  %v3604_v9 = vsel %vm3593_vm11, nan, %v3603_v10  ;;  %v9635_v60 = vpop.f32.mrb[113].mxu0  ;;  %vm18450_vm14 = vmmov %vm18382_vm0 }
 0x30e   :  { %18317 = vst [vmem:[#allocation111_spill] sm:$0xff] %v15924_v16  ;;  %v6179_v39 = vsel %vm3593_vm11, nan, %v6178_v34  ;;  %v15940_v54 = vmul.f32 2.0, %v15801_v1  ;;  %v15944_v6 = vadd.f32 %v15576_v51, %v18319_v21  ;;  %v6192_v30 = vpack.c.bf16 %v3604_v9, %v3604_v9  ;;  %v18329_v34 = vld [vmem:[#allocation39_spill] sm:$0xff]  ;;  %v18339_v60 = vld [vmem:[#allocation98_spill] sm:$0xff]  ;;  %vm18426_vm11 = vmmov %vm18382_vm0 }
 0x30f   :  { %18315 = vst [vmem:[#allocation109_spill] sm:$0xff] %v15908_v42  ;;  %v6409_v28 = vpack.c.bf16 %v6179_v39, %v6179_v39  ;;  %v6638_v18 = vmul.f32 2.0, %v3604_v9  ;;  %v15950_v57 = vpack.c.bf16 %v17655_v20, %v17656_v35  ;;  %v15956_v43 = vadd.f32 %v15593_v52, %v18322_v56  ;;  %v18330_v21 = vld [vmem:[#allocation67_spill] sm:$0xff]  ;;  %v15971_v52 = vpop.f32.mrb[112].mxu1  ;;  %v18336_v56 = vld [vmem:[#allocation66_spill] sm:$0xff]  ;;  %vm18451_vm15 = vmmov %vm18382_vm0 }
 0x310   :  { %18320 = vst [vmem:[#allocation100_spill] sm:$0xff] %v15944_v6  ;;  %v15960_v51 = vadd.f32 %v15668_v53, %v18324_v49  ;;  %9674 = vmatmul.mubr.msk.bf16.gmra.mrb[152].mxu0 %vm18326_vm9, %v6192_v30  ;;  %v7682_v35 = vmul.f32 2.0, %v18329_v34  ;;  %v18331_v53 = vld [vmem:[#allocation92_spill] sm:$0xff]  ;;  %v18334_v30 = vld [vmem:[#allocation34_spill] sm:$0xff]  ;;  %v7683_v20 = vmul.f32 2.0, %v18330_v21  ;;  %v9689_v47 = vpop.f32.mrb[113].mxu1  ;;  %vm18476_vm4 = vmmov %vm18382_vm0 }
 0x311   :  { %18321 = vst [vmem:[#allocation88_spill] sm:$0xff] %v15950_v57  ;;  %18323 = vst [vmem:[#allocation89_spill] sm:$0xff] %v15956_v43  ;;  %9728 = vmatmul.mubr.msk.bf16.gmra.mrb[152].mxu1 %vm18327_vm3, %v6409_v28  ;;  %v15964_v26 = vmul.f32 %v6638_v18, %v6179_v39  ;;  %v6688_v10 = vmul.f32 %v6638_v18, %v3604_v9  ;;  %9733 = vmatprep.mubr.msk.bf16.mxu0 %vm17937_vm5, %v17760_v45  ;;  %v18333_v9 = vld [vmem:[#allocation62_spill] sm:$0xff]  ;;  %v18335_v18 = vld [vmem:[#allocation11_spill] sm:$0xff] }
 0x312   :  { %18325 = vst [vmem:[#allocation63_spill] sm:$0xff] %v15960_v51  ;;  %9787 = vmatprep.mubr.msk.bf16.mxu1 %vm17937_vm5, %v17760_v45  ;;  %v15979_v39 = vmul.f32 %v15442_v40, %v18331_v53  ;;  %v7198_v28 = vmul.f32 %v18334_v30, %v18333_v9  ;;  %v7199_v49 = vmul.f32 %v18336_v56, %v18335_v18  ;;  %v18337_v57 = vld [vmem:[#allocation94_spill] sm:$0xff]  ;;  %v15994_v53 = vpop.f32.mrb[114].mxu0  ;;  %v15996_v30 = vpop.f32.mrb[114].mxu1  ;;  %vm18498_vm6 = vmmov %vm18382_vm0 }
 0x313   :  { %18328 = vst [vmem:[#allocation112_spill] sm:$0xff] %v15964_v26  ;;  %v15988_v5 = vmul.f32 %v15453_v14, %v18337_v57  ;;  %v15990_v36 = vsub.f32 1.0, %v6688_v10  ;;  %v7172_v51 = vmul.f32 2.0, %v15964_v26  ;;  %v7732_v40 = vmul.f32 %v7682_v35, %v18329_v34  ;;  %v9636_v14 = vpop.f32.mrb[115].mxu0  ;;  %v9690_v57 = vpop.f32.mrb[115].mxu1  ;;  %vm18500_vm9 = vmmov %vm18382_vm0 }
 0x314   :  { %18332 = vst [vmem:[#allocation92_spill] sm:$0xff] %v15979_v39  ;;  %v7223_v42 = vsub.f32 1.0, %v7198_v28  ;;  %v7224_v56 = vsub.f32 1.0, %v7199_v49  ;;  %v7733_v43 = vmul.f32 %v7683_v20, %v18330_v21  ;;  %v16001_v47 = vadd.f32 %v15786_v4, %v18339_v60  ;;  %vm18522_vm3 = vmmov %vm18382_vm0 }
 0x315   :  { %18338 = vst [vmem:[#allocation62_spill] sm:$0xff] %v15990_v36  ;;  %v16004_v10 = vmul.f32 2.0, %v15805_v23  ;;  %v16007_v6 = vmul.f32 %v7172_v51, %v15990_v36  ;;  %v7222_v34 = vmul.f32 %v7172_v51, %v15964_v26  ;;  %v7757_v55 = vsub.f32 1.0, %v7732_v40  ;;  %v18350_v40 = vld [vmem:[#allocation101_spill] sm:$0xff] }
 0x316   :  { %v16010_v22 = vpack.c.bf16 %v7224_v56, %v7223_v42  ;;  %v16012_v28 = vmul.f32 %v7682_v35, %v7223_v42  ;;  %v16014_v49 = vmul.f32 %v7683_v20, %v7224_v56  ;;  %v7758_v21 = vsub.f32 1.0, %v7733_v43  ;;  %v18349_v20 = vld [vmem:[#allocation3_spill] sm:$0xff]  ;;  %v16056_v42 = vpop.f32.mrb[116].mxu0 }
 0x317   :  { %18340 = vst [vmem:[#allocation34_spill] sm:$0xff] %v16004_v10  ;;  %18341 = vst [vmem:[#allocation11_spill] sm:$0xff] %v16007_v6  ;;  %v18345_v4 = vsub.f32 1.0, %v15912_v38  ;;  %v16022_v14 = vmul.f32 2.0, %v15809_v0  ;;  %v16024_v57 = vsub.f32 1.0, %v7222_v34  ;;  %v16027_v51 = vmul.f32 2.0, %v16007_v6 }
 0x318   :  { %18342 = vst [vmem:[#allocation66_spill] sm:$0xff] %v16010_v22  ;;  %18343 = vst [vmem:[#allocation94_spill] sm:$0xff] %v16012_v28  ;;  %v16031_v35 = vpack.c.bf16 %v7758_v21, %v7757_v55  ;;  %v16035_v43 = vadd.f32 %v15812_v59, %v18349_v20  ;;  %v18351_v56 = vld [vmem:[#allocation103_spill] sm:$0xff]  ;;  %v18352_v22 = vpack.c.bf16 %v18335_v18, %v18333_v9  ;;  %v18355_v34 = vsub.f32 1.0, %v15924_v16  ;;  %v16058_v9 = vpop.f32.mrb[116].mxu1  ;;  %v18359_v18 = vld [vmem:[#allocation44_spill] sm:$0xff] }
 0x319   :  { %18344 = vst [vmem:[#allocation98_spill] sm:$0xff] %v16014_v49  ;;  %v16019_v60 = vmul.f32 %v15932_v44, %v18345_v4  ;;  %18346 = vst [vmem:[#allocation113_spill] sm:$0xff] %v16024_v57  ;;  %9788 = vmatmul.mubr.msk.bf16.vlgmr.msra.gmra.mrb[156].mxu1 %vm18354_vm10, %v15836_v58  ;;  %v16053_v59 = vmul.f32 %v16027_v51, %v16024_v57  ;;  %v7684_v20 = vmul.f32 2.0, %v18350_v40  ;;  %v18361_v21 = vld [vmem:[#allocation4_spill] sm:$0xff]  ;;  %v18363_v28 = vld [vmem:[#allocation61_spill] sm:$0xff]  ;;  %v9639_v6 = vpop.f32.mrb[117].mxu0 }
 0x31a   :  { %18347 = vst [vmem:[#allocation114_spill] sm:$0xff] %v16027_v51  ;;  %18348 = vst [vmem:[#allocation115_spill] sm:$0xff] %v16031_v35  ;;  %9734 = vmatmul.mubr.msk.bf16.vlgmr.msra.gmra.mrb[156].mxu0 %vm18353_vm13, %v18352_v22  ;;  %v16048_v55 = vmul.f32 %v15940_v54, %v18355_v34  ;;  %v18357_v58 = vand.u32 %v15752_v15, %v18290_v50  ;;  %v18358_v22 = vand.u32 %v15772_v13, %v18290_v50  ;;  %v18360_v34 = vld [vmem:[#allocation38_spill] sm:$0xff]  ;;  %v18364_v49 = vld [vmem:[#allocation84_spill] sm:$0xff]  ;;  %v9693_v36 = vpop.f32.mrb[117].mxu1  ;;  %v16086_v6 = vpop.f32.mrb[118].mxu0 }
 0x31b   :  { %18356 = vst [vmem:[#allocation3_spill] sm:$0xff] %v16053_v59  ;;  %v7200_v4 = vmul.f32 %v18360_v34, %v18359_v18  ;;  %v18362_v51 = vld [vmem:[#allocation6_spill] sm:$0xff]  ;;  %v7685_v35 = vmul.f32 2.0, %v18351_v56  ;;  %v982_v57 = vadd.f32 %v18364_v49, %v18363_v28  ;;  %9737 = vmatprep.mubr.msk.bf16.mxu0 %vm17937_vm5, %v17760_v45  ;;  %9791 = vmatprep.mubr.msk.bf16.mxu1 %vm17937_vm5, %v17760_v45  ;;  %v18365_v13 = vsub.f32 1.0, %v15979_v39  ;;  %v16088_v36 = vpop.f32.mrb[118].mxu1  ;;  %v9640_v26 = vpop.f32.mrb[119].mxu0  ;;  %vm18523_vm13 = vmmov %vm18382_vm0 }
 0x31c   :  { %9840 = vmatpush3.bf16.msra.mxu0 %v18357_v58  ;;  %9894 = vmatpush3.bf16.msra.mxu1 %v18358_v22  ;;  %v7201_v59 = vmul.f32 %v18362_v51, %v18361_v21  ;;  %v7734_v51 = vmul.f32 %v7684_v20, %v18350_v40  ;;  %v18366_v22 = vld [vmem:[#allocation47_spill] sm:$0xff]  ;;  %v18367_v34 = vld [vmem:[#allocation86_spill] sm:$0xff]  ;;  %v9694_v39 = vpop.f32.mrb[119].mxu1  ;;  %v18368_v40 = vsub.f32 1.0, %v15988_v5  ;;  %v18369_v38 = vld [vmem:[#allocation52_spill] sm:$0xff] }
 0x31d   :  { %v16081_v58 = vmul.f32 %v16004_v10, %v18365_v13  ;;  %v983_v28 = vadd.f32 %v18367_v34, %v18366_v22  ;;  %9947 = vmatprep.subr.bf16.mxu0 %v17760_v45  ;;  %10001 = vmatprep.subr.bf16.mxu1 %v17760_v45  ;;  %v7225_v49 = vsub.f32 1.0, %v7200_v4  ;;  %v7735_v50 = vmul.f32 %v7685_v35, %v18351_v56  ;;  %v18370_v0 = vld [vmem:[#allocation68_spill] sm:$0xff]  ;;  %v16136_v10 = vpop.f32.mrb[120].mxu1  ;;  %vm18530_vm10 = vmmov %vm18382_vm0 }
 0x31e   :  { %v7226_v15 = vsub.f32 1.0, %v7201_v59  ;;  %v6374_v13 = vadd.f32 %v15882_v12, %v982_v57  ;;  %v16097_v22 = vmul.f32 %v16022_v14, %v18368_v40  ;;  %v7759_v34 = vsub.f32 1.0, %v7734_v51  ;;  %v18375_v57 = vld [vmem:[#allocation50_spill] sm:$0xff]  ;;  %v18376_v40 = vld [vmem:[#allocation51_spill] sm:$0xff] }
 0x31f   :  { %v6375_v16 = vadd.f32 %v15914_v17, %v983_v28  ;;  %v16104_v4 = vmul.f32 %v7684_v20, %v7225_v49  ;;  %v7760_v12 = vsub.f32 1.0, %v7735_v50  ;;  %v7202_v51 = vmul.f32 %v18376_v40, %v18375_v57  ;;  %v18377_v17 = vld [vmem:[#allocation55_spill] sm:$0xff]  ;;  %v18378_v28 = vld [vmem:[#allocation46_spill] sm:$0xff]  ;;  %v18385_v40 = vld [vmem:[#allocation48_spill] sm:$0xff] }
 0x320   :  { %v16102_v23 = vpack.c.bf16 %v7226_v15, %v7225_v49  ;;  %v16106_v59 = vmul.f32 %v7685_v35, %v7226_v15  ;;  %v16109_v26 = vadd.f32 %v15884_v46, %v6374_v13  ;;  %v7203_v56 = vmul.f32 %v18378_v28, %v18377_v17  ;;  %v18383_v15 = vld [vmem:[#allocation49_spill] sm:$0xff]  ;;  %v18384_v49 = vld [vmem:[#allocation35_spill] sm:$0xff]  ;;  %v16134_v28 = vpop.f32.mrb[120].mxu0 }
 0x321   :  { %18371 = vst [vmem:[#allocation44_spill] sm:$0xff] %v16104_v4  ;;  %v16112_v39 = vadd.f32 %v15916_v25, %v6375_v16  ;;  %v16120_v20 = vpack.c.bf16 %v7760_v12, %v7759_v34  ;;  %v7686_v35 = vmul.f32 2.0, %v18369_v38  ;;  %v7687_v50 = vmul.f32 2.0, %v18370_v0  ;;  %9792 = vmatmul.mubr.msk.bf16.gmra.mrb[160].mxu1 %vm18382_vm0, %v15844_v29  ;;  %v18386_v34 = vld [vmem:[#allocation64_spill] sm:$0xff] }
 0x322   :  { %18372 = vst [vmem:[#allocation38_spill] sm:$0xff] %v16106_v59  ;;  %18373 = vst [vmem:[#allocation4_spill] sm:$0xff] %v16109_v26  ;;  %v18380_v46 = vpack.c.bf16 %v18361_v21, %v18359_v18  ;;  %v7227_v25 = vsub.f32 1.0, %v7202_v51  ;;  %v7228_v16 = vsub.f32 1.0, %v7203_v56  ;;  %v984_v13 = vadd.f32 %v18384_v49, %v18383_v15  ;;  %9795 = vmatprep.mubr.msk.bf16.mxu1 %vm17937_vm5, %v17760_v45  ;;  %v9643_v51 = vpop.f32.mrb[121].mxu0  ;;  %v18389_v21 = vld [vmem:[#allocation10_spill] sm:$0xff] }
 0x323   :  { %18374 = vst [vmem:[#allocation6_spill] sm:$0xff] %v16112_v39  ;;  %18379 = vst [vmem:[#allocation61_spill] sm:$0xff] %v16120_v20  ;;  %v985_v12 = vadd.f32 %v18386_v34, %v18385_v40  ;;  %v7736_v29 = vmul.f32 %v7686_v35, %v18369_v38  ;;  %v7737_v56 = vmul.f32 %v7687_v50, %v18370_v0  ;;  %v7688_v18 = vmul.f32 2.0, %v15547_v63  ;;  %v6305_v39 = vpop.f32.mrb[122].mxu0  ;;  %v18390_v38 = vld [vmem:[#allocation7_spill] sm:$0xff] }
 0x324   :  { %9738 = vmatmul.mubr.msk.bf16.gmra.mrb[160].mxu0 %vm18381_vm12, %v18380_v46  ;;  %v9697_v46 = vpop.f32.mrb[121].mxu1  ;;  %v16147_v15 = vpack.c.bf16 %v7228_v16, %v7227_v25  ;;  %v16149_v49 = vmul.f32 %v7686_v35, %v7227_v25  ;;  %v16151_v40 = vmul.f32 %v7687_v50, %v7228_v16  ;;  %v6376_v34 = vadd.f32 %v15969_v62, %v984_v13  ;;  %v9644_v51 = vpop.f32.mrb[123].mxu0  ;;  %v18392_v25 = vld [vmem:[#allocation59_spill] sm:$0xff]  ;;  %v18393_v62 = vld [vmem:[#allocation73_spill] sm:$0xff]  ;;  %v18397_v35 = vld [vmem:[#allocation36_spill] sm:$0xff] }
 0x325   :  { %9741 = vmatprep.mubr.msk.bf16.mxu0 %vm17937_vm5, %v17760_v45  ;;  %v16154_v26 = vpop.f32.mrb[122].mxu1  ;;  %v7761_v20 = vsub.f32 1.0, %v7736_v29  ;;  %v7762_v4 = vsub.f32 1.0, %v7737_v56  ;;  %v6377_v59 = vadd.f32 %v15994_v53, %v985_v12  ;;  %v7204_v0 = vmul.f32 %v18390_v38, %v18389_v21  ;;  %vm18531_vm12 = vmmov %vm18382_vm0 }
 0x326   :  { %18387 = vst [vmem:[#allocation84_spill] sm:$0xff] %v16149_v49  ;;  %18388 = vst [vmem:[#allocation47_spill] sm:$0xff] %v16151_v40  ;;  %v9698_v46 = vpop.f32.mrb[123].mxu1  ;;  %v16162_v50 = vadd.f32 %v15971_v52, %v6376_v34  ;;  %v7205_v16 = vmul.f32 %v18393_v62, %v18392_v25  ;;  %v7689_v13 = vmul.f32 2.0, %v15570_v61  ;;  %v7738_v38 = vmul.f32 %v7688_v18, %v15547_v63  ;;  %v18398_v34 = vld [vmem:[#allocation53_spill] sm:$0xff] }
 0x327   :  { %v16167_v29 = vpack.c.bf16 %v7762_v4, %v7761_v20  ;;  %v16170_v53 = vadd.f32 %v15996_v30, %v6377_v59  ;;  %v7229_v12 = vsub.f32 1.0, %v7204_v0  ;;  %v18396_v46 = vld [vmem:[#allocation72_spill] sm:$0xff]  ;;  %v18401_v4 = vld [vmem:[#allocation105_spill] sm:$0xff]  ;;  %v18402_v20 = vld [vmem:[#allocation106_spill] sm:$0xff] }
 0x328   :  { %18391 = vst [vmem:[#allocation86_spill] sm:$0xff] %v16162_v50  ;;  %v7230_v56 = vsub.f32 1.0, %v7205_v16  ;;  %v7739_v51 = vmul.f32 %v7689_v13, %v15570_v61  ;;  %v986_v52 = vadd.f32 %v18397_v35, %v18396_v46  ;;  %v18399_v50 = vld [vmem:[#allocation87_spill] sm:$0xff]  ;;  %v7763_v40 = vsub.f32 1.0, %v7738_v38  ;;  %v18403_v30 = vld [vmem:[#allocation37_spill] sm:$0xff]  ;;  %v18404_v59 = vld [vmem:[#allocation74_spill] sm:$0xff] }
 0x329   :  { %18394 = vst [vmem:[#allocation50_spill] sm:$0xff] %v16167_v29  ;;  %18395 = vst [vmem:[#allocation51_spill] sm:$0xff] %v16170_v53  ;;  %v987_v49 = vadd.f32 %v18399_v50, %v18398_v34  ;;  %v16178_v62 = vmul.f32 %v7688_v18, %v7229_v12  ;;  %v7206_v0 = vmul.f32 %v18404_v59, %v18403_v30  ;;  %9796 = vmatmul.mubr.msk.bf16.gmra.mrb[164].mxu1 %vm18407_vm8, %v15860_v3  ;;  %v16195_v46 = vpop.f32.mrb[124].mxu0  ;;  %v16197_v34 = vpop.f32.mrb[124].mxu1  ;;  %v18410_v3 = vld [vmem:[#allocation43_spill] sm:$0xff] }
 0x32a   :  { %v18405_v16 = vpack.c.bf16 %v18377_v17, %v18375_v57  ;;  %v16190_v35 = vpack.c.bf16 %v7230_v56, %v7229_v12  ;;  %v16192_v50 = vmul.f32 %v7689_v13, %v7230_v56  ;;  %v7764_v18 = vsub.f32 1.0, %v7739_v51  ;;  %9799 = vmatprep.mubr.msk.bf16.mxu1 %vm17937_vm5, %v17760_v45  ;;  %v18411_v17 = vld [vmem:[#allocation75_spill] sm:$0xff]  ;;  %v9647_v51 = vpop.f32.mrb[125].mxu0  ;;  %vm18541_vm8 = vmmov %vm18382_vm0 }
 0x32b   :  { %18400 = vst [vmem:[#allocation55_spill] sm:$0xff] %v16178_v62  ;;  %v6378_v38 = vadd.f32 %v16056_v42, %v986_v52  ;;  %v6379_v57 = vadd.f32 %v16086_v6, %v987_v49  ;;  %v7207_v12 = vmul.f32 %v18411_v17, %v18410_v3  ;;  %v7231_v13 = vsub.f32 1.0, %v7206_v0  ;;  %v9701_v42 = vpop.f32.mrb[125].mxu1  ;;  %v6313_v53 = vpop.f32.mrb[126].mxu0  ;;  %v18417_v52 = vld [vmem:[#allocation90_spill] sm:$0xff] }
 0x32c   :  { %9742 = vmatmul.mubr.msk.bf16.gmra.mrb[164].mxu0 %vm18406_vm1, %v18405_v16  ;;  %18408 = vst [vmem:[#allocation46_spill] sm:$0xff] %v16190_v35  ;;  %18409 = vst [vmem:[#allocation49_spill] sm:$0xff] %v16192_v50  ;;  %v7690_v56 = vmul.f32 2.0, %v18401_v4  ;;  %v16209_v59 = vpack.c.bf16 %v7764_v18, %v7763_v40  ;;  %v7691_v29 = vmul.f32 2.0, %v18402_v20  ;;  %v6530_v6 = vpop.f32.mrb[126].mxu1  ;;  %v9648_v42 = vpop.f32.mrb[127].mxu0 }
 0x32d   :  { %9745 = vmatprep.mubr.msk.bf16.mxu0 %vm17937_vm5, %v17760_v45  ;;  %v16212_v16 = vadd.f32 %v16058_v9, %v6378_v38  ;;  %v16216_v49 = vadd.f32 %v16088_v36, %v6379_v57  ;;  %v7232_v0 = vsub.f32 1.0, %v7207_v12  ;;  %v9702_v35 = vpop.f32.mrb[127].mxu1  ;;  %v18416_v18 = vld [vmem:[#allocation57_spill] sm:$0xff]  ;;  %v18418_v38 = vld [vmem:[#allocation56_spill] sm:$0xff]  ;;  %vm18537_vm1 = vmmov %vm18382_vm0 }
 0x32e   :  { %18412 = vst [vmem:[#allocation35_spill] sm:$0xff] %v16209_v59  ;;  %v16218_v17 = vmul.f32 %v7690_v56, %v7231_v13  ;;  %v7740_v51 = vmul.f32 %v7690_v56, %v18401_v4  ;;  %v7741_v40 = vmul.f32 %v7691_v29, %v18402_v20  ;;  %v988_v9 = vadd.f32 %v18417_v52, %v18416_v18  ;;  %v18422_v56 = vld [vmem:[#allocation17_spill] sm:$0xff]  ;;  %v18423_v20 = vld [vmem:[#allocation32_spill] sm:$0xff] }
 0x32f   :  { %18413 = vst [vmem:[#allocation48_spill] sm:$0xff] %v16212_v16  ;;  %18414 = vst [vmem:[#allocation64_spill] sm:$0xff] %v16216_v49  ;;  %v18419_v16 = vld [vmem:[#allocation91_spill] sm:$0xff]  ;;  %v16228_v36 = vpack.c.bf16 %v7232_v0, %v7231_v13  ;;  %v16230_v57 = vmul.f32 %v7691_v29, %v7232_v0  ;;  %v18421_v49 = vld [vmem:[#allocation18_spill] sm:$0xff]  ;;  %v7692_v13 = vmul.f32 2.0, %v15684_v48  ;;  %v7693_v29 = vmul.f32 2.0, %v15689_v41 }
 0x330   :  { %18415 = vst [vmem:[#allocation10_spill] sm:$0xff] %v16218_v17  ;;  %v989_v59 = vadd.f32 %v18419_v16, %v18418_v38  ;;  %v7765_v12 = vsub.f32 1.0, %v7740_v51  ;;  %v7208_v42 = vmul.f32 %v18422_v56, %v18421_v49  ;;  %v7766_v35 = vsub.f32 1.0, %v7741_v40  ;;  %v18424_v52 = vld [vmem:[#allocation77_spill] sm:$0xff]  ;;  %v6318_v40 = vpop.f32.mrb[128].mxu0  ;;  %v18433_v56 = vld [vmem:[#allocation24_spill] sm:$0xff] }
 0x331   :  { %18420 = vst [vmem:[#allocation7_spill] sm:$0xff] %v16230_v57  ;;  %v6380_v50 = vadd.f32 %v16134_v28, %v988_v9  ;;  %v7209_v18 = vmul.f32 %v18424_v52, %v18423_v20  ;;  %v18425_v0 = vpack.c.bf16 %v18392_v25, %v18389_v21  ;;  %9800 = vmatmul.mubr.msk.bf16.gmra.mrb[168].mxu1 %vm18427_vm7, %v15870_v33  ;;  %v6535_v9 = vpop.f32.mrb[128].mxu1  ;;  %v18435_v52 = vld [vmem:[#allocation79_spill] sm:$0xff]  ;;  %vm18543_vm7 = vmmov %vm18382_vm0 }
 0x332   :  { %v6381_v4 = vadd.f32 %v6305_v39, %v989_v59  ;;  %v7233_v38 = vsub.f32 1.0, %v7208_v42  ;;  %v16247_v39 = vpack.c.bf16 %v7766_v35, %v7765_v12  ;;  %9803 = vmatprep.mubr.msk.bf16.mxu1 %vm17937_vm5, %v17760_v45  ;;  %v7742_v33 = vmul.f32 %v7692_v13, %v15684_v48  ;;  %v18434_v42 = vld [vmem:[#allocation93_spill] sm:$0xff] }
 0x333   :  { %v16250_v28 = vadd.f32 %v16136_v10, %v6380_v50  ;;  %v7234_v51 = vsub.f32 1.0, %v7209_v18  ;;  %v7743_v25 = vmul.f32 %v7693_v29, %v15689_v41  ;;  %v7694_v10 = vmul.f32 2.0, %v15712_v24  ;;  %v9651_v50 = vpop.f32.mrb[129].mxu0  ;;  %v18436_v18 = vld [vmem:[#allocation95_spill] sm:$0xff] }
 0x334   :  { %9746 = vmatmul.mubr.msk.bf16.gmra.mrb[168].mxu0 %vm18426_vm11, %v18425_v0  ;;  %18428 = vst [vmem:[#allocation59_spill] sm:$0xff] %v16247_v39  ;;  %v16253_v59 = vadd.f32 %v16154_v26, %v6381_v4  ;;  %v16259_v21 = vmul.f32 %v7692_v13, %v7233_v38  ;;  %v9705_v26 = vpop.f32.mrb[129].mxu1  ;;  %v990_v35 = vadd.f32 %v18434_v42, %v18433_v56  ;;  %v6321_v16 = vpop.f32.mrb[130].mxu0  ;;  %v18437_v39 = vld [vmem:[#allocation25_spill] sm:$0xff]  ;;  %v18438_v50 = vld [vmem:[#allocation15_spill] sm:$0xff]  ;;  %v18439_v42 = vld [vmem:[#allocation20_spill] sm:$0xff] }
 0x335   :  { %18429 = vst [vmem:[#allocation73_spill] sm:$0xff] %v16250_v28  ;;  %9749 = vmatprep.mubr.msk.bf16.mxu0 %vm17937_vm5, %v17760_v45  ;;  %v16264_v4 = vpack.c.bf16 %v7234_v51, %v7233_v38  ;;  %v16266_v12 = vmul.f32 %v7693_v29, %v7234_v51  ;;  %v991_v0 = vadd.f32 %v18436_v18, %v18435_v52  ;;  %v6538_v62 = vpop.f32.mrb[130].mxu1  ;;  %v7768_v13 = vsub.f32 1.0, %v7743_v25  ;;  %v9652_v38 = vpop.f32.mrb[131].mxu0  ;;  %v18440_v52 = vld [vmem:[#allocation22_spill] sm:$0xff]  ;;  %v18444_v29 = vld [vmem:[#allocation80_spill] sm:$0xff]  ;;  %vm18542_vm11 = vmmov %vm18382_vm0 }
 0x336   :  { %18430 = vst [vmem:[#allocation72_spill] sm:$0xff] %v16253_v59  ;;  %18431 = vst [vmem:[#allocation36_spill] sm:$0xff] %v16259_v21  ;;  %v7767_v59 = vsub.f32 1.0, %v7742_v33  ;;  %v7210_v26 = vmul.f32 %v18438_v50, %v18437_v39  ;;  %v9706_v17 = vpop.f32.mrb[131].mxu1  ;;  %v6382_v51 = vadd.f32 %v16195_v46, %v990_v35  ;;  %v7211_v18 = vmul.f32 %v18440_v52, %v18439_v42  ;;  %v18445_v21 = vld [vmem:[#allocation65_spill] sm:$0xff] }
 0x337   :  { %18432 = vst [vmem:[#allocation53_spill] sm:$0xff] %v16266_v12  ;;  %v6383_v56 = vadd.f32 %v6313_v53, %v991_v0  ;;  %v7695_v25 = vmul.f32 2.0, %v15723_v7  ;;  %v7744_v28 = vmul.f32 %v7694_v10, %v15712_v24  ;;  %v992_v46 = vadd.f32 %v18445_v21, %v18444_v29  ;;  %v18447_v0 = vld [vmem:[#allocation29_spill] sm:$0xff] }
 0x338   :  { %v16281_v57 = vpack.c.bf16 %v7768_v13, %v7767_v59  ;;  %v7235_v33 = vsub.f32 1.0, %v7210_v26  ;;  %v16286_v50 = vadd.f32 %v16197_v34, %v6382_v51  ;;  %v7236_v38 = vsub.f32 1.0, %v7211_v18  ;;  %v18448_v13 = vld [vmem:[#allocation71_spill] sm:$0xff]  ;;  %v6326_v51 = vpop.f32.mrb[132].mxu0 }
 0x339   :  { %v16288_v17 = vadd.f32 %v6530_v6, %v6383_v56  ;;  %v7745_v35 = vmul.f32 %v7695_v25, %v15723_v7  ;;  %v7769_v59 = vsub.f32 1.0, %v7744_v28  ;;  %v993_v26 = vadd.f32 %v18448_v13, %v18447_v0  ;;  %9804 = vmatmul.mubr.msk.bf16.gmra.mrb[172].mxu1 %vm18451_vm15, %v15876_v27  ;;  %v6543_v28 = vpop.f32.mrb[132].mxu1  ;;  %v18455_v56 = vld [vmem:[#allocation8_spill] sm:$0xff]  ;;  %v18456_v18 = vld [vmem:[#allocation31_spill] sm:$0xff]  ;;  %v18459_v13 = vld [vmem:[#allocation82_spill] sm:$0xff] }
 0x33a   :  { %18441 = vst [vmem:[#allocation87_spill] sm:$0xff] %v16281_v57  ;;  %18442 = vst [vmem:[#allocation37_spill] sm:$0xff] %v16286_v50  ;;  %v16292_v53 = vmul.f32 %v7694_v10, %v7235_v33  ;;  %v18449_v52 = vpack.c.bf16 %v18410_v3, %v18403_v30  ;;  %v16303_v34 = vpack.c.bf16 %v7236_v38, %v7235_v33  ;;  %v18454_v10 = vld [vmem:[#allocation23_spill] sm:$0xff]  ;;  %9807 = vmatprep.mubr.msk.bf16.mxu1 %vm17937_vm5, %v17760_v45 }
 0x33b   :  { %18443 = vst [vmem:[#allocation74_spill] sm:$0xff] %v16288_v17  ;;  %v16305_v6 = vmul.f32 %v7695_v25, %v7236_v38  ;;  %v6384_v21 = vadd.f32 %v6318_v40, %v992_v46  ;;  %v7696_v29 = vmul.f32 2.0, %v18454_v10  ;;  %v7770_v30 = vsub.f32 1.0, %v7745_v35  ;;  %v18457_v33 = vld [vmem:[#allocation19_spill] sm:$0xff]  ;;  %v9655_v38 = vpop.f32.mrb[133].mxu0  ;;  %v9709_v40 = vpop.f32.mrb[133].mxu1  ;;  %vm18548_vm15 = vmmov %vm18382_vm0 }
 0x33c   :  { %18446 = vst [vmem:[#allocation43_spill] sm:$0xff] %v16292_v53  ;;  %9750 = vmatmul.mubr.msk.bf16.gmra.mrb[172].mxu0 %vm18450_vm14, %v18449_v52  ;;  %18452 = vst [vmem:[#allocation75_spill] sm:$0xff] %v16303_v34  ;;  %v6385_v3 = vadd.f32 %v6321_v16, %v993_v26  ;;  %v7212_v25 = vmul.f32 %v18457_v33, %v18456_v18  ;;  %v18460_v52 = vld [vmem:[#allocation41_spill] sm:$0xff]  ;;  %v7697_v50 = vmul.f32 2.0, %v18455_v56  ;;  %v6329_v35 = vpop.f32.mrb[134].mxu0  ;;  %v6546_v16 = vpop.f32.mrb[134].mxu1 }
 0x33d   :  { %18453 = vst [vmem:[#allocation57_spill] sm:$0xff] %v16305_v6  ;;  %9753 = vmatprep.mubr.msk.bf16.mxu0 %vm17937_vm5, %v17760_v45  ;;  %v16318_v0 = vadd.f32 %v6535_v9, %v6384_v21  ;;  %v7213_v17 = vmul.f32 %v18460_v52, %v18459_v13  ;;  %v16323_v26 = vpack.c.bf16 %v7770_v30, %v7769_v59  ;;  %v9656_v38 = vpop.f32.mrb[135].mxu0  ;;  %v9710_v40 = vpop.f32.mrb[135].mxu1  ;;  %v18463_v21 = vld [vmem:[#allocation30_spill] sm:$0xff]  ;;  %v18464_v46 = vld [vmem:[#allocation96_spill] sm:$0xff]  ;;  %v18466_v53 = vld [vmem:[#allocation97_spill] sm:$0xff] }
 0x33e   :  { %v16325_v27 = vadd.f32 %v6538_v62, %v6385_v3  ;;  %v7237_v57 = vsub.f32 1.0, %v7212_v25  ;;  %v7746_v33 = vmul.f32 %v7696_v29, %v18454_v10  ;;  %v7747_v9 = vmul.f32 %v7697_v50, %v18455_v56  ;;  %v18465_v52 = vld [vmem:[#allocation60_spill] sm:$0xff]  ;;  %v18468_v30 = vld [vmem:[#allocation85_spill] sm:$0xff]  ;;  %vm18545_vm14 = vmmov %vm18382_vm0 }
 0x33f   :  { %18458 = vst [vmem:[#allocation90_spill] sm:$0xff] %v16318_v0  ;;  %18461 = vst [vmem:[#allocation56_spill] sm:$0xff] %v16323_v26  ;;  %v7238_v12 = vsub.f32 1.0, %v7213_v17  ;;  %v994_v0 = vadd.f32 %v18464_v46, %v18463_v21  ;;  %v995_v6 = vadd.f32 %v18466_v53, %v18465_v52  ;;  %v7214_v3 = vmul.f32 %v15780_v19, %v18468_v30  ;;  %v18470_v46 = vld [vmem:[#allocation70_spill] sm:$0xff]  ;;  %v18471_v21 = vld [vmem:[#allocation33_spill] sm:$0xff] }
 0x340   :  { %18462 = vst [vmem:[#allocation91_spill] sm:$0xff] %v16325_v27  ;;  %v16333_v34 = vmul.f32 %v7696_v29, %v7237_v57  ;;  %v7771_v59 = vsub.f32 1.0, %v7746_v33  ;;  %v7772_v38 = vsub.f32 1.0, %v7747_v9  ;;  %v7215_v26 = vmul.f32 %v18471_v21, %v18470_v46  ;;  %v18472_v29 = vld [vmem:[#allocation83_spill] sm:$0xff]  ;;  %v18473_v52 = vld [vmem:[#allocation45_spill] sm:$0xff] }
 0x341   :  { %v16339_v25 = vpack.c.bf16 %v7238_v12, %v7237_v57  ;;  %v16341_v17 = vmul.f32 %v7697_v50, %v7238_v12  ;;  %v6386_v40 = vadd.f32 %v6326_v51, %v994_v0  ;;  %v6387_v27 = vadd.f32 %v6329_v35, %v995_v6  ;;  %9808 = vmatmul.mubr.msk.bf16.gmra.mrb[176].mxu1 %vm18476_vm4, %v15890_v32  ;;  %v6334_v6 = vpop.f32.mrb[136].mxu0  ;;  %v6551_v51 = vpop.f32.mrb[136].mxu1  ;;  %vm18554_vm4 = vmmov %vm18382_vm0 }
 0x342   :  { %18467 = vst [vmem:[#allocation18_spill] sm:$0xff] %v16333_v34  ;;  %v7239_v53 = vsub.f32 1.0, %v7214_v3  ;;  %v996_v33 = vadd.f32 %v18473_v52, %v18472_v29  ;;  %v18474_v62 = vpack.c.bf16 %v18423_v20, %v18421_v49  ;;  %v16355_v57 = vpack.c.bf16 %v7772_v38, %v7771_v59  ;;  %9811 = vmatprep.mubr.msk.bf16.mxu1 %vm17937_vm5, %v17760_v45  ;;  %v9659_v35 = vpop.f32.mrb[137].mxu0  ;;  %v9713_v9 = vpop.f32.mrb[137].mxu1  ;;  %v18482_v3 = vld [vmem:[#allocation99_spill] sm:$0xff] }
 0x343   :  { %18469 = vst [vmem:[#allocation17_spill] sm:$0xff] %v16341_v17  ;;  %v16357_v12 = vadd.f32 %v6543_v28, %v6386_v40  ;;  %v7698_v50 = vmul.f32 2.0, %v15821_v8  ;;  %v16364_v20 = vadd.f32 %v6546_v16, %v6387_v27  ;;  %v7240_v32 = vsub.f32 1.0, %v7215_v26  ;;  %v6337_v40 = vpop.f32.mrb[138].mxu0  ;;  %v6554_v21 = vpop.f32.mrb[138].mxu1 }
 0x344   :  { %9754 = vmatmul.mubr.msk.bf16.gmra.mrb[176].mxu0 %vm18475_vm2, %v18474_v62  ;;  %18477 = vst [vmem:[#allocation32_spill] sm:$0xff] %v16355_v57  ;;  %v7699_v49 = vmul.f32 2.0, %v15826_v31  ;;  %v6388_v0 = vadd.f32 %v6334_v6, %v996_v33  ;;  %v18481_v62 = vld [vmem:[#allocation27_spill] sm:$0xff]  ;;  %v9660_v33 = vpop.f32.mrb[139].mxu0  ;;  %v9714_v6 = vpop.f32.mrb[139].mxu1  ;;  %v16383_v9 = vmul.f32 %v15932_v44, %v18318_v2  ;;  %vm18549_vm2 = vmmov %vm18382_vm0 }
 0x345   :  { %18478 = vst [vmem:[#allocation77_spill] sm:$0xff] %v16357_v12  ;;  %9757 = vmatprep.mubr.msk.bf16.mxu0 %vm17937_vm5, %v17760_v45  ;;  %18479 = vst [vmem:[#allocation24_spill] sm:$0xff] %v16364_v20  ;;  %v16367_v28 = vmul.f32 %v7698_v50, %v7239_v53  ;;  %v7748_v59 = vmul.f32 %v7698_v50, %v15821_v8  ;;  %v997_v38 = vadd.f32 %v18482_v3, %v18481_v62  ;;  %v18491_v33 = vld [vmem:[#allocation58_spill] sm:$0xff]  ;;  %v18492_v6 = vld [vmem:[#allocation9_spill] sm:$0xff] }
 0x346   :  { %v16374_v27 = vpack.c.bf16 %v7240_v32, %v7239_v53  ;;  %v16376_v16 = vmul.f32 %v7699_v49, %v7240_v32  ;;  %v7749_v26 = vmul.f32 %v7699_v49, %v15826_v31  ;;  %v16379_v52 = vadd.f32 %v6551_v51, %v6388_v0  ;;  %v18485_v49 = vld [vmem:[#allocation5_spill] sm:$0xff]  ;;  %v18486_v0 = vld [vmem:[#allocation102_spill] sm:$0xff]  ;;  %v18515_v12 = vld [vmem:[#allocation107_spill] sm:$0xff] }
 0x347   :  { %18480 = vst [vmem:[#allocation93_spill] sm:$0xff] %v16367_v28  ;;  %v7773_v35 = vsub.f32 1.0, %v7748_v59  ;;  %v6389_v50 = vadd.f32 %v6337_v40, %v997_v38  ;;  %v16387_v62 = vmul.f32 %v15940_v54, %v15801_v1  ;;  %v16393_v51 = vadd.f32 %v18485_v49, %v15830_v11  ;;  %v18488_v38 = vld [vmem:[#allocation13_spill] sm:$0xff]  ;;  %v18489_v40 = vld [vmem:[#allocation104_spill] sm:$0xff]  ;;  %v18494_v49 = vld [vmem:[#allocation54_spill] sm:$0xff] }
 0x348   :  { %18483 = vst [vmem:[#allocation79_spill] sm:$0xff] %v16376_v16  ;;  %18484 = vst [vmem:[#allocation95_spill] sm:$0xff] %v16379_v52  ;;  %v7774_v53 = vsub.f32 1.0, %v7749_v26  ;;  %v16397_v59 = vadd.f32 %v18486_v0, %v15848_v37  ;;  %v17697_v44 = vsub.f32 1.0, %v16383_v9  ;;  %v16404_v54 = vadd.f32 %v18489_v40, %v18488_v38  ;;  %v18493_v11 = vld [vmem:[#allocation100_spill] sm:$0xff]  ;;  %v18495_v37 = vld [vmem:[#allocation89_spill] sm:$0xff] }
 0x349   :  { %v16399_v3 = vadd.f32 %v6554_v21, %v6389_v50  ;;  %v16410_v32 = vadd.f32 %v18492_v6, %v18491_v33  ;;  %v16414_v19 = vadd.f32 %v18494_v49, %v18493_v11  ;;  %v18496_v0 = vld [vmem:[#allocation14_spill] sm:$0xff]  ;;  %v18497_v50 = vpack.c.bf16 %v18439_v42, %v18437_v39  ;;  %v18499_v38 = vld [vmem:[#allocation109_spill] sm:$0xff]  ;;  %v18501_v33 = vld [vmem:[#allocation63_spill] sm:$0xff] }
 0x34a   :  { %v16406_v26 = vpack.c.bf16 %v7774_v53, %v7773_v35  ;;  %v16418_v21 = vadd.f32 %v18496_v0, %v18495_v37  ;;  %9812 = vmatmul.mubr.msk.bf16.gmra.mrb[180].mxu1 %vm18500_vm9, %v18499_v38  ;;  %v17699_v35 = vsub.f32 1.0, %v16387_v62  ;;  %v7700_v53 = vmul.f32 2.0, %v16019_v60  ;;  %v18502_v6 = vld [vmem:[#allocation12_spill] sm:$0xff]  ;;  %v18503_v42 = vld [vmem:[#allocation69_spill] sm:$0xff]  ;;  %v18513_v28 = vld [vmem:[#allocation78_spill] sm:$0xff] }
 0x34b   :  { %18487 = vst [vmem:[#allocation25_spill] sm:$0xff] %v16399_v3  ;;  %v7701_v40 = vmul.f32 2.0, %v16048_v55  ;;  %v16431_v11 = vadd.f32 %v18502_v6, %v18501_v33  ;;  %9815 = vmatprep.mubr.msk.bf16.mxu1 %vm17937_vm5, %v17760_v45  ;;  %v16441_v49 = vadd.f32 %v18503_v42, %v16001_v47  ;;  %v18504_v37 = vld [vmem:[#allocation108_spill] sm:$0xff]  ;;  %v18507_v39 = vld [vmem:[#allocation81_spill] sm:$0xff]  ;;  %vm18560_vm9 = vmmov %vm18382_vm0 }
 0x34c   :  { %18490 = vst [vmem:[#allocation15_spill] sm:$0xff] %v16406_v26  ;;  %9758 = vmatmul.mubr.msk.bf16.gmra.mrb[180].mxu0 %vm18498_vm6, %v18497_v50  ;;  %v16445_v0 = vadd.f32 %v18504_v37, %v16035_v43  ;;  %v16449_v50 = vmul.f32 %v7700_v53, %v17697_v44  ;;  %v7750_v33 = vmul.f32 %v7700_v53, %v16019_v60  ;;  %v18508_v29 = vsub.f32 1.0, %v18507_v39  ;;  %v18509_v47 = vld [vmem:[#allocation16_spill] sm:$0xff]  ;;  %v18512_v37 = vld [vmem:[#allocation42_spill] sm:$0xff]  ;;  %v18516_v39 = vld [vmem:[#allocation21_spill] sm:$0xff] }
 0x34d   :  { %9761 = vmatprep.mubr.msk.bf16.mxu0 %vm17937_vm5, %v17760_v45  ;;  %v16453_v38 = vmul.f32 %v7701_v40, %v17699_v35  ;;  %v7751_v6 = vmul.f32 %v7701_v40, %v16048_v55  ;;  %v18510_v42 = vsub.f32 1.0, %v18509_v47  ;;  %v18511_v52 = vld [vmem:[#allocation40_spill] sm:$0xff]  ;;  %v7171_v26 = vmul.f32 2.0, %v18512_v37  ;;  %v18514_v44 = vld [vmem:[#allocation34_spill] sm:$0xff]  ;;  %vm18556_vm6 = vmmov %vm18382_vm0 }
 0x34e   :  { %18505 = vst [vmem:[#allocation20_spill] sm:$0xff] %v16449_v50  ;;  %v7170_v43 = vmul.f32 2.0, %v18511_v52  ;;  %v16465_v16 = vmul.f32 %v18514_v44, %v18513_v28  ;;  %v7775_v20 = vsub.f32 1.0, %v7750_v33  ;;  %v16471_v40 = vmul.f32 %v16022_v14, %v18515_v12 }
 0x34f   :  { %18506 = vst [vmem:[#allocation22_spill] sm:$0xff] %v16453_v38  ;;  %v6938_v3 = vpack.c.bf16 %v18510_v42, %v18508_v29  ;;  %v7776_v35 = vsub.f32 1.0, %v7751_v6  ;;  %v18517_v47 = vsub.f32 1.0, %v18516_v39  ;;  %v18518_v42 = vld [vmem:[#allocation76_spill] sm:$0xff]  ;;  %v18521_v44 = vpack.c.bf16 %v18459_v13, %v18456_v18 }
 0x350   :  { %v18519_v57 = vsub.f32 1.0, %v18518_v42  ;;  %v17703_v14 = vsub.f32 1.0, %v16465_v16  ;;  %v17704_v33 = vsub.f32 1.0, %v16471_v40  ;;  %v7702_v6 = vmul.f32 2.0, %v16081_v58  ;;  %v18526_v42 = vld [vmem:[#allocation26_spill] sm:$0xff] }
 0x351   :  { %v16475_v29 = vmul.f32 %v7170_v43, %v18517_v47  ;;  %v16481_v17 = vpack.c.bf16 %v7776_v35, %v7775_v20  ;;  %v7703_v39 = vmul.f32 2.0, %v16097_v22  ;;  %v18524_v35 = vld [vmem:[#allocation28_spill] sm:$0xff] }
 0x352   :  { %v16479_v34 = vmul.f32 %v7171_v26, %v18519_v57  ;;  %9816 = vmatmul.mubr.msk.bf16.gmra.mrb[184].mxu1 %vm18523_vm13, %v6938_v3  ;;  %v16500_v13 = vmul.f32 %v7702_v6, %v17703_v14  ;;  %v7752_v20 = vmul.f32 %v7702_v6, %v16081_v58  ;;  %v18525_v47 = vsub.f32 1.0, %v18524_v35  ;;  %vm18565_vm13 = vmmov %vm18382_vm0 }
 0x353   :  { %18520 = vst [vmem:[#allocation80_spill] sm:$0xff] %v16481_v17  ;;  %9819 = vmatprep.mubr.msk.bf16.mxu1 %vm17937_vm5, %v17760_v45  ;;  %v16504_v57 = vmul.f32 %v7703_v39, %v17704_v33  ;;  %v7753_v3 = vmul.f32 %v7703_v39, %v16097_v22  ;;  %v16513_v17 = vmul.f32 %v7170_v43, %v18511_v52 }
 0x354   :  { %9762 = vmatmul.mubr.msk.bf16.gmra.mrb[184].mxu0 %vm18522_vm3, %v18521_v44  ;;  %v18527_v44 = vsub.f32 1.0, %v18526_v42  ;;  %v7777_v18 = vsub.f32 1.0, %v7752_v20  ;;  %v16518_v33 = vmul.f32 %v7171_v26, %v18512_v37  ;;  %v18529_v6 = vpack.c.bf16 %v18470_v46, %v18468_v30  ;;  %vm18561_vm3 = vmmov %vm18382_vm0 }
 0x355   :  { %9765 = vmatprep.mubr.msk.bf16.mxu0 %vm17937_vm5, %v17760_v45  ;;  %v7778_v50 = vsub.f32 1.0, %v7753_v3  ;;  %v17706_v43 = vsub.f32 1.0, %v16513_v17  ;;  %v7704_v20 = vmul.f32 2.0, %v16475_v29  ;;  %v7705_v3 = vmul.f32 2.0, %v16479_v34 }
 0x356   :  { %v6939_v53 = vpack.c.bf16 %v18527_v44, %v18525_v47  ;;  %v17707_v39 = vsub.f32 1.0, %v16518_v33  ;;  %v18534_v47 = vld [vmem:[#allocation111_spill] sm:$0xff] }
 0x357   :  { %v16520_v38 = vpack.c.bf16 %v7778_v50, %v7777_v18  ;;  %v16537_v30 = vmul.f32 %v7704_v20, %v17706_v43  ;;  %v7754_v26 = vmul.f32 %v7704_v20, %v16475_v29  ;;  %v7755_v50 = vmul.f32 %v7705_v3, %v16479_v34  ;;  %v18532_v18 = vld [vmem:[#allocation110_spill] sm:$0xff] }
 0x358   :  { %v16541_v46 = vmul.f32 %v7705_v3, %v17707_v39  ;;  %v18533_v35 = vsub.f32 1.0, %v18532_v18  ;;  %v18535_v42 = vsub.f32 1.0, %v18534_v47 }
 0x359   :  { %18528 = vst [vmem:[#allocation65_spill] sm:$0xff] %v16520_v38  ;;  %v7780_v14 = vsub.f32 1.0, %v7755_v50  ;;  %v18538_v50 = vld [vmem:[#allocation92_spill] sm:$0xff] }
 0x35a   :  { %9820 = vmatmul.mubr.msk.bf16.gmra.mrb[188].mxu1 %vm18531_vm12, %v6939_v53  ;;  %v6723_v53 = vpack.c.bf16 %v15801_v1, %v18318_v2  ;;  %v6940_v44 = vpack.c.bf16 %v18535_v42, %v18533_v35  ;;  %v6342_v1 = vpop.f32.mrb[140].mxu0  ;;  %v6559_v2 = vpop.f32.mrb[140].mxu1  ;;  %v18539_v18 = vsub.f32 1.0, %v18538_v50  ;;  %v18557_v50 = vld [vmem:[#allocation103_spill] sm:$0xff]  ;;  %vm18568_vm12 = vmmov %vm18382_vm0 }
 0x35b   :  { %9823 = vmatprep.mubr.msk.bf16.mxu1 %vm17937_vm5, %v17760_v45  ;;  %v6390_v20 = vadd.f32 %v6342_v1, %v16393_v51  ;;  %v9663_v3 = vpop.f32.mrb[141].mxu0 }
 0x35c   :  { %9766 = vmatmul.mubr.msk.bf16.gmra.mrb[188].mxu0 %vm18530_vm10, %v18529_v6  ;;  %v7779_v6 = vsub.f32 1.0, %v7754_v26  ;;  %v9717_v26 = vpop.f32.mrb[141].mxu1  ;;  %v6345_v47 = vpop.f32.mrb[142].mxu0  ;;  %v18552_v3 = vld [vmem:[#allocation39_spill] sm:$0xff]  ;;  %vm18566_vm10 = vmmov %vm18382_vm0 }
 0x35d   :  { %9769 = vmatprep.mubr.msk.bf16.mxu0 %vm17937_vm5, %v17760_v45  ;;  %v6562_v42 = vpop.f32.mrb[142].mxu1  ;;  %v9664_v43 = vpop.f32.mrb[143].mxu0 }
 0x35e   :  { %v16553_v38 = vpack.c.bf16 %v7780_v14, %v7779_v6  ;;  %v6724_v14 = vpack.c.bf16 %v18515_v12, %v18513_v28  ;;  %v6391_v6 = vadd.f32 %v6345_v47, %v16397_v59  ;;  %v9718_v39 = vpop.f32.mrb[143].mxu1  ;;  %v18544_v12 = vld [vmem:[#allocation88_spill] sm:$0xff]  ;;  %v18547_v59 = vld [vmem:[#allocation62_spill] sm:$0xff] }
 0x35f   :  { %v18546_v28 = vld [vmem:[#allocation112_spill] sm:$0xff]  ;;  %v6943_v43 = vpack.c.bf16 %v18547_v59, %v18547_v59  ;;  %v18550_v39 = vld [vmem:[#allocation2_spill] sm:$0xff] }
 0x360   :  { %18536 = vst [vmem:[#allocation29_spill] sm:$0xff] %v16553_v38  ;;  %v16571_v38 = vadd.f32 %v6562_v42, %v6391_v6  ;;  %v6726_v51 = vpack.c.bf16 %v18546_v28, %v18546_v28  ;;  %v18563_v47 = vld [vmem:[#allocation52_spill] sm:$0xff] }
 0x362   :  { %9824 = vmatmul.mubr.msk.bf16.gmra.mrb[192].mxu1 %vm18537_vm1, %v6940_v44  ;;  %v16568_v44 = vadd.f32 %v6559_v2, %v6390_v20  ;;  %v18551_v20 = vld [vmem:[#allocation67_spill] sm:$0xff]  ;;  %vm18573_vm1 = vmmov %vm18382_vm0 }
 0x363   :  { %9827 = vmatprep.mubr.msk.bf16.mxu1 %vm17937_vm5, %v17760_v45  ;;  %v18553_v26 = vpack.c.bf16 %v18551_v20, %v18552_v3  ;;  %v18580_v20 = vld [vmem:[#allocation75_spill] sm:$0xff] }
 0x364   :  { %9770 = vmatmul.mubr.msk.bf16.gmra.mrb[192].mxu0 %vm18382_vm0, %v6723_v53  ;;  %v18540_v53 = vsub.f32 1.0, %v15988_v5  ;;  %v6725_v5 = vpack.c.bf16 %v18512_v37, %v18511_v52  ;;  %v7795_v52 = vld [vmem:[%s17375_s14] sm:$0x3] }
 0x365   :  { %9773 = vmatprep.mubr.msk.bf16.mxu0 %vm17937_vm5, %v17760_v45  ;;  %v8012_v37 = vld [vmem:[%s17376_s15] sm:$0x3]  ;;  %v7836_v1 = vand.u32 %v7795_v52, %v18550_v39 }
 0x366   :  { %v6941_v35 = vpack.c.bf16 %v18540_v53, %v18539_v18  ;;  %v8053_v2 = vand.u32 %v8012_v37, %v18550_v39  ;;  %v18558_v18 = vld [vmem:[#allocation101_spill] sm:$0xff] }
 0x367   :  { %v18559_v53 = vpack.c.bf16 %v18557_v50, %v18558_v18 }
 0x36a   :  { %9828 = vmatmul.mubr.msk.bf16.gmra.mrb[196].mxu1 %vm18542_vm11, %v6941_v35  ;;  %v18562_v35 = vld [vmem:[#allocation68_spill] sm:$0xff]  ;;  %vm18576_vm11 = vmmov %vm18382_vm0 }
 0x36b   :  { %9831 = vmatprep.mubr.msk.bf16.mxu1 %vm17937_vm5, %v17760_v45  ;;  %v18564_v42 = vpack.c.bf16 %v18562_v35, %v18563_v47  ;;  %v18600_v35 = vpack.c.bf16 %v16479_v34, %v16475_v29 }
 0x36c   :  { %9774 = vmatmul.mubr.msk.bf16.gmra.mrb[196].mxu0 %vm18541_vm8, %v6724_v14  ;;  %v18555_v14 = vld [vmem:[#allocation66_spill] sm:$0xff]  ;;  %vm18574_vm8 = vmmov %vm18382_vm0 }
 0x36d   :  { %9777 = vmatprep.mubr.msk.bf16.mxu0 %vm17937_vm5, %v17760_v45 }
 0x372   :  { %9832 = vmatmul.mubr.msk.bf16.gmra.mrb[200].mxu1 %vm18545_vm14, %v18544_v12  ;;  %v18569_v12 = vld [vmem:[#allocation46_spill] sm:$0xff]  ;;  %vm18579_vm14 = vmmov %vm18382_vm0 }
 0x373   :  { %9835 = vmatprep.mubr.msk.bf16.mxu1 %vm17937_vm5, %v17760_v45 }
 0x374   :  { %9778 = vmatmul.mubr.msk.bf16.gmra.mrb[200].mxu0 %vm18543_vm7, %v6725_v5  ;;  %v18567_v5 = vpack.c.bf16 %v15570_v61, %v15547_v63  ;;  %vm18577_vm7 = vmmov %vm18382_vm0 }
 0x375   :  { %9781 = vmatprep.mubr.msk.bf16.mxu0 %vm17937_vm5, %v17760_v45 }
 0x37a   :  { %9836 = vmatmul.mubr.msk.bf16.gmra.mrb[204].mxu1 %vm18549_vm2, %v6943_v43  ;;  %vm18583_vm2 = vmmov %vm18382_vm0 }
 0x37b   :  { %9895 = vmatprep.mubr.msk.bf16.mxu1 %vm17937_vm5, %v17760_v45 }
 0x37c   :  { %9782 = vmatmul.mubr.msk.bf16.gmra.mrb[204].mxu0 %vm18548_vm15, %v6726_v51  ;;  %vm18581_vm15 = vmmov %vm18382_vm0 }
 0x37d   :  { %9841 = vmatprep.mubr.msk.bf16.mxu0 %vm17937_vm5, %v17760_v45 }
 0x382   :  { %9896 = vmatmul.mubr.msk.bf16.vlgmr.msra.gmra.mrb[208].mxu1 %vm18556_vm6, %v18555_v14  ;;  %vm18586_vm6 = vmmov %vm18382_vm0  ;;  %v18593_v14 = vsub.f32 1.0, %v16465_v16  ;;  %v18598_v16 = vsub.f32 1.0, %v16513_v17  ;;  %v18603_v17 = vld [vmem:[#allocation113_spill] sm:$0xff] }
 0x383   :  { %10002 = vmatpush3.bf16.msra.mxu1 %v8053_v2  ;;  %9899 = vmatprep.mubr.msk.bf16.mxu1 %vm17937_vm5, %v17760_v45 }
 0x384   :  { %9842 = vmatmul.mubr.msk.bf16.vlgmr.msra.gmra.mrb[208].mxu0 %vm18554_vm4, %v18553_v26  ;;  %10115 = vmatprep.subr.bf16.mxu1 %v17760_v45  ;;  %vm18584_vm4 = vmmov %vm18382_vm0 }
 0x385   :  { %9948 = vmatpush3.bf16.msra.mxu0 %v7836_v1  ;;  %9845 = vmatprep.mubr.msk.bf16.mxu0 %vm17937_vm5, %v17760_v45  ;;  %v18570_v1 = vld [vmem:[#allocation106_spill] sm:$0xff] }
 0x386   :  { %10055 = vmatprep.subr.bf16.mxu0 %v17760_v45 }
 0x38a   :  { %9900 = vmatmul.mubr.msk.bf16.gmra.mrb[212].mxu1 %vm18561_vm3, %v16102_v23  ;;  %vm18591_vm3 = vmmov %vm18382_vm0 }
 0x38b   :  { %9903 = vmatprep.mubr.msk.bf16.mxu1 %vm17937_vm5, %v17760_v45 }
 0x38c   :  { %9846 = vmatmul.mubr.msk.bf16.gmra.mrb[212].mxu0 %vm18560_vm9, %v18559_v53  ;;  %vm18587_vm9 = vmmov %vm18382_vm0  ;;  %v18595_v53 = vpack.c.bf16 %v16097_v22, %v16081_v58  ;;  %v18602_v58 = vld [vmem:[#allocation11_spill] sm:$0xff] }
 0x38d   :  { %9849 = vmatprep.mubr.msk.bf16.mxu0 %vm17937_vm5, %v17760_v45  ;;  %v6350_v23 = vpop.f32.mrb[144].mxu0  ;;  %v7260_v22 = vpack.c.bf16 %v18602_v58, %v18602_v58 }
 0x38e   :  { %v6567_v6 = vpop.f32.mrb[144].mxu1  ;;  %v6392_v28 = vadd.f32 %v6350_v23, %v16404_v54  ;;  %v9667_v51 = vpop.f32.mrb[145].mxu0  ;;  %v18571_v54 = vld [vmem:[#allocation105_spill] sm:$0xff] }
 0x38f   :  { %v6353_v59 = vpop.f32.mrb[146].mxu0  ;;  %v18572_v2 = vpack.c.bf16 %v18570_v1, %v18571_v54 }
 0x390   :  { %v16649_v52 = vadd.f32 %v6567_v6, %v6392_v28  ;;  %v6393_v63 = vadd.f32 %v6353_v59, %v16410_v32  ;;  %v9668_v61 = vpop.f32.mrb[147].mxu0  ;;  %v18575_v32 = vpack.c.bf16 %v15689_v41, %v15684_v48  ;;  %v18582_v41 = vpack.c.bf16 %v18455_v56, %v18454_v10  ;;  %v18606_v59 = vld [vmem:[#allocation98_spill] sm:$0xff] }
 0x391   :  { %v18585_v48 = vpack.c.bf16 %v15826_v31, %v15821_v8  ;;  %v18590_v31 = vpack.c.bf16 %v16048_v55, %v16019_v60  ;;  %v18610_v61 = vld [vmem:[#allocation115_spill] sm:$0xff] }
 0x392   :  { %9904 = vmatmul.mubr.msk.bf16.gmra.mrb[216].mxu1 %vm18566_vm10, %v16147_v15  ;;  %v9721_v15 = vpop.f32.mrb[145].mxu1  ;;  %vm18596_vm10 = vmmov %vm18382_vm0 }
 0x393   :  { %9907 = vmatprep.mubr.msk.bf16.mxu1 %vm17937_vm5, %v17760_v45  ;;  %v6570_v43 = vpop.f32.mrb[146].mxu1  ;;  %v10286_v15 = vld [vmem:[%s17377_s17] sm:$0xff]  }
 0x394   :  { %9850 = vmatmul.mubr.msk.bf16.gmra.mrb[216].mxu0 %vm18565_vm13, %v18564_v42  ;;  %v9722_v37 = vpop.f32.mrb[147].mxu1  ;;  %v16652_v39 = vadd.f32 %v6570_v43, %v6393_v63  ;;  %vm18592_vm13 = vmmov %vm18382_vm0  ;;  %v18607_v43 = vld [vmem:[#allocation94_spill] sm:$0xff] }
 0x395   :  { %9853 = vmatprep.mubr.msk.bf16.mxu0 %vm17937_vm5, %v17760_v45  ;;  %v18608_v63 = vpack.c.bf16 %v18606_v59, %v18607_v43  ;;  %v10287_v59 = vld [vmem:[%s17377_s17 + $0x8] sm:$0xff]  }
 0x39a   :  { %9908 = vmatmul.mubr.msk.bf16.gmra.mrb[220].mxu1 %vm18382_vm0, %v18569_v12 }
 0x39b   :  { %9911 = vmatprep.mubr.msk.bf16.mxu1 %vm17937_vm5, %v17760_v45 }
 0x39c   :  { %9854 = vmatmul.mubr.msk.bf16.gmra.mrb[220].mxu0 %vm18568_vm12, %v18567_v5  ;;  %vm18597_vm12 = vmmov %vm18382_vm0 }
 0x39d   :  { %9857 = vmatprep.mubr.msk.bf16.mxu0 %vm17937_vm5, %v17760_v45 }
 0x3a2   :  { %9912 = vmatmul.mubr.msk.bf16.gmra.mrb[224].mxu1 %vm18574_vm8, %v16228_v36  ;;  %v18578_v36 = vpack.c.bf16 %v15723_v7, %v15712_v24  ;;  %v18588_v24 = vsub.f32 1.0, %v16383_v9  ;;  %v18589_v7 = vsub.f32 1.0, %v16387_v62  ;;  %vm18604_vm8 = vmmov %vm18382_vm0 }
 0x3a3   :  { %9915 = vmatprep.mubr.msk.bf16.mxu1 %vm17937_vm5, %v17760_v45 }
 0x3a4   :  { %9858 = vmatmul.mubr.msk.bf16.gmra.mrb[224].mxu0 %vm18573_vm1, %v18572_v2  ;;  %vm18601_vm1 = vmmov %vm18382_vm0 }
 0x3a5   :  { %9861 = vmatprep.mubr.msk.bf16.mxu0 %vm17937_vm5, %v17760_v45 }
 0x3aa   :  { %9916 = vmatmul.mubr.msk.bf16.gmra.mrb[228].mxu1 %vm18577_vm7, %v16264_v4  ;;  %v7474_v4 = vpack.c.bf16 %v18589_v7, %v18588_v24  ;;  %vm18609_vm7 = vmmov %vm18382_vm0 }
 0x3ab   :  { %9919 = vmatprep.mubr.msk.bf16.mxu1 %vm17937_vm5, %v17760_v45 }
 0x3ac   :  { %9862 = vmatmul.mubr.msk.bf16.gmra.mrb[228].mxu0 %vm18576_vm11, %v18575_v32  ;;  %vm18605_vm11 = vmmov %vm18382_vm0 }
 0x3ad   :  { %9865 = vmatprep.mubr.msk.bf16.mxu0 %vm17937_vm5, %v17760_v45 }
 0x3b2   :  { %9920 = vmatmul.mubr.msk.bf16.gmra.mrb[232].mxu1 %vm18581_vm15, %v18580_v20  ;;  %vm18615_vm15 = vmmov %vm18382_vm0 }
 0x3b3   :  { %9923 = vmatprep.mubr.msk.bf16.mxu1 %vm17937_vm5, %v17760_v45 }
 0x3b4   :  { %9866 = vmatmul.mubr.msk.bf16.gmra.mrb[232].mxu0 %vm18579_vm14, %v18578_v36  ;;  %vm18611_vm14 = vmmov %vm18382_vm0 }
 0x3b5   :  { %9869 = vmatprep.mubr.msk.bf16.mxu0 %vm17937_vm5, %v17760_v45 }
 0x3ba   :  { %9924 = vmatmul.mubr.msk.bf16.gmra.mrb[236].mxu1 %vm18584_vm4, %v16339_v25  ;;  %vm18623_vm4 = vmmov %vm18382_vm0 }
 0x3bb   :  { %9927 = vmatprep.mubr.msk.bf16.mxu1 %vm17937_vm5, %v17760_v45 }
 0x3bc   :  { %9870 = vmatmul.mubr.msk.bf16.gmra.mrb[236].mxu0 %vm18583_vm2, %v18582_v41  ;;  %vm18617_vm2 = vmmov %vm18382_vm0 }
 0x3bd   :  { %9873 = vmatprep.mubr.msk.bf16.mxu0 %vm17937_vm5, %v17760_v45 }
 0x3c1   :  { %v6358_v10 = vpop.f32.mrb[148].mxu0  ;;  %v6575_v56 = vpop.f32.mrb[148].mxu1 }
 0x3c2   :  { %9928 = vmatmul.mubr.msk.bf16.gmra.mrb[240].mxu1 %vm18587_vm9, %v16374_v27  ;;  %v6394_v8 = vadd.f32 %v6358_v10, %v16414_v19  ;;  %v9671_v25 = vpop.f32.mrb[149].mxu0  ;;  %v9725_v27 = vpop.f32.mrb[149].mxu1  ;;  %v18594_v19 = vsub.f32 1.0, %v16471_v40  ;;  %v18613_v10 = vld [vmem:[#allocation44_spill] sm:$0xff]  ;;  %vm18631_vm9 = vmmov %vm18382_vm0 }
 0x3c3   :  { %9931 = vmatprep.mubr.msk.bf16.mxu1 %vm17937_vm5, %v17760_v45  ;;  %v6361_v9 = vpop.f32.mrb[150].mxu0  ;;  %v6578_v62 = vpop.f32.mrb[150].mxu1 }
 0x3c4   :  { %9874 = vmatmul.mubr.msk.bf16.gmra.mrb[240].mxu0 %vm18586_vm6, %v18585_v48  ;;  %v16718_v3 = vadd.f32 %v6575_v56, %v6394_v8  ;;  %v6395_v60 = vadd.f32 %v6361_v9, %v16418_v21  ;;  %v9672_v55 = vpop.f32.mrb[151].mxu0  ;;  %v9726_v26 = vpop.f32.mrb[151].mxu1  ;;  %v7475_v50 = vpack.c.bf16 %v18594_v19, %v18593_v14  ;;  %v18599_v21 = vsub.f32 1.0, %v16518_v33  ;;  %v18618_v8 = vld [vmem:[#allocation4_spill] sm:$0xff]  ;;  %vm18625_vm6 = vmmov %vm18382_vm0 }
 0x3c5   :  { %9877 = vmatprep.mubr.msk.bf16.mxu0 %vm17937_vm5, %v17760_v45  ;;  %v7477_v33 = vpack.c.bf16 %v18603_v17, %v18603_v17  ;;  %v18619_v26 = vld [vmem:[#allocation6_spill] sm:$0xff] }
 0x3c6   :  { %v16725_v18 = vadd.f32 %v6578_v62, %v6395_v60  ;;  %v7476_v40 = vpack.c.bf16 %v18599_v21, %v18598_v16  ;;  %v18620_v16 = vld [vmem:[#allocation47_spill] sm:$0xff]  ;;  %v18621_v21 = vld [vmem:[#allocation84_spill] sm:$0xff] }
 0x3ca   :  { %9932 = vmatmul.mubr.msk.bf16.gmra.mrb[244].mxu1 %vm18592_vm13, %v7474_v4  ;;  %v18612_v4 = vld [vmem:[#allocation38_spill] sm:$0xff]  ;;  %vm18639_vm13 = vmmov %vm18382_vm0 }
 0x3cb   :  { %9935 = vmatprep.mubr.msk.bf16.mxu1 %vm17937_vm5, %v17760_v45  ;;  %v18614_v56 = vpack.c.bf16 %v18612_v4, %v18613_v10  ;;  %v18635_v10 = vld [vmem:[#allocation64_spill] sm:$0xff] }
 0x3cc   :  { %9878 = vmatmul.mubr.msk.bf16.gmra.mrb[244].mxu0 %vm18591_vm3, %v18590_v31  ;;  %v18616_v31 = vld [vmem:[#allocation61_spill] sm:$0xff]  ;;  %vm18633_vm3 = vmmov %vm18382_vm0 }
 0x3cd   :  { %9881 = vmatprep.mubr.msk.bf16.mxu0 %vm17937_vm5, %v17760_v45 }
 0x3d2   :  { %9936 = vmatmul.mubr.msk.bf16.gmra.mrb[248].mxu1 %vm18597_vm12, %v7475_v50  ;;  %vm18647_vm12 = vmmov %vm18382_vm0 }
 0x3d3   :  { %9939 = vmatprep.mubr.msk.bf16.mxu1 %vm17937_vm5, %v17760_v45 }
 0x3d4   :  { %9882 = vmatmul.mubr.msk.bf16.gmra.mrb[248].mxu0 %vm18596_vm10, %v18595_v53  ;;  %vm18641_vm10 = vmmov %vm18382_vm0 }
 0x3d5   :  { %9885 = vmatprep.mubr.msk.bf16.mxu0 %vm17937_vm5, %v17760_v45 }
 0x3da   :  { %9940 = vmatmul.mubr.msk.bf16.gmra.mrb[252].mxu1 %vm18601_vm1, %v7476_v40  ;;  %v18622_v40 = vpack.c.bf16 %v18620_v16, %v18621_v21  ;;  %vm18654_vm1 = vmmov %vm18382_vm0 }
 0x3db   :  { %9943 = vmatprep.mubr.msk.bf16.mxu1 %vm17937_vm5, %v17760_v45 }
 0x3dc   :  { %9886 = vmatmul.mubr.msk.bf16.gmra.mrb[252].mxu0 %vm18382_vm0, %v18600_v35  ;;  %v18624_v35 = vld [vmem:[#allocation50_spill] sm:$0xff] }
 0x3dd   :  { %9889 = vmatprep.mubr.msk.bf16.mxu0 %vm17937_vm5, %v17760_v45 }
 0x3e2   :  { %9944 = vmatmul.mubr.msk.bf16.gmra.mrb[0].mxu1 %vm18605_vm11, %v7477_v33  ;;  %v18626_v33 = vld [vmem:[#allocation86_spill] sm:$0xff]  ;;  %vm18662_vm11 = vmmov %vm18382_vm0 }
 0x3e3   :  { %10003 = vmatprep.mubr.msk.bf16.mxu1 %vm17937_vm5, %v17760_v45  ;;  %v6366_v34 = vpop.f32.mrb[152].mxu0 }
 0x3e4   :  { %9890 = vmatmul.mubr.msk.bf16.gmra.mrb[0].mxu0 %vm18604_vm8, %v7260_v22  ;;  %v6583_v29 = vpop.f32.mrb[152].mxu1  ;;  %v6396_v47 = vadd.f32 %v6366_v34, %v16431_v11  ;;  %v9675_v42 = vpop.f32.mrb[153].mxu0  ;;  %vm18656_vm8 = vmmov %vm18382_vm0 }
 0x3e5   :  { %9949 = vmatprep.mubr.msk.bf16.mxu0 %vm17937_vm5, %v17760_v45  ;;  %v9729_v23 = vpop.f32.mrb[153].mxu1  ;;  %v6369_v6 = vpop.f32.mrb[154].mxu0 }
 0x3e6   :  { %v6586_v5 = vpop.f32.mrb[154].mxu1  ;;  %v16760_v12 = vadd.f32 %v6583_v29, %v6396_v47  ;;  %v9676_v28 = vpop.f32.mrb[155].mxu0 }
 0x3e7   :  { %v9730_v51 = vpop.f32.mrb[155].mxu1  ;;  %v18627_v5 = vld [vmem:[#allocation51_spill] sm:$0xff] }
 0x3ea   :  { %10004 = vmatmul.mubr.msk.bf16.vlgmr.msra.gmra.mrb[4].mxu1 %vm18611_vm14, %v18610_v61  ;;  %v18629_v61 = vld [vmem:[#allocation55_spill] sm:$0xff]  ;;  %vm18670_vm14 = vmmov %vm18382_vm0 }
 0x3eb   :  { %10007 = vmatprep.mubr.msk.bf16.mxu1 %vm17937_vm5, %v17760_v45 }
 0x3ec   :  { %9950 = vmatmul.mubr.msk.bf16.vlgmr.msra.gmra.mrb[4].mxu0 %vm18609_vm7, %v18608_v63  ;;  %v7021_v37 = vpop.f32.mrb[156].mxu1  ;;  %v18628_v63 = vld [vmem:[#allocation49_spill] sm:$0xff]  ;;  %vm18664_vm7 = vmmov %vm18382_vm0 }
 0x3ed   :  { %9953 = vmatprep.mubr.msk.bf16.mxu0 %vm17937_vm5, %v17760_v45  ;;  %10056 = vmatpush3.bf16.msra.mxu0 %v10286_v15  ;;  %v6804_v11 = vpop.f32.mrb[156].mxu0  ;;  %v9789_v2 = vpop.f32.mrb[157].mxu1 }
 0x3ee   :  { %10057 = vmatprep.subr.bf16.mxu0 %v17760_v45  ;;  %v6906_v1 = vadd.f32 %v6804_v11, %v16441_v49  ;;  %v9735_v54 = vpop.f32.mrb[157].mxu0  ;;  %v7024_v36 = vpop.f32.mrb[158].mxu1  ;;  %v18630_v11 = vpack.c.bf16 %v18628_v63, %v18629_v61  ;;  %v18634_v2 = vld [vmem:[#allocation48_spill] sm:$0xff] }
 0x3ef   :  { %v6807_v32 = vpop.f32.mrb[158].mxu0  ;;  %v9790_v24 = vpop.f32.mrb[159].mxu1 }
 0x3f0   :  { %v16777_v20 = vadd.f32 %v7021_v37, %v6906_v1  ;;  %v6907_v41 = vadd.f32 %v6807_v32, %v16445_v0  ;;  %v9736_v48 = vpop.f32.mrb[159].mxu0  ;;  %v18632_v37 = vld [vmem:[#allocation35_spill] sm:$0xff] }
 0x3f1   :  { %10058 = vmatpush3.bf16.msra.mxu0 %v10287_v59 }
 0x3f2   :  { %v16780_v7 = vadd.f32 %v7024_v36, %v6907_v41  ;;  %10008 = vmatmul.mubr.msk.bf16.gmra.mrb[8].mxu1 %vm18617_vm2, %v18616_v31  ;;  %10059 = vmatprep.subr.bf16.mxu0 %v17760_v45  ;;  %vm18678_vm2 = vmmov %vm18382_vm0 }
 0x3f3   :  { %10011 = vmatprep.mubr.msk.bf16.mxu1 %vm17937_vm5, %v17760_v45 }
 0x3f4   :  { %9954 = vmatmul.mubr.msk.bf16.gmra.mrb[8].mxu0 %vm18615_vm15, %v18614_v56  ;;  %v7029_v0 = vpop.f32.mrb[160].mxu1  ;;  %vm18672_vm15 = vmmov %vm18382_vm0 }
 0x3f5   :  { %9957 = vmatprep.mubr.msk.bf16.mxu0 %vm17937_vm5, %v17760_v45  ;;  %v9793_v9 = vpop.f32.mrb[161].mxu1 }
 0x3f6   :  { %v7032_v60 = vpop.f32.mrb[162].mxu1  ;;  %v18640_v9 = vld [vmem:[#allocation59_spill] sm:$0xff] }
 0x3f7   :  { %v6812_v49 = vpop.f32.mrb[160].mxu0  ;;  %v9794_v50 = vpop.f32.mrb[163].mxu1 }
 0x3f8   :  { %v6908_v25 = vadd.f32 %v6812_v49, %v18618_v8  ;;  %v9739_v27 = vpop.f32.mrb[161].mxu0  ;;  %v18636_v8 = vld [vmem:[#allocation7_spill] sm:$0xff] }
 0x3f9   :  { %v6815_v62 = vpop.f32.mrb[162].mxu0 }
 0x3fa   :  { %v16793_v55 = vadd.f32 %v7029_v0, %v6908_v25  ;;  %v6909_v14 = vadd.f32 %v6815_v62, %v18619_v26  ;;  %v9740_v19 = vpop.f32.mrb[163].mxu0  ;;  %10012 = vmatmul.mubr.msk.bf16.gmra.mrb[12].mxu1 %vm18625_vm6, %v18624_v35  ;;  %v18637_v25 = vld [vmem:[#allocation10_spill] sm:$0xff]  ;;  %v18642_v26 = vld [vmem:[#allocation73_spill] sm:$0xff]  ;;  %v18643_v35 = vld [vmem:[#allocation72_spill] sm:$0xff] }
 0x3fb   :  { %10015 = vmatprep.mubr.msk.bf16.mxu1 %vm17937_vm5, %v17760_v45  ;;  %v18638_v27 = vpack.c.bf16 %v18636_v8, %v18637_v25  ;;  %v18657_v8 = vld [vmem:[#allocation90_spill] sm:$0xff]  ;;  %vm18682_vm6 = vmmov %vm18382_vm0 }
 0x3fc   :  { %v16796_v53 = vadd.f32 %v7032_v60, %v6909_v14  ;;  %9958 = vmatmul.mubr.msk.bf16.gmra.mrb[12].mxu0 %vm18623_vm4, %v18622_v40  ;;  %v7037_v17 = vpop.f32.mrb[164].mxu1  ;;  %vm18680_vm4 = vmmov %vm18382_vm0 }
 0x3fd   :  { %9961 = vmatprep.mubr.msk.bf16.mxu0 %vm17937_vm5, %v17760_v45  ;;  %v9797_v47 = vpop.f32.mrb[165].mxu1 }
 0x3fe   :  { %v7040_v23 = vpop.f32.mrb[166].mxu1  ;;  %v18645_v47 = vld [vmem:[#allocation36_spill] sm:$0xff] }
 0x3ff   :  { %v6820_v22 = vpop.f32.mrb[164].mxu0  ;;  %v9798_v15 = vpop.f32.mrb[167].mxu1 }
 0x400   :  { %v6910_v34 = vadd.f32 %v6820_v22, %v18626_v33  ;;  %v9743_v29 = vpop.f32.mrb[165].mxu0 }
 0x401   :  { %v6823_v42 = vpop.f32.mrb[166].mxu0  ;;  %v18644_v29 = vld [vmem:[#allocation53_spill] sm:$0xff] }
 0x402   :  { %v16809_v6 = vadd.f32 %v7037_v17, %v6910_v34  ;;  %v6911_v28 = vadd.f32 %v6823_v42, %v18627_v5  ;;  %v9744_v51 = vpop.f32.mrb[167].mxu0  ;;  %10016 = vmatmul.mubr.msk.bf16.gmra.mrb[16].mxu1 %vm18633_vm3, %v18632_v37  ;;  %v18646_v42 = vpack.c.bf16 %v18644_v29, %v18645_v47  ;;  %vm18687_vm3 = vmmov %vm18382_vm0 }
 0x403   :  { %10019 = vmatprep.mubr.msk.bf16.mxu1 %vm17937_vm5, %v17760_v45  ;;  %v18649_v51 = vld [vmem:[#allocation37_spill] sm:$0xff] }
 0x404   :  { %v16815_v43 = vadd.f32 %v7040_v23, %v6911_v28  ;;  %9962 = vmatmul.mubr.msk.bf16.gmra.mrb[16].mxu0 %vm18631_vm9, %v18630_v11  ;;  %v7045_v54 = vpop.f32.mrb[168].mxu1  ;;  %v18648_v23 = vld [vmem:[#allocation87_spill] sm:$0xff]  ;;  %vm18684_vm9 = vmmov %vm18382_vm0 }
 0x405   :  { %9965 = vmatprep.mubr.msk.bf16.mxu0 %vm17937_vm5, %v17760_v45  ;;  %v9801_v41 = vpop.f32.mrb[169].mxu1 }
 0x406   :  { %v7048_v24 = vpop.f32.mrb[170].mxu1  ;;  %v18651_v41 = vld [vmem:[#allocation57_spill] sm:$0xff] }
 0x407   :  { %v6828_v1 = vpop.f32.mrb[168].mxu0  ;;  %v9802_v49 = vpop.f32.mrb[171].mxu1 }
 0x408   :  { %v6912_v32 = vadd.f32 %v6828_v1, %v18634_v2  ;;  %v9747_v36 = vpop.f32.mrb[169].mxu0  ;;  %v18650_v1 = vld [vmem:[#allocation74_spill] sm:$0xff] }
 0x409   :  { %v6831_v48 = vpop.f32.mrb[170].mxu0 }
 0x40a   :  { %v16829_v4 = vadd.f32 %v7045_v54, %v6912_v32  ;;  %v6913_v56 = vadd.f32 %v6831_v48, %v18635_v10  ;;  %v9748_v31 = vpop.f32.mrb[171].mxu0  ;;  %10020 = vmatmul.mubr.msk.bf16.gmra.mrb[20].mxu1 %vm18641_vm10, %v18640_v9  ;;  %v18652_v48 = vld [vmem:[#allocation43_spill] sm:$0xff]  ;;  %v18655_v10 = vld [vmem:[#allocation56_spill] sm:$0xff]  ;;  %vm18691_vm10 = vmmov %vm18382_vm0 }
 0x40b   :  { %10023 = vmatprep.mubr.msk.bf16.mxu1 %vm17937_vm5, %v17760_v45 }
 0x40c   :  { %v16832_v0 = vadd.f32 %v7048_v24, %v6913_v56  ;;  %9966 = vmatmul.mubr.msk.bf16.gmra.mrb[20].mxu0 %vm18639_vm13, %v18638_v27  ;;  %v7053_v60 = vpop.f32.mrb[172].mxu1  ;;  %v18653_v24 = vpack.c.bf16 %v18651_v41, %v18652_v48  ;;  %v10288_v56 = vld [vmem:[%s17377_s17 + $0x10] sm:$0xff]   ;;  %v18671_v48 = vld [vmem:[#allocation15_spill] sm:$0xff]  ;;  %vm18689_vm13 = vmmov %vm18382_vm0 }
 0x40d   :  { %9969 = vmatprep.mubr.msk.bf16.mxu0 %vm17937_vm5, %v17760_v45  ;;  %v9805_v50 = vpop.f32.mrb[173].mxu1  ;;  %10060 = vmatpush3.bf16.msra.mxu0 %v10288_v56  ;;  %v18673_v56 = vld [vmem:[#allocation95_spill] sm:$0xff] }
 0x40e   :  { %v7056_v21 = vpop.f32.mrb[174].mxu1  ;;  %10061 = vmatprep.subr.bf16.mxu0 %v17760_v45 }
 0x40f   :  { %v6836_v62 = vpop.f32.mrb[172].mxu0  ;;  %v9806_v33 = vpop.f32.mrb[175].mxu1 }
 0x410   :  { %v6914_v14 = vadd.f32 %v6836_v62, %v18642_v26  ;;  %v9751_v19 = vpop.f32.mrb[173].mxu0  ;;  %v18663_v33 = vld [vmem:[#allocation32_spill] sm:$0xff] }
 0x411   :  { %v6839_v16 = vpop.f32.mrb[174].mxu0 }
 0x412   :  { %v16845_v40 = vadd.f32 %v7053_v60, %v6914_v14  ;;  %v6915_v22 = vadd.f32 %v6839_v16, %v18643_v35  ;;  %v9752_v17 = vpop.f32.mrb[175].mxu0  ;;  %10024 = vmatmul.mubr.msk.bf16.gmra.mrb[24].mxu1 %vm18382_vm0, %v18648_v23  ;;  %v18658_v14 = vld [vmem:[#allocation91_spill] sm:$0xff]  ;;  %v18659_v35 = vld [vmem:[#allocation17_spill] sm:$0xff] }
 0x413   :  { %10027 = vmatprep.mubr.msk.bf16.mxu1 %vm17937_vm5, %v17760_v45 }
 0x414   :  { %v16848_v34 = vadd.f32 %v7056_v21, %v6915_v22  ;;  %9970 = vmatmul.mubr.msk.bf16.gmra.mrb[24].mxu0 %vm18647_vm12, %v18646_v42  ;;  %v7061_v28 = vpop.f32.mrb[176].mxu1  ;;  %v18660_v22 = vld [vmem:[#allocation18_spill] sm:$0xff]  ;;  %v18665_v42 = vld [vmem:[#allocation77_spill] sm:$0xff]  ;;  %vm18692_vm12 = vmmov %vm18382_vm0  ;;  %vm8325_vm0 = vcmask 523264  }
 0x415   :  { %9973 = vmatprep.mubr.msk.bf16.mxu0 %vm17937_vm5, %v17760_v45  ;;  %v9809_v63 = vpop.f32.mrb[177].mxu1  ;;  %v18661_v17 = vpack.c.bf16 %v18659_v35, %v18660_v22  ;;  %v18676_v35 = vld [vmem:[#allocation20_spill] sm:$0xff] }
 0x416   :  { %v7064_v11 = vpop.f32.mrb[178].mxu1  ;;  %v18666_v63 = vld [vmem:[#allocation24_spill] sm:$0xff] }
 0x417   :  { %v6844_v5 = vpop.f32.mrb[176].mxu0  ;;  %v9810_v32 = vpop.f32.mrb[179].mxu1 }
 0x418   :  { %v6916_v15 = vadd.f32 %v6844_v5, %v18649_v51  ;;  %v9755_v59 = vpop.f32.mrb[177].mxu0  ;;  %v18668_v32 = vld [vmem:[#allocation93_spill] sm:$0xff] }
 0x419   :  { %v6847_v61 = vpop.f32.mrb[178].mxu0 }
 0x41a   :  { %v16861_v37 = vadd.f32 %v7061_v28, %v6916_v15  ;;  %v6917_v54 = vadd.f32 %v6847_v61, %v18650_v1  ;;  %v9756_v2 = vpop.f32.mrb[179].mxu0  ;;  %10028 = vmatmul.mubr.msk.bf16.gmra.mrb[28].mxu1 %vm18656_vm8, %v18655_v10  ;;  %vm18694_vm8 = vmmov %vm18654_vm1 }
 0x41b   :  { %10031 = vmatprep.mubr.msk.bf16.mxu1 %vm17937_vm5, %v17760_v45  ;;  %v18667_v2 = vld [vmem:[#allocation79_spill] sm:$0xff] }
 0x41c   :  { %v16864_v36 = vadd.f32 %v7064_v11, %v6917_v54  ;;  %9974 = vmatmul.mubr.msk.bf16.gmra.mrb[28].mxu0 %vm18654_vm1, %v18653_v24  ;;  %v18669_v41 = vpack.c.bf16 %v18667_v2, %v18668_v32  ;;  %v18681_v2 = vpack.c.bf16 %v16504_v57, %v16500_v13  ;;  %v18683_v32 = vld [vmem:[#allocation65_spill] sm:$0xff] }
 0x41d   :  { %9977 = vmatprep.mubr.msk.bf16.mxu0 %vm17937_vm5, %v17760_v45  ;;  %v7069_v49 = vpop.f32.mrb[180].mxu1 }
 0x41e   :  { %v9813_v9 = vpop.f32.mrb[181].mxu1 }
 0x41f   :  { %v6852_v31 = vpop.f32.mrb[180].mxu0  ;;  %v7072_v60 = vpop.f32.mrb[182].mxu1 }
 0x420   :  { %v6918_v25 = vadd.f32 %v6852_v31, %v18657_v8  ;;  %v9759_v27 = vpop.f32.mrb[181].mxu0  ;;  %v9814_v16 = vpop.f32.mrb[183].mxu1 }
 0x421   :  { %v6855_v62 = vpop.f32.mrb[182].mxu0  ;;  %v18675_v16 = vld [vmem:[#allocation22_spill] sm:$0xff] }
 0x422   :  { %v16881_v26 = vadd.f32 %v7069_v49, %v6918_v25  ;;  %v6919_v19 = vadd.f32 %v6855_v62, %v18658_v14  ;;  %v9760_v50 = vpop.f32.mrb[183].mxu0  ;;  %10032 = vmatmul.mubr.msk.bf16.gmra.mrb[32].mxu1 %vm18664_vm7, %v18663_v33  ;;  %v18674_v62 = vld [vmem:[#allocation25_spill] sm:$0xff]  ;;  %v18677_v22 = vpack.c.bf16 %v18675_v16, %v18676_v35  ;;  %vm18696_vm7 = vmmov %vm18654_vm1 }
 0x423   :  { %10035 = vmatprep.mubr.msk.bf16.mxu1 %vm17937_vm5, %v17760_v45  ;;  %v10289_v33 = vld [vmem:[%s17377_s17 + $0x18] sm:$0xff]  }
 0x424   :  { %v16884_v21 = vadd.f32 %v7072_v60, %v6919_v19  ;;  %9978 = vmatmul.mubr.msk.bf16.gmra.mrb[32].mxu0 %vm18662_vm11, %v18661_v17  ;;  %v18679_v17 = vld [vmem:[#allocation80_spill] sm:$0xff]  ;;  %vm18695_vm11 = vmmov %vm18654_vm1 }
 0x425   :  { %9981 = vmatprep.mubr.msk.bf16.mxu0 %vm17937_vm5, %v17760_v45  ;;  %v7077_v47 = vpop.f32.mrb[184].mxu1  ;;  %10062 = vmatpush3.bf16.msra.mxu0 %v10289_v33 }
 0x426   :  { %v9817_v28 = vpop.f32.mrb[185].mxu1 }
 0x427   :  { %v6860_v29 = vpop.f32.mrb[184].mxu0  ;;  %v7080_v15 = vpop.f32.mrb[186].mxu1 }
 0x428   :  { %v6920_v23 = vadd.f32 %v6860_v29, %v18665_v42  ;;  %v9763_v5 = vpop.f32.mrb[185].mxu0  ;;  %v9818_v1 = vpop.f32.mrb[187].mxu1 }
 0x429   :  { %v6863_v51 = vpop.f32.mrb[186].mxu0 }
 0x42a   :  { %v16897_v59 = vadd.f32 %v7077_v47, %v6920_v23  ;;  %v6921_v61 = vadd.f32 %v6863_v51, %v18666_v63  ;;  %v9764_v11 = vpop.f32.mrb[187].mxu0  ;;  %10036 = vmatmul.mubr.msk.bf16.gmra.mrb[36].mxu1 %vm18672_vm15, %v18671_v48  ;;  %vm18698_vm15 = vmmov %vm18654_vm1 }
 0x42b   :  { %10039 = vmatprep.mubr.msk.bf16.mxu1 %vm17937_vm5, %v17760_v45 }
 0x42c   :  { %v16900_v54 = vadd.f32 %v7080_v15, %v6921_v61  ;;  %9982 = vmatmul.mubr.msk.bf16.gmra.mrb[36].mxu0 %vm18670_vm14, %v18669_v41  ;;  %v18685_v41 = vld [vmem:[#allocation114_spill] sm:$0xff]  ;;  %vm18697_vm14 = vmmov %vm18654_vm1 }
 0x42d   :  { %9985 = vmatprep.mubr.msk.bf16.mxu0 %vm17937_vm5, %v17760_v45  ;;  %v7085_v10 = vpop.f32.mrb[188].mxu1  ;;  %v7756_v48 = vmul.f32 %v18685_v41, %v18602_v58  ;;  %v18688_v58 = vld [vmem:[#allocation29_spill] sm:$0xff] }
 0x42e   :  { %v9821_v8 = vpop.f32.mrb[189].mxu1 }
 0x42f   :  { %v6868_v24 = vpop.f32.mrb[188].mxu0  ;;  %v7088_v27 = vpop.f32.mrb[190].mxu1 }
 0x430   :  { %v6922_v31 = vadd.f32 %v6868_v24, %v18673_v56  ;;  %v9767_v49 = vpop.f32.mrb[189].mxu0  ;;  %v9822_v19 = vpop.f32.mrb[191].mxu1 }
 0x431   :  { %v6871_v25 = vpop.f32.mrb[190].mxu0 }
 0x432   :  { %v16913_v9 = vadd.f32 %v7085_v10, %v6922_v31  ;;  %v6923_v60 = vadd.f32 %v6871_v25, %v18674_v62  ;;  %v9768_v14 = vpop.f32.mrb[191].mxu0  ;;  %10040 = vmatmul.mubr.msk.bf16.gmra.mrb[40].mxu1 %vm18680_vm4, %v18679_v17  ;;  %vm18700_vm4 = vmmov %vm18654_vm1 }
 0x433   :  { %10043 = vmatprep.mubr.msk.bf16.mxu1 %vm17937_vm5, %v17760_v45  ;;  %v18690_v14 = vld [vmem:[#allocation3_spill] sm:$0xff] }
 0x434   :  { %v16916_v50 = vadd.f32 %v7088_v27, %v6923_v60  ;;  %9986 = vmatmul.mubr.msk.bf16.gmra.mrb[40].mxu0 %vm18678_vm2, %v18677_v22  ;;  %v7781_v27 = vsub.f32 1.0, %v7756_v48  ;;  %v18686_v60 = vpack.c.bf16 %v16541_v46, %v16537_v30  ;;  %v7794_v19 = vpack.c.bf16 %v18690_v14, %v18690_v14  ;;  %vm18699_vm2 = vmmov %vm18654_vm1 }
 0x435   :  { %9989 = vmatprep.mubr.msk.bf16.mxu0 %vm17937_vm5, %v17760_v45  ;;  %v7093_v47 = vpop.f32.mrb[192].mxu1 }
 0x436   :  { %v9825_v5 = vpop.f32.mrb[193].mxu1  ;;  %v8011_v16 = vpack.c.bf16 %v7781_v27, %v7781_v27 }
 0x437   :  { %v6876_v29 = vpop.f32.mrb[192].mxu0  ;;  %v7096_v51 = vpop.f32.mrb[194].mxu1 }
 0x438   :  { %v6924_v42 = vadd.f32 %v6876_v29, %v16568_v44  ;;  %v9771_v23 = vpop.f32.mrb[193].mxu0  ;;  %v9826_v11 = vpop.f32.mrb[195].mxu1 }
 0x439   :  { %v6879_v28 = vpop.f32.mrb[194].mxu0 }
 0x43a   :  { %v16932_v15 = vadd.f32 %v7093_v47, %v6924_v42  ;;  %v6925_v63 = vadd.f32 %v6879_v28, %v16571_v38  ;;  %v9772_v61 = vpop.f32.mrb[195].mxu0  ;;  %10044 = vmatmul.mubr.msk.bf16.gmra.mrb[44].mxu1 %vm18684_vm9, %v18683_v32  ;;  %vm18702_vm9 = vmmov %vm18654_vm1 }
 0x43b   :  { %10047 = vmatprep.mubr.msk.bf16.mxu1 %vm17937_vm5, %v17760_v45 }
 0x43c   :  { %v16935_v1 = vadd.f32 %v7096_v51, %v6925_v63  ;;  %9990 = vmatmul.mubr.msk.bf16.gmra.mrb[44].mxu0 %vm18682_vm6, %v18681_v2  ;;  %vm18701_vm6 = vmmov %vm18654_vm1 }
 0x43d   :  { %9993 = vmatprep.mubr.msk.bf16.mxu0 %vm17937_vm5, %v17760_v45  ;;  %v7101_v38 = vpop.f32.mrb[196].mxu1 }
 0x43e   :  { %v9829_v13 = vpop.f32.mrb[197].mxu1 }
 0x43f   :  { %v6884_v44 = vpop.f32.mrb[196].mxu0  ;;  %v7104_v56 = vpop.f32.mrb[198].mxu1 }
 0x440   :  { %v6926_v24 = vadd.f32 %v6884_v44, %v16649_v52  ;;  %v9775_v10 = vpop.f32.mrb[197].mxu0  ;;  %v9830_v25 = vpop.f32.mrb[199].mxu1 }
 0x441   :  { %v6887_v57 = vpop.f32.mrb[198].mxu0 }
 0x442   :  { %v16950_v31 = vadd.f32 %v7101_v38, %v6926_v24  ;;  %v6927_v49 = vadd.f32 %v6887_v57, %v16652_v39  ;;  %v9776_v8 = vpop.f32.mrb[199].mxu0  ;;  %10048 = vmatmul.mubr.msk.bf16.gmra.mrb[48].mxu1 %vm18689_vm13, %v18688_v58  ;;  %vm18704_vm13 = vmmov %vm18654_vm1 }
 0x443   :  { %10051 = vmatprep.mubr.msk.bf16.mxu1 %vm17937_vm5, %v17760_v45 }
 0x444   :  { %v16953_v62 = vadd.f32 %v7104_v56, %v6927_v49  ;;  %9994 = vmatmul.mubr.msk.bf16.gmra.mrb[48].mxu0 %vm18687_vm3, %v18686_v60  ;;  %vm18703_vm3 = vmmov %vm18654_vm1 }
 0x445   :  { %9997 = vmatprep.mubr.msk.bf16.mxu0 %vm17937_vm5, %v17760_v45  ;;  %v7109_v39 = vpop.f32.mrb[200].mxu1 }
 0x446   :  { %v9833_v46 = vpop.f32.mrb[201].mxu1 }
 0x447   :  { %v6892_v52 = vpop.f32.mrb[200].mxu0  ;;  %v7112_v17 = vpop.f32.mrb[202].mxu1 }
 0x448   :  { %v6928_v35 = vadd.f32 %v6892_v52, %v16718_v3  ;;  %v9779_v30 = vpop.f32.mrb[201].mxu0  ;;  %v9834_v42 = vpop.f32.mrb[203].mxu1 }
 0x449   :  { %v6895_v22 = vpop.f32.mrb[202].mxu0 }
 0x44a   :  { %v16968_v33 = vadd.f32 %v7109_v39, %v6928_v35  ;;  %v6929_v29 = vadd.f32 %v6895_v22, %v16725_v18  ;;  %v9780_v47 = vpop.f32.mrb[203].mxu0  ;;  %10052 = vmatmul.mubr.msk.bf16.gmra.mrb[52].mxu1 %vm18692_vm12, %v8011_v16  ;;  %vm18706_vm12 = vmmov %vm18654_vm1 }
 0x44b   :  { %10123 = vmatprep.mubr.msk.bf16.mxu1 %vm17937_vm5, %v17760_v45 }
 0x44c   :  { %v16971_v23 = vadd.f32 %v7112_v17, %v6929_v29  ;;  %9998 = vmatmul.mubr.msk.bf16.gmra.mrb[52].mxu0 %vm18691_vm10, %v7794_v19  ;;  %vm18705_vm10 = vmmov %vm18654_vm1 }
 0x44d   :  { %10063 = vmatprep.mubr.msk.bf16.mxu0 %vm17937_vm5, %v17760_v45  ;;  %v7117_v5 = vpop.f32.mrb[204].mxu1 }
 0x44e   :  { %v9837_v18 = vpop.f32.mrb[205].mxu1 }
 0x44f   :  { %v6900_v3 = vpop.f32.mrb[204].mxu0  ;;  %v7120_v61 = vpop.f32.mrb[206].mxu1 }
 0x450   :  { %v6930_v28 = vadd.f32 %v6900_v3, %v16760_v12  ;;  %v9783_v51 = vpop.f32.mrb[205].mxu0  ;;  %v9838_v32 = vpop.f32.mrb[207].mxu1 }
 0x451   :  { %v6903_v63 = vpop.f32.mrb[206].mxu0 }
 0x452   :  { %v16980_v11 = vadd.f32 %v7117_v5, %v6930_v28  ;;  %v9784_v2 = vpop.f32.mrb[207].mxu0 }
 0x455   :  { %v7555_v38 = vpop.f32.mrb[208].mxu1 }
 0x456   :  { %v9897_v24 = vpop.f32.mrb[209].mxu1 }
 0x457   :  { %v7338_v44 = vpop.f32.mrb[208].mxu0  ;;  %v7558_v13 = vpop.f32.mrb[210].mxu1 }
 0x458   :  { %v7440_v41 = vadd.f32 %v7338_v44, %v16777_v20  ;;  %v9843_v48 = vpop.f32.mrb[209].mxu0  ;;  %v9898_v49 = vpop.f32.mrb[211].mxu1 }
 0x459   :  { %v7341_v10 = vpop.f32.mrb[210].mxu0 }
 0x45a   :  { %v16983_v57 = vadd.f32 %v7555_v38, %v7440_v41  ;;  %v7441_v12 = vadd.f32 %v7341_v10, %v16780_v7  ;;  %v9844_v56 = vpop.f32.mrb[211].mxu0 }
 0x45c   :  { %v16986_v8 = vadd.f32 %v7558_v13, %v7441_v12 }
 0x45d   :  { %v7563_v27 = vpop.f32.mrb[212].mxu1 }
 0x45e   :  { %v9901_v52 = vpop.f32.mrb[213].mxu1 }
 0x45f   :  { %v7346_v25 = vpop.f32.mrb[212].mxu0  ;;  %v7566_v20 = vpop.f32.mrb[214].mxu1 }
 0x460   :  { %v7442_v60 = vadd.f32 %v7346_v25, %v16793_v55  ;;  %v9847_v58 = vpop.f32.mrb[213].mxu0  ;;  %v9902_v35 = vpop.f32.mrb[215].mxu1 }
 0x461   :  { %v7349_v39 = vpop.f32.mrb[214].mxu0 }
 0x462   :  { %v16989_v14 = vadd.f32 %v7563_v27, %v7442_v60  ;;  %v7443_v19 = vadd.f32 %v7349_v39, %v16796_v53  ;;  %v9848_v16 = vpop.f32.mrb[215].mxu0 }
 0x464   :  { %v16992_v30 = vadd.f32 %v7566_v20, %v7443_v19 }
 0x465   :  { %v7571_v46 = vpop.f32.mrb[216].mxu1 }
 0x466   :  { %v9905_v29 = vpop.f32.mrb[217].mxu1 }
 0x467   :  { %v7354_v7 = vpop.f32.mrb[216].mxu0  ;;  %v7574_v55 = vpop.f32.mrb[218].mxu1 }
 0x468   :  { %v7444_v22 = vadd.f32 %v7354_v7, %v16809_v6  ;;  %v9851_v17 = vpop.f32.mrb[217].mxu0  ;;  %v9906_v28 = vpop.f32.mrb[219].mxu1 }
 0x469   :  { %v7357_v47 = vpop.f32.mrb[218].mxu0 }
 0x46a   :  { %v16995_v42 = vadd.f32 %v7571_v46, %v7444_v22  ;;  %v7445_v3 = vadd.f32 %v7357_v47, %v16815_v43  ;;  %v9852_v5 = vpop.f32.mrb[219].mxu0 }
 0x46c   :  { %v16998_v51 = vadd.f32 %v7574_v55, %v7445_v3 }
 0x46d   :  { %v7579_v18 = vpop.f32.mrb[220].mxu1 }
 0x46e   :  { %v9909_v2 = vpop.f32.mrb[221].mxu1 }
 0x46f   :  { %v7362_v53 = vpop.f32.mrb[220].mxu0  ;;  %v7582_v6 = vpop.f32.mrb[222].mxu1 }
 0x470   :  { %v7446_v63 = vadd.f32 %v7362_v53, %v16829_v4  ;;  %v9855_v61 = vpop.f32.mrb[221].mxu0  ;;  %v9910_v48 = vpop.f32.mrb[223].mxu1 }
 0x471   :  { %v7365_v32 = vpop.f32.mrb[222].mxu0 }
 0x472   :  { %v17001_v44 = vadd.f32 %v7579_v18, %v7446_v63  ;;  %v7447_v38 = vadd.f32 %v7365_v32, %v16832_v0  ;;  %v9856_v41 = vpop.f32.mrb[223].mxu0 }
 0x474   :  { %v17004_v24 = vadd.f32 %v7582_v6, %v7447_v38 }
 0x475   :  { %v7587_v10 = vpop.f32.mrb[224].mxu1 }
 0x476   :  { %v9913_v56 = vpop.f32.mrb[225].mxu1 }
 0x477   :  { %v7370_v43 = vpop.f32.mrb[224].mxu0  ;;  %v7590_v4 = vpop.f32.mrb[226].mxu1 }
 0x478   :  { %v7448_v13 = vadd.f32 %v7370_v43, %v16845_v40  ;;  %v9859_v12 = vpop.f32.mrb[225].mxu0  ;;  %v9914_v58 = vpop.f32.mrb[227].mxu1 }
 0x479   :  { %v7373_v49 = vpop.f32.mrb[226].mxu0 }
 0x47a   :  { %v17007_v25 = vadd.f32 %v7587_v10, %v7448_v13  ;;  %v7449_v27 = vadd.f32 %v7373_v49, %v16848_v34  ;;  %v9860_v60 = vpop.f32.mrb[227].mxu0 }
 0x47c   :  { %v17010_v52 = vadd.f32 %v7590_v4, %v7449_v27 }
 0x47d   :  { %v7595_v39 = vpop.f32.mrb[228].mxu1 }
 0x47e   :  { %v9917_v16 = vpop.f32.mrb[229].mxu1 }
 0x47f   :  { %v7378_v0 = vpop.f32.mrb[228].mxu0  ;;  %v7598_v40 = vpop.f32.mrb[230].mxu1 }
 0x480   :  { %v7450_v20 = vadd.f32 %v7378_v0, %v16861_v37  ;;  %v9863_v19 = vpop.f32.mrb[229].mxu0  ;;  %v9918_v17 = vpop.f32.mrb[231].mxu1 }
 0x481   :  { %v7381_v35 = vpop.f32.mrb[230].mxu0 }
 0x482   :  { %v17013_v7 = vadd.f32 %v7595_v39, %v7450_v20  ;;  %v7451_v46 = vadd.f32 %v7381_v35, %v16864_v36  ;;  %v9864_v22 = vpop.f32.mrb[231].mxu0 }
 0x484   :  { %v17016_v29 = vadd.f32 %v7598_v40, %v7451_v46 }
 0x485   :  { %v7603_v47 = vpop.f32.mrb[232].mxu1 }
 0x486   :  { %v9921_v5 = vpop.f32.mrb[233].mxu1 }
 0x487   :  { %v7386_v34 = vpop.f32.mrb[232].mxu0  ;;  %v7606_v37 = vpop.f32.mrb[234].mxu1 }
 0x488   :  { %v7452_v55 = vadd.f32 %v7386_v34, %v16881_v26  ;;  %v9867_v3 = vpop.f32.mrb[233].mxu0  ;;  %v9922_v61 = vpop.f32.mrb[235].mxu1 }
 0x489   :  { %v7389_v28 = vpop.f32.mrb[234].mxu0 }
 0x48a   :  { %v17019_v53 = vadd.f32 %v7603_v47, %v7452_v55  ;;  %v7453_v18 = vadd.f32 %v7389_v28, %v16884_v21  ;;  %v9868_v63 = vpop.f32.mrb[235].mxu0 }
 0x48c   :  { %v17022_v2 = vadd.f32 %v7606_v37, %v7453_v18 }
 0x48d   :  { %v7611_v32 = vpop.f32.mrb[236].mxu1 }
 0x48e   :  { %v9925_v41 = vpop.f32.mrb[237].mxu1 }
 0x48f   :  { %v7394_v36 = vpop.f32.mrb[236].mxu0  ;;  %v7614_v26 = vpop.f32.mrb[238].mxu1 }
 0x490   :  { %v7454_v6 = vadd.f32 %v7394_v36, %v16897_v59  ;;  %v9871_v38 = vpop.f32.mrb[237].mxu0  ;;  %v9926_v12 = vpop.f32.mrb[239].mxu1 }
 0x491   :  { %v7397_v48 = vpop.f32.mrb[238].mxu0 }
 0x492   :  { %v17025_v43 = vadd.f32 %v7611_v32, %v7454_v6  ;;  %v7455_v10 = vadd.f32 %v7397_v48, %v16900_v54  ;;  %v9872_v13 = vpop.f32.mrb[239].mxu0 }
 0x494   :  { %v17028_v56 = vadd.f32 %v7614_v26, %v7455_v10 }
 0x495   :  { %v7619_v49 = vpop.f32.mrb[240].mxu1 }
 0x496   :  { %v9929_v60 = vpop.f32.mrb[241].mxu1 }
 0x497   :  { %v7402_v21 = vpop.f32.mrb[240].mxu0  ;;  %v7622_v59 = vpop.f32.mrb[242].mxu1 }
 0x498   :  { %v7456_v4 = vadd.f32 %v7402_v21, %v16913_v9  ;;  %v9875_v27 = vpop.f32.mrb[241].mxu0  ;;  %v9930_v19 = vpop.f32.mrb[243].mxu1 }
 0x499   :  { %v7405_v58 = vpop.f32.mrb[242].mxu0 }
 0x49a   :  { %v17031_v0 = vadd.f32 %v7619_v49, %v7456_v4  ;;  %v7457_v39 = vadd.f32 %v7405_v58, %v16916_v50  ;;  %v9876_v20 = vpop.f32.mrb[243].mxu0  ;;  %v10292_v58 = vld [vmem:[%s17378_s19 + $0x10] sm:$0xff]  }
 0x49b   :  { %v10293_v20 = vld [vmem:[%s17378_s19 + $0x18] sm:$0xff]  }
 0x49c   :  { %v17034_v16 = vadd.f32 %v7622_v59, %v7457_v39 }
 0x49d   :  { %v7627_v35 = vpop.f32.mrb[244].mxu1 }
 0x49e   :  { %v9933_v22 = vpop.f32.mrb[245].mxu1 }
 0x49f   :  { %v7410_v54 = vpop.f32.mrb[244].mxu0  ;;  %v7630_v9 = vpop.f32.mrb[246].mxu1 }
 0x4a0   :  { %v7458_v40 = vadd.f32 %v7410_v54, %v16932_v15  ;;  %v9879_v46 = vpop.f32.mrb[245].mxu0  ;;  %v9934_v3 = vpop.f32.mrb[247].mxu1 }
 0x4a1   :  { %v7413_v17 = vpop.f32.mrb[246].mxu0 }
 0x4a2   :  { %v17037_v34 = vadd.f32 %v7627_v35, %v7458_v40  ;;  %v7459_v47 = vadd.f32 %v7413_v17, %v16935_v1  ;;  %v9880_v55 = vpop.f32.mrb[247].mxu0  ;;  %v10290_v1 = vld [vmem:[%s17378_s19] sm:$0xff]  }
 0x4a3   :  { %10116 = vmatpush3.bf16.msra.mxu1 %v10290_v1 }
 0x4a4   :  { %v17040_v5 = vadd.f32 %v7630_v9, %v7459_v47  ;;  %10117 = vmatprep.subr.bf16.mxu1 %v17760_v45 }
 0x4a5   :  { %v7635_v28 = vpop.f32.mrb[248].mxu1 }
 0x4a6   :  { %v9937_v63 = vpop.f32.mrb[249].mxu1 }
 0x4a7   :  { %v7418_v50 = vpop.f32.mrb[248].mxu0  ;;  %v7638_v15 = vpop.f32.mrb[250].mxu1 }
 0x4a8   :  { %v7460_v37 = vadd.f32 %v7418_v50, %v16950_v31  ;;  %v9883_v18 = vpop.f32.mrb[249].mxu0  ;;  %v9938_v38 = vpop.f32.mrb[251].mxu1  ;;  %v10291_v31 = vld [vmem:[%s17378_s19 + $0x8] sm:$0xff]  }
 0x4a9   :  { %v7421_v61 = vpop.f32.mrb[250].mxu0  ;;  %10118 = vmatpush3.bf16.msra.mxu1 %v10291_v31 }
 0x4aa   :  { %v17043_v36 = vadd.f32 %v7635_v28, %v7460_v37  ;;  %v7461_v32 = vadd.f32 %v7421_v61, %v16953_v62  ;;  %v9884_v6 = vpop.f32.mrb[251].mxu0  ;;  %10119 = vmatprep.subr.bf16.mxu1 %v17760_v45 }
 0x4ac   :  { %v17046_v41 = vadd.f32 %v7638_v15, %v7461_v32 }
 0x4ad   :  { %v7643_v26 = vpop.f32.mrb[252].mxu1  ;;  %10120 = vmatpush3.bf16.msra.mxu1 %v10292_v58 }
 0x4ae   :  { %v9941_v12 = vpop.f32.mrb[253].mxu1  ;;  %10121 = vmatprep.subr.bf16.mxu1 %v17760_v45 }
 0x4af   :  { %v7426_v48 = vpop.f32.mrb[252].mxu0  ;;  %v7646_v21 = vpop.f32.mrb[254].mxu1 }
 0x4b0   :  { %v7462_v10 = vadd.f32 %v7426_v48, %v16968_v33  ;;  %v9887_v13 = vpop.f32.mrb[253].mxu0  ;;  %v9942_v60 = vpop.f32.mrb[255].mxu1 }
 0x4b1   :  { %v7429_v62 = vpop.f32.mrb[254].mxu0  ;;  %10122 = vmatpush3.bf16.msra.mxu1 %v10293_v20 }
 0x4b2   :  { %v17056_v49 = vadd.f32 %v7643_v26, %v7462_v10  ;;  %v7463_v4 = vadd.f32 %v7429_v62, %v16971_v23  ;;  %v9888_v27 = vpop.f32.mrb[255].mxu0 }
 0x4b4   :  { %v17062_v59 = vadd.f32 %v7646_v21, %v7463_v4 }
 0x4b5   :  { %v7651_v39 = vpop.f32.mrb[0].mxu1 }
 0x4b6   :  { %v9945_v54 = vpop.f32.mrb[1].mxu1 }
 0x4b7   :  { %v7434_v33 = vpop.f32.mrb[0].mxu0  ;;  %v7654_v40 = vpop.f32.mrb[2].mxu1 }
 0x4b8   :  { %v7464_v23 = vadd.f32 %v7434_v33, %v16980_v11  ;;  %v9891_v19 = vpop.f32.mrb[1].mxu0  ;;  %v9946_v17 = vpop.f32.mrb[3].mxu1  ;;  %v17076_v11 = vld [vmem:[%s17379_s16] ss:$0 sm:$0xff] }
 0x4b9   :  { %v7437_v35 = vpop.f32.mrb[2].mxu0 }
 0x4ba   :  { %v17070_v46 = vadd.f32 %v7651_v39, %v7464_v23  ;;  %v9892_v22 = vpop.f32.mrb[3].mxu0 }
 0x4bd   :  { %v8089_v47 = vpop.f32.mrb[4].mxu1 }
 0x4be   :  { %v10005_v50 = vpop.f32.mrb[5].mxu1 }
 0x4bf   :  { %v7872_v9 = vpop.f32.mrb[4].mxu0  ;;  %v8092_v37 = vpop.f32.mrb[6].mxu1 }
 0x4c0   :  { %v7974_v55 = vadd.f32 %v7872_v9, %v16983_v57  ;;  %v9951_v3 = vpop.f32.mrb[5].mxu0  ;;  %v10006_v15 = vpop.f32.mrb[7].mxu1 }
 0x4c1   :  { %v7875_v28 = vpop.f32.mrb[6].mxu0 }
 0x4c2   :  { %v8191_v18 = vadd.f32 %v8089_v47, %v7974_v55  ;;  %v7975_v63 = vadd.f32 %v7875_v28, %v16986_v8  ;;  %v9952_v61 = vpop.f32.mrb[7].mxu0 }
 0x4c4   :  { %v8223_v32 = vadd.f32 %v17076_v11, %v8191_v18  ;;  %v8192_v6 = vadd.f32 %v8092_v37, %v7975_v63 }
 0x4c5   :  { %v8097_v1 = vpop.f32.mrb[8].mxu1 }
 0x4c6   :  { %v8224_v38 = vadd.f32 %v17076_v11, %v8192_v6  ;;  %v8248_v31 = vmax.f32 %v8223_v32, 0.0  ;;  %v10009_v13 = vpop.f32.mrb[9].mxu1 }
 0x4c7   :  { %v7880_v57 = vpop.f32.mrb[8].mxu0  ;;  %v8100_v62 = vpop.f32.mrb[10].mxu1 }
 0x4c8   :  { %v8249_v48 = vmax.f32 %v8224_v38, 0.0  ;;  %v7976_v26 = vadd.f32 %v7880_v57, %v16989_v14  ;;  %v9955_v10 = vpop.f32.mrb[9].mxu0  ;;  %v10010_v60 = vpop.f32.mrb[11].mxu1 }
 0x4c9   :  { %v7883_v12 = vpop.f32.mrb[10].mxu0 }
 0x4ca   :  { %v8273_v21 = vpack.c.bf16 %v8249_v48, %v8248_v31  ;;  %v8193_v8 = vadd.f32 %v8097_v1, %v7976_v26  ;;  %v7977_v4 = vadd.f32 %v7883_v12, %v16992_v30  ;;  %v9956_v27 = vpop.f32.mrb[11].mxu0 }
 0x4cc   :  { %v8225_v58 = vadd.f32 %v17076_v11, %v8193_v8  ;;  %v8194_v33 = vadd.f32 %v8100_v62, %v7977_v4  ;;  %10064 = vmatmul.mubr.msk.bf16.vlgmr.msra.gmra.mrb[56].mxu0 %vm8325_vm0, %v8273_v21 }
 0x4cd   :  { %10067 = vmatprep.mubr.msk.bf16.mxu0 %vm17937_vm5, %v17760_v45  ;;  %v8105_v20 = vpop.f32.mrb[12].mxu1 }
 0x4ce   :  { %v8226_v14 = vadd.f32 %v17076_v11, %v8194_v33  ;;  %v8250_v23 = vmax.f32 %v8225_v58, 0.0  ;;  %v10013_v30 = vpop.f32.mrb[13].mxu1 }
 0x4cf   :  { %v7888_v39 = vpop.f32.mrb[12].mxu0  ;;  %v8108_v22 = vpop.f32.mrb[14].mxu1 }
 0x4d0   :  { %v8251_v19 = vmax.f32 %v8226_v14, 0.0  ;;  %v7978_v54 = vadd.f32 %v7888_v39, %v16995_v42  ;;  %v9959_v35 = vpop.f32.mrb[13].mxu0  ;;  %v10014_v3 = vpop.f32.mrb[15].mxu1 }
 0x4d1   :  { %v7891_v40 = vpop.f32.mrb[14].mxu0 }
 0x4d2   :  { %v8274_v17 = vpack.c.bf16 %v8251_v19, %v8250_v23  ;;  %v8195_v9 = vadd.f32 %v8105_v20, %v7978_v54  ;;  %v7979_v47 = vadd.f32 %v7891_v40, %v16998_v51  ;;  %v9960_v55 = vpop.f32.mrb[15].mxu0 }
 0x4d4   :  { %v8227_v50 = vadd.f32 %v17076_v11, %v8195_v9  ;;  %v8196_v28 = vadd.f32 %v8108_v22, %v7979_v47  ;;  %10068 = vmatmul.mubr.msk.bf16.gmra.mrb[60].mxu0 %vm8325_vm0, %v8274_v17 }
 0x4d5   :  { %10071 = vmatprep.mubr.msk.bf16.mxu0 %vm17937_vm5, %v17760_v45  ;;  %v8113_v18 = vpop.f32.mrb[16].mxu1 }
 0x4d6   :  { %v8228_v42 = vadd.f32 %v17076_v11, %v8196_v28  ;;  %v8252_v63 = vmax.f32 %v8227_v50, 0.0  ;;  %v10017_v51 = vpop.f32.mrb[17].mxu1 }
 0x4d7   :  { %v7896_v37 = vpop.f32.mrb[16].mxu0  ;;  %v8116_v38 = vpop.f32.mrb[18].mxu1 }
 0x4d8   :  { %v8253_v61 = vmax.f32 %v8228_v42, 0.0  ;;  %v7980_v15 = vadd.f32 %v7896_v37, %v17001_v44  ;;  %v9963_v32 = vpop.f32.mrb[17].mxu0  ;;  %v10018_v26 = vpop.f32.mrb[19].mxu1 }
 0x4d9   :  { %v7899_v6 = vpop.f32.mrb[18].mxu0 }
 0x4da   :  { %v8275_v57 = vpack.c.bf16 %v8253_v61, %v8252_v63  ;;  %v8197_v1 = vadd.f32 %v8113_v18, %v7980_v15  ;;  %v7981_v31 = vadd.f32 %v7899_v6, %v17004_v24  ;;  %v9964_v48 = vpop.f32.mrb[19].mxu0 }
 0x4dc   :  { %v8229_v10 = vadd.f32 %v17076_v11, %v8197_v1  ;;  %v8198_v13 = vadd.f32 %v8116_v38, %v7981_v31  ;;  %10072 = vmatmul.mubr.msk.bf16.gmra.mrb[64].mxu0 %vm8325_vm0, %v8275_v57 }
 0x4dd   :  { %10075 = vmatprep.mubr.msk.bf16.mxu0 %vm17937_vm5, %v17760_v45  ;;  %v8121_v62 = vpop.f32.mrb[20].mxu1 }
 0x4de   :  { %v8230_v44 = vadd.f32 %v17076_v11, %v8198_v13  ;;  %v8254_v21 = vmax.f32 %v8229_v10, 0.0  ;;  %v10021_v24 = vpop.f32.mrb[21].mxu1 }
 0x4df   :  { %v7904_v12 = vpop.f32.mrb[20].mxu0  ;;  %v8124_v58 = vpop.f32.mrb[22].mxu1 }
 0x4e0   :  { %v8255_v8 = vmax.f32 %v8230_v44, 0.0  ;;  %v7982_v4 = vadd.f32 %v7904_v12, %v17007_v25  ;;  %v9967_v27 = vpop.f32.mrb[21].mxu0  ;;  %v10022_v23 = vpop.f32.mrb[23].mxu1 }
 0x4e1   :  { %v7907_v60 = vpop.f32.mrb[22].mxu0 }
 0x4e2   :  { %v8276_v33 = vpack.c.bf16 %v8255_v8, %v8254_v21  ;;  %v8199_v14 = vadd.f32 %v8121_v62, %v7982_v4  ;;  %v7983_v39 = vadd.f32 %v7907_v60, %v17010_v52  ;;  %v9968_v20 = vpop.f32.mrb[23].mxu0 }
 0x4e4   :  { %v8231_v19 = vadd.f32 %v17076_v11, %v8199_v14  ;;  %v8200_v54 = vadd.f32 %v8124_v58, %v7983_v39  ;;  %10076 = vmatmul.mubr.msk.bf16.gmra.mrb[68].mxu0 %vm8325_vm0, %v8276_v33 }
 0x4e5   :  { %10079 = vmatprep.mubr.msk.bf16.mxu0 %vm17937_vm5, %v17760_v45  ;;  %v8129_v30 = vpop.f32.mrb[24].mxu1 }
 0x4e6   :  { %v8232_v25 = vadd.f32 %v17076_v11, %v8200_v54  ;;  %v8256_v40 = vmax.f32 %v8231_v19, 0.0  ;;  %v10025_v52 = vpop.f32.mrb[25].mxu1 }
 0x4e7   :  { %v7912_v35 = vpop.f32.mrb[24].mxu0  ;;  %v8132_v55 = vpop.f32.mrb[26].mxu1 }
 0x4e8   :  { %v8257_v22 = vmax.f32 %v8232_v25, 0.0  ;;  %v7984_v17 = vadd.f32 %v7912_v35, %v17013_v7  ;;  %v9971_v9 = vpop.f32.mrb[25].mxu0  ;;  %v10026_v37 = vpop.f32.mrb[27].mxu1 }
 0x4e9   :  { %v7915_v47 = vpop.f32.mrb[26].mxu0 }
 0x4ea   :  { %v8277_v3 = vpack.c.bf16 %v8257_v22, %v8256_v40  ;;  %v8201_v50 = vadd.f32 %v8129_v30, %v7984_v17  ;;  %v7985_v28 = vadd.f32 %v7915_v47, %v17016_v29  ;;  %v9972_v42 = vpop.f32.mrb[27].mxu0 }
 0x4ec   :  { %v8233_v18 = vadd.f32 %v17076_v11, %v8201_v50  ;;  %v8202_v63 = vadd.f32 %v8132_v55, %v7985_v28  ;;  %10080 = vmatmul.mubr.msk.bf16.gmra.mrb[72].mxu0 %vm8325_vm0, %v8277_v3 }
 0x4ed   :  { %10083 = vmatprep.mubr.msk.bf16.mxu0 %vm17937_vm5, %v17760_v45  ;;  %v8137_v15 = vpop.f32.mrb[28].mxu1 }
 0x4ee   :  { %v8234_v7 = vadd.f32 %v17076_v11, %v8202_v63  ;;  %v8258_v32 = vmax.f32 %v8233_v18, 0.0  ;;  %v10029_v29 = vpop.f32.mrb[29].mxu1 }
 0x4ef   :  { %v7920_v61 = vpop.f32.mrb[28].mxu0  ;;  %v8140_v1 = vpop.f32.mrb[30].mxu1 }
 0x4f0   :  { %v8259_v51 = vmax.f32 %v8234_v7, 0.0  ;;  %v7986_v6 = vadd.f32 %v7920_v61, %v17019_v53  ;;  %v9975_v38 = vpop.f32.mrb[29].mxu0  ;;  %v10030_v13 = vpop.f32.mrb[31].mxu1 }
 0x4f1   :  { %v7923_v57 = vpop.f32.mrb[30].mxu0 }
 0x4f2   :  { %v8278_v31 = vpack.c.bf16 %v8259_v51, %v8258_v32  ;;  %v8203_v48 = vadd.f32 %v8137_v15, %v7986_v6  ;;  %v7987_v26 = vadd.f32 %v7923_v57, %v17022_v2  ;;  %v9976_v10 = vpop.f32.mrb[31].mxu0 }
 0x4f4   :  { %v8235_v44 = vadd.f32 %v17076_v11, %v8203_v48  ;;  %v8204_v12 = vadd.f32 %v8140_v1, %v7987_v26  ;;  %10084 = vmatmul.mubr.msk.bf16.gmra.mrb[76].mxu0 %vm8325_vm0, %v8278_v31 }
 0x4f5   :  { %10087 = vmatprep.mubr.msk.bf16.mxu0 %vm17937_vm5, %v17760_v45  ;;  %v8145_v21 = vpop.f32.mrb[32].mxu1 }
 0x4f6   :  { %v8236_v53 = vadd.f32 %v17076_v11, %v8204_v12  ;;  %v8260_v8 = vmax.f32 %v8235_v44, 0.0  ;;  %v10033_v2 = vpop.f32.mrb[33].mxu1 }
 0x4f7   :  { %v7928_v62 = vpop.f32.mrb[32].mxu0  ;;  %v8148_v58 = vpop.f32.mrb[34].mxu1 }
 0x4f8   :  { %v8261_v4 = vmax.f32 %v8236_v53, 0.0  ;;  %v7988_v27 = vadd.f32 %v7928_v62, %v17025_v43  ;;  %v9979_v24 = vpop.f32.mrb[33].mxu0  ;;  %v10034_v23 = vpop.f32.mrb[35].mxu1 }
 0x4f9   :  { %v7931_v60 = vpop.f32.mrb[34].mxu0 }
 0x4fa   :  { %v8279_v33 = vpack.c.bf16 %v8261_v4, %v8260_v8  ;;  %v8205_v14 = vadd.f32 %v8145_v21, %v7988_v27  ;;  %v7989_v39 = vadd.f32 %v7931_v60, %v17028_v56  ;;  %v9980_v20 = vpop.f32.mrb[35].mxu0 }
 0x4fc   :  { %v8237_v19 = vadd.f32 %v17076_v11, %v8205_v14  ;;  %v8206_v54 = vadd.f32 %v8148_v58, %v7989_v39  ;;  %10088 = vmatmul.mubr.msk.bf16.gmra.mrb[80].mxu0 %vm8325_vm0, %v8279_v33 }
 0x4fd   :  { %10091 = vmatprep.mubr.msk.bf16.mxu0 %vm17937_vm5, %v17760_v45  ;;  %v8153_v35 = vpop.f32.mrb[36].mxu1 }
 0x4fe   :  { %v8238_v43 = vadd.f32 %v17076_v11, %v8206_v54  ;;  %v8262_v30 = vmax.f32 %v8237_v19, 0.0  ;;  %v10037_v56 = vpop.f32.mrb[37].mxu1 }
 0x4ff   :  { %v7936_v25 = vpop.f32.mrb[36].mxu0  ;;  %v8156_v52 = vpop.f32.mrb[38].mxu1 }
 0x500   :  { %v8263_v40 = vmax.f32 %v8238_v43, 0.0  ;;  %v7990_v22 = vadd.f32 %v7936_v25, %v17031_v0  ;;  %v9983_v17 = vpop.f32.mrb[37].mxu0  ;;  %v10038_v28 = vpop.f32.mrb[39].mxu1 }
 0x501   :  { %v7939_v9 = vpop.f32.mrb[38].mxu0 }
 0x502   :  { %v8280_v47 = vpack.c.bf16 %v8263_v40, %v8262_v30  ;;  %v8207_v55 = vadd.f32 %v8153_v35, %v7990_v22  ;;  %v7991_v3 = vadd.f32 %v7939_v9, %v17034_v16  ;;  %v9984_v50 = vpop.f32.mrb[39].mxu0 }
 0x504   :  { %v8239_v42 = vadd.f32 %v17076_v11, %v8207_v55  ;;  %v8208_v37 = vadd.f32 %v8156_v52, %v7991_v3  ;;  %10092 = vmatmul.mubr.msk.bf16.gmra.mrb[84].mxu0 %vm8325_vm0, %v8280_v47 }
 0x505   :  { %10095 = vmatprep.mubr.msk.bf16.mxu0 %vm17937_vm5, %v17760_v45  ;;  %v8161_v63 = vpop.f32.mrb[40].mxu1 }
 0x506   :  { %v8240_v0 = vadd.f32 %v17076_v11, %v8208_v37  ;;  %v8264_v7 = vmax.f32 %v8239_v42, 0.0  ;;  %v10041_v16 = vpop.f32.mrb[41].mxu1 }
 0x507   :  { %v7944_v18 = vpop.f32.mrb[40].mxu0  ;;  %v8164_v6 = vpop.f32.mrb[42].mxu1 }
 0x508   :  { %v8265_v61 = vmax.f32 %v8240_v0, 0.0  ;;  %v7992_v15 = vadd.f32 %v7944_v18, %v17037_v34  ;;  %v9987_v32 = vpop.f32.mrb[41].mxu0  ;;  %v10042_v31 = vpop.f32.mrb[43].mxu1 }
 0x509   :  { %v7947_v51 = vpop.f32.mrb[42].mxu0 }
 0x50a   :  { %v8281_v38 = vpack.c.bf16 %v8265_v61, %v8264_v7  ;;  %v8209_v29 = vadd.f32 %v8161_v63, %v7992_v15  ;;  %v7993_v57 = vadd.f32 %v7947_v51, %v17040_v5  ;;  %v9988_v1 = vpop.f32.mrb[43].mxu0 }
 0x50c   :  { %v8241_v48 = vadd.f32 %v17076_v11, %v8209_v29  ;;  %v8210_v26 = vadd.f32 %v8164_v6, %v7993_v57  ;;  %10096 = vmatmul.mubr.msk.bf16.gmra.mrb[88].mxu0 %vm8325_vm0, %v8281_v38 }
 0x50d   :  { %10099 = vmatprep.mubr.msk.bf16.mxu0 %vm17937_vm5, %v17760_v45  ;;  %v8169_v13 = vpop.f32.mrb[44].mxu1 }
 0x50e   :  { %v8242_v34 = vadd.f32 %v17076_v11, %v8210_v26  ;;  %v8266_v44 = vmax.f32 %v8241_v48, 0.0  ;;  %v10045_v5 = vpop.f32.mrb[45].mxu1 }
 0x50f   :  { %v7952_v10 = vpop.f32.mrb[44].mxu0  ;;  %v8172_v8 = vpop.f32.mrb[46].mxu1 }
 0x510   :  { %v8267_v12 = vmax.f32 %v8242_v34, 0.0  ;;  %v7994_v53 = vadd.f32 %v7952_v10, %v17043_v36  ;;  %v9991_v62 = vpop.f32.mrb[45].mxu0  ;;  %v10046_v60 = vpop.f32.mrb[47].mxu1 }
 0x511   :  { %v7955_v21 = vpop.f32.mrb[46].mxu0 }
 0x512   :  { %v8282_v4 = vpack.c.bf16 %v8267_v12, %v8266_v44  ;;  %v8211_v27 = vadd.f32 %v8169_v13, %v7994_v53  ;;  %v7995_v24 = vadd.f32 %v7955_v21, %v17046_v41  ;;  %v9992_v2 = vpop.f32.mrb[47].mxu0 }
 0x514   :  { %v8243_v58 = vadd.f32 %v17076_v11, %v8211_v27  ;;  %v8212_v33 = vadd.f32 %v8172_v8, %v7995_v24  ;;  %10100 = vmatmul.mubr.msk.bf16.gmra.mrb[92].mxu0 %vm8325_vm0, %v8282_v4 }
 0x515   :  { %10103 = vmatprep.mubr.msk.bf16.mxu0 %vm17937_vm5, %v17760_v45  ;;  %v8177_v39 = vpop.f32.mrb[48].mxu1 }
 0x516   :  { %v8244_v36 = vadd.f32 %v17076_v11, %v8212_v33  ;;  %v8268_v20 = vmax.f32 %v8243_v58, 0.0  ;;  %v10049_v41 = vpop.f32.mrb[49].mxu1 }
 0x517   :  { %v7960_v14 = vpop.f32.mrb[48].mxu0  ;;  %v8180_v25 = vpop.f32.mrb[50].mxu1 }
 0x518   :  { %v8269_v23 = vmax.f32 %v8244_v36, 0.0  ;;  %v7996_v19 = vadd.f32 %v7960_v14, %v17056_v49  ;;  %v9995_v54 = vpop.f32.mrb[49].mxu0  ;;  %v10050_v17 = vpop.f32.mrb[51].mxu1 }
 0x519   :  { %v7963_v43 = vpop.f32.mrb[50].mxu0 }
 0x51a   :  { %v8283_v35 = vpack.c.bf16 %v8269_v23, %v8268_v20  ;;  %v8213_v30 = vadd.f32 %v8177_v39, %v7996_v19  ;;  %v7997_v40 = vadd.f32 %v7963_v43, %v17062_v59  ;;  %v9996_v22 = vpop.f32.mrb[51].mxu0 }
 0x51c   :  { %v8245_v56 = vadd.f32 %v17076_v11, %v8213_v30  ;;  %v8214_v9 = vadd.f32 %v8180_v25, %v7997_v40  ;;  %10104 = vmatmul.mubr.msk.bf16.gmra.mrb[96].mxu0 %vm8325_vm0, %v8283_v35 }
 0x51d   :  { %10107 = vmatprep.mubr.msk.bf16.mxu0 %vm17937_vm5, %v17760_v45  ;;  %v8185_v47 = vpop.f32.mrb[52].mxu1 }
 0x51e   :  { %v8246_v49 = vadd.f32 %v17076_v11, %v8214_v9  ;;  %v8270_v55 = vmax.f32 %v8245_v56, 0.0  ;;  %v10053_v59 = vpop.f32.mrb[53].mxu1 }
 0x51f   :  { %v7968_v52 = vpop.f32.mrb[52].mxu0  ;;  %v8188_v37 = vpop.f32.mrb[54].mxu1 }
 0x520   :  { %v8271_v3 = vmax.f32 %v8246_v49, 0.0  ;;  %v7998_v50 = vadd.f32 %v7968_v52, %v17070_v46  ;;  %v9999_v28 = vpop.f32.mrb[53].mxu0  ;;  %v10054_v7 = vpop.f32.mrb[55].mxu1  ;;  %v17167_v46 = vld [vmem:[%s17380_s18] ss:$0 sm:$0xff] }
 0x521   :  { %v7971_v42 = vpop.f32.mrb[54].mxu0 }
 0x522   :  { %v8284_v0 = vpack.c.bf16 %v8271_v3, %v8270_v55  ;;  %v8215_v18 = vadd.f32 %v8185_v47, %v7998_v50  ;;  %v10000_v63 = vpop.f32.mrb[55].mxu0 }
 0x524   :  { %v8247_v61 = vadd.f32 %v17076_v11, %v8215_v18  ;;  %10108 = vmatmul.mubr.msk.bf16.gmra.mrb[100].mxu0 %vm8325_vm0, %v8284_v0 }
 0x525   :  { %10111 = vmatprep.mubr.msk.bf16.mxu0 %vm17937_vm5, %v17760_v45 }
 0x526   :  { %v8272_v15 = vmax.f32 %v8247_v61, 0.0 }
 0x528   :  { %v8285_v32 = vpack.c.bf16 %v8272_v15, %v8272_v15 }
 0x52c   :  { %10112 = vmatmul.mubr.msk.bf16.gmra.mrb[104].mxu0 %vm8325_vm0, %v8285_v32 }
 0x59f   :  { %v8399_v16 = vpop.f32.mrb[56].mxu0 }
 0x5a0   :  { %v8400_v51 = vadd.f32 %v17167_v46, %v8399_v16  ;;  %v10065_v6 = vpop.f32.mrb[57].mxu0 }
 0x5a1   :  { %v8402_v38 = vpop.f32.mrb[58].mxu0 }
 0x5a2   :  { %v8403_v11 = vadd.f32 %v17167_v46, %v8402_v38  ;;  %v10066_v29 = vpop.f32.mrb[59].mxu0  ;;  %v8501_v57 = vmax.f32 %v8400_v51, 0.0 }
 0x5a4   :  { %v8502_v1 = vmax.f32 %v8403_v11, 0.0 }
 0x5a6   :  { %v8526_v31 = vpack.c.bf16 %v8502_v1, %v8501_v57 }
 0x5a7   :  { %v8407_v48 = vpop.f32.mrb[60].mxu0 }
 0x5a8   :  { %v8408_v26 = vadd.f32 %v17167_v46, %v8407_v48  ;;  %v10069_v34 = vpop.f32.mrb[61].mxu0  ;;  %10124 = vmatmul.mubr.msk.bf16.vlgmr.msra.gmra.mrb[56].mxu1 %vm8325_vm0, %v8526_v31 }
 0x5a9   :  { %v8410_v10 = vpop.f32.mrb[62].mxu0  ;;  %10127 = vmatprep.mubr.msk.bf16.mxu1 %vm17937_vm5, %v17760_v45 }
 0x5aa   :  { %v8411_v13 = vadd.f32 %v17167_v46, %v8410_v10  ;;  %v10070_v44 = vpop.f32.mrb[63].mxu0  ;;  %v8503_v12 = vmax.f32 %v8408_v26, 0.0 }
 0x5ac   :  { %v8504_v53 = vmax.f32 %v8411_v13, 0.0 }
 0x5ae   :  { %v8527_v62 = vpack.c.bf16 %v8504_v53, %v8503_v12 }
 0x5af   :  { %v8415_v5 = vpop.f32.mrb[64].mxu0 }
 0x5b0   :  { %v8416_v21 = vadd.f32 %v17167_v46, %v8415_v5  ;;  %v10073_v8 = vpop.f32.mrb[65].mxu0  ;;  %10128 = vmatmul.mubr.msk.bf16.gmra.mrb[60].mxu1 %vm8325_vm0, %v8527_v62 }
 0x5b1   :  { %v8418_v4 = vpop.f32.mrb[66].mxu0  ;;  %10131 = vmatprep.mubr.msk.bf16.mxu1 %vm17937_vm5, %v17760_v45 }
 0x5b2   :  { %v8419_v27 = vadd.f32 %v17167_v46, %v8418_v4  ;;  %v10074_v24 = vpop.f32.mrb[67].mxu0  ;;  %v8505_v2 = vmax.f32 %v8416_v21, 0.0 }
 0x5b4   :  { %v8506_v60 = vmax.f32 %v8419_v27, 0.0 }
 0x5b6   :  { %v8528_v58 = vpack.c.bf16 %v8506_v60, %v8505_v2 }
 0x5b7   :  { %v8423_v33 = vpop.f32.mrb[68].mxu0 }
 0x5b8   :  { %v8424_v36 = vadd.f32 %v17167_v46, %v8423_v33  ;;  %v10077_v14 = vpop.f32.mrb[69].mxu0  ;;  %10132 = vmatmul.mubr.msk.bf16.gmra.mrb[64].mxu1 %vm8325_vm0, %v8528_v58 }
 0x5b9   :  { %v8426_v39 = vpop.f32.mrb[70].mxu0  ;;  %10135 = vmatprep.mubr.msk.bf16.mxu1 %vm17937_vm5, %v17760_v45 }
 0x5ba   :  { %v8427_v20 = vadd.f32 %v17167_v46, %v8426_v39  ;;  %v10078_v23 = vpop.f32.mrb[71].mxu0  ;;  %v8507_v19 = vmax.f32 %v8424_v36, 0.0 }
 0x5bc   :  { %v8508_v54 = vmax.f32 %v8427_v20, 0.0 }
 0x5be   :  { %v8529_v41 = vpack.c.bf16 %v8508_v54, %v8507_v19 }
 0x5bf   :  { %v8431_v43 = vpop.f32.mrb[72].mxu0 }
 0x5c0   :  { %v8432_v25 = vadd.f32 %v17167_v46, %v8431_v43  ;;  %v10081_v35 = vpop.f32.mrb[73].mxu0  ;;  %10136 = vmatmul.mubr.msk.bf16.gmra.mrb[68].mxu1 %vm8325_vm0, %v8529_v41 }
 0x5c1   :  { %v8434_v30 = vpop.f32.mrb[74].mxu0  ;;  %10139 = vmatprep.mubr.msk.bf16.mxu1 %vm17937_vm5, %v17760_v45 }
 0x5c2   :  { %v8435_v40 = vadd.f32 %v17167_v46, %v8434_v30  ;;  %v10082_v22 = vpop.f32.mrb[75].mxu0  ;;  %v8509_v17 = vmax.f32 %v8432_v25, 0.0 }
 0x5c4   :  { %v8510_v56 = vmax.f32 %v8435_v40, 0.0 }
 0x5c6   :  { %v8530_v9 = vpack.c.bf16 %v8510_v56, %v8509_v17 }
 0x5c7   :  { %v8439_v49 = vpop.f32.mrb[76].mxu0 }
 0x5c8   :  { %v8440_v52 = vadd.f32 %v17167_v46, %v8439_v49  ;;  %v10085_v47 = vpop.f32.mrb[77].mxu0  ;;  %10140 = vmatmul.mubr.msk.bf16.gmra.mrb[72].mxu1 %vm8325_vm0, %v8530_v9 }
 0x5c9   :  { %v8442_v55 = vpop.f32.mrb[78].mxu0  ;;  %10143 = vmatprep.mubr.msk.bf16.mxu1 %vm17937_vm5, %v17760_v45 }
 0x5ca   :  { %v8443_v3 = vadd.f32 %v17167_v46, %v8442_v55  ;;  %v10086_v50 = vpop.f32.mrb[79].mxu0  ;;  %v8511_v28 = vmax.f32 %v8440_v52, 0.0 }
 0x5cc   :  { %v8512_v59 = vmax.f32 %v8443_v3, 0.0 }
 0x5ce   :  { %v8531_v42 = vpack.c.bf16 %v8512_v59, %v8511_v28 }
 0x5cf   :  { %v8447_v37 = vpop.f32.mrb[80].mxu0 }
 0x5d0   :  { %v8448_v0 = vadd.f32 %v17167_v46, %v8447_v37  ;;  %v10089_v18 = vpop.f32.mrb[81].mxu0  ;;  %10144 = vmatmul.mubr.msk.bf16.gmra.mrb[76].mxu1 %vm8325_vm0, %v8531_v42  ;;  %v17234_v42 = vld [vmem:[%s17381_s20] ss:$0 sm:$0xff] }
 0x5d1   :  { %v8450_v63 = vpop.f32.mrb[82].mxu0  ;;  %10147 = vmatprep.mubr.msk.bf16.mxu1 %vm17937_vm5, %v17760_v45 }
 0x5d2   :  { %v8451_v7 = vadd.f32 %v17167_v46, %v8450_v63  ;;  %v10090_v61 = vpop.f32.mrb[83].mxu0  ;;  %v8513_v15 = vmax.f32 %v8448_v0, 0.0 }
 0x5d4   :  { %v8514_v32 = vmax.f32 %v8451_v7, 0.0 }
 0x5d6   :  { %v8532_v16 = vpack.c.bf16 %v8514_v32, %v8513_v15 }
 0x5d7   :  { %v8455_v51 = vpop.f32.mrb[84].mxu0 }
 0x5d8   :  { %v8456_v6 = vadd.f32 %v17167_v46, %v8455_v51  ;;  %v10093_v38 = vpop.f32.mrb[85].mxu0  ;;  %10148 = vmatmul.mubr.msk.bf16.gmra.mrb[80].mxu1 %vm8325_vm0, %v8532_v16 }
 0x5d9   :  { %v8458_v11 = vpop.f32.mrb[86].mxu0  ;;  %10151 = vmatprep.mubr.msk.bf16.mxu1 %vm17937_vm5, %v17760_v45 }
 0x5da   :  { %v8459_v29 = vadd.f32 %v17167_v46, %v8458_v11  ;;  %v10094_v57 = vpop.f32.mrb[87].mxu0  ;;  %v8515_v1 = vmax.f32 %v8456_v6, 0.0 }
 0x5dc   :  { %v8516_v31 = vmax.f32 %v8459_v29, 0.0 }
 0x5de   :  { %v8533_v48 = vpack.c.bf16 %v8516_v31, %v8515_v1 }
 0x5df   :  { %v8463_v26 = vpop.f32.mrb[88].mxu0 }
 0x5e0   :  { %v8464_v34 = vadd.f32 %v17167_v46, %v8463_v26  ;;  %v10097_v10 = vpop.f32.mrb[89].mxu0  ;;  %10152 = vmatmul.mubr.msk.bf16.gmra.mrb[84].mxu1 %vm8325_vm0, %v8533_v48 }
 0x5e1   :  { %v8466_v13 = vpop.f32.mrb[90].mxu0  ;;  %10155 = vmatprep.mubr.msk.bf16.mxu1 %vm17937_vm5, %v17760_v45 }
 0x5e2   :  { %v8467_v44 = vadd.f32 %v17167_v46, %v8466_v13  ;;  %v10098_v12 = vpop.f32.mrb[91].mxu0  ;;  %v8517_v53 = vmax.f32 %v8464_v34, 0.0 }
 0x5e4   :  { %v8518_v62 = vmax.f32 %v8467_v44, 0.0 }
 0x5e6   :  { %v8534_v5 = vpack.c.bf16 %v8518_v62, %v8517_v53 }
 0x5e7   :  { %v8471_v21 = vpop.f32.mrb[92].mxu0 }
 0x5e8   :  { %v8472_v8 = vadd.f32 %v17167_v46, %v8471_v21  ;;  %v10101_v4 = vpop.f32.mrb[93].mxu0  ;;  %10156 = vmatmul.mubr.msk.bf16.gmra.mrb[88].mxu1 %vm8325_vm0, %v8534_v5 }
 0x5e9   :  { %v8474_v27 = vpop.f32.mrb[94].mxu0  ;;  %10159 = vmatprep.mubr.msk.bf16.mxu1 %vm17937_vm5, %v17760_v45 }
 0x5ea   :  { %v8475_v24 = vadd.f32 %v17167_v46, %v8474_v27  ;;  %v10102_v2 = vpop.f32.mrb[95].mxu0  ;;  %v8519_v60 = vmax.f32 %v8472_v8, 0.0 }
 0x5ec   :  { %v8520_v58 = vmax.f32 %v8475_v24, 0.0 }
 0x5ee   :  { %v8535_v33 = vpack.c.bf16 %v8520_v58, %v8519_v60 }
 0x5ef   :  { %v8479_v36 = vpop.f32.mrb[96].mxu0 }
 0x5f0   :  { %v8480_v14 = vadd.f32 %v17167_v46, %v8479_v36  ;;  %v10105_v39 = vpop.f32.mrb[97].mxu0  ;;  %10160 = vmatmul.mubr.msk.bf16.gmra.mrb[92].mxu1 %vm8325_vm0, %v8535_v33 }
 0x5f1   :  { %v8482_v20 = vpop.f32.mrb[98].mxu0  ;;  %10163 = vmatprep.mubr.msk.bf16.mxu1 %vm17937_vm5, %v17760_v45 }
 0x5f2   :  { %v8483_v23 = vadd.f32 %v17167_v46, %v8482_v20  ;;  %v10106_v19 = vpop.f32.mrb[99].mxu0  ;;  %v8521_v54 = vmax.f32 %v8480_v14, 0.0 }
 0x5f4   :  { %v8522_v41 = vmax.f32 %v8483_v23, 0.0 }
 0x5f6   :  { %v8536_v43 = vpack.c.bf16 %v8522_v41, %v8521_v54 }
 0x5f7   :  { %v8487_v25 = vpop.f32.mrb[100].mxu0 }
 0x5f8   :  { %v8488_v35 = vadd.f32 %v17167_v46, %v8487_v25  ;;  %v10109_v30 = vpop.f32.mrb[101].mxu0  ;;  %10164 = vmatmul.mubr.msk.bf16.gmra.mrb[96].mxu1 %vm8325_vm0, %v8536_v43 }
 0x5f9   :  { %v8490_v40 = vpop.f32.mrb[102].mxu0  ;;  %10167 = vmatprep.mubr.msk.bf16.mxu1 %vm17937_vm5, %v17760_v45 }
 0x5fa   :  { %v8491_v22 = vadd.f32 %v17167_v46, %v8490_v40  ;;  %v10110_v17 = vpop.f32.mrb[103].mxu0  ;;  %v8523_v56 = vmax.f32 %v8488_v35, 0.0 }
 0x5fc   :  { %v8524_v9 = vmax.f32 %v8491_v22, 0.0 }
 0x5fe   :  { %v8537_v49 = vpack.c.bf16 %v8524_v9, %v8523_v56 }
 0x5ff   :  { %v8495_v52 = vpop.f32.mrb[104].mxu0 }
 0x600   :  { %v8496_v47 = vadd.f32 %v17167_v46, %v8495_v52  ;;  %v10113_v55 = vpop.f32.mrb[105].mxu0  ;;  %10168 = vmatmul.mubr.msk.bf16.gmra.mrb[100].mxu1 %vm8325_vm0, %v8537_v49 }
 0x601   :  { %v8498_v3 = vpop.f32.mrb[106].mxu0  ;;  %10171 = vmatprep.mubr.msk.bf16.mxu1 %vm17937_vm5, %v17760_v45  ;;  %vm18693_vm5 = vmmov %vm18654_vm1 }
 0x602   :  { %v8525_v50 = vmax.f32 %v8496_v47, 0.0  ;;  %v10114_v28 = vpop.f32.mrb[107].mxu0 }
 0x604   :  { %v8538_v59 = vpack.c.bf16 %v8525_v50, %v8525_v50 }
 0x608   :  { %10172 = vmatmul.mubr.msk.bf16.gmra.mrb[104].mxu1 %vm8325_vm0, %v8538_v59  ;;  %vm18707_vm0 = vmmov %vm18654_vm1 }
 0x67b   :  { %v8651_v37 = vpop.f32.mrb[56].mxu1 }
 0x67c   :  { %v8652_v46 = vadd.f32 %v17234_v42, %v8651_v37  ;;  %v10125_v0 = vpop.f32.mrb[57].mxu1 }
 0x67d   :  { %v8654_v18 = vpop.f32.mrb[58].mxu1 }
 0x67e   :  { %10394 = vtanh.f32 %v8652_v46  ;;  %v8655_v63 = vadd.f32 %v17234_v42, %v8654_v18  ;;  %v10126_v7 = vpop.f32.mrb[59].mxu1 }
 0x680   :  { %10396 = vtanh.f32 %v8655_v63 }
 0x683   :  { %v8659_v45 = vpop.f32.mrb[60].mxu1 }
 0x684   :  { %v8660_v61 = vadd.f32 %v17234_v42, %v8659_v45  ;;  %v10129_v15 = vpop.f32.mrb[61].mxu1 }
 0x685   :  { %v8662_v32 = vpop.f32.mrb[62].mxu1 }
 0x686   :  { %10398 = vtanh.f32 %v8660_v61  ;;  %v8663_v16 = vadd.f32 %v17234_v42, %v8662_v32  ;;  %v10130_v51 = vpop.f32.mrb[63].mxu1 }
 0x688   :  { %v10395_v6 = vpop.eup %10394  ;;  %10400 = vtanh.f32 %v8663_v16 }
 0x689   :  { %8778 = vst.msk [vmem:[%s17382_s21] sm:$0xff] %vm18693_vm5, %v10395_v6  ;;  %vm18708_vm5 = vmmov %vm18707_vm0 }
 0x68a   :  { %v10397_v38 = vpop.eup %10396 }
 0x68b   :  { %8779 = vst.msk [vmem:[%s17382_s21 + $0x8] sm:$0xff] %vm18654_vm1, %v10397_v38  ;;  %v8667_v11 = vpop.f32.mrb[64].mxu1  ;;  %vm18709_vm1 = vmmov %vm18707_vm0 }
 0x68c   :  { %v8668_v29 = vadd.f32 %v17234_v42, %v8667_v11  ;;  %v10133_v57 = vpop.f32.mrb[65].mxu1 }
 0x68d   :  { %v8670_v1 = vpop.f32.mrb[66].mxu1 }
 0x68e   :  { %10402 = vtanh.f32 %v8668_v29  ;;  %v8671_v31 = vadd.f32 %v17234_v42, %v8670_v1  ;;  %v10134_v48 = vpop.f32.mrb[67].mxu1 }
 0x690   :  { %v10399_v26 = vpop.eup %10398  ;;  %10404 = vtanh.f32 %v8671_v31 }
 0x691   :  { %8780 = vst.msk [vmem:[%s17382_s21 + $0x10] sm:$0xff] %vm18694_vm8, %v10399_v26  ;;  %vm18710_vm8 = vmmov %vm18707_vm0 }
 0x692   :  { %v10401_v34 = vpop.eup %10400 }
 0x693   :  { %8781 = vst.msk [vmem:[%s17382_s21 + $0x18] sm:$0xff] %vm18695_vm11, %v10401_v34  ;;  %v8675_v10 = vpop.f32.mrb[68].mxu1  ;;  %vm18711_vm11 = vmmov %vm18707_vm0 }
 0x694   :  { %v8676_v13 = vadd.f32 %v17234_v42, %v8675_v10  ;;  %v10137_v44 = vpop.f32.mrb[69].mxu1 }
 0x695   :  { %v8678_v12 = vpop.f32.mrb[70].mxu1 }
 0x696   :  { %10406 = vtanh.f32 %v8676_v13  ;;  %v8679_v53 = vadd.f32 %v17234_v42, %v8678_v12  ;;  %v10138_v62 = vpop.f32.mrb[71].mxu1 }
 0x698   :  { %v10403_v5 = vpop.eup %10402  ;;  %10408 = vtanh.f32 %v8679_v53 }
 0x699   :  { %8782 = vst.msk [vmem:[%s17382_s21 + $0x20] sm:$0xff] %vm18696_vm7, %v10403_v5  ;;  %vm18712_vm7 = vmmov %vm18707_vm0 }
 0x69a   :  { %v10405_v21 = vpop.eup %10404 }
 0x69b   :  { %8783 = vst.msk [vmem:[%s17382_s21 + $0x28] sm:$0xff] %vm18697_vm14, %v10405_v21  ;;  %v8683_v8 = vpop.f32.mrb[72].mxu1  ;;  %vm18713_vm14 = vmmov %vm18707_vm0 }
 0x69c   :  { %v8684_v4 = vadd.f32 %v17234_v42, %v8683_v8  ;;  %v10141_v27 = vpop.f32.mrb[73].mxu1 }
 0x69d   :  { %v8686_v24 = vpop.f32.mrb[74].mxu1 }
 0x69e   :  { %10410 = vtanh.f32 %v8684_v4  ;;  %v8687_v2 = vadd.f32 %v17234_v42, %v8686_v24  ;;  %v10142_v60 = vpop.f32.mrb[75].mxu1 }
 0x6a0   :  { %v10407_v58 = vpop.eup %10406  ;;  %10412 = vtanh.f32 %v8687_v2 }
 0x6a1   :  { %8784 = vst.msk [vmem:[%s17382_s21 + $0x30] sm:$0xff] %vm18698_vm15, %v10407_v58  ;;  %vm18714_vm15 = vmmov %vm18707_vm0 }
 0x6a2   :  { %v10409_v33 = vpop.eup %10408 }
 0x6a3   :  { %8785 = vst.msk [vmem:[%s17382_s21 + $0x38] sm:$0xff] %vm18699_vm2, %v10409_v33  ;;  %v8691_v36 = vpop.f32.mrb[76].mxu1  ;;  %vm18715_vm2 = vmmov %vm18707_vm0 }
 0x6a4   :  { %v8692_v14 = vadd.f32 %v17234_v42, %v8691_v36  ;;  %v10145_v39 = vpop.f32.mrb[77].mxu1 }
 0x6a5   :  { %v8694_v20 = vpop.f32.mrb[78].mxu1 }
 0x6a6   :  { %10414 = vtanh.f32 %v8692_v14  ;;  %v8695_v23 = vadd.f32 %v17234_v42, %v8694_v20  ;;  %v10146_v19 = vpop.f32.mrb[79].mxu1 }
 0x6a8   :  { %v10411_v54 = vpop.eup %10410  ;;  %10416 = vtanh.f32 %v8695_v23 }
 0x6a9   :  { %8786 = vst.msk [vmem:[%s17382_s21 + $0x40] sm:$0xff] %vm18700_vm4, %v10411_v54  ;;  %vm18716_vm4 = vmmov %vm18707_vm0 }
 0x6aa   :  { %v10413_v41 = vpop.eup %10412 }
 0x6ab   :  { %8787 = vst.msk [vmem:[%s17382_s21 + $0x48] sm:$0xff] %vm18701_vm6, %v10413_v41  ;;  %v8699_v43 = vpop.f32.mrb[80].mxu1 }
 0x6ac   :  { %v8700_v25 = vadd.f32 %v17234_v42, %v8699_v43  ;;  %v10149_v35 = vpop.f32.mrb[81].mxu1 }
 0x6ad   :  { %v8702_v30 = vpop.f32.mrb[82].mxu1 }
 0x6ae   :  { %10418 = vtanh.f32 %v8700_v25  ;;  %v8703_v40 = vadd.f32 %v17234_v42, %v8702_v30  ;;  %v10150_v22 = vpop.f32.mrb[83].mxu1 }
 0x6b0   :  { %v10415_v17 = vpop.eup %10414  ;;  %10420 = vtanh.f32 %v8703_v40 }
 0x6b1   :  { %8788 = vst.msk [vmem:[%s17382_s21 + $0x50] sm:$0xff] %vm18702_vm9, %v10415_v17 }
 0x6b2   :  { %v10417_v56 = vpop.eup %10416 }
 0x6b3   :  { %8789 = vst.msk [vmem:[%s17382_s21 + $0x58] sm:$0xff] %vm18703_vm3, %v10417_v56  ;;  %v8707_v9 = vpop.f32.mrb[84].mxu1 }
 0x6b4   :  { %v8708_v49 = vadd.f32 %v17234_v42, %v8707_v9  ;;  %v10153_v52 = vpop.f32.mrb[85].mxu1 }
 0x6b5   :  { %v8710_v47 = vpop.f32.mrb[86].mxu1 }
 0x6b6   :  { %10422 = vtanh.f32 %v8708_v49  ;;  %v8711_v55 = vadd.f32 %v17234_v42, %v8710_v47  ;;  %v10154_v3 = vpop.f32.mrb[87].mxu1 }
 0x6b8   :  { %v10419_v50 = vpop.eup %10418  ;;  %10424 = vtanh.f32 %v8711_v55 }
 0x6b9   :  { %8790 = vst.msk [vmem:[%s17382_s21 + $0x60] sm:$0xff] %vm18704_vm13, %v10419_v50 }
 0x6ba   :  { %v10421_v28 = vpop.eup %10420 }
 0x6bb   :  { %8791 = vst.msk [vmem:[%s17382_s21 + $0x68] sm:$0xff] %vm18705_vm10, %v10421_v28  ;;  %v8715_v59 = vpop.f32.mrb[88].mxu1 }
 0x6bc   :  { %v8716_v37 = vadd.f32 %v17234_v42, %v8715_v59  ;;  %v10157_v46 = vpop.f32.mrb[89].mxu1 }
 0x6bd   :  { %v8718_v0 = vpop.f32.mrb[90].mxu1 }
 0x6be   :  { %10426 = vtanh.f32 %v8716_v37  ;;  %v8719_v18 = vadd.f32 %v17234_v42, %v8718_v0  ;;  %v10158_v63 = vpop.f32.mrb[91].mxu1 }
 0x6c0   :  { %v10423_v7 = vpop.eup %10422  ;;  %10428 = vtanh.f32 %v8719_v18 }
 0x6c1   :  { %8792 = vst.msk [vmem:[%s17382_s21 + $0x70] sm:$0xff] %vm18706_vm12, %v10423_v7 }
 0x6c2   :  { %v10425_v45 = vpop.eup %10424 }
 0x6c3   :  { %8793 = vst.msk [vmem:[%s17382_s21 + $0x78] sm:$0xff] %vm18707_vm0, %v10425_v45  ;;  %v8723_v61 = vpop.f32.mrb[92].mxu1 }
 0x6c4   :  { %v8724_v15 = vadd.f32 %v17234_v42, %v8723_v61  ;;  %v10161_v32 = vpop.f32.mrb[93].mxu1 }
 0x6c5   :  { %v8726_v16 = vpop.f32.mrb[94].mxu1 }
 0x6c6   :  { %10430 = vtanh.f32 %v8724_v15  ;;  %v8727_v51 = vadd.f32 %v17234_v42, %v8726_v16  ;;  %v10162_v6 = vpop.f32.mrb[95].mxu1 }
 0x6c8   :  { %v10427_v38 = vpop.eup %10426  ;;  %10432 = vtanh.f32 %v8727_v51 }
 0x6c9   :  { %8794 = vst.msk [vmem:[%s17382_s21 + $0x80] sm:$0xff] %vm18708_vm5, %v10427_v38 }
 0x6ca   :  { %v10429_v11 = vpop.eup %10428 }
 0x6cb   :  { %8795 = vst.msk [vmem:[%s17382_s21 + $0x88] sm:$0xff] %vm18709_vm1, %v10429_v11  ;;  %v8731_v29 = vpop.f32.mrb[96].mxu1 }
 0x6cc   :  { %v8732_v57 = vadd.f32 %v17234_v42, %v8731_v29  ;;  %v10165_v1 = vpop.f32.mrb[97].mxu1 }
 0x6cd   :  { %v8734_v31 = vpop.f32.mrb[98].mxu1 }
 0x6ce   :  { %10434 = vtanh.f32 %v8732_v57  ;;  %v8735_v48 = vadd.f32 %v17234_v42, %v8734_v31  ;;  %v10166_v26 = vpop.f32.mrb[99].mxu1 }
 0x6d0   :  { %v10431_v34 = vpop.eup %10430  ;;  %10436 = vtanh.f32 %v8735_v48 }
 0x6d1   :  { %8796 = vst.msk [vmem:[%s17382_s21 + $0x90] sm:$0xff] %vm18710_vm8, %v10431_v34 }
 0x6d2   :  { %v10433_v10 = vpop.eup %10432 }
 0x6d3   :  { %8797 = vst.msk [vmem:[%s17382_s21 + $0x98] sm:$0xff] %vm18711_vm11, %v10433_v10  ;;  %v8739_v13 = vpop.f32.mrb[100].mxu1 }
 0x6d4   :  { %v8740_v44 = vadd.f32 %v17234_v42, %v8739_v13  ;;  %v10169_v12 = vpop.f32.mrb[101].mxu1 }
 0x6d5   :  { %v8742_v53 = vpop.f32.mrb[102].mxu1 }
 0x6d6   :  { %10438 = vtanh.f32 %v8740_v44  ;;  %v8743_v62 = vadd.f32 %v17234_v42, %v8742_v53  ;;  %v10170_v5 = vpop.f32.mrb[103].mxu1 }
 0x6d8   :  { %v10435_v21 = vpop.eup %10434  ;;  %10440 = vtanh.f32 %v8743_v62 }
 0x6d9   :  { %8798 = vst.msk [vmem:[%s17382_s21 + $0xa0] sm:$0xff] %vm18712_vm7, %v10435_v21 }
 0x6da   :  { %v10437_v8 = vpop.eup %10436 }
 0x6db   :  { %8799 = vst.msk [vmem:[%s17382_s21 + $0xa8] sm:$0xff] %vm18713_vm14, %v10437_v8  ;;  %v8747_v4 = vpop.f32.mrb[104].mxu1 }
 0x6dc   :  { %v8748_v27 = vadd.f32 %v17234_v42, %v8747_v4  ;;  %v10173_v24 = vpop.f32.mrb[105].mxu1 }
 0x6dd   :  { %v8750_v2 = vpop.f32.mrb[106].mxu1 }
 0x6de   :  { %10442 = vtanh.f32 %v8748_v27  ;;  %v10174_v60 = vpop.f32.mrb[107].mxu1 }
 0x6e0   :  { %v10439_v58 = vpop.eup %10438 }
 0x6e1   :  { %8800 = vst.msk [vmem:[%s17382_s21 + $0xb0] sm:$0xff] %vm18714_vm15, %v10439_v58 }
 0x6e2   :  { %v10441_v33 = vpop.eup %10440 }
 0x6e3   :  { %8801 = vst.msk [vmem:[%s17382_s21 + $0xb8] sm:$0xff] %vm18715_vm2, %v10441_v33 }
 0x6e8   :  { %v10443_v36 = vpop.eup %10442 }
 0x6e9   :  { %8802 = vst.msk [vmem:[%s17382_s21 + $0xc0] sm:$0xff] %vm18716_vm4, %v10443_v36 }

// kernel: _forward.1
= control target key start
LH: loop header
LB: loop body
LE: loop exit
PB: predicated region body
PF: predicated region fallthrough
CT: control target
= control target key end

     0   :  { %vm177_vm0 = vcmask 1044480   ;;  %vm360_vm1 = vcmask 1040384   ;;  %v2181_v0 = vmov 0.0   ;;  %v2182_v2 = vmov 65535   ;;  %s3109_s5 = inlined_call_operand.vmem [shape: bf16[27,64], index: 5, kind: input, shape index: {}]   ;;  %s3110_s4 = inlined_call_operand.vmem [shape: bf16[3,64], index: 4, kind: input, shape index: {}]   ;;  %s3111_s6 = inlined_call_operand.vmem [shape: bf16[3,64], index: 6, kind: input, shape index: {}]   ;;  %s3112_s0 = inlined_call_operand.vmem [shape: f32[200,3], index: 0, kind: input, shape index: {}]   ;;  %s3113_s1 = inlined_call_operand.vmem [shape: f32[200,27], index: 1, kind: input, shape index: {}]   ;;  %s3114_s7 = inlined_call_operand.vmem [shape: bf16[32,64], index: 7, kind: input, shape index: {}]   ;;  %s3115_s2 = inlined_call_operand.vmem [shape: f32[200,3], index: 2, kind: input, shape index: {}]   ;;  %s3116_s3 = inlined_call_operand.vmem [shape: f32[200,32], index: 3, kind: input, shape index: {}]   ;;  %s3117_s9 = inlined_call_operand.vmem [shape: bf16[64,64], index: 9, kind: input, shape index: {}]   ;;  %s3118_s11 = inlined_call_operand.vmem [shape: bf16[64,3], index: 11, kind: input, shape index: {}]   ;;  %s3119_s8 = inlined_call_operand.vmem [shape: f32[1,64], index: 8, kind: input, shape index: {}]   ;;  %s3120_s10 = inlined_call_operand.vmem [shape: f32[1,64], index: 10, kind: input, shape index: {}]   ;;  %s3121_s12 = inlined_call_operand.vmem [shape: f32[1,3], index: 12, kind: input, shape index: {}]   ;;  %s3122_s13 = inlined_call_operand.vmem [shape: f32[200,3], index: 13, kind: output, shape index: {}]  }
   0x1   :  { %1776 = vmatprep.subr.bf16.mxu0 %v2181_v0  ;;  %v2119_v1 = vld [vmem:[%s3109_s5] sm:$0xff]   ;;  %1832 = vmatprep.subr.bf16.mxu1 %v2181_v0  ;;  %v179_v3 = vsel %vm177_vm0, 4294967295, %v2182_v2  ;;  %vm361_vm2 = vcmask 1041408   ;;  %v362_v5 = vsel %vm360_vm1, 4294967295, %v2182_v2  ;;  %vm2183_vm3 = vmmov 0   ;;  %v46_v11 = vld [vmem:[%s3112_s0 + $0x8] sm:$0xff] }
   0x2   :  { %v83_v4 = vld [vmem:[%s3110_s4] sm:$0x3]  ;;  %1777 = vmatpush3.bf16.msra.mxu0 %v2119_v1  ;;  %v363_v7 = vsel %vm361_vm2, %v362_v5, 0  ;;  %1834 = vmatprep.mubr.msk.bf16.mxu1 %vm2183_vm3, %v2181_v0  ;;  %v2120_v9 = vld [vmem:[%s3109_s5 + $0x8] sm:$0x3f]   ;;  %vm178_vm4 = vcmask 1045504  }
   0x3   :  { %v541_v6 = vld [vmem:[%s3111_s6] sm:$0x3]  ;;  %v365_v8 = vand.u32 %v363_v7, %v83_v4  ;;  %1778 = vmatprep.subr.bf16.mxu0 %v2181_v0  ;;  %v180_v12 = vsel %vm178_vm4, %v179_v3, 0  ;;  %1780 = vmatprep.mubr.msk.bf16.mxu0 %vm2183_vm3, %v2181_v0  ;;  %v85_v15 = vld [vmem:[%s3113_s1 + $0x8] sm:$0xff]  ;;  %vm320_vm5 = vcmask 23552   ;;  %vm137_vm6 = vcmask 220160  }
   0x4   :  { %v45_v10 = vld [vmem:[%s3112_s0] sm:$0xff]  ;;  %v582_v16 = vand.u32 %v541_v6, %v363_v7  ;;  %v182_v17 = vand.u32 %v2120_v9, %v180_v12  ;;  %v47_v20 = vld [vmem:[%s3112_s0 + $0x10] sm:$0xff]  ;;  %v48_v21 = vld [vmem:[%s3112_s0 + $0x18] sm:$0xff]  ;;  %vm799_vm7 = vcmask 261120   ;;  %vm1109_vm8 = vcmask 523264  }
   0x5   :  { %v70_v13 = vpack.c.bf16 %v46_v11, %v45_v10  ;;  %v84_v14 = vld [vmem:[%s3113_s1] sm:$0xff]  ;;  %1833 = vmatpush3.bf16.msra.mxu1 %v365_v8  ;;  %v86_v22 = vld [vmem:[%s3113_s1 + $0x10] sm:$0xff]  ;;  %v87_v23 = vld [vmem:[%s3113_s1 + $0x18] sm:$0xff]  ;;  %v71_v24 = vpack.c.bf16 %v48_v21, %v47_v20 }
   0x6   :  { %1886 = vmatprep.subr.bf16.mxu1 %v2181_v0  ;;  %v109_v18 = vpack.c.bf16 %v85_v15, %v84_v14  ;;  %1779 = vmatpush3.bf16.msra.mxu0 %v182_v17  ;;  %v2121_v19 = vld [vmem:[%s3114_s7] sm:$0xff]   ;;  %v110_v25 = vpack.c.bf16 %v87_v23, %v86_v22  ;;  %v2122_v26 = vld [vmem:[%s3114_s7 + $0x8] sm:$0xff]   ;;  %v51_v33 = vld [vmem:[%s3112_s0 + $0x30] sm:$0xff] }
   0x7   :  { %1940 = vmatprep.subr.bf16.mxu0 %v2181_v0  ;;  %v49_v27 = vld [vmem:[%s3112_s0 + $0x20] sm:$0xff]  ;;  %v50_v28 = vld [vmem:[%s3112_s0 + $0x28] sm:$0xff]  ;;  %v52_v34 = vld [vmem:[%s3112_s0 + $0x38] sm:$0xff] }
   0x8   :  { %1835 = vmatmul.mubr.msk.bf16.vlgmr.msra.gmra.mrb[0].mxu1 %vm320_vm5, %v70_v13  ;;  %v88_v29 = vld [vmem:[%s3113_s1 + $0x20] sm:$0xff]  ;;  %v89_v30 = vld [vmem:[%s3113_s1 + $0x28] sm:$0xff]  ;;  %v72_v31 = vpack.c.bf16 %v50_v28, %v49_v27  ;;  %v90_v35 = vld [vmem:[%s3113_s1 + $0x30] sm:$0xff]  ;;  %v73_v37 = vpack.c.bf16 %v52_v34, %v51_v33 }
   0x9   :  { %1887 = vmatpush3.bf16.msra.mxu1 %v582_v16  ;;  %1838 = vmatprep.mubr.msk.bf16.mxu1 %vm2183_vm3, %v2181_v0  ;;  %v111_v32 = vpack.c.bf16 %v89_v30, %v88_v29  ;;  %v91_v36 = vld [vmem:[%s3113_s1 + $0x38] sm:$0xff]  ;;  %v53_v39 = vld [vmem:[%s3112_s0 + $0x40] sm:$0xff]  ;;  %v54_v40 = vld [vmem:[%s3112_s0 + $0x48] sm:$0xff] }
   0xa   :  { %1781 = vmatmul.mubr.msk.bf16.vlgmr.msra.gmra.mrb[0].mxu0 %vm137_vm6, %v109_v18  ;;  %1996 = vmatprep.subr.bf16.mxu1 %v2181_v0  ;;  %v112_v38 = vpack.c.bf16 %v91_v36, %v90_v35  ;;  %v92_v41 = vld [vmem:[%s3113_s1 + $0x40] sm:$0xff]  ;;  %v93_v42 = vld [vmem:[%s3113_s1 + $0x48] sm:$0xff]  ;;  %v74_v43 = vpack.c.bf16 %v54_v40, %v53_v39  ;;  %v55_v45 = vld [vmem:[%s3112_s0 + $0x50] sm:$0xff] }
   0xb   :  { %1941 = vmatpush3.bf16.msra.mxu0 %v2121_v19  ;;  %1784 = vmatprep.mubr.msk.bf16.mxu0 %vm2183_vm3, %v2181_v0  ;;  %v113_v44 = vpack.c.bf16 %v93_v42, %v92_v41  ;;  %v56_v46 = vld [vmem:[%s3112_s0 + $0x58] sm:$0xff]  ;;  %v94_v47 = vld [vmem:[%s3113_s1 + $0x50] sm:$0xff]  ;;  %v57_v51 = vld [vmem:[%s3112_s0 + $0x60] sm:$0xff] }
   0xc   :  { %1942 = vmatprep.subr.bf16.mxu0 %v2181_v0  ;;  %v95_v48 = vld [vmem:[%s3113_s1 + $0x58] sm:$0xff]  ;;  %v75_v49 = vpack.c.bf16 %v56_v46, %v55_v45  ;;  %v58_v52 = vld [vmem:[%s3112_s0 + $0x68] sm:$0xff]  ;;  %v96_v53 = vld [vmem:[%s3113_s1 + $0x60] sm:$0xff] }
   0xd   :  { %v114_v50 = vpack.c.bf16 %v95_v48, %v94_v47  ;;  %v97_v54 = vld [vmem:[%s3113_s1 + $0x68] sm:$0xff]  ;;  %v76_v55 = vpack.c.bf16 %v58_v52, %v57_v51  ;;  %v59_v57 = vld [vmem:[%s3112_s0 + $0x70] sm:$0xff]  ;;  %v60_v58 = vld [vmem:[%s3112_s0 + $0x78] sm:$0xff] }
   0xe   :  { %v115_v56 = vpack.c.bf16 %v97_v54, %v96_v53  ;;  %v98_v59 = vld [vmem:[%s3113_s1 + $0x70] sm:$0xff]  ;;  %v99_v60 = vld [vmem:[%s3113_s1 + $0x78] sm:$0xff]  ;;  %v77_v61 = vpack.c.bf16 %v60_v58, %v59_v57  ;;  %v61_v63 = vld [vmem:[%s3112_s0 + $0x80] sm:$0xff] }
   0xf   :  { %1943 = vmatpush3.bf16.msra.mxu0 %v2122_v26  ;;  %v116_v62 = vpack.c.bf16 %v99_v60, %v98_v59  ;;  %v62_v1 = vld [vmem:[%s3112_s0 + $0x88] sm:$0xff]  ;;  %v100_v2 = vld [vmem:[%s3113_s1 + $0x80] sm:$0xff]  ;;  %v63_v6 = vld [vmem:[%s3112_s0 + $0x90] sm:$0xff] }
  0x10   :  { %1839 = vmatmul.mubr.msk.bf16.gmra.mrb[4].mxu1 %vm320_vm5, %v71_v24  ;;  %2056 = vmatprep.subr.bf16.mxu0 %v2181_v0  ;;  %v101_v3 = vld [vmem:[%s3113_s1 + $0x88] sm:$0xff]  ;;  %v78_v4 = vpack.c.bf16 %v62_v1, %v61_v63  ;;  %v64_v7 = vld [vmem:[%s3112_s0 + $0x98] sm:$0xff]  ;;  %v102_v8 = vld [vmem:[%s3113_s1 + $0x90] sm:$0xff] }
  0x11   :  { %1842 = vmatprep.mubr.msk.bf16.mxu1 %vm2183_vm3, %v2181_v0  ;;  %v117_v5 = vpack.c.bf16 %v101_v3, %v100_v2  ;;  %v103_v9 = vld [vmem:[%s3113_s1 + $0x98] sm:$0xff]  ;;  %v79_v10 = vpack.c.bf16 %v64_v7, %v63_v6  ;;  %v65_v12 = vld [vmem:[%s3112_s0 + $0xa0] sm:$0xff]  ;;  %v66_v13 = vld [vmem:[%s3112_s0 + $0xa8] sm:$0xff] }
  0x12   :  { %1785 = vmatmul.mubr.msk.bf16.gmra.mrb[4].mxu0 %vm137_vm6, %v110_v25  ;;  %v118_v11 = vpack.c.bf16 %v103_v9, %v102_v8  ;;  %v104_v14 = vld [vmem:[%s3113_s1 + $0xa0] sm:$0xff]  ;;  %v105_v15 = vld [vmem:[%s3113_s1 + $0xa8] sm:$0xff]  ;;  %v80_v16 = vpack.c.bf16 %v66_v13, %v65_v12  ;;  %v67_v18 = vld [vmem:[%s3112_s0 + $0xb0] sm:$0xff] }
  0x13   :  { %1788 = vmatprep.mubr.msk.bf16.mxu0 %vm2183_vm3, %v2181_v0  ;;  %v119_v17 = vpack.c.bf16 %v105_v15, %v104_v14  ;;  %v68_v19 = vld [vmem:[%s3112_s0 + $0xb8] sm:$0xff]  ;;  %v106_v20 = vld [vmem:[%s3113_s1 + $0xb0] sm:$0xff]  ;;  %v69_v24 = vld [vmem:[%s3112_s0 + $0xc0] sm:$0xff] }
  0x14   :  { %v107_v21 = vld [vmem:[%s3113_s1 + $0xb8] sm:$0xff]  ;;  %v81_v22 = vpack.c.bf16 %v68_v19, %v67_v18  ;;  %v108_v25 = vld [vmem:[%s3113_s1 + $0xc0] sm:$0xff]  ;;  %v82_v26 = vpack.c.bf16 %v69_v24, %v69_v24  ;;  %v504_v29 = vld [vmem:[%s3115_s2 + $0x8] sm:$0xff] }
  0x15   :  { %v120_v23 = vpack.c.bf16 %v107_v21, %v106_v20  ;;  %v121_v27 = vpack.c.bf16 %v108_v25, %v108_v25  ;;  %v503_v28 = vld [vmem:[%s3115_s2] sm:$0xff]  ;;  %v505_v35 = vld [vmem:[%s3115_s2 + $0x10] sm:$0xff]  ;;  %v506_v36 = vld [vmem:[%s3115_s2 + $0x18] sm:$0xff] }
  0x16   :  { %v745_v30 = vld [vmem:[%s3116_s3] sm:$0xff]  ;;  %v529_v39 = vpack.c.bf16 %v506_v36, %v505_v35  ;;  %v508_v42 = vld [vmem:[%s3115_s2 + $0x28] sm:$0xff]  ;;  %v509_v47 = vld [vmem:[%s3115_s2 + $0x30] sm:$0xff] }
  0x17   :  { %v2123_v33 = vld [vmem:[%s3117_s9] sm:$0xff]   ;;  %v510_v48 = vld [vmem:[%s3115_s2 + $0x38] sm:$0xff]  ;;  %v2124_v52 = vld [vmem:[%s3117_s9 + $0x8] sm:$0xff]  }
  0x18   :  { %1843 = vmatmul.mubr.msk.bf16.gmra.mrb[8].mxu1 %vm320_vm5, %v72_v31  ;;  %v746_v31 = vld [vmem:[%s3116_s3 + $0x8] sm:$0xff]  ;;  %v507_v41 = vld [vmem:[%s3115_s2 + $0x20] sm:$0xff]  ;;  %v531_v51 = vpack.c.bf16 %v510_v48, %v509_v47  ;;  %v513_v60 = vld [vmem:[%s3115_s2 + $0x50] sm:$0xff] }
  0x19   :  { %1846 = vmatprep.mubr.msk.bf16.mxu1 %vm2183_vm3, %v2181_v0  ;;  %v770_v34 = vpack.c.bf16 %v746_v31, %v745_v30  ;;  %v530_v45 = vpack.c.bf16 %v508_v42, %v507_v41  ;;  %v511_v54 = vld [vmem:[%s3115_s2 + $0x40] sm:$0xff]  ;;  %v754_v57 = vld [vmem:[%s3116_s3 + $0x48] sm:$0xff]  ;;  %v756_v63 = vld [vmem:[%s3116_s3 + $0x58] sm:$0xff] }
  0x1a   :  { %1789 = vmatmul.mubr.msk.bf16.gmra.mrb[8].mxu0 %vm137_vm6, %v111_v32  ;;  %v528_v32 = vpack.c.bf16 %v504_v29, %v503_v28  ;;  %v515_v3 = vld [vmem:[%s3115_s2 + $0x60] sm:$0xff]  ;;  %v758_v6 = vld [vmem:[%s3116_s3 + $0x68] sm:$0xff]  ;;  %v2125_v9 = vld [vmem:[%s3117_s9 + $0x10] sm:$0xff]  }
  0x1b   :  { %1792 = vmatprep.mubr.msk.bf16.mxu0 %vm2183_vm3, %v2181_v0  ;;  %v759_v12 = vld [vmem:[%s3116_s3 + $0x70] sm:$0xff]  ;;  %v760_v13 = vld [vmem:[%s3116_s3 + $0x78] sm:$0xff]  ;;  %v761_v18 = vld [vmem:[%s3116_s3 + $0x80] sm:$0xff] }
  0x1c   :  { %v777_v15 = vpack.c.bf16 %v760_v13, %v759_v12  ;;  %v762_v19 = vld [vmem:[%s3116_s3 + $0x88] sm:$0xff]  ;;  %v763_v24 = vld [vmem:[%s3116_s3 + $0x90] sm:$0xff]  ;;  %v764_v25 = vld [vmem:[%s3116_s3 + $0x98] sm:$0xff] }
  0x1d   :  { %v778_v21 = vpack.c.bf16 %v762_v19, %v761_v18  ;;  %v2126_v28 = vld [vmem:[%s3117_s9 + $0x18] sm:$0xff]   ;;  %v523_v29 = vld [vmem:[%s3115_s2 + $0xa0] sm:$0xff]  ;;  %v524_v30 = vld [vmem:[%s3115_s2 + $0xa8] sm:$0xff] }
  0x1e   :  { %v765_v31 = vld [vmem:[%s3116_s3 + $0xa0] sm:$0xff]  ;;  %v525_v35 = vld [vmem:[%s3115_s2 + $0xb0] sm:$0xff]  ;;  %v526_v36 = vld [vmem:[%s3115_s2 + $0xb8] sm:$0xff] }
  0x1f   :  { %v527_v41 = vld [vmem:[%s3115_s2 + $0xc0] sm:$0xff] }
  0x20   :  { %1847 = vmatmul.mubr.msk.bf16.gmra.mrb[12].mxu1 %vm320_vm5, %v73_v37  ;;  %v747_v37 = vld [vmem:[%s3116_s3 + $0x10] sm:$0xff]  ;;  %v769_v42 = vld [vmem:[%s3116_s3 + $0xc0] sm:$0xff] }
  0x21   :  { %1850 = vmatprep.mubr.msk.bf16.mxu1 %vm2183_vm3, %v2181_v0 }
  0x22   :  { %1793 = vmatmul.mubr.msk.bf16.gmra.mrb[12].mxu0 %vm137_vm6, %v112_v38  ;;  %v748_v38 = vld [vmem:[%s3116_s3 + $0x18] sm:$0xff] }
  0x23   :  { %1796 = vmatprep.mubr.msk.bf16.mxu0 %vm2183_vm3, %v2181_v0  ;;  %v771_v40 = vpack.c.bf16 %v748_v38, %v747_v37  ;;  %v767_v37 = vld [vmem:[%s3116_s3 + $0xb0] sm:$0xff]  ;;  %v768_v38 = vld [vmem:[%s3116_s3 + $0xb8] sm:$0xff] }
  0x28   :  { %1851 = vmatmul.mubr.msk.bf16.gmra.mrb[16].mxu1 %vm320_vm5, %v74_v43  ;;  %v749_v43 = vld [vmem:[%s3116_s3 + $0x20] sm:$0xff] }
  0x29   :  { %1854 = vmatprep.mubr.msk.bf16.mxu1 %vm2183_vm3, %v2181_v0 }
  0x2a   :  { %1797 = vmatmul.mubr.msk.bf16.gmra.mrb[16].mxu0 %vm137_vm6, %v113_v44  ;;  %v750_v44 = vld [vmem:[%s3116_s3 + $0x28] sm:$0xff] }
  0x2b   :  { %1800 = vmatprep.mubr.msk.bf16.mxu0 %vm2183_vm3, %v2181_v0  ;;  %v772_v46 = vpack.c.bf16 %v750_v44, %v749_v43  ;;  %v540_v43 = vpack.c.bf16 %v527_v41, %v527_v41  ;;  %v782_v44 = vpack.c.bf16 %v769_v42, %v769_v42 }
  0x30   :  { %1855 = vmatmul.mubr.msk.bf16.gmra.mrb[20].mxu1 %vm320_vm5, %v75_v49  ;;  %v751_v49 = vld [vmem:[%s3116_s3 + $0x30] sm:$0xff] }
  0x31   :  { %1858 = vmatprep.mubr.msk.bf16.mxu1 %vm2183_vm3, %v2181_v0 }
  0x32   :  { %1801 = vmatmul.mubr.msk.bf16.gmra.mrb[20].mxu0 %vm137_vm6, %v114_v50  ;;  %v752_v50 = vld [vmem:[%s3116_s3 + $0x38] sm:$0xff] }
  0x33   :  { %1804 = vmatprep.mubr.msk.bf16.mxu0 %vm2183_vm3, %v2181_v0  ;;  %v773_v53 = vpack.c.bf16 %v752_v50, %v751_v49 }
  0x38   :  { %1859 = vmatmul.mubr.msk.bf16.gmra.mrb[24].mxu1 %vm320_vm5, %v76_v55  ;;  %v512_v55 = vld [vmem:[%s3115_s2 + $0x48] sm:$0xff] }
  0x39   :  { %1862 = vmatprep.mubr.msk.bf16.mxu1 %vm2183_vm3, %v2181_v0  ;;  %v532_v58 = vpack.c.bf16 %v512_v55, %v511_v54 }
  0x3a   :  { %1805 = vmatmul.mubr.msk.bf16.gmra.mrb[24].mxu0 %vm137_vm6, %v115_v56  ;;  %v753_v56 = vld [vmem:[%s3116_s3 + $0x40] sm:$0xff] }
  0x3b   :  { %1808 = vmatprep.mubr.msk.bf16.mxu0 %vm2183_vm3, %v2181_v0  ;;  %v774_v59 = vpack.c.bf16 %v754_v57, %v753_v56 }
  0x40   :  { %1863 = vmatmul.mubr.msk.bf16.gmra.mrb[28].mxu1 %vm320_vm5, %v77_v61  ;;  %v514_v61 = vld [vmem:[%s3115_s2 + $0x58] sm:$0xff] }
  0x41   :  { %1866 = vmatprep.mubr.msk.bf16.mxu1 %vm2183_vm3, %v2181_v0  ;;  %v533_v1 = vpack.c.bf16 %v514_v61, %v513_v60 }
  0x42   :  { %1809 = vmatmul.mubr.msk.bf16.gmra.mrb[28].mxu0 %vm137_vm6, %v116_v62  ;;  %v755_v62 = vld [vmem:[%s3116_s3 + $0x50] sm:$0xff] }
  0x43   :  { %1812 = vmatprep.mubr.msk.bf16.mxu0 %vm2183_vm3, %v2181_v0  ;;  %v775_v2 = vpack.c.bf16 %v756_v63, %v755_v62 }
  0x48   :  { %1867 = vmatmul.mubr.msk.bf16.gmra.mrb[32].mxu1 %vm320_vm5, %v78_v4  ;;  %v516_v4 = vld [vmem:[%s3115_s2 + $0x68] sm:$0xff] }
  0x49   :  { %1870 = vmatprep.mubr.msk.bf16.mxu1 %vm2183_vm3, %v2181_v0  ;;  %v534_v7 = vpack.c.bf16 %v516_v4, %v515_v3 }
  0x4a   :  { %1813 = vmatmul.mubr.msk.bf16.gmra.mrb[32].mxu0 %vm137_vm6, %v117_v5  ;;  %v757_v5 = vld [vmem:[%s3116_s3 + $0x60] sm:$0xff] }
  0x4b   :  { %1816 = vmatprep.mubr.msk.bf16.mxu0 %vm2183_vm3, %v2181_v0  ;;  %v776_v8 = vpack.c.bf16 %v758_v6, %v757_v5 }
  0x50   :  { %1871 = vmatmul.mubr.msk.bf16.gmra.mrb[36].mxu1 %vm320_vm5, %v79_v10  ;;  %v517_v10 = vld [vmem:[%s3115_s2 + $0x70] sm:$0xff] }
  0x51   :  { %1874 = vmatprep.mubr.msk.bf16.mxu1 %vm2183_vm3, %v2181_v0 }
  0x52   :  { %1817 = vmatmul.mubr.msk.bf16.gmra.mrb[36].mxu0 %vm137_vm6, %v118_v11  ;;  %v518_v11 = vld [vmem:[%s3115_s2 + $0x78] sm:$0xff] }
  0x53   :  { %1820 = vmatprep.mubr.msk.bf16.mxu0 %vm2183_vm3, %v2181_v0  ;;  %v535_v14 = vpack.c.bf16 %v518_v11, %v517_v10 }
  0x58   :  { %1875 = vmatmul.mubr.msk.bf16.gmra.mrb[40].mxu1 %vm320_vm5, %v80_v16  ;;  %v519_v16 = vld [vmem:[%s3115_s2 + $0x80] sm:$0xff] }
  0x59   :  { %1878 = vmatprep.mubr.msk.bf16.mxu1 %vm2183_vm3, %v2181_v0 }
  0x5a   :  { %1821 = vmatmul.mubr.msk.bf16.gmra.mrb[40].mxu0 %vm137_vm6, %v119_v17  ;;  %v520_v17 = vld [vmem:[%s3115_s2 + $0x88] sm:$0xff] }
  0x5b   :  { %1824 = vmatprep.mubr.msk.bf16.mxu0 %vm2183_vm3, %v2181_v0  ;;  %v536_v20 = vpack.c.bf16 %v520_v17, %v519_v16 }
  0x60   :  { %1879 = vmatmul.mubr.msk.bf16.gmra.mrb[44].mxu1 %vm320_vm5, %v81_v22  ;;  %v521_v22 = vld [vmem:[%s3115_s2 + $0x90] sm:$0xff] }
  0x61   :  { %1882 = vmatprep.mubr.msk.bf16.mxu1 %vm2183_vm3, %v2181_v0 }
  0x62   :  { %1825 = vmatmul.mubr.msk.bf16.gmra.mrb[44].mxu0 %vm137_vm6, %v120_v23  ;;  %v522_v23 = vld [vmem:[%s3115_s2 + $0x98] sm:$0xff] }
  0x63   :  { %1828 = vmatprep.mubr.msk.bf16.mxu0 %vm2183_vm3, %v2181_v0 }
  0x68   :  { %1883 = vmatmul.mubr.msk.bf16.gmra.mrb[48].mxu1 %vm320_vm5, %v82_v26  ;;  %v537_v26 = vpack.c.bf16 %v522_v23, %v521_v22 }
  0x69   :  { %1888 = vmatprep.mubr.msk.bf16.mxu1 %vm2183_vm3, %v2181_v0 }
  0x6a   :  { %1829 = vmatmul.mubr.msk.bf16.gmra.mrb[48].mxu0 %vm137_vm6, %v121_v27  ;;  %v779_v27 = vpack.c.bf16 %v764_v25, %v763_v24 }
  0x6b   :  { %1944 = vmatprep.mubr.msk.bf16.mxu0 %vm2183_vm3, %v2181_v0 }
  0x70   :  { %1889 = vmatmul.mubr.msk.bf16.vlgmr.msra.gmra.mrb[52].mxu1 %vm320_vm5, %v528_v32  ;;  %v766_v32 = vld [vmem:[%s3116_s3 + $0xa8] sm:$0xff] }
  0x71   :  { %1892 = vmatprep.mubr.msk.bf16.mxu1 %vm2183_vm3, %v2181_v0  ;;  %1997 = vmatpush3.bf16.msra.mxu1 %v2123_v33  ;;  %v538_v33 = vpack.c.bf16 %v524_v30, %v523_v29 }
  0x72   :  { %1945 = vmatmul.mubr.msk.bf16.vlgmr.msra.gmra.mrb[52].mxu0 %vm799_vm7, %v770_v34  ;;  %1998 = vmatprep.subr.bf16.mxu1 %v2181_v0  ;;  %v780_v34 = vpack.c.bf16 %v766_v32, %v765_v31 }
  0x73   :  { %1948 = vmatprep.mubr.msk.bf16.mxu0 %vm2183_vm3, %v2181_v0 }
  0x75   :  { %1999 = vmatpush3.bf16.msra.mxu1 %v2124_v52 }
  0x76   :  { %2000 = vmatprep.subr.bf16.mxu1 %v2181_v0 }
  0x78   :  { %1893 = vmatmul.mubr.msk.bf16.gmra.mrb[56].mxu1 %vm320_vm5, %v529_v39  ;;  %v539_v39 = vpack.c.bf16 %v526_v36, %v525_v35 }
  0x79   :  { %1896 = vmatprep.mubr.msk.bf16.mxu1 %vm2183_vm3, %v2181_v0  ;;  %2001 = vmatpush3.bf16.msra.mxu1 %v2125_v9 }
  0x7a   :  { %1949 = vmatmul.mubr.msk.bf16.gmra.mrb[56].mxu0 %vm799_vm7, %v771_v40  ;;  %2002 = vmatprep.subr.bf16.mxu1 %v2181_v0  ;;  %v781_v40 = vpack.c.bf16 %v768_v38, %v767_v37 }
  0x7b   :  { %1952 = vmatprep.mubr.msk.bf16.mxu0 %vm2183_vm3, %v2181_v0 }
  0x7d   :  { %2003 = vmatpush3.bf16.msra.mxu1 %v2126_v28 }
  0x80   :  { %1897 = vmatmul.mubr.msk.bf16.gmra.mrb[60].mxu1 %vm320_vm5, %v530_v45 }
  0x81   :  { %1900 = vmatprep.mubr.msk.bf16.mxu1 %vm2183_vm3, %v2181_v0 }
  0x82   :  { %1953 = vmatmul.mubr.msk.bf16.gmra.mrb[60].mxu0 %vm799_vm7, %v772_v46 }
  0x83   :  { %1956 = vmatprep.mubr.msk.bf16.mxu0 %vm2183_vm3, %v2181_v0 }
  0x88   :  { %1901 = vmatmul.mubr.msk.bf16.gmra.mrb[64].mxu1 %vm320_vm5, %v531_v51 }
  0x89   :  { %1904 = vmatprep.mubr.msk.bf16.mxu1 %vm2183_vm3, %v2181_v0 }
  0x8a   :  { %1957 = vmatmul.mubr.msk.bf16.gmra.mrb[64].mxu0 %vm799_vm7, %v773_v53 }
  0x8b   :  { %1960 = vmatprep.mubr.msk.bf16.mxu0 %vm2183_vm3, %v2181_v0 }
  0x90   :  { %1905 = vmatmul.mubr.msk.bf16.gmra.mrb[68].mxu1 %vm320_vm5, %v532_v58 }
  0x91   :  { %1908 = vmatprep.mubr.msk.bf16.mxu1 %vm2183_vm3, %v2181_v0 }
  0x92   :  { %1961 = vmatmul.mubr.msk.bf16.gmra.mrb[68].mxu0 %vm799_vm7, %v774_v59 }
  0x93   :  { %1964 = vmatprep.mubr.msk.bf16.mxu0 %vm2183_vm3, %v2181_v0 }
  0x98   :  { %1909 = vmatmul.mubr.msk.bf16.gmra.mrb[72].mxu1 %vm320_vm5, %v533_v1 }
  0x99   :  { %1912 = vmatprep.mubr.msk.bf16.mxu1 %vm2183_vm3, %v2181_v0 }
  0x9a   :  { %1965 = vmatmul.mubr.msk.bf16.gmra.mrb[72].mxu0 %vm799_vm7, %v775_v2 }
  0x9b   :  { %1968 = vmatprep.mubr.msk.bf16.mxu0 %vm2183_vm3, %v2181_v0 }
  0xa0   :  { %1913 = vmatmul.mubr.msk.bf16.gmra.mrb[76].mxu1 %vm320_vm5, %v534_v7 }
  0xa1   :  { %1916 = vmatprep.mubr.msk.bf16.mxu1 %vm2183_vm3, %v2181_v0 }
  0xa2   :  { %1969 = vmatmul.mubr.msk.bf16.gmra.mrb[76].mxu0 %vm799_vm7, %v776_v8 }
  0xa3   :  { %1972 = vmatprep.mubr.msk.bf16.mxu0 %vm2183_vm3, %v2181_v0 }
  0xa8   :  { %1917 = vmatmul.mubr.msk.bf16.gmra.mrb[80].mxu1 %vm320_vm5, %v535_v14 }
  0xa9   :  { %1920 = vmatprep.mubr.msk.bf16.mxu1 %vm2183_vm3, %v2181_v0 }
  0xaa   :  { %1973 = vmatmul.mubr.msk.bf16.gmra.mrb[80].mxu0 %vm799_vm7, %v777_v15 }
  0xab   :  { %1976 = vmatprep.mubr.msk.bf16.mxu0 %vm2183_vm3, %v2181_v0 }
  0xb0   :  { %1921 = vmatmul.mubr.msk.bf16.gmra.mrb[84].mxu1 %vm320_vm5, %v536_v20 }
  0xb1   :  { %1924 = vmatprep.mubr.msk.bf16.mxu1 %vm2183_vm3, %v2181_v0 }
  0xb2   :  { %1977 = vmatmul.mubr.msk.bf16.gmra.mrb[84].mxu0 %vm799_vm7, %v778_v21 }
  0xb3   :  { %1980 = vmatprep.mubr.msk.bf16.mxu0 %vm2183_vm3, %v2181_v0 }
  0xb8   :  { %1925 = vmatmul.mubr.msk.bf16.gmra.mrb[88].mxu1 %vm320_vm5, %v537_v26 }
  0xb9   :  { %1928 = vmatprep.mubr.msk.bf16.mxu1 %vm2183_vm3, %v2181_v0 }
  0xba   :  { %1981 = vmatmul.mubr.msk.bf16.gmra.mrb[88].mxu0 %vm799_vm7, %v779_v27 }
  0xbb   :  { %1984 = vmatprep.mubr.msk.bf16.mxu0 %vm2183_vm3, %v2181_v0 }
  0xc0   :  { %1929 = vmatmul.mubr.msk.bf16.gmra.mrb[92].mxu1 %vm320_vm5, %v538_v33 }
  0xc1   :  { %1932 = vmatprep.mubr.msk.bf16.mxu1 %vm2183_vm3, %v2181_v0 }
  0xc2   :  { %1985 = vmatmul.mubr.msk.bf16.gmra.mrb[92].mxu0 %vm799_vm7, %v780_v34 }
  0xc3   :  { %1988 = vmatprep.mubr.msk.bf16.mxu0 %vm2183_vm3, %v2181_v0 }
  0xc8   :  { %1933 = vmatmul.mubr.msk.bf16.gmra.mrb[96].mxu1 %vm320_vm5, %v539_v39 }
  0xc9   :  { %1936 = vmatprep.mubr.msk.bf16.mxu1 %vm2183_vm3, %v2181_v0 }
  0xca   :  { %1989 = vmatmul.mubr.msk.bf16.gmra.mrb[96].mxu0 %vm799_vm7, %v781_v40 }
  0xcb   :  { %1992 = vmatprep.mubr.msk.bf16.mxu0 %vm2183_vm3, %v2181_v0 }
  0xd0   :  { %1937 = vmatmul.mubr.msk.bf16.gmra.mrb[100].mxu1 %vm320_vm5, %v540_v43 }
  0xd1   :  { %2004 = vmatprep.mubr.msk.bf16.mxu1 %vm2183_vm3, %v2181_v0 }
  0xd2   :  { %1993 = vmatmul.mubr.msk.bf16.gmra.mrb[100].mxu0 %vm799_vm7, %v782_v44 }
  0xd3   :  { %2064 = vmatprep.mubr.msk.bf16.mxu0 %vm2183_vm3, %v2181_v0 }
  0xdb   :  { %v401_v45 = vpop.f32.mrb[0].mxu1 }
  0xdc   :  { %v1836_v46 = vpop.f32.mrb[1].mxu1 }
  0xdd   :  { %v404_v47 = vpop.f32.mrb[2].mxu1  ;;  %v218_v48 = vpop.f32.mrb[0].mxu0 }
  0xde   :  { %v2755_v49 = vadd.f32 %v401_v45, %v218_v48  ;;  %v1837_v50 = vpop.f32.mrb[3].mxu1  ;;  %v1782_v51 = vpop.f32.mrb[1].mxu0 }
  0xdf   :  { %v221_v52 = vpop.f32.mrb[2].mxu0 }
  0xe0   :  { %v2757_v53 = vadd.f32 %v404_v47, %v221_v52  ;;  %v1783_v54 = vpop.f32.mrb[3].mxu0 }
  0xe3   :  { %v409_v55 = vpop.f32.mrb[4].mxu1 }
  0xe4   :  { %v1840_v56 = vpop.f32.mrb[5].mxu1 }
  0xe5   :  { %v412_v57 = vpop.f32.mrb[6].mxu1  ;;  %v226_v58 = vpop.f32.mrb[4].mxu0 }
  0xe6   :  { %v2759_v59 = vadd.f32 %v409_v55, %v226_v58  ;;  %v1841_v60 = vpop.f32.mrb[7].mxu1  ;;  %v1786_v61 = vpop.f32.mrb[5].mxu0 }
  0xe7   :  { %v229_v62 = vpop.f32.mrb[6].mxu0 }
  0xe8   :  { %v2761_v63 = vadd.f32 %v412_v57, %v229_v62  ;;  %v1787_v1 = vpop.f32.mrb[7].mxu0 }
  0xeb   :  { %v417_v2 = vpop.f32.mrb[8].mxu1 }
  0xec   :  { %v1844_v3 = vpop.f32.mrb[9].mxu1 }
  0xed   :  { %v420_v4 = vpop.f32.mrb[10].mxu1  ;;  %v234_v5 = vpop.f32.mrb[8].mxu0 }
  0xee   :  { %v2763_v6 = vadd.f32 %v417_v2, %v234_v5  ;;  %v1845_v7 = vpop.f32.mrb[11].mxu1  ;;  %v1790_v8 = vpop.f32.mrb[9].mxu0 }
  0xef   :  { %v237_v9 = vpop.f32.mrb[10].mxu0 }
  0xf0   :  { %v2765_v10 = vadd.f32 %v420_v4, %v237_v9  ;;  %v1791_v11 = vpop.f32.mrb[11].mxu0 }
  0xf3   :  { %v425_v12 = vpop.f32.mrb[12].mxu1 }
  0xf4   :  { %v1848_v13 = vpop.f32.mrb[13].mxu1 }
  0xf5   :  { %v428_v14 = vpop.f32.mrb[14].mxu1  ;;  %v242_v15 = vpop.f32.mrb[12].mxu0 }
  0xf6   :  { %v2767_v16 = vadd.f32 %v425_v12, %v242_v15  ;;  %v1849_v17 = vpop.f32.mrb[15].mxu1  ;;  %v1794_v18 = vpop.f32.mrb[13].mxu0 }
  0xf7   :  { %v245_v19 = vpop.f32.mrb[14].mxu0 }
  0xf8   :  { %v2769_v20 = vadd.f32 %v428_v14, %v245_v19  ;;  %v1795_v21 = vpop.f32.mrb[15].mxu0 }
  0xfb   :  { %v433_v22 = vpop.f32.mrb[16].mxu1 }
  0xfc   :  { %v1852_v23 = vpop.f32.mrb[17].mxu1 }
  0xfd   :  { %v436_v24 = vpop.f32.mrb[18].mxu1  ;;  %v250_v25 = vpop.f32.mrb[16].mxu0 }
  0xfe   :  { %v2771_v26 = vadd.f32 %v433_v22, %v250_v25  ;;  %v1853_v27 = vpop.f32.mrb[19].mxu1  ;;  %v1798_v28 = vpop.f32.mrb[17].mxu0 }
  0xff   :  { %v253_v29 = vpop.f32.mrb[18].mxu0 }
 0x100   :  { %v2773_v30 = vadd.f32 %v436_v24, %v253_v29  ;;  %v1799_v31 = vpop.f32.mrb[19].mxu0 }
 0x103   :  { %v441_v32 = vpop.f32.mrb[20].mxu1 }
 0x104   :  { %v1856_v33 = vpop.f32.mrb[21].mxu1 }
 0x105   :  { %v444_v34 = vpop.f32.mrb[22].mxu1  ;;  %v258_v35 = vpop.f32.mrb[20].mxu0 }
 0x106   :  { %v2775_v36 = vadd.f32 %v441_v32, %v258_v35  ;;  %v1857_v37 = vpop.f32.mrb[23].mxu1  ;;  %v1802_v38 = vpop.f32.mrb[21].mxu0 }
 0x107   :  { %v261_v39 = vpop.f32.mrb[22].mxu0 }
 0x108   :  { %v2777_v40 = vadd.f32 %v444_v34, %v261_v39  ;;  %v1803_v41 = vpop.f32.mrb[23].mxu0 }
 0x109   :  { %v2127_v41 = vld [vmem:[%s3118_s11] sm:$0xff]  }
 0x10a   :  { %2057 = vmatpush3.bf16.msra.mxu0 %v2127_v41 }
 0x10b   :  { %v449_v42 = vpop.f32.mrb[24].mxu1  ;;  %2058 = vmatprep.subr.bf16.mxu0 %v2181_v0 }
 0x10c   :  { %v1860_v43 = vpop.f32.mrb[25].mxu1 }
 0x10d   :  { %v452_v44 = vpop.f32.mrb[26].mxu1  ;;  %v266_v45 = vpop.f32.mrb[24].mxu0  ;;  %v2128_v43 = vld [vmem:[%s3118_s11 + $0x8] sm:$0xff]  }
 0x10e   :  { %v2779_v46 = vadd.f32 %v449_v42, %v266_v45  ;;  %v1861_v47 = vpop.f32.mrb[27].mxu1  ;;  %v1806_v48 = vpop.f32.mrb[25].mxu0  ;;  %2059 = vmatpush3.bf16.msra.mxu0 %v2128_v43 }
 0x10f   :  { %v269_v50 = vpop.f32.mrb[26].mxu0  ;;  %2060 = vmatprep.subr.bf16.mxu0 %v2181_v0 }
 0x110   :  { %v2781_v51 = vadd.f32 %v452_v44, %v269_v50  ;;  %v1807_v52 = vpop.f32.mrb[27].mxu0 }
 0x113   :  { %v457_v54 = vpop.f32.mrb[28].mxu1 }
 0x114   :  { %v1864_v55 = vpop.f32.mrb[29].mxu1 }
 0x115   :  { %v460_v56 = vpop.f32.mrb[30].mxu1  ;;  %v274_v57 = vpop.f32.mrb[28].mxu0  ;;  %v2129_v55 = vld [vmem:[%s3118_s11 + $0x10] sm:$0xff]  }
 0x116   :  { %v2783_v58 = vadd.f32 %v457_v54, %v274_v57  ;;  %v1865_v60 = vpop.f32.mrb[31].mxu1  ;;  %v1810_v61 = vpop.f32.mrb[29].mxu0  ;;  %2061 = vmatpush3.bf16.msra.mxu0 %v2129_v55 }
 0x117   :  { %v277_v62 = vpop.f32.mrb[30].mxu0  ;;  %v2130_v61 = vld [vmem:[%s3118_s11 + $0x18] sm:$0xff]   ;;  %2062 = vmatprep.subr.bf16.mxu0 %v2181_v0 }
 0x118   :  { %v2785_v1 = vadd.f32 %v460_v56, %v277_v62  ;;  %v1811_v2 = vpop.f32.mrb[31].mxu0 }
 0x11a   :  { %2063 = vmatpush3.bf16.msra.mxu0 %v2130_v61 }
 0x11b   :  { %v465_v3 = vpop.f32.mrb[32].mxu1 }
 0x11c   :  { %v1868_v4 = vpop.f32.mrb[33].mxu1 }
 0x11d   :  { %v468_v5 = vpop.f32.mrb[34].mxu1  ;;  %v282_v7 = vpop.f32.mrb[32].mxu0 }
 0x11e   :  { %v2787_v8 = vadd.f32 %v465_v3, %v282_v7  ;;  %v1869_v9 = vpop.f32.mrb[35].mxu1  ;;  %v1814_v11 = vpop.f32.mrb[33].mxu0 }
 0x11f   :  { %v285_v12 = vpop.f32.mrb[34].mxu0 }
 0x120   :  { %v2789_v13 = vadd.f32 %v468_v5, %v285_v12  ;;  %v1815_v14 = vpop.f32.mrb[35].mxu0 }
 0x123   :  { %v473_v15 = vpop.f32.mrb[36].mxu1 }
 0x124   :  { %v1872_v17 = vpop.f32.mrb[37].mxu1 }
 0x125   :  { %v476_v18 = vpop.f32.mrb[38].mxu1  ;;  %v290_v19 = vpop.f32.mrb[36].mxu0 }
 0x126   :  { %v2791_v21 = vadd.f32 %v473_v15, %v290_v19  ;;  %v1873_v22 = vpop.f32.mrb[39].mxu1  ;;  %v1818_v23 = vpop.f32.mrb[37].mxu0  ;;  %v2824_v19 = vld [vmem:[%s3119_s8] ss:$0 sm:$0xff] }
 0x127   :  { %v293_v24 = vpop.f32.mrb[38].mxu0 }
 0x128   :  { %v2793_v25 = vadd.f32 %v476_v18, %v293_v24  ;;  %v1819_v27 = vpop.f32.mrb[39].mxu0 }
 0x12b   :  { %v481_v28 = vpop.f32.mrb[40].mxu1 }
 0x12c   :  { %v1876_v29 = vpop.f32.mrb[41].mxu1 }
 0x12d   :  { %v484_v31 = vpop.f32.mrb[42].mxu1  ;;  %v298_v32 = vpop.f32.mrb[40].mxu0 }
 0x12e   :  { %v2795_v33 = vadd.f32 %v481_v28, %v298_v32  ;;  %v1877_v34 = vpop.f32.mrb[43].mxu1  ;;  %v1822_v35 = vpop.f32.mrb[41].mxu0 }
 0x12f   :  { %v301_v37 = vpop.f32.mrb[42].mxu0 }
 0x130   :  { %v2797_v38 = vadd.f32 %v484_v31, %v301_v37  ;;  %v1823_v39 = vpop.f32.mrb[43].mxu0 }
 0x133   :  { %v489_v42 = vpop.f32.mrb[44].mxu1 }
 0x134   :  { %v1880_v44 = vpop.f32.mrb[45].mxu1 }
 0x135   :  { %v492_v45 = vpop.f32.mrb[46].mxu1  ;;  %v306_v47 = vpop.f32.mrb[44].mxu0 }
 0x136   :  { %v2806_v48 = vadd.f32 %v489_v42, %v306_v47  ;;  %v1881_v50 = vpop.f32.mrb[47].mxu1  ;;  %v1826_v52 = vpop.f32.mrb[45].mxu0 }
 0x137   :  { %v309_v54 = vpop.f32.mrb[46].mxu0 }
 0x138   :  { %v2811_v56 = vadd.f32 %v492_v45, %v309_v54  ;;  %v1827_v57 = vpop.f32.mrb[47].mxu0 }
 0x13b   :  { %v497_v60 = vpop.f32.mrb[48].mxu1 }
 0x13c   :  { %v1884_v62 = vpop.f32.mrb[49].mxu1 }
 0x13d   :  { %v500_v2 = vpop.f32.mrb[50].mxu1  ;;  %v314_v3 = vpop.f32.mrb[48].mxu0 }
 0x13e   :  { %v2818_v4 = vadd.f32 %v497_v60, %v314_v3  ;;  %v1885_v5 = vpop.f32.mrb[51].mxu1  ;;  %v1830_v7 = vpop.f32.mrb[49].mxu0 }
 0x13f   :  { %v317_v9 = vpop.f32.mrb[50].mxu0 }
 0x140   :  { %v1831_v11 = vpop.f32.mrb[51].mxu0 }
 0x143   :  { %v618_v12 = vpop.f32.mrb[52].mxu1 }
 0x144   :  { %v720_v14 = vadd.f32 %v618_v12, %v2755_v49  ;;  %v1890_v15 = vpop.f32.mrb[53].mxu1 }
 0x145   :  { %v621_v17 = vpop.f32.mrb[54].mxu1  ;;  %v873_v18 = vpop.f32.mrb[52].mxu0 }
 0x146   :  { %v721_v22 = vadd.f32 %v621_v17, %v2757_v53  ;;  %v1891_v23 = vpop.f32.mrb[55].mxu1  ;;  %v975_v24 = vadd.f32 %v873_v18, %v720_v14  ;;  %v1946_v27 = vpop.f32.mrb[53].mxu0 }
 0x147   :  { %v876_v28 = vpop.f32.mrb[54].mxu0 }
 0x148   :  { %v1007_v29 = vadd.f32 %v2824_v19, %v975_v24  ;;  %v976_v31 = vadd.f32 %v876_v28, %v721_v22  ;;  %v1947_v32 = vpop.f32.mrb[55].mxu0 }
 0x14a   :  { %v1008_v49 = vadd.f32 %v2824_v19, %v976_v31  ;;  %v1032_v35 = vmax.f32 %v1007_v29, 0.0 }
 0x14b   :  { %v626_v34 = vpop.f32.mrb[56].mxu1 }
 0x14c   :  { %v1033_v37 = vmax.f32 %v1008_v49, 0.0  ;;  %v722_v39 = vadd.f32 %v626_v34, %v2759_v59  ;;  %v1894_v41 = vpop.f32.mrb[57].mxu1 }
 0x14d   :  { %v629_v42 = vpop.f32.mrb[58].mxu1  ;;  %v881_v43 = vpop.f32.mrb[56].mxu0 }
 0x14e   :  { %v1057_v53 = vpack.c.bf16 %v1033_v37, %v1032_v35  ;;  %v723_v44 = vadd.f32 %v629_v42, %v2761_v63  ;;  %v1895_v45 = vpop.f32.mrb[59].mxu1  ;;  %v977_v47 = vadd.f32 %v881_v43, %v722_v39  ;;  %v1950_v50 = vpop.f32.mrb[57].mxu0 }
 0x14f   :  { %v884_v52 = vpop.f32.mrb[58].mxu0 }
 0x150   :  { %v1009_v54 = vadd.f32 %v2824_v19, %v977_v47  ;;  %v978_v55 = vadd.f32 %v884_v52, %v723_v44  ;;  %v1951_v57 = vpop.f32.mrb[59].mxu0  ;;  %2005 = vmatmul.mubr.msk.bf16.vlgmr.msra.gmra.mrb[104].mxu1 %vm1109_vm8, %v1057_v53 }
 0x151   :  { %2008 = vmatprep.mubr.msk.bf16.mxu1 %vm2183_vm3, %v2181_v0 }
 0x152   :  { %v1010_v59 = vadd.f32 %v2824_v19, %v978_v55  ;;  %v1034_v61 = vmax.f32 %v1009_v54, 0.0 }
 0x153   :  { %v634_v60 = vpop.f32.mrb[60].mxu1 }
 0x154   :  { %v1035_v62 = vmax.f32 %v1010_v59, 0.0  ;;  %v724_v63 = vadd.f32 %v634_v60, %v2763_v6  ;;  %v1898_v2 = vpop.f32.mrb[61].mxu1 }
 0x155   :  { %v637_v3 = vpop.f32.mrb[62].mxu1  ;;  %v889_v5 = vpop.f32.mrb[60].mxu0 }
 0x156   :  { %v1058_v7 = vpack.c.bf16 %v1035_v62, %v1034_v61  ;;  %v725_v9 = vadd.f32 %v637_v3, %v2765_v10  ;;  %v1899_v11 = vpop.f32.mrb[63].mxu1  ;;  %v979_v12 = vadd.f32 %v889_v5, %v724_v63  ;;  %v1954_v14 = vpop.f32.mrb[61].mxu0 }
 0x157   :  { %v892_v15 = vpop.f32.mrb[62].mxu0 }
 0x158   :  { %v1011_v17 = vadd.f32 %v2824_v19, %v979_v12  ;;  %v980_v18 = vadd.f32 %v892_v15, %v725_v9  ;;  %v1955_v22 = vpop.f32.mrb[63].mxu0  ;;  %2009 = vmatmul.mubr.msk.bf16.gmra.mrb[108].mxu1 %vm1109_vm8, %v1058_v7 }
 0x159   :  { %2012 = vmatprep.mubr.msk.bf16.mxu1 %vm2183_vm3, %v2181_v0 }
 0x15a   :  { %v1012_v6 = vadd.f32 %v2824_v19, %v980_v18  ;;  %v1036_v24 = vmax.f32 %v1011_v17, 0.0 }
 0x15b   :  { %v642_v23 = vpop.f32.mrb[64].mxu1 }
 0x15c   :  { %v1037_v27 = vmax.f32 %v1012_v6, 0.0  ;;  %v726_v10 = vadd.f32 %v642_v23, %v2767_v16  ;;  %v1902_v28 = vpop.f32.mrb[65].mxu1 }
 0x15d   :  { %v645_v29 = vpop.f32.mrb[66].mxu1  ;;  %v897_v31 = vpop.f32.mrb[64].mxu0 }
 0x15e   :  { %v1059_v32 = vpack.c.bf16 %v1037_v27, %v1036_v24  ;;  %v727_v49 = vadd.f32 %v645_v29, %v2769_v20  ;;  %v1903_v34 = vpop.f32.mrb[67].mxu1  ;;  %v981_v35 = vadd.f32 %v897_v31, %v726_v10  ;;  %v1958_v37 = vpop.f32.mrb[65].mxu0 }
 0x15f   :  { %v900_v39 = vpop.f32.mrb[66].mxu0 }
 0x160   :  { %v1013_v41 = vadd.f32 %v2824_v19, %v981_v35  ;;  %v982_v42 = vadd.f32 %v900_v39, %v727_v49  ;;  %v1959_v43 = vpop.f32.mrb[67].mxu0  ;;  %2013 = vmatmul.mubr.msk.bf16.gmra.mrb[112].mxu1 %vm1109_vm8, %v1059_v32 }
 0x161   :  { %2016 = vmatprep.mubr.msk.bf16.mxu1 %vm2183_vm3, %v2181_v0 }
 0x162   :  { %v1014_v16 = vadd.f32 %v2824_v19, %v982_v42  ;;  %v1038_v44 = vmax.f32 %v1013_v41, 0.0 }
 0x163   :  { %v650_v53 = vpop.f32.mrb[68].mxu1 }
 0x164   :  { %v1039_v45 = vmax.f32 %v1014_v16, 0.0  ;;  %v728_v20 = vadd.f32 %v650_v53, %v2771_v26  ;;  %v1906_v47 = vpop.f32.mrb[69].mxu1 }
 0x165   :  { %v653_v50 = vpop.f32.mrb[70].mxu1  ;;  %v905_v52 = vpop.f32.mrb[68].mxu0 }
 0x166   :  { %v1060_v54 = vpack.c.bf16 %v1039_v45, %v1038_v44  ;;  %v729_v55 = vadd.f32 %v653_v50, %v2773_v30  ;;  %v1907_v57 = vpop.f32.mrb[71].mxu1  ;;  %v983_v59 = vadd.f32 %v905_v52, %v728_v20  ;;  %v1962_v60 = vpop.f32.mrb[69].mxu0 }
 0x167   :  { %v908_v61 = vpop.f32.mrb[70].mxu0 }
 0x168   :  { %v1015_v62 = vadd.f32 %v2824_v19, %v983_v59  ;;  %v984_v63 = vadd.f32 %v908_v61, %v729_v55  ;;  %v1963_v2 = vpop.f32.mrb[71].mxu0  ;;  %2017 = vmatmul.mubr.msk.bf16.gmra.mrb[116].mxu1 %vm1109_vm8, %v1060_v54 }
 0x169   :  { %2020 = vmatprep.mubr.msk.bf16.mxu1 %vm2183_vm3, %v2181_v0 }
 0x16a   :  { %v1016_v26 = vadd.f32 %v2824_v19, %v984_v63  ;;  %v1040_v5 = vmax.f32 %v1015_v62, 0.0 }
 0x16b   :  { %v658_v3 = vpop.f32.mrb[72].mxu1 }
 0x16c   :  { %v1041_v7 = vmax.f32 %v1016_v26, 0.0  ;;  %v730_v30 = vadd.f32 %v658_v3, %v2775_v36  ;;  %v1910_v9 = vpop.f32.mrb[73].mxu1 }
 0x16d   :  { %v661_v11 = vpop.f32.mrb[74].mxu1  ;;  %v913_v12 = vpop.f32.mrb[72].mxu0 }
 0x16e   :  { %v1061_v14 = vpack.c.bf16 %v1041_v7, %v1040_v5  ;;  %v731_v15 = vadd.f32 %v661_v11, %v2777_v40  ;;  %v1911_v17 = vpop.f32.mrb[75].mxu1  ;;  %v985_v18 = vadd.f32 %v913_v12, %v730_v30  ;;  %v1966_v22 = vpop.f32.mrb[73].mxu0 }
 0x16f   :  { %v916_v6 = vpop.f32.mrb[74].mxu0 }
 0x170   :  { %v1017_v23 = vadd.f32 %v2824_v19, %v985_v18  ;;  %v986_v24 = vadd.f32 %v916_v6, %v731_v15  ;;  %v1967_v27 = vpop.f32.mrb[75].mxu0  ;;  %2021 = vmatmul.mubr.msk.bf16.gmra.mrb[120].mxu1 %vm1109_vm8, %v1061_v14 }
 0x171   :  { %2024 = vmatprep.mubr.msk.bf16.mxu1 %vm2183_vm3, %v2181_v0 }
 0x172   :  { %v1018_v36 = vadd.f32 %v2824_v19, %v986_v24  ;;  %v1042_v28 = vmax.f32 %v1017_v23, 0.0 }
 0x173   :  { %v666_v10 = vpop.f32.mrb[76].mxu1 }
 0x174   :  { %v1043_v29 = vmax.f32 %v1018_v36, 0.0  ;;  %v732_v40 = vadd.f32 %v666_v10, %v2779_v46  ;;  %v1914_v31 = vpop.f32.mrb[77].mxu1 }
 0x175   :  { %v669_v32 = vpop.f32.mrb[78].mxu1  ;;  %v921_v49 = vpop.f32.mrb[76].mxu0 }
 0x176   :  { %v1062_v34 = vpack.c.bf16 %v1043_v29, %v1042_v28  ;;  %v733_v35 = vadd.f32 %v669_v32, %v2781_v51  ;;  %v1915_v37 = vpop.f32.mrb[79].mxu1  ;;  %v987_v39 = vadd.f32 %v921_v49, %v732_v40  ;;  %v1970_v41 = vpop.f32.mrb[77].mxu0 }
 0x177   :  { %v924_v42 = vpop.f32.mrb[78].mxu0 }
 0x178   :  { %v1019_v43 = vadd.f32 %v2824_v19, %v987_v39  ;;  %v988_v16 = vadd.f32 %v924_v42, %v733_v35  ;;  %v1971_v53 = vpop.f32.mrb[79].mxu0  ;;  %2025 = vmatmul.mubr.msk.bf16.gmra.mrb[124].mxu1 %vm1109_vm8, %v1062_v34 }
 0x179   :  { %2028 = vmatprep.mubr.msk.bf16.mxu1 %vm2183_vm3, %v2181_v0 }
 0x17a   :  { %v1020_v46 = vadd.f32 %v2824_v19, %v988_v16  ;;  %v1044_v45 = vmax.f32 %v1019_v43, 0.0 }
 0x17b   :  { %v674_v44 = vpop.f32.mrb[80].mxu1 }
 0x17c   :  { %v1045_v20 = vmax.f32 %v1020_v46, 0.0  ;;  %v734_v51 = vadd.f32 %v674_v44, %v2783_v58  ;;  %v1918_v47 = vpop.f32.mrb[81].mxu1 }
 0x17d   :  { %v677_v50 = vpop.f32.mrb[82].mxu1  ;;  %v929_v52 = vpop.f32.mrb[80].mxu0 }
 0x17e   :  { %v1063_v54 = vpack.c.bf16 %v1045_v20, %v1044_v45  ;;  %v735_v55 = vadd.f32 %v677_v50, %v2785_v1  ;;  %v1919_v57 = vpop.f32.mrb[83].mxu1  ;;  %v989_v59 = vadd.f32 %v929_v52, %v734_v51  ;;  %v1974_v60 = vpop.f32.mrb[81].mxu0 }
 0x17f   :  { %v932_v61 = vpop.f32.mrb[82].mxu0 }
 0x180   :  { %v1021_v62 = vadd.f32 %v2824_v19, %v989_v59  ;;  %v990_v63 = vadd.f32 %v932_v61, %v735_v55  ;;  %v1975_v2 = vpop.f32.mrb[83].mxu0  ;;  %2029 = vmatmul.mubr.msk.bf16.gmra.mrb[128].mxu1 %vm1109_vm8, %v1063_v54 }
 0x181   :  { %2032 = vmatprep.mubr.msk.bf16.mxu1 %vm2183_vm3, %v2181_v0 }
 0x182   :  { %v1022_v58 = vadd.f32 %v2824_v19, %v990_v63  ;;  %v1046_v3 = vmax.f32 %v1021_v62, 0.0 }
 0x183   :  { %v682_v26 = vpop.f32.mrb[84].mxu1 }
 0x184   :  { %v1047_v5 = vmax.f32 %v1022_v58, 0.0  ;;  %v736_v1 = vadd.f32 %v682_v26, %v2787_v8  ;;  %v1922_v7 = vpop.f32.mrb[85].mxu1 }
 0x185   :  { %v685_v30 = vpop.f32.mrb[86].mxu1  ;;  %v937_v9 = vpop.f32.mrb[84].mxu0 }
 0x186   :  { %v1064_v11 = vpack.c.bf16 %v1047_v5, %v1046_v3  ;;  %v737_v12 = vadd.f32 %v685_v30, %v2789_v13  ;;  %v1923_v14 = vpop.f32.mrb[87].mxu1  ;;  %v991_v15 = vadd.f32 %v937_v9, %v736_v1  ;;  %v1978_v17 = vpop.f32.mrb[85].mxu0 }
 0x187   :  { %v940_v18 = vpop.f32.mrb[86].mxu0 }
 0x188   :  { %v1023_v22 = vadd.f32 %v2824_v19, %v991_v15  ;;  %v992_v6 = vadd.f32 %v940_v18, %v737_v12  ;;  %v1979_v23 = vpop.f32.mrb[87].mxu0  ;;  %2033 = vmatmul.mubr.msk.bf16.gmra.mrb[132].mxu1 %vm1109_vm8, %v1064_v11 }
 0x189   :  { %2036 = vmatprep.mubr.msk.bf16.mxu1 %vm2183_vm3, %v2181_v0 }
 0x18a   :  { %v1024_v8 = vadd.f32 %v2824_v19, %v992_v6  ;;  %v1048_v27 = vmax.f32 %v1023_v22, 0.0 }
 0x18b   :  { %v690_v24 = vpop.f32.mrb[88].mxu1 }
 0x18c   :  { %v1049_v36 = vmax.f32 %v1024_v8, 0.0  ;;  %v738_v13 = vadd.f32 %v690_v24, %v2791_v21  ;;  %v1926_v10 = vpop.f32.mrb[89].mxu1 }
 0x18d   :  { %v693_v28 = vpop.f32.mrb[90].mxu1  ;;  %v945_v29 = vpop.f32.mrb[88].mxu0 }
 0x18e   :  { %v1065_v40 = vpack.c.bf16 %v1049_v36, %v1048_v27  ;;  %v739_v31 = vadd.f32 %v693_v28, %v2793_v25  ;;  %v1927_v32 = vpop.f32.mrb[91].mxu1  ;;  %v993_v49 = vadd.f32 %v945_v29, %v738_v13  ;;  %v1982_v34 = vpop.f32.mrb[89].mxu0 }
 0x18f   :  { %v948_v35 = vpop.f32.mrb[90].mxu0 }
 0x190   :  { %v1025_v37 = vadd.f32 %v2824_v19, %v993_v49  ;;  %v994_v39 = vadd.f32 %v948_v35, %v739_v31  ;;  %v1983_v41 = vpop.f32.mrb[91].mxu0  ;;  %2037 = vmatmul.mubr.msk.bf16.gmra.mrb[136].mxu1 %vm1109_vm8, %v1065_v40 }
 0x191   :  { %2040 = vmatprep.mubr.msk.bf16.mxu1 %vm2183_vm3, %v2181_v0 }
 0x192   :  { %v1026_v21 = vadd.f32 %v2824_v19, %v994_v39  ;;  %v1050_v43 = vmax.f32 %v1025_v37, 0.0 }
 0x193   :  { %v698_v42 = vpop.f32.mrb[92].mxu1 }
 0x194   :  { %v1051_v16 = vmax.f32 %v1026_v21, 0.0  ;;  %v740_v25 = vadd.f32 %v698_v42, %v2795_v33  ;;  %v1930_v53 = vpop.f32.mrb[93].mxu1 }
 0x195   :  { %v701_v46 = vpop.f32.mrb[94].mxu1  ;;  %v953_v44 = vpop.f32.mrb[92].mxu0 }
 0x196   :  { %v1066_v45 = vpack.c.bf16 %v1051_v16, %v1050_v43  ;;  %v741_v20 = vadd.f32 %v701_v46, %v2797_v38  ;;  %v1931_v51 = vpop.f32.mrb[95].mxu1  ;;  %v995_v47 = vadd.f32 %v953_v44, %v740_v25  ;;  %v1986_v50 = vpop.f32.mrb[93].mxu0 }
 0x197   :  { %v956_v52 = vpop.f32.mrb[94].mxu0 }
 0x198   :  { %v1027_v54 = vadd.f32 %v2824_v19, %v995_v47  ;;  %v996_v55 = vadd.f32 %v956_v52, %v741_v20  ;;  %v1987_v57 = vpop.f32.mrb[95].mxu0  ;;  %2041 = vmatmul.mubr.msk.bf16.gmra.mrb[140].mxu1 %vm1109_vm8, %v1066_v45 }
 0x199   :  { %2044 = vmatprep.mubr.msk.bf16.mxu1 %vm2183_vm3, %v2181_v0 }
 0x19a   :  { %v1028_v33 = vadd.f32 %v2824_v19, %v996_v55  ;;  %v1052_v60 = vmax.f32 %v1027_v54, 0.0 }
 0x19b   :  { %v706_v59 = vpop.f32.mrb[96].mxu1 }
 0x19c   :  { %v1053_v61 = vmax.f32 %v1028_v33, 0.0  ;;  %v742_v38 = vadd.f32 %v706_v59, %v2806_v48  ;;  %v1934_v62 = vpop.f32.mrb[97].mxu1 }
 0x19d   :  { %v709_v63 = vpop.f32.mrb[98].mxu1  ;;  %v961_v2 = vpop.f32.mrb[96].mxu0 }
 0x19e   :  { %v1067_v58 = vpack.c.bf16 %v1053_v61, %v1052_v60  ;;  %v743_v26 = vadd.f32 %v709_v63, %v2811_v56  ;;  %v1935_v3 = vpop.f32.mrb[99].mxu1  ;;  %v997_v5 = vadd.f32 %v961_v2, %v742_v38  ;;  %v1990_v1 = vpop.f32.mrb[97].mxu0 }
 0x19f   :  { %v964_v7 = vpop.f32.mrb[98].mxu0 }
 0x1a0   :  { %v1029_v30 = vadd.f32 %v2824_v19, %v997_v5  ;;  %v998_v9 = vadd.f32 %v964_v7, %v743_v26  ;;  %v1991_v11 = vpop.f32.mrb[99].mxu0  ;;  %2045 = vmatmul.mubr.msk.bf16.gmra.mrb[144].mxu1 %vm1109_vm8, %v1067_v58 }
 0x1a1   :  { %2048 = vmatprep.mubr.msk.bf16.mxu1 %vm2183_vm3, %v2181_v0 }
 0x1a2   :  { %v1030_v48 = vadd.f32 %v2824_v19, %v998_v9  ;;  %v1054_v14 = vmax.f32 %v1029_v30, 0.0 }
 0x1a3   :  { %v714_v12 = vpop.f32.mrb[100].mxu1 }
 0x1a4   :  { %v1055_v15 = vmax.f32 %v1030_v48, 0.0  ;;  %v744_v56 = vadd.f32 %v714_v12, %v2818_v4  ;;  %v1938_v17 = vpop.f32.mrb[101].mxu1  ;;  %v2915_v4 = vld [vmem:[%s3120_s10] ss:$0 sm:$0xff] }
 0x1a5   :  { %v969_v18 = vpop.f32.mrb[100].mxu0  ;;  %v717_v22 = vpop.f32.mrb[102].mxu1 }
 0x1a6   :  { %v1068_v6 = vpack.c.bf16 %v1055_v15, %v1054_v14  ;;  %v999_v23 = vadd.f32 %v969_v18, %v744_v56  ;;  %v1939_v8 = vpop.f32.mrb[103].mxu1  ;;  %v1994_v24 = vpop.f32.mrb[101].mxu0 }
 0x1a7   :  { %v972_v27 = vpop.f32.mrb[102].mxu0 }
 0x1a8   :  { %v1031_v36 = vadd.f32 %v2824_v19, %v999_v23  ;;  %2049 = vmatmul.mubr.msk.bf16.gmra.mrb[148].mxu1 %vm1109_vm8, %v1068_v6  ;;  %v1995_v13 = vpop.f32.mrb[103].mxu0 }
 0x1a9   :  { %2052 = vmatprep.mubr.msk.bf16.mxu1 %vm2183_vm3, %v2181_v0 }
 0x1aa   :  { %v1056_v10 = vmax.f32 %v1031_v36, 0.0 }
 0x1ac   :  { %v1069_v28 = vpack.c.bf16 %v1056_v10, %v1056_v10 }
 0x1b0   :  { %2053 = vmatmul.mubr.msk.bf16.gmra.mrb[152].mxu1 %vm1109_vm8, %v1069_v28 }
 0x223   :  { %v1183_v29 = vpop.f32.mrb[104].mxu1 }
 0x224   :  { %v1184_v40 = vadd.f32 %v2915_v4, %v1183_v29  ;;  %v2006_v31 = vpop.f32.mrb[105].mxu1 }
 0x225   :  { %v1186_v19 = vpop.f32.mrb[106].mxu1 }
 0x226   :  { %v1187_v32 = vadd.f32 %v2915_v4, %v1186_v19  ;;  %v2007_v49 = vpop.f32.mrb[107].mxu1  ;;  %v1285_v34 = vmax.f32 %v1184_v40, 0.0 }
 0x228   :  { %v1286_v35 = vmax.f32 %v1187_v32, 0.0 }
 0x22a   :  { %v1310_v37 = vpack.c.bf16 %v1286_v35, %v1285_v34 }
 0x22b   :  { %v1191_v39 = vpop.f32.mrb[108].mxu1 }
 0x22c   :  { %v1192_v41 = vadd.f32 %v2915_v4, %v1191_v39  ;;  %v2010_v21 = vpop.f32.mrb[109].mxu1  ;;  %2065 = vmatmul.mubr.msk.bf16.vlgmr.msra.gmra.mrb[104].mxu0 %vm1109_vm8, %v1310_v37 }
 0x22d   :  { %v1194_v42 = vpop.f32.mrb[110].mxu1  ;;  %2068 = vmatprep.mubr.msk.bf16.mxu0 %vm2183_vm3, %v2181_v0 }
 0x22e   :  { %v1195_v43 = vadd.f32 %v2915_v4, %v1194_v42  ;;  %v2011_v16 = vpop.f32.mrb[111].mxu1  ;;  %v1287_v25 = vmax.f32 %v1192_v41, 0.0 }
 0x230   :  { %v1288_v53 = vmax.f32 %v1195_v43, 0.0 }
 0x232   :  { %v1311_v46 = vpack.c.bf16 %v1288_v53, %v1287_v25 }
 0x233   :  { %v1199_v44 = vpop.f32.mrb[112].mxu1 }
 0x234   :  { %v1200_v45 = vadd.f32 %v2915_v4, %v1199_v44  ;;  %v2014_v20 = vpop.f32.mrb[113].mxu1  ;;  %2069 = vmatmul.mubr.msk.bf16.gmra.mrb[108].mxu0 %vm1109_vm8, %v1311_v46 }
 0x235   :  { %v1202_v51 = vpop.f32.mrb[114].mxu1  ;;  %2072 = vmatprep.mubr.msk.bf16.mxu0 %vm2183_vm3, %v2181_v0 }
 0x236   :  { %v1203_v47 = vadd.f32 %v2915_v4, %v1202_v51  ;;  %v2015_v50 = vpop.f32.mrb[115].mxu1  ;;  %v1289_v52 = vmax.f32 %v1200_v45, 0.0 }
 0x238   :  { %v1290_v54 = vmax.f32 %v1203_v47, 0.0 }
 0x23a   :  { %v1312_v55 = vpack.c.bf16 %v1290_v54, %v1289_v52 }
 0x23b   :  { %v1207_v57 = vpop.f32.mrb[116].mxu1 }
 0x23c   :  { %v1208_v33 = vadd.f32 %v2915_v4, %v1207_v57  ;;  %v2018_v59 = vpop.f32.mrb[117].mxu1  ;;  %2073 = vmatmul.mubr.msk.bf16.gmra.mrb[112].mxu0 %vm1109_vm8, %v1312_v55 }
 0x23d   :  { %v1210_v60 = vpop.f32.mrb[118].mxu1  ;;  %2076 = vmatprep.mubr.msk.bf16.mxu0 %vm2183_vm3, %v2181_v0 }
 0x23e   :  { %v1211_v61 = vadd.f32 %v2915_v4, %v1210_v60  ;;  %v2019_v38 = vpop.f32.mrb[119].mxu1  ;;  %v1291_v62 = vmax.f32 %v1208_v33, 0.0 }
 0x240   :  { %v1292_v63 = vmax.f32 %v1211_v61, 0.0 }
 0x242   :  { %v1313_v2 = vpack.c.bf16 %v1292_v63, %v1291_v62 }
 0x243   :  { %v1215_v58 = vpop.f32.mrb[120].mxu1 }
 0x244   :  { %v1216_v26 = vadd.f32 %v2915_v4, %v1215_v58  ;;  %v2022_v3 = vpop.f32.mrb[121].mxu1  ;;  %2077 = vmatmul.mubr.msk.bf16.gmra.mrb[116].mxu0 %vm1109_vm8, %v1313_v2 }
 0x245   :  { %v1218_v5 = vpop.f32.mrb[122].mxu1  ;;  %2080 = vmatprep.mubr.msk.bf16.mxu0 %vm2183_vm3, %v2181_v0 }
 0x246   :  { %v1219_v1 = vadd.f32 %v2915_v4, %v1218_v5  ;;  %v2023_v7 = vpop.f32.mrb[123].mxu1  ;;  %v1293_v30 = vmax.f32 %v1216_v26, 0.0 }
 0x248   :  { %v1294_v9 = vmax.f32 %v1219_v1, 0.0 }
 0x24a   :  { %v1314_v11 = vpack.c.bf16 %v1294_v9, %v1293_v30 }
 0x24b   :  { %v1223_v48 = vpop.f32.mrb[124].mxu1 }
 0x24c   :  { %v1224_v12 = vadd.f32 %v2915_v4, %v1223_v48  ;;  %v2026_v14 = vpop.f32.mrb[125].mxu1  ;;  %2081 = vmatmul.mubr.msk.bf16.gmra.mrb[120].mxu0 %vm1109_vm8, %v1314_v11 }
 0x24d   :  { %v1226_v15 = vpop.f32.mrb[126].mxu1  ;;  %2084 = vmatprep.mubr.msk.bf16.mxu0 %vm2183_vm3, %v2181_v0 }
 0x24e   :  { %v1227_v56 = vadd.f32 %v2915_v4, %v1226_v15  ;;  %v2027_v17 = vpop.f32.mrb[127].mxu1  ;;  %v1295_v18 = vmax.f32 %v1224_v12, 0.0 }
 0x250   :  { %v1296_v22 = vmax.f32 %v1227_v56, 0.0 }
 0x252   :  { %v1315_v6 = vpack.c.bf16 %v1296_v22, %v1295_v18 }
 0x253   :  { %v1231_v23 = vpop.f32.mrb[128].mxu1 }
 0x254   :  { %v1232_v8 = vadd.f32 %v2915_v4, %v1231_v23  ;;  %v2030_v24 = vpop.f32.mrb[129].mxu1  ;;  %2085 = vmatmul.mubr.msk.bf16.gmra.mrb[124].mxu0 %vm1109_vm8, %v1315_v6  ;;  %v2982_v6 = vld [vmem:[%s3121_s12] ss:$0 sm:$0xff] }
 0x255   :  { %v1234_v27 = vpop.f32.mrb[130].mxu1  ;;  %2088 = vmatprep.mubr.msk.bf16.mxu0 %vm2183_vm3, %v2181_v0 }
 0x256   :  { %v1235_v36 = vadd.f32 %v2915_v4, %v1234_v27  ;;  %v2031_v13 = vpop.f32.mrb[131].mxu1  ;;  %v1297_v10 = vmax.f32 %v1232_v8, 0.0 }
 0x258   :  { %v1298_v28 = vmax.f32 %v1235_v36, 0.0 }
 0x25a   :  { %v1316_v29 = vpack.c.bf16 %v1298_v28, %v1297_v10 }
 0x25b   :  { %v1239_v40 = vpop.f32.mrb[132].mxu1 }
 0x25c   :  { %v1240_v31 = vadd.f32 %v2915_v4, %v1239_v40  ;;  %v2034_v19 = vpop.f32.mrb[133].mxu1  ;;  %2089 = vmatmul.mubr.msk.bf16.gmra.mrb[128].mxu0 %vm1109_vm8, %v1316_v29 }
 0x25d   :  { %v1242_v32 = vpop.f32.mrb[134].mxu1  ;;  %2092 = vmatprep.mubr.msk.bf16.mxu0 %vm2183_vm3, %v2181_v0 }
 0x25e   :  { %v1243_v49 = vadd.f32 %v2915_v4, %v1242_v32  ;;  %v2035_v34 = vpop.f32.mrb[135].mxu1  ;;  %v1299_v35 = vmax.f32 %v1240_v31, 0.0 }
 0x260   :  { %v1300_v37 = vmax.f32 %v1243_v49, 0.0 }
 0x262   :  { %v1317_v39 = vpack.c.bf16 %v1300_v37, %v1299_v35 }
 0x263   :  { %v1247_v41 = vpop.f32.mrb[136].mxu1 }
 0x264   :  { %v1248_v21 = vadd.f32 %v2915_v4, %v1247_v41  ;;  %v2038_v42 = vpop.f32.mrb[137].mxu1  ;;  %2093 = vmatmul.mubr.msk.bf16.gmra.mrb[132].mxu0 %vm1109_vm8, %v1317_v39 }
 0x265   :  { %v1250_v43 = vpop.f32.mrb[138].mxu1  ;;  %2096 = vmatprep.mubr.msk.bf16.mxu0 %vm2183_vm3, %v2181_v0 }
 0x266   :  { %v1251_v16 = vadd.f32 %v2915_v4, %v1250_v43  ;;  %v2039_v25 = vpop.f32.mrb[139].mxu1  ;;  %v1301_v53 = vmax.f32 %v1248_v21, 0.0 }
 0x268   :  { %v1302_v46 = vmax.f32 %v1251_v16, 0.0 }
 0x26a   :  { %v1318_v44 = vpack.c.bf16 %v1302_v46, %v1301_v53 }
 0x26b   :  { %v1255_v45 = vpop.f32.mrb[140].mxu1 }
 0x26c   :  { %v1256_v20 = vadd.f32 %v2915_v4, %v1255_v45  ;;  %v2042_v51 = vpop.f32.mrb[141].mxu1  ;;  %2097 = vmatmul.mubr.msk.bf16.gmra.mrb[136].mxu0 %vm1109_vm8, %v1318_v44 }
 0x26d   :  { %v1258_v47 = vpop.f32.mrb[142].mxu1  ;;  %2100 = vmatprep.mubr.msk.bf16.mxu0 %vm2183_vm3, %v2181_v0 }
 0x26e   :  { %v1259_v50 = vadd.f32 %v2915_v4, %v1258_v47  ;;  %v2043_v52 = vpop.f32.mrb[143].mxu1  ;;  %v1303_v54 = vmax.f32 %v1256_v20, 0.0 }
 0x270   :  { %v1304_v55 = vmax.f32 %v1259_v50, 0.0 }
 0x272   :  { %v1319_v57 = vpack.c.bf16 %v1304_v55, %v1303_v54 }
 0x273   :  { %v1263_v33 = vpop.f32.mrb[144].mxu1 }
 0x274   :  { %v1264_v59 = vadd.f32 %v2915_v4, %v1263_v33  ;;  %v2046_v60 = vpop.f32.mrb[145].mxu1  ;;  %2101 = vmatmul.mubr.msk.bf16.gmra.mrb[140].mxu0 %vm1109_vm8, %v1319_v57 }
 0x275   :  { %v1266_v61 = vpop.f32.mrb[146].mxu1  ;;  %2104 = vmatprep.mubr.msk.bf16.mxu0 %vm2183_vm3, %v2181_v0 }
 0x276   :  { %v1267_v38 = vadd.f32 %v2915_v4, %v1266_v61  ;;  %v2047_v62 = vpop.f32.mrb[147].mxu1  ;;  %v1305_v63 = vmax.f32 %v1264_v59, 0.0 }
 0x278   :  { %v1306_v2 = vmax.f32 %v1267_v38, 0.0 }
 0x27a   :  { %v1320_v58 = vpack.c.bf16 %v1306_v2, %v1305_v63 }
 0x27b   :  { %v1271_v26 = vpop.f32.mrb[148].mxu1 }
 0x27c   :  { %v1272_v3 = vadd.f32 %v2915_v4, %v1271_v26  ;;  %v2050_v5 = vpop.f32.mrb[149].mxu1  ;;  %2105 = vmatmul.mubr.msk.bf16.gmra.mrb[144].mxu0 %vm1109_vm8, %v1320_v58 }
 0x27d   :  { %v1274_v1 = vpop.f32.mrb[150].mxu1  ;;  %2108 = vmatprep.mubr.msk.bf16.mxu0 %vm2183_vm3, %v2181_v0 }
 0x27e   :  { %v1275_v7 = vadd.f32 %v2915_v4, %v1274_v1  ;;  %v2051_v30 = vpop.f32.mrb[151].mxu1  ;;  %v1307_v9 = vmax.f32 %v1272_v3, 0.0 }
 0x280   :  { %v1308_v11 = vmax.f32 %v1275_v7, 0.0 }
 0x282   :  { %v1321_v48 = vpack.c.bf16 %v1308_v11, %v1307_v9 }
 0x283   :  { %v1279_v12 = vpop.f32.mrb[152].mxu1 }
 0x284   :  { %v1280_v14 = vadd.f32 %v2915_v4, %v1279_v12  ;;  %v2054_v15 = vpop.f32.mrb[153].mxu1  ;;  %2109 = vmatmul.mubr.msk.bf16.gmra.mrb[148].mxu0 %vm1109_vm8, %v1321_v48 }
 0x285   :  { %v1282_v56 = vpop.f32.mrb[154].mxu1  ;;  %2112 = vmatprep.mubr.msk.bf16.mxu0 %vm2183_vm3, %v2181_v0 }
 0x286   :  { %v1309_v17 = vmax.f32 %v1280_v14, 0.0  ;;  %v2055_v18 = vpop.f32.mrb[155].mxu1 }
 0x288   :  { %v1322_v22 = vpack.c.bf16 %v1309_v17, %v1309_v17 }
 0x28c   :  { %2113 = vmatmul.mubr.msk.bf16.gmra.mrb[152].mxu0 %vm1109_vm8, %v1322_v22 }
 0x2ff   :  { %v1435_v23 = vpop.f32.mrb[104].mxu0 }
 0x300   :  { %v1436_v4 = vadd.f32 %v2982_v6, %v1435_v23  ;;  %v2066_v8 = vpop.f32.mrb[105].mxu0 }
 0x301   :  { %v1438_v24 = vpop.f32.mrb[106].mxu0 }
 0x302   :  { %2131 = vtanh.f32 %v1436_v4  ;;  %v1439_v27 = vadd.f32 %v2982_v6, %v1438_v24  ;;  %v2067_v36 = vpop.f32.mrb[107].mxu0 }
 0x304   :  { %2133 = vtanh.f32 %v1439_v27 }
 0x307   :  { %v1443_v0 = vpop.f32.mrb[108].mxu0 }
 0x308   :  { %v1444_v13 = vadd.f32 %v2982_v6, %v1443_v0  ;;  %v2070_v10 = vpop.f32.mrb[109].mxu0 }
 0x309   :  { %v1446_v28 = vpop.f32.mrb[110].mxu0 }
 0x30a   :  { %2135 = vtanh.f32 %v1444_v13  ;;  %v1447_v29 = vadd.f32 %v2982_v6, %v1446_v28  ;;  %v2071_v40 = vpop.f32.mrb[111].mxu0 }
 0x30c   :  { %v2132_v31 = vpop.eup %2131  ;;  %2137 = vtanh.f32 %v1447_v29 }
 0x30d   :  { %1562 = vst.msk [vmem:[%s3122_s13] sm:$0xff] %vm320_vm5, %v2132_v31 }
 0x30e   :  { %v2134_v19 = vpop.eup %2133 }
 0x30f   :  { %1563 = vst.msk [vmem:[%s3122_s13 + $0x8] sm:$0xff] %vm320_vm5, %v2134_v19  ;;  %v1451_v32 = vpop.f32.mrb[112].mxu0 }
 0x310   :  { %v1452_v49 = vadd.f32 %v2982_v6, %v1451_v32  ;;  %v2074_v34 = vpop.f32.mrb[113].mxu0 }
 0x311   :  { %v1454_v35 = vpop.f32.mrb[114].mxu0 }
 0x312   :  { %2139 = vtanh.f32 %v1452_v49  ;;  %v1455_v37 = vadd.f32 %v2982_v6, %v1454_v35  ;;  %v2075_v39 = vpop.f32.mrb[115].mxu0 }
 0x314   :  { %v2136_v41 = vpop.eup %2135  ;;  %2141 = vtanh.f32 %v1455_v37 }
 0x315   :  { %1564 = vst.msk [vmem:[%s3122_s13 + $0x10] sm:$0xff] %vm320_vm5, %v2136_v41 }
 0x316   :  { %v2138_v21 = vpop.eup %2137 }
 0x317   :  { %1565 = vst.msk [vmem:[%s3122_s13 + $0x18] sm:$0xff] %vm320_vm5, %v2138_v21  ;;  %v1459_v42 = vpop.f32.mrb[116].mxu0 }
 0x318   :  { %v1460_v43 = vadd.f32 %v2982_v6, %v1459_v42  ;;  %v2078_v16 = vpop.f32.mrb[117].mxu0 }
 0x319   :  { %v1462_v25 = vpop.f32.mrb[118].mxu0 }
 0x31a   :  { %2143 = vtanh.f32 %v1460_v43  ;;  %v1463_v53 = vadd.f32 %v2982_v6, %v1462_v25  ;;  %v2079_v46 = vpop.f32.mrb[119].mxu0 }
 0x31c   :  { %v2140_v44 = vpop.eup %2139  ;;  %2145 = vtanh.f32 %v1463_v53 }
 0x31d   :  { %1566 = vst.msk [vmem:[%s3122_s13 + $0x20] sm:$0xff] %vm320_vm5, %v2140_v44 }
 0x31e   :  { %v2142_v45 = vpop.eup %2141 }
 0x31f   :  { %1567 = vst.msk [vmem:[%s3122_s13 + $0x28] sm:$0xff] %vm320_vm5, %v2142_v45  ;;  %v1467_v20 = vpop.f32.mrb[120].mxu0 }
 0x320   :  { %v1468_v51 = vadd.f32 %v2982_v6, %v1467_v20  ;;  %v2082_v47 = vpop.f32.mrb[121].mxu0 }
 0x321   :  { %v1470_v50 = vpop.f32.mrb[122].mxu0 }
 0x322   :  { %2147 = vtanh.f32 %v1468_v51  ;;  %v1471_v52 = vadd.f32 %v2982_v6, %v1470_v50  ;;  %v2083_v54 = vpop.f32.mrb[123].mxu0 }
 0x324   :  { %v2144_v55 = vpop.eup %2143  ;;  %2149 = vtanh.f32 %v1471_v52 }
 0x325   :  { %1568 = vst.msk [vmem:[%s3122_s13 + $0x30] sm:$0xff] %vm320_vm5, %v2144_v55 }
 0x326   :  { %v2146_v57 = vpop.eup %2145 }
 0x327   :  { %1569 = vst.msk [vmem:[%s3122_s13 + $0x38] sm:$0xff] %vm320_vm5, %v2146_v57  ;;  %v1475_v33 = vpop.f32.mrb[124].mxu0 }
 0x328   :  { %v1476_v59 = vadd.f32 %v2982_v6, %v1475_v33  ;;  %v2086_v60 = vpop.f32.mrb[125].mxu0 }
 0x329   :  { %v1478_v61 = vpop.f32.mrb[126].mxu0 }
 0x32a   :  { %2151 = vtanh.f32 %v1476_v59  ;;  %v1479_v38 = vadd.f32 %v2982_v6, %v1478_v61  ;;  %v2087_v62 = vpop.f32.mrb[127].mxu0 }
 0x32c   :  { %v2148_v63 = vpop.eup %2147  ;;  %2153 = vtanh.f32 %v1479_v38 }
 0x32d   :  { %1570 = vst.msk [vmem:[%s3122_s13 + $0x40] sm:$0xff] %vm320_vm5, %v2148_v63 }
 0x32e   :  { %v2150_v2 = vpop.eup %2149 }
 0x32f   :  { %1571 = vst.msk [vmem:[%s3122_s13 + $0x48] sm:$0xff] %vm320_vm5, %v2150_v2  ;;  %v1483_v58 = vpop.f32.mrb[128].mxu0 }
 0x330   :  { %v1484_v26 = vadd.f32 %v2982_v6, %v1483_v58  ;;  %v2090_v3 = vpop.f32.mrb[129].mxu0 }
 0x331   :  { %v1486_v5 = vpop.f32.mrb[130].mxu0 }
 0x332   :  { %2155 = vtanh.f32 %v1484_v26  ;;  %v1487_v1 = vadd.f32 %v2982_v6, %v1486_v5  ;;  %v2091_v7 = vpop.f32.mrb[131].mxu0 }
 0x334   :  { %v2152_v30 = vpop.eup %2151  ;;  %2157 = vtanh.f32 %v1487_v1 }
 0x335   :  { %1572 = vst.msk [vmem:[%s3122_s13 + $0x50] sm:$0xff] %vm320_vm5, %v2152_v30 }
 0x336   :  { %v2154_v9 = vpop.eup %2153 }
 0x337   :  { %1573 = vst.msk [vmem:[%s3122_s13 + $0x58] sm:$0xff] %vm320_vm5, %v2154_v9  ;;  %v1491_v11 = vpop.f32.mrb[132].mxu0 }
 0x338   :  { %v1492_v48 = vadd.f32 %v2982_v6, %v1491_v11  ;;  %v2094_v12 = vpop.f32.mrb[133].mxu0 }
 0x339   :  { %v1494_v14 = vpop.f32.mrb[134].mxu0 }
 0x33a   :  { %2159 = vtanh.f32 %v1492_v48  ;;  %v1495_v15 = vadd.f32 %v2982_v6, %v1494_v14  ;;  %v2095_v56 = vpop.f32.mrb[135].mxu0 }
 0x33c   :  { %v2156_v17 = vpop.eup %2155  ;;  %2161 = vtanh.f32 %v1495_v15 }
 0x33d   :  { %1574 = vst.msk [vmem:[%s3122_s13 + $0x60] sm:$0xff] %vm320_vm5, %v2156_v17 }
 0x33e   :  { %v2158_v18 = vpop.eup %2157 }
 0x33f   :  { %1575 = vst.msk [vmem:[%s3122_s13 + $0x68] sm:$0xff] %vm320_vm5, %v2158_v18  ;;  %v1499_v22 = vpop.f32.mrb[136].mxu0 }
 0x340   :  { %v1500_v23 = vadd.f32 %v2982_v6, %v1499_v22  ;;  %v2098_v4 = vpop.f32.mrb[137].mxu0 }
 0x341   :  { %v1502_v8 = vpop.f32.mrb[138].mxu0 }
 0x342   :  { %2163 = vtanh.f32 %v1500_v23  ;;  %v1503_v24 = vadd.f32 %v2982_v6, %v1502_v8  ;;  %v2099_v27 = vpop.f32.mrb[139].mxu0 }
 0x344   :  { %v2160_v36 = vpop.eup %2159  ;;  %2165 = vtanh.f32 %v1503_v24 }
 0x345   :  { %1576 = vst.msk [vmem:[%s3122_s13 + $0x70] sm:$0xff] %vm320_vm5, %v2160_v36 }
 0x346   :  { %v2162_v0 = vpop.eup %2161 }
 0x347   :  { %1577 = vst.msk [vmem:[%s3122_s13 + $0x78] sm:$0xff] %vm320_vm5, %v2162_v0  ;;  %v1507_v13 = vpop.f32.mrb[140].mxu0 }
 0x348   :  { %v1508_v10 = vadd.f32 %v2982_v6, %v1507_v13  ;;  %v2102_v28 = vpop.f32.mrb[141].mxu0 }
 0x349   :  { %v1510_v29 = vpop.f32.mrb[142].mxu0 }
 0x34a   :  { %2167 = vtanh.f32 %v1508_v10  ;;  %v1511_v40 = vadd.f32 %v2982_v6, %v1510_v29  ;;  %v2103_v31 = vpop.f32.mrb[143].mxu0 }
 0x34c   :  { %v2164_v19 = vpop.eup %2163  ;;  %2169 = vtanh.f32 %v1511_v40 }
 0x34d   :  { %1578 = vst.msk [vmem:[%s3122_s13 + $0x80] sm:$0xff] %vm320_vm5, %v2164_v19 }
 0x34e   :  { %v2166_v32 = vpop.eup %2165 }
 0x34f   :  { %1579 = vst.msk [vmem:[%s3122_s13 + $0x88] sm:$0xff] %vm320_vm5, %v2166_v32  ;;  %v1515_v49 = vpop.f32.mrb[144].mxu0 }
 0x350   :  { %v1516_v34 = vadd.f32 %v2982_v6, %v1515_v49  ;;  %v2106_v35 = vpop.f32.mrb[145].mxu0 }
 0x351   :  { %v1518_v37 = vpop.f32.mrb[146].mxu0 }
 0x352   :  { %2171 = vtanh.f32 %v1516_v34  ;;  %v1519_v39 = vadd.f32 %v2982_v6, %v1518_v37  ;;  %v2107_v41 = vpop.f32.mrb[147].mxu0 }
 0x354   :  { %v2168_v21 = vpop.eup %2167  ;;  %2173 = vtanh.f32 %v1519_v39 }
 0x355   :  { %1580 = vst.msk [vmem:[%s3122_s13 + $0x90] sm:$0xff] %vm320_vm5, %v2168_v21 }
 0x356   :  { %v2170_v42 = vpop.eup %2169 }
 0x357   :  { %1581 = vst.msk [vmem:[%s3122_s13 + $0x98] sm:$0xff] %vm320_vm5, %v2170_v42  ;;  %v1523_v43 = vpop.f32.mrb[148].mxu0 }
 0x358   :  { %v1524_v16 = vadd.f32 %v2982_v6, %v1523_v43  ;;  %v2110_v25 = vpop.f32.mrb[149].mxu0 }
 0x359   :  { %v1526_v53 = vpop.f32.mrb[150].mxu0 }
 0x35a   :  { %2175 = vtanh.f32 %v1524_v16  ;;  %v1527_v46 = vadd.f32 %v2982_v6, %v1526_v53  ;;  %v2111_v44 = vpop.f32.mrb[151].mxu0 }
 0x35c   :  { %v2172_v45 = vpop.eup %2171  ;;  %2177 = vtanh.f32 %v1527_v46 }
 0x35d   :  { %1582 = vst.msk [vmem:[%s3122_s13 + $0xa0] sm:$0xff] %vm320_vm5, %v2172_v45 }
 0x35e   :  { %v2174_v20 = vpop.eup %2173 }
 0x35f   :  { %1583 = vst.msk [vmem:[%s3122_s13 + $0xa8] sm:$0xff] %vm320_vm5, %v2174_v20  ;;  %v1531_v51 = vpop.f32.mrb[152].mxu0 }
 0x360   :  { %v1532_v47 = vadd.f32 %v2982_v6, %v1531_v51  ;;  %v2114_v50 = vpop.f32.mrb[153].mxu0 }
 0x361   :  { %v1534_v52 = vpop.f32.mrb[154].mxu0 }
 0x362   :  { %2179 = vtanh.f32 %v1532_v47  ;;  %v2115_v54 = vpop.f32.mrb[155].mxu0 }
 0x364   :  { %v2176_v55 = vpop.eup %2175 }
 0x365   :  { %1584 = vst.msk [vmem:[%s3122_s13 + $0xb0] sm:$0xff] %vm320_vm5, %v2176_v55 }
 0x366   :  { %v2178_v57 = vpop.eup %2177 }
 0x367   :  { %1585 = vst.msk [vmem:[%s3122_s13 + $0xb8] sm:$0xff] %vm320_vm5, %v2178_v57 }
 0x36c   :  { %v2180_v33 = vpop.eup %2179 }
 0x36d   :  { %1586 = vst.msk [vmem:[%s3122_s13 + $0xc0] sm:$0xff] %vm320_vm5, %v2180_v33 }

</bundles_post_ra>
